<compile_context>
chip_gen: v7x
topology: tpu7x:2x2x1
jax: 0.10.0
libtpu: 0.0.40
codegen_flags: <defaults>
</compile_context>

<pallas_src>
import jax
import jax.numpy as jnp
from jax.experimental import pallas as pl
from jax.experimental.pallas import tpu as pltpu

MATMUL_DTYPE = jnp.float32   # set to jnp.bfloat16 for the v6e/v7x fast MXU path
_VMEM_LIMIT = 32 * 1024 * 1024


def _round_up(x, m):
    return ((x + m - 1) // m) * m


# ----------------------------- in-kernel math ------------------------------

def _erf(x):
    # Abramowitz & Stegun 7.1.26 (max abs err ~1.5e-7, f32-level accuracy).
    a1, a2, a3, a4, a5 = 0.254829592, -0.284496736, 1.421413741, -1.453152027, 1.061405429
    p = 0.3275911
    s = jnp.where(x >= 0.0, 1.0, -1.0)
    ax = jnp.abs(x)
    t = 1.0 / (1.0 + p * ax)
    poly = ((((a5 * t + a4) * t + a3) * t + a2) * t + a1) * t
    return s * (1.0 - poly * jnp.exp(-ax * ax))


def _gelu(x):
    # Exact (erf-based) GELU, matching torch F.gelu(approximate='none').
    return 0.5 * x * (1.0 + _erf(x * 0.7071067811865476))


# ----------------------------- Pallas kernels ------------------------------

def _matmul_bias_kernel(a_ref, b_ref, bias_ref, o_ref, acc_ref):
    k = pl.program_id(2)

    @pl.when(k == 0)
    def _():
        acc_ref[...] = jnp.zeros_like(acc_ref)

    acc_ref[...] += jnp.dot(a_ref[...], b_ref[...],
                            preferred_element_type=jnp.float32)

    @pl.when(k == pl.num_programs(2) - 1)
    def _():
        o_ref[...] = acc_ref[...] + bias_ref[...]


def pallas_matmul_bias(a, b, bias):
    """(M,K) @ (K,N) + bias(N,) -> (M,N), tiled + pipelined, f32 accumulate."""
    M, K = a.shape
    K2, N = b.shape
    assert K == K2
    tm = min(256, _round_up(M, 8))
    tn = min(256, _round_up(N, 128))
    tk = min(512, _round_up(K, 128))
    Mp, Kp, Np = _round_up(M, tm), _round_up(K, tk), _round_up(N, tn)

    a_p = jnp.pad(a.astype(MATMUL_DTYPE), ((0, Mp - M), (0, Kp - K)))
    b_p = jnp.pad(b.astype(MATMUL_DTYPE), ((0, Kp - K), (0, Np - N)))
    bias_p = jnp.pad(bias.astype(jnp.float32).reshape(1, N), ((0, 0), (0, Np - N)))

    out = pl.pallas_call(
        _matmul_bias_kernel,
        out_shape=jax.ShapeDtypeStruct((Mp, Np), jnp.float32),
        grid_spec=pltpu.PrefetchScalarGridSpec(
            num_scalar_prefetch=0,
            grid=(Mp // tm, Np // tn, Kp // tk),
            in_specs=[pl.BlockSpec((tm, tk), lambda i, j, k: (i, k)),
                      pl.BlockSpec((tk, tn), lambda i, j, k: (k, j)),
                      pl.BlockSpec((1, tn), lambda i, j, k: (0, j))],
            out_specs=pl.BlockSpec((tm, tn), lambda i, j, k: (i, j)),
            scratch_shapes=[pltpu.VMEM((tm, tn), jnp.float32)]),
        compiler_params=pltpu.CompilerParams(
            dimension_semantics=("parallel", "parallel", "arbitrary"),
            vmem_limit_bytes=_VMEM_LIMIT),
    )(a_p, b_p, bias_p)
    return out[:M, :N]


def _ln_gelu_kernel(x_ref, g_ref, b_ref, o_ref):
    x = x_ref[...]
    mean = jnp.mean(x, axis=-1, keepdims=True)
    var = jnp.mean((x - mean) ** 2, axis=-1, keepdims=True)   # biased var (torch)
    inv = jax.lax.rsqrt(var + 1e-5)                           # torch eps=1e-5
    o_ref[...] = _gelu((x - mean) * inv * g_ref[...] + b_ref[...])


def pallas_ln_gelu_rows(x2d, gamma, beta):
    """Fused LayerNorm(last dim) + GELU over a 2-D (rows, feat) array."""
    N, F = x2d.shape
    tm = min(512, _round_up(N, 8))
    Np = _round_up(N, tm)
    x_p = jnp.pad(x2d.astype(jnp.float32), ((0, Np - N), (0, 0)))
    out = pl.pallas_call(
        _ln_gelu_kernel,
        out_shape=jax.ShapeDtypeStruct((Np, F), jnp.float32),
        grid_spec=pltpu.PrefetchScalarGridSpec(
            num_scalar_prefetch=0, grid=(Np // tm,),
            in_specs=[pl.BlockSpec((tm, F), lambda i: (i, 0)),
                      pl.BlockSpec((1, F), lambda i: (0, 0)),
                      pl.BlockSpec((1, F), lambda i: (0, 0))],
            out_specs=pl.BlockSpec((tm, F), lambda i: (i, 0))),
        compiler_params=pltpu.CompilerParams(dimension_semantics=("parallel",)),
    )(x_p, gamma.reshape(1, F).astype(jnp.float32),
      beta.reshape(1, F).astype(jnp.float32))
    return out[:N]


def _cnn_ln_gelu_kernel(x_ref, g_ref, b_ref, o_ref):
    # x_ref: (rb, H, W); LayerNorm reduces over the n_feats (H, sublane) axis,
    # so no transpose sandwich is needed around this kernel.
    x = x_ref[...]
    mean = jnp.mean(x, axis=1, keepdims=True)
    var = jnp.mean((x - mean) ** 2, axis=1, keepdims=True)
    inv = jax.lax.rsqrt(var + 1e-5)
    o_ref[...] = _gelu((x - mean) * inv * g_ref[...] + b_ref[...])


def pallas_cnn_ln_gelu(x3, gamma, beta):
    """Fused CNNLayerNorm + GELU on a (B*C, n_feats, W) view, no HBM transposes."""
    R, H, W = x3.shape
    per_row = H * W * 4
    rb = max(1, min(R, (2 * 1024 * 1024) // max(per_row, 1)))
    Rp = _round_up(R, rb)
    x_p = jnp.pad(x3.astype(jnp.float32), ((0, Rp - R), (0, 0), (0, 0)))
    out = pl.pallas_call(
        _cnn_ln_gelu_kernel,
        out_shape=jax.ShapeDtypeStruct((Rp, H, W), jnp.float32),
        grid_spec=pltpu.PrefetchScalarGridSpec(
            num_scalar_prefetch=0, grid=(Rp // rb,),
            in_specs=[pl.BlockSpec((rb, H, W), lambda i: (i, 0, 0)),
                      pl.BlockSpec((1, H, 1), lambda i: (0, 0, 0)),
                      pl.BlockSpec((1, H, 1), lambda i: (0, 0, 0))],
            out_specs=pl.BlockSpec((rb, H, W), lambda i: (i, 0, 0))),
        compiler_params=pltpu.CompilerParams(dimension_semantics=("parallel",)),
    )(x_p, gamma.reshape(1, H, 1).astype(jnp.float32),
      beta.reshape(1, H, 1).astype(jnp.float32))
    return out[:R]


def _bigru_scan_kernel(xg_ref, whh_ref, bhh_ref, mask_ref, o_ref, h_ref):
    # xg_ref:   (tc, 2B, 3H)  precomputed x @ W_ih^T + b_ih for fwd rows [0:B]
    #                          and reversed-bwd rows [B:2B]  (gate order r,z,n)
    # whh_ref:  (H, 6H)  = [W_hh_f^T | W_hh_b^T]
    # bhh_ref:  (2B, 3H) per-row hidden bias   mask_ref: (2B, 1) 1=fwd, 0=bwd
    # o_ref:    (tc, 2B, H)   h_ref: persistent VMEM scratch (2B, H)
    @pl.when(pl.program_id(0) == 0)
    def _():
        h_ref[...] = jnp.zeros_like(h_ref)

    tc = xg_ref.shape[0]
    H = h_ref.shape[1]

    def body(t, carry):
        h = h_ref[...]
        hg_all = jnp.dot(h, whh_ref[...], preferred_element_type=jnp.float32)
        m = mask_ref[...]
        hg = m * hg_all[:, 0:3 * H] + (1.0 - m) * hg_all[:, 3 * H:6 * H] + bhh_ref[...]
        xg = xg_ref[t]
        r = jax.nn.sigmoid(xg[:, 0:H] + hg[:, 0:H])
        z = jax.nn.sigmoid(xg[:, H:2 * H] + hg[:, H:2 * H])
        n = jnp.tanh(xg[:, 2 * H:3 * H] + r * hg[:, 2 * H:3 * H])
        h_new = (1.0 - z) * n + z * h
        h_ref[...] = h_new
        o_ref[t] = h_new
        return carry

    jax.lax.fori_loop(0, tc, body, 0)


def pallas_bigru_scan(xg, whh_cat_t, bhh_rows, dir_mask):
    """Fused fwd+bwd GRU recurrence, input/output streamed through VMEM in
    time chunks (grid axis) while the hidden state lives in VMEM scratch."""
    T, B2, H3 = xg.shape
    H = H3 // 3
    bytes_per_step = B2 * (H3 + H) * 4
    tc = max(1, min(T, (2 * 1024 * 1024) // max(bytes_per_step, 1)))
    Tp = _round_up(T, tc)
    xg_p = jnp.pad(xg.astype(jnp.float32), ((0, Tp - T), (0, 0), (0, 0)))

    out = pl.pallas_call(
        _bigru_scan_kernel,
        out_shape=jax.ShapeDtypeStruct((Tp, B2, H), jnp.float32),
        grid_spec=pltpu.PrefetchScalarGridSpec(
            num_scalar_prefetch=0, grid=(Tp // tc,),
            in_specs=[pl.BlockSpec((tc, B2, H3), lambda i: (i, 0, 0)),
                      pl.BlockSpec((H, 6 * H), lambda i: (0, 0)),
                      pl.BlockSpec((B2, H3), lambda i: (0, 0)),
                      pl.BlockSpec((B2, 1), lambda i: (0, 0))],
            out_specs=pl.BlockSpec((tc, B2, H), lambda i: (i, 0, 0)),
            scratch_shapes=[pltpu.VMEM((B2, H), jnp.float32)]),
        compiler_params=pltpu.CompilerParams(
            dimension_semantics=("arbitrary",),
            vmem_limit_bytes=_VMEM_LIMIT),
    )(xg_p, whh_cat_t.astype(jnp.float32), bhh_rows.astype(jnp.float32),
      dir_mask.astype(jnp.float32))
    return out[:T]


def _classifier_kernel(x_ref, w1_ref, b1_ref, w2_ref, b2_ref, o_ref):
    h = jnp.dot(x_ref[...], w1_ref[...], preferred_element_type=jnp.float32) + b1_ref[...]
    h = _gelu(h)
    o_ref[...] = jnp.dot(h, w2_ref[...], preferred_element_type=jnp.float32) + b2_ref[...]


def pallas_classifier(x2d, w1_t, b1, w2_t, b2):
    """Fused Linear -> GELU -> Linear (intermediate never leaves VMEM)."""
    M, D = x2d.shape
    H = w1_t.shape[1]
    N = w2_t.shape[1]
    tm = min(256, _round_up(M, 8))
    Mp = _round_up(M, tm)
    Np = _round_up(N, 128)                     # lane-dense output store
    x_p = jnp.pad(x2d.astype(jnp.float32), ((0, Mp - M), (0, 0)))
    w2_p = jnp.pad(w2_t.astype(jnp.float32), ((0, 0), (0, Np - N)))
    b2_p = jnp.pad(b2.astype(jnp.float32).reshape(1, N), ((0, 0), (0, Np - N)))

    out = pl.pallas_call(
        _classifier_kernel,
        out_shape=jax.ShapeDtypeStruct((Mp, Np), jnp.float32),
        grid_spec=pltpu.PrefetchScalarGridSpec(
            num_scalar_prefetch=0, grid=(Mp // tm,),
            in_specs=[pl.BlockSpec((tm, D), lambda i: (i, 0)),
                      pl.BlockSpec((D, H), lambda i: (0, 0)),
                      pl.BlockSpec((1, H), lambda i: (0, 0)),
                      pl.BlockSpec((H, Np), lambda i: (0, 0)),
                      pl.BlockSpec((1, Np), lambda i: (0, 0))],
            out_specs=pl.BlockSpec((tm, Np), lambda i: (i, 0))),
        compiler_params=pltpu.CompilerParams(
            dimension_semantics=("parallel",),
            vmem_limit_bytes=_VMEM_LIMIT),
    )(x_p, w1_t.astype(jnp.float32), b1.reshape(1, H).astype(jnp.float32),
      w2_p, b2_p)
    return out[:M, :N]


# ----------------------------- model pieces --------------------------------

def conv2d(x, w, b, stride, padding):
    """PyTorch-semantics Conv2d (NCHW) via im2col + tiled Pallas matmul."""
    # TODO(synk): replace im2col patch materialization with a direct Pallas conv
    # (or lax.conv) to avoid the K*K activation blow-up in HBM at large shapes.
    B, Cin, H, W = x.shape
    Cout, _, K, _ = w.shape
    xp = jnp.pad(x, ((0, 0), (0, 0), (padding, padding), (padding, padding)))
    Hout = (H + 2 * padding - K) // stride + 1
    Wout = (W + 2 * padding - K) // stride + 1
    cols = []
    for dh in range(K):
        for dw in range(K):
            cols.append(xp[:, :, dh:dh + stride * Hout:stride,
                               dw:dw + stride * Wout:stride])
    patches = jnp.stack(cols, axis=-1)                      # (B,Cin,Hout,Wout,K*K)
    patches = patches.transpose(0, 2, 3, 1, 4).reshape(B * Hout * Wout, Cin * K * K)
    w2 = w.reshape(Cout, Cin * K * K).T                     # (Cin*K*K, Cout)
    out = pallas_matmul_bias(patches, w2, b)                # (B*Hout*Wout, Cout)
    return out.reshape(B, Hout, Wout, Cout).transpose(0, 3, 1, 2)


def cnn_ln_gelu(x, gamma, beta):
    """CNNLayerNorm (LN over n_feats) + GELU, fused, no HBM transposes."""
    B, C, H, W = x.shape
    y = pallas_cnn_ln_gelu(x.reshape(B * C, H, W), gamma, beta)
    return y.reshape(B, C, H, W)


def residual_cnn(x, p):
    residual = x
    y = cnn_ln_gelu(x, p['ln1_g'], p['ln1_b'])
    # Dropout -> identity (inference)
    y = conv2d(y, p['w1'], p['b1'], stride=1, padding=1)
    y = cnn_ln_gelu(y, p['ln2_g'], p['ln2_b'])
    y = conv2d(y, p['w2'], p['b2'], stride=1, padding=1)
    return y + residual


def bigru(x_seq, p):
    """Bidirectional GRU over (T, B, D) -> (T, B, 2H), both directions fused."""
    T, B, D = x_seq.shape
    H = p['w_hh_cat_t'].shape[0]
    # One matmul produces both directions' input projections.
    proj = pallas_matmul_bias(x_seq.reshape(T * B, D),
                              p['w_ih_cat_t'], p['b_ih_cat']).reshape(T, B, 6 * H)
    xg = jnp.concatenate([proj[:, :, :3 * H],          # forward stream
                          proj[::-1, :, 3 * H:]],      # time-reversed backward
                         axis=1)                       # (T, 2B, 3H)
    bhh_rows = jnp.concatenate(
        [jnp.broadcast_to(p['b_hh_f'].reshape(1, 3 * H), (B, 3 * H)),
         jnp.broadcast_to(p['b_hh_b'].reshape(1, 3 * H), (B, 3 * H))], axis=0)
    dir_mask = (jnp.arange(2 * B) < B).astype(jnp.float32).reshape(2 * B, 1)
    h_all = pallas_bigru_scan(xg, p['w_hh_cat_t'], bhh_rows, dir_mask)  # (T,2B,H)
    h_f = h_all[:, :B, :]
    h_b = h_all[::-1, B:, :]
    return jnp.concatenate([h_f, h_b], axis=-1)        # (T, B, 2H)


def bigru_layer(x, p, batch_first):
    # x physically (B, T, D). For batch_first=False layers, PyTorch's GRU
    # treats dim 0 (batch) as the sequence axis — reproduced on purpose.
    B, T, D = x.shape
    xn = pallas_ln_gelu_rows(x.reshape(B * T, D), p['ln_g'], p['ln_b']).reshape(B, T, D)
    if batch_first:
        out = bigru(xn.transpose(1, 0, 2), p).transpose(1, 0, 2)
    else:
        out = bigru(xn, p)
    return out  # Dropout -> identity (inference)


def speech_recognition_model(x, params):
    # x: (B, 1, n_feats, time)
    x = conv2d(x, params['cnn_w'], params['cnn_b'], stride=2, padding=1)
    for p in params['rescnn']:
        x = residual_cnn(x, p)
    B, C, Fr, T = x.shape
    x = x.reshape(B, C * Fr, T).transpose(0, 2, 1)           # (B, T, C*F)
    x = pallas_matmul_bias(x.reshape(B * T, C * Fr),
                           params['fc_w_t'], params['fc_b']).reshape(B, T, -1)
    for i, p in enumerate(params['birnn']):
        x = bigru_layer(x, p, batch_first=(i == 0))
    # classifier: Linear -> GELU -> Dropout(identity) -> Linear, fused kernel.
    B, T, D = x.shape
    o = pallas_classifier(x.reshape(B * T, D),
                          params['cls_w1_t'], params['cls_b1'],
                          params['cls_w2_t'], params['cls_b2'])
    return o.reshape(B, T, -1)


# ------------------------ params: init + layout prep ------------------------

def init_params(key, n_cnn_layers, n_rnn_layers, rnn_dim, n_class, n_feats):
    """PyTorch-layout parameters (deterministic)."""
    nf = n_feats // 2
    keys = iter(jax.random.split(key, 64 + 16 * (n_cnn_layers + n_rnn_layers)))

    def nrm(shape, scale):
        return jax.random.normal(next(keys), shape, jnp.float32) * scale

    params = {
        'cnn_w': nrm((32, 1, 3, 3), 0.2),
        'cnn_b': nrm((32,), 0.1),
        'fc_w': nrm((rnn_dim, nf * 32), 0.05),
        'fc_b': nrm((rnn_dim,), 0.05),
        'cls_w1': nrm((rnn_dim, rnn_dim * 2), 0.1),
        'cls_b1': nrm((rnn_dim,), 0.05),
        'cls_w2': nrm((n_class, rnn_dim), 0.1),
        'cls_b2': nrm((n_class,), 0.05),
        'rescnn': [],
        'birnn': [],
    }
    for _ in range(n_cnn_layers):
        params['rescnn'].append(dict(
            ln1_g=jnp.ones((nf,), jnp.float32), ln1_b=jnp.zeros((nf,), jnp.float32),
            ln2_g=jnp.ones((nf,), jnp.float32), ln2_b=jnp.zeros((nf,), jnp.float32),
            w1=nrm((32, 32, 3, 3), 0.04), b1=nrm((32,), 0.02),
            w2=nrm((32, 32, 3, 3), 0.04), b2=nrm((32,), 0.02),
        ))
    for i in range(n_rnn_layers):
        d = rnn_dim if i == 0 else rnn_dim * 2
        params['birnn'].append(dict(
            ln_g=jnp.ones((d,), jnp.float32), ln_b=jnp.zeros((d,), jnp.float32),
            w_ih_f=nrm((3 * rnn_dim, d), 0.1),
            w_hh_f=nrm((3 * rnn_dim, rnn_dim), 0.1),
            b_ih_f=nrm((3 * rnn_dim,), 0.05),
            b_hh_f=nrm((3 * rnn_dim,), 0.05),
            w_ih_b=nrm((3 * rnn_dim, d), 0.1),
            w_hh_b=nrm((3 * rnn_dim, rnn_dim), 0.1),
            b_ih_b=nrm((3 * rnn_dim,), 0.05),
            b_hh_b=nrm((3 * rnn_dim,), 0.05),
        ))
    return params


def prepare_params(p):
    """One-time layout prep: pre-transpose / pre-concatenate weights so the
    forward pass never transposes weights per call."""
    out = {
        'cnn_w': p['cnn_w'], 'cnn_b': p['cnn_b'],
        'fc_w_t': p['fc_w'].T, 'fc_b': p['fc_b'],
        'cls_w1_t': p['cls_w1'].T, 'cls_b1': p['cls_b1'],
        'cls_w2_t': p['cls_w2'].T, 'cls_b2': p['cls_b2'],
        'rescnn': p['rescnn'],
        'birnn': [],
    }
    for q in p['birnn']:
        out['birnn'].append(dict(
            ln_g=q['ln_g'], ln_b=q['ln_b'],
            w_ih_cat_t=jnp.concatenate([q['w_ih_f'].T, q['w_ih_b'].T], axis=1),  # (D, 6H)
            b_ih_cat=jnp.concatenate([q['b_ih_f'], q['b_ih_b']]),                # (6H,)
            w_hh_cat_t=jnp.concatenate([q['w_hh_f'].T, q['w_hh_b'].T], axis=1),  # (H, 6H)
            b_hh_f=q['b_hh_f'], b_hh_b=q['b_hh_b'],
        ))
    return out


if __name__ == "__main__":
    key = jax.random.PRNGKey(0)
    k_params, k_x = jax.random.split(key)

    n_cnn_layers, n_rnn_layers = 2, 2
    rnn_dim, n_class, n_feats = 32, 10, 16
    B, T_in = 2, 16

    params = prepare_params(
        init_params(k_params, n_cnn_layers, n_rnn_layers, rnn_dim, n_class, n_feats))
    x = jax.random.normal(k_x, (B, 1, n_feats, T_in), jnp.float32)

    out = jax.jit(speech_recognition_model)(x, params)
    out = jax.block_until_ready(out)
    assert out.shape == (B, T_in // 2, n_class), out.shape
    print("KERNEL_OK")
</pallas_src>

<mosaic_0001>
module attributes {stable_mosaic.version = 11 : i64} {
  func.func @_matmul_bias_kernel(%arg0: i32, %arg1: i32, %arg2: i32, %arg3: memref<128x128xf32, #tpu.memory_space<vmem>>, %arg4: memref<128x128xf32, #tpu.memory_space<vmem>>, %arg5: memref<1x128xf32, #tpu.memory_space<vmem>>, %arg6: memref<128x128xf32, #tpu.memory_space<vmem>>, %arg7: memref<128x128xf32, #tpu.memory_space<vmem>>) attributes {dimension_semantics = [#tpu.dimension_semantics<parallel>, #tpu.dimension_semantics<parallel>, #tpu.dimension_semantics<arbitrary>], iteration_bounds = array<i64: 1, 1, 1>, scalar_prefetch = 0 : i64, scratch_operands = 1 : i64, tpu.core_type = #tpu.core_type<tc>, window_params = [{transform_indices = @transform_0, window_bounds = array<i64: 128, 128>}, {transform_indices = @transform_1, window_bounds = array<i64: 128, 128>}, {transform_indices = @transform_2, window_bounds = array<i64: 1, 128>}, {transform_indices = @transform_3, window_bounds = array<i64: 128, 128>}]} {
    %c0_i32 = arith.constant 0 : i32
    %0 = arith.cmpi eq, %arg2, %c0_i32 : i32
    %1 = arith.extui %0 : i1 to i32
    %c0_i32_0 = arith.constant 0 : i32
    %2 = arith.cmpi ne, %1, %c0_i32_0 : i32
    scf.if %2 {
      %cst_10 = arith.constant 0.000000e+00 : f32
      %12 = vector.broadcast %cst_10 : f32 to vector<128x128xf32>
      %c0_11 = arith.constant 0 : index
      %c0_12 = arith.constant 0 : index
      %13 = vector.load %arg7[%c0_11, %c0_12] : memref<128x128xf32, #tpu.memory_space<vmem>>, vector<128x128xf32>
      tpu.vector_store %arg7[%c0_11, %c0_12], %12 {strides = array<i32>} : memref<128x128xf32, #tpu.memory_space<vmem>>, vector<128x128xf32>,
    } else {
    }
    %c0 = arith.constant 0 : index
    %c0_1 = arith.constant 0 : index
    %3 = vector.load %arg7[%c0, %c0_1] : memref<128x128xf32, #tpu.memory_space<vmem>>, vector<128x128xf32>
    %c0_2 = arith.constant 0 : index
    %c0_3 = arith.constant 0 : index
    %4 = vector.load %arg3[%c0_2, %c0_3] : memref<128x128xf32, #tpu.memory_space<vmem>>, vector<128x128xf32>
    %c0_4 = arith.constant 0 : index
    %c0_5 = arith.constant 0 : index
    %5 = vector.load %arg4[%c0_4, %c0_5] : memref<128x128xf32, #tpu.memory_space<vmem>>, vector<128x128xf32>
    %cst = arith.constant dense<0.000000e+00> : vector<128x128xf32>
    %6 = tpu.matmul %4, %5, %cst {dimension_numbers = #tpu.dot_dimension_numbers<[1], [0], [0], [1], [0, 0, 1, 1], [], []>} : vector<128x128xf32>, vector<128x128xf32>, vector<128x128xf32> -> vector<128x128xf32>
    %7 = arith.addf %3, %6 : vector<128x128xf32>
    %c0_6 = arith.constant 0 : index
    %c0_7 = arith.constant 0 : index
    %8 = vector.load %arg7[%c0_6, %c0_7] : memref<128x128xf32, #tpu.memory_space<vmem>>, vector<128x128xf32>
    tpu.vector_store %arg7[%c0_6, %c0_7], %7 {strides = array<i32>} : memref<128x128xf32, #tpu.memory_space<vmem>>, vector<128x128xf32>,
    %c0_i32_8 = arith.constant 0 : i32
    %9 = arith.cmpi eq, %arg2, %c0_i32_8 : i32
    %10 = arith.extui %9 : i1 to i32
    %c0_i32_9 = arith.constant 0 : i32
    %11 = arith.cmpi ne, %10, %c0_i32_9 : i32
    scf.if %11 {
      %c0_10 = arith.constant 0 : index
      %c0_11 = arith.constant 0 : index
      %12 = vector.load %arg7[%c0_10, %c0_11] : memref<128x128xf32, #tpu.memory_space<vmem>>, vector<128x128xf32>
      %c0_12 = arith.constant 0 : index
      %c0_13 = arith.constant 0 : index
      %13 = vector.load %arg5[%c0_12, %c0_13] : memref<1x128xf32, #tpu.memory_space<vmem>>, vector<1x128xf32>
      %14 = vector.broadcast %13 : vector<1x128xf32> to vector<128x128xf32>
      %15 = arith.addf %12, %14 : vector<128x128xf32>
      %c0_14 = arith.constant 0 : index
      %c0_15 = arith.constant 0 : index
      %16 = vector.load %arg6[%c0_14, %c0_15] : memref<128x128xf32, #tpu.memory_space<vmem>>, vector<128x128xf32>
      tpu.vector_store %arg6[%c0_14, %c0_15], %15 {strides = array<i32>} : memref<128x128xf32, #tpu.memory_space<vmem>>, vector<128x128xf32>,
    } else {
    }
    return
  }
  func.func @transform_0(%arg0: i32, %arg1: i32, %arg2: i32) -> (i32, i32) {
    %c0_i32 = arith.constant 0 : i32
    return %arg0, %arg2 : i32, i32
  }
  func.func @transform_1(%arg0: i32, %arg1: i32, %arg2: i32) -> (i32, i32) {
    %c0_i32 = arith.constant 0 : i32
    return %arg2, %arg1 : i32, i32
  }
  func.func @transform_2(%arg0: i32, %arg1: i32, %arg2: i32) -> (i32, i32) {
    %c0_i32 = arith.constant 0 : i32
    %c0_i32_0 = arith.constant 0 : i32
    return %c0_i32, %arg1 : i32, i32
  }
  func.func @transform_3(%arg0: i32, %arg1: i32, %arg2: i32) -> (i32, i32) {
    %c0_i32 = arith.constant 0 : i32
    return %arg0, %arg1 : i32, i32
  }
}

module attributes {stable_mosaic.version = 11 : i64} {
  func.func @_cnn_ln_gelu_kernel(%arg0: i32, %arg1: memref<64x8x8xf32, #tpu.memory_space<vmem>>, %arg2: memref<1x8x1xf32, #tpu.memory_space<vmem>>, %arg3: memref<1x8x1xf32, #tpu.memory_space<vmem>>, %arg4: memref<64x8x8xf32, #tpu.memory_space<vmem>>) attributes {dimension_semantics = [#tpu.dimension_semantics<parallel>], iteration_bounds = array<i64: 1>, scalar_prefetch = 0 : i64, scratch_operands = 0 : i64, tpu.core_type = #tpu.core_type<tc>, window_params = [{transform_indices = @transform_0, window_bounds = array<i64: 64, 8, 8>}, {pipeline_mode = #tpu.pipeline_mode<synchronous>, transform_indices = @transform_1, window_bounds = array<i64: 1, 8, 1>}, {pipeline_mode = #tpu.pipeline_mode<synchronous>, transform_indices = @transform_2, window_bounds = array<i64: 1, 8, 1>}, {transform_indices = @transform_3, window_bounds = array<i64: 64, 8, 8>}]} {
    %c0 = arith.constant 0 : index
    %c0_0 = arith.constant 0 : index
    %c0_1 = arith.constant 0 : index
    %0 = vector.load %arg1[%c0, %c0_0, %c0_1] : memref<64x8x8xf32, #tpu.memory_space<vmem>>, vector<64x8x8xf32>
    %cst = arith.constant dense<0.000000e+00> : vector<64x8xf32>
    %1 = vector.multi_reduction <add>, %0, %cst [1] : vector<64x8x8xf32> to vector<64x8xf32>
    %2 = vector.shape_cast %1 : vector<64x8xf32> to vector<64x1x8xf32>
    %cst_2 = arith.constant 8.000000e+00 : f32
    %3 = vector.broadcast %cst_2 : f32 to vector<64x1x8xf32>
    %4 = arith.divf %2, %3 : vector<64x1x8xf32>
    %5 = vector.broadcast %4 : vector<64x1x8xf32> to vector<64x8x8xf32>
    %6 = arith.subf %0, %5 : vector<64x8x8xf32>
    %7 = arith.mulf %6, %6 : vector<64x8x8xf32>
    %cst_3 = arith.constant dense<0.000000e+00> : vector<64x8xf32>
    %8 = vector.multi_reduction <add>, %7, %cst_3 [1] : vector<64x8x8xf32> to vector<64x8xf32>
    %9 = vector.shape_cast %8 : vector<64x8xf32> to vector<64x1x8xf32>
    %cst_4 = arith.constant 8.000000e+00 : f32
    %10 = vector.broadcast %cst_4 : f32 to vector<64x1x8xf32>
    %11 = arith.divf %9, %10 : vector<64x1x8xf32>
    %cst_5 = arith.constant 9.99999974E-6 : f32
    %12 = vector.broadcast %cst_5 : f32 to vector<64x1x8xf32>
    %13 = arith.addf %11, %12 : vector<64x1x8xf32>
    %14 = math.rsqrt %13 : vector<64x1x8xf32>
    %15 = vector.broadcast %4 : vector<64x1x8xf32> to vector<64x8x8xf32>
    %16 = arith.subf %0, %15 : vector<64x8x8xf32>
    %17 = vector.broadcast %14 : vector<64x1x8xf32> to vector<64x8x8xf32>
    %18 = arith.mulf %16, %17 : vector<64x8x8xf32>
    %c0_6 = arith.constant 0 : index
    %c0_7 = arith.constant 0 : index
    %c0_8 = arith.constant 0 : index
    %19 = vector.load %arg2[%c0_6, %c0_7, %c0_8] : memref<1x8x1xf32, #tpu.memory_space<vmem>>, vector<1x8x1xf32>
    %20 = vector.broadcast %19 : vector<1x8x1xf32> to vector<64x8x8xf32>
    %21 = arith.mulf %18, %20 : vector<64x8x8xf32>
    %c0_9 = arith.constant 0 : index
    %c0_10 = arith.constant 0 : index
    %c0_11 = arith.constant 0 : index
    %22 = vector.load %arg3[%c0_9, %c0_10, %c0_11] : memref<1x8x1xf32, #tpu.memory_space<vmem>>, vector<1x8x1xf32>
    %23 = vector.broadcast %22 : vector<1x8x1xf32> to vector<64x8x8xf32>
    %24 = arith.addf %21, %23 : vector<64x8x8xf32>
    %cst_12 = arith.constant 5.000000e-01 : f32
    %25 = vector.broadcast %cst_12 : f32 to vector<64x8x8xf32>
    %26 = arith.mulf %25, %24 : vector<64x8x8xf32>
    %cst_13 = arith.constant 0.707106769 : f32
    %27 = vector.broadcast %cst_13 : f32 to vector<64x8x8xf32>
    %28 = arith.mulf %24, %27 : vector<64x8x8xf32>
    %cst_14 = arith.constant 0.000000e+00 : f32
    %29 = vector.broadcast %cst_14 : f32 to vector<64x8x8xf32>
    %30 = arith.cmpf oge, %28, %29 : vector<64x8x8xf32>
    %cst_15 = arith.constant 1.000000e+00 : f32
    %cst_16 = arith.constant -1.000000e+00 : f32
    %31 = vector.broadcast %cst_15 : f32 to vector<64x8x8xf32>
    %32 = vector.broadcast %cst_16 : f32 to vector<64x8x8xf32>
    %33 = arith.select %30, %31, %32 : vector<64x8x8xi1>, vector<64x8x8xf32>
    %34 = math.absf %28 : vector<64x8x8xf32>
    %cst_17 = arith.constant 0.327591091 : f32
    %35 = vector.broadcast %cst_17 : f32 to vector<64x8x8xf32>
    %36 = arith.mulf %35, %34 : vector<64x8x8xf32>
    %cst_18 = arith.constant 1.000000e+00 : f32
    %37 = vector.broadcast %cst_18 : f32 to vector<64x8x8xf32>
    %38 = arith.addf %37, %36 : vector<64x8x8xf32>
    %cst_19 = arith.constant 1.000000e+00 : f32
    %39 = vector.broadcast %cst_19 : f32 to vector<64x8x8xf32>
    %40 = arith.divf %39, %38 : vector<64x8x8xf32>
    %cst_20 = arith.constant 1.06140542 : f32
    %41 = vector.broadcast %cst_20 : f32 to vector<64x8x8xf32>
    %42 = arith.mulf %41, %40 : vector<64x8x8xf32>
    %cst_21 = arith.constant -1.45315206 : f32
    %43 = vector.broadcast %cst_21 : f32 to vector<64x8x8xf32>
    %44 = arith.addf %42, %43 : vector<64x8x8xf32>
    %45 = arith.mulf %44, %40 : vector<64x8x8xf32>
    %cst_22 = arith.constant 1.42141378 : f32
    %46 = vector.broadcast %cst_22 : f32 to vector<64x8x8xf32>
    %47 = arith.addf %45, %46 : vector<64x8x8xf32>
    %48 = arith.mulf %47, %40 : vector<64x8x8xf32>
    %cst_23 = arith.constant -0.284496725 : f32
    %49 = vector.broadcast %cst_23 : f32 to vector<64x8x8xf32>
    %50 = arith.addf %48, %49 : vector<64x8x8xf32>
    %51 = arith.mulf %50, %40 : vector<64x8x8xf32>
    %cst_24 = arith.constant 0.254829586 : f32
    %52 = vector.broadcast %cst_24 : f32 to vector<64x8x8xf32>
    %53 = arith.addf %51, %52 : vector<64x8x8xf32>
    %54 = arith.mulf %53, %40 : vector<64x8x8xf32>
    %cst_25 = arith.constant 0.000000e+00 : f32
    %55 = vector.broadcast %cst_25 : f32 to vector<64x8x8xf32>
    %56 = arith.subf %55, %34 : vector<64x8x8xf32>
    %57 = arith.mulf %56, %34 : vector<64x8x8xf32>
    %58 = math.exp %57 : vector<64x8x8xf32>
    %59 = arith.mulf %54, %58 : vector<64x8x8xf32>
    %cst_26 = arith.constant 1.000000e+00 : f32
    %60 = vector.broadcast %cst_26 : f32 to vector<64x8x8xf32>
    %61 = arith.subf %60, %59 : vector<64x8x8xf32>
    %62 = arith.mulf %33, %61 : vector<64x8x8xf32>
    %cst_27 = arith.constant 1.000000e+00 : f32
    %63 = vector.broadcast %cst_27 : f32 to vector<64x8x8xf32>
    %64 = arith.addf %63, %62 : vector<64x8x8xf32>
    %65 = arith.mulf %26, %64 : vector<64x8x8xf32>
    %c0_28 = arith.constant 0 : index
    %c0_29 = arith.constant 0 : index
    %c0_30 = arith.constant 0 : index
    %66 = vector.load %arg4[%c0_28, %c0_29, %c0_30] : memref<64x8x8xf32, #tpu.memory_space<vmem>>, vector<64x8x8xf32>
    tpu.vector_store %arg4[%c0_28, %c0_29, %c0_30], %65 {strides = array<i32>} : memref<64x8x8xf32, #tpu.memory_space<vmem>>, vector<64x8x8xf32>,
    return
  }
  func.func @transform_0(%arg0: i32) -> (i32, i32, i32) {
    %c0_i32 = arith.constant 0 : i32
    %c0_i32_0 = arith.constant 0 : i32
    %c0_i32_1 = arith.constant 0 : i32
    return %arg0, %c0_i32, %c0_i32_0 : i32, i32, i32
  }
  func.func @transform_1(%arg0: i32) -> (i32, i32, i32) {
    %c0_i32 = arith.constant 0 : i32
    %c0_i32_0 = arith.constant 0 : i32
    %c0_i32_1 = arith.constant 0 : i32
    %c0_i32_2 = arith.constant 0 : i32
    return %c0_i32, %c0_i32_0, %c0_i32_1 : i32, i32, i32
  }
  func.func @transform_2(%arg0: i32) -> (i32, i32, i32) {
    %c0_i32 = arith.constant 0 : i32
    %c0_i32_0 = arith.constant 0 : i32
    %c0_i32_1 = arith.constant 0 : i32
    %c0_i32_2 = arith.constant 0 : i32
    return %c0_i32, %c0_i32_0, %c0_i32_1 : i32, i32, i32
  }
  func.func @transform_3(%arg0: i32) -> (i32, i32, i32) {
    %c0_i32 = arith.constant 0 : i32
    %c0_i32_0 = arith.constant 0 : i32
    %c0_i32_1 = arith.constant 0 : i32
    return %arg0, %c0_i32, %c0_i32_0 : i32, i32, i32
  }
}

module attributes {stable_mosaic.version = 11 : i64} {
  func.func @_matmul_bias_kernel(%arg0: i32, %arg1: i32, %arg2: i32, %arg3: memref<128x384xf32, #tpu.memory_space<vmem>>, %arg4: memref<384x128xf32, #tpu.memory_space<vmem>>, %arg5: memref<1x128xf32, #tpu.memory_space<vmem>>, %arg6: memref<128x128xf32, #tpu.memory_space<vmem>>, %arg7: memref<128x128xf32, #tpu.memory_space<vmem>>) attributes {dimension_semantics = [#tpu.dimension_semantics<parallel>, #tpu.dimension_semantics<parallel>, #tpu.dimension_semantics<arbitrary>], iteration_bounds = array<i64: 1, 1, 1>, scalar_prefetch = 0 : i64, scratch_operands = 1 : i64, tpu.core_type = #tpu.core_type<tc>, window_params = [{transform_indices = @transform_0, window_bounds = array<i64: 128, 384>}, {transform_indices = @transform_1, window_bounds = array<i64: 384, 128>}, {transform_indices = @transform_2, window_bounds = array<i64: 1, 128>}, {transform_indices = @transform_3, window_bounds = array<i64: 128, 128>}]} {
    %c0_i32 = arith.constant 0 : i32
    %0 = arith.cmpi eq, %arg2, %c0_i32 : i32
    %1 = arith.extui %0 : i1 to i32
    %c0_i32_0 = arith.constant 0 : i32
    %2 = arith.cmpi ne, %1, %c0_i32_0 : i32
    scf.if %2 {
      %cst_10 = arith.constant 0.000000e+00 : f32
      %12 = vector.broadcast %cst_10 : f32 to vector<128x128xf32>
      %c0_11 = arith.constant 0 : index
      %c0_12 = arith.constant 0 : index
      %13 = vector.load %arg7[%c0_11, %c0_12] : memref<128x128xf32, #tpu.memory_space<vmem>>, vector<128x128xf32>
      tpu.vector_store %arg7[%c0_11, %c0_12], %12 {strides = array<i32>} : memref<128x128xf32, #tpu.memory_space<vmem>>, vector<128x128xf32>,
    } else {
    }
    %c0 = arith.constant 0 : index
    %c0_1 = arith.constant 0 : index
    %3 = vector.load %arg7[%c0, %c0_1] : memref<128x128xf32, #tpu.memory_space<vmem>>, vector<128x128xf32>
    %c0_2 = arith.constant 0 : index
    %c0_3 = arith.constant 0 : index
    %4 = vector.load %arg3[%c0_2, %c0_3] : memref<128x384xf32, #tpu.memory_space<vmem>>, vector<128x384xf32>
    %c0_4 = arith.constant 0 : index
    %c0_5 = arith.constant 0 : index
    %5 = vector.load %arg4[%c0_4, %c0_5] : memref<384x128xf32, #tpu.memory_space<vmem>>, vector<384x128xf32>
    %cst = arith.constant dense<0.000000e+00> : vector<128x128xf32>
    %6 = tpu.matmul %4, %5, %cst {dimension_numbers = #tpu.dot_dimension_numbers<[1], [0], [0], [1], [0, 0, 1, 1], [], []>} : vector<128x384xf32>, vector<384x128xf32>, vector<128x128xf32> -> vector<128x128xf32>
    %7 = arith.addf %3, %6 : vector<128x128xf32>
    %c0_6 = arith.constant 0 : index
    %c0_7 = arith.constant 0 : index
    %8 = vector.load %arg7[%c0_6, %c0_7] : memref<128x128xf32, #tpu.memory_space<vmem>>, vector<128x128xf32>
    tpu.vector_store %arg7[%c0_6, %c0_7], %7 {strides = array<i32>} : memref<128x128xf32, #tpu.memory_space<vmem>>, vector<128x128xf32>,
    %c0_i32_8 = arith.constant 0 : i32
    %9 = arith.cmpi eq, %arg2, %c0_i32_8 : i32
    %10 = arith.extui %9 : i1 to i32
    %c0_i32_9 = arith.constant 0 : i32
    %11 = arith.cmpi ne, %10, %c0_i32_9 : i32
    scf.if %11 {
      %c0_10 = arith.constant 0 : index
      %c0_11 = arith.constant 0 : index
      %12 = vector.load %arg7[%c0_10, %c0_11] : memref<128x128xf32, #tpu.memory_space<vmem>>, vector<128x128xf32>
      %c0_12 = arith.constant 0 : index
      %c0_13 = arith.constant 0 : index
      %13 = vector.load %arg5[%c0_12, %c0_13] : memref<1x128xf32, #tpu.memory_space<vmem>>, vector<1x128xf32>
      %14 = vector.broadcast %13 : vector<1x128xf32> to vector<128x128xf32>
      %15 = arith.addf %12, %14 : vector<128x128xf32>
      %c0_14 = arith.constant 0 : index
      %c0_15 = arith.constant 0 : index
      %16 = vector.load %arg6[%c0_14, %c0_15] : memref<128x128xf32, #tpu.memory_space<vmem>>, vector<128x128xf32>
      tpu.vector_store %arg6[%c0_14, %c0_15], %15 {strides = array<i32>} : memref<128x128xf32, #tpu.memory_space<vmem>>, vector<128x128xf32>,
    } else {
    }
    return
  }
  func.func @transform_0(%arg0: i32, %arg1: i32, %arg2: i32) -> (i32, i32) {
    %c0_i32 = arith.constant 0 : i32
    return %arg0, %arg2 : i32, i32
  }
  func.func @transform_1(%arg0: i32, %arg1: i32, %arg2: i32) -> (i32, i32) {
    %c0_i32 = arith.constant 0 : i32
    return %arg2, %arg1 : i32, i32
  }
  func.func @transform_2(%arg0: i32, %arg1: i32, %arg2: i32) -> (i32, i32) {
    %c0_i32 = arith.constant 0 : i32
    %c0_i32_0 = arith.constant 0 : i32
    return %c0_i32, %arg1 : i32, i32
  }
  func.func @transform_3(%arg0: i32, %arg1: i32, %arg2: i32) -> (i32, i32) {
    %c0_i32 = arith.constant 0 : i32
    return %arg0, %arg1 : i32, i32
  }
}

module attributes {stable_mosaic.version = 11 : i64} {
  func.func @_matmul_bias_kernel(%arg0: i32, %arg1: i32, %arg2: i32, %arg3: memref<16x256xf32, #tpu.memory_space<vmem>>, %arg4: memref<256x128xf32, #tpu.memory_space<vmem>>, %arg5: memref<1x128xf32, #tpu.memory_space<vmem>>, %arg6: memref<16x128xf32, #tpu.memory_space<vmem>>, %arg7: memref<16x128xf32, #tpu.memory_space<vmem>>) attributes {dimension_semantics = [#tpu.dimension_semantics<parallel>, #tpu.dimension_semantics<parallel>, #tpu.dimension_semantics<arbitrary>], iteration_bounds = array<i64: 1, 1, 1>, scalar_prefetch = 0 : i64, scratch_operands = 1 : i64, tpu.core_type = #tpu.core_type<tc>, window_params = [{transform_indices = @transform_0, window_bounds = array<i64: 16, 256>}, {transform_indices = @transform_1, window_bounds = array<i64: 256, 128>}, {transform_indices = @transform_2, window_bounds = array<i64: 1, 128>}, {transform_indices = @transform_3, window_bounds = array<i64: 16, 128>}]} {
    %c0_i32 = arith.constant 0 : i32
    %0 = arith.cmpi eq, %arg2, %c0_i32 : i32
    %1 = arith.extui %0 : i1 to i32
    %c0_i32_0 = arith.constant 0 : i32
    %2 = arith.cmpi ne, %1, %c0_i32_0 : i32
    scf.if %2 {
      %cst_10 = arith.constant 0.000000e+00 : f32
      %12 = vector.broadcast %cst_10 : f32 to vector<16x128xf32>
      %c0_11 = arith.constant 0 : index
      %c0_12 = arith.constant 0 : index
      %13 = vector.load %arg7[%c0_11, %c0_12] : memref<16x128xf32, #tpu.memory_space<vmem>>, vector<16x128xf32>
      tpu.vector_store %arg7[%c0_11, %c0_12], %12 {strides = array<i32>} : memref<16x128xf32, #tpu.memory_space<vmem>>, vector<16x128xf32>,
    } else {
    }
    %c0 = arith.constant 0 : index
    %c0_1 = arith.constant 0 : index
    %3 = vector.load %arg7[%c0, %c0_1] : memref<16x128xf32, #tpu.memory_space<vmem>>, vector<16x128xf32>
    %c0_2 = arith.constant 0 : index
    %c0_3 = arith.constant 0 : index
    %4 = vector.load %arg3[%c0_2, %c0_3] : memref<16x256xf32, #tpu.memory_space<vmem>>, vector<16x256xf32>
    %c0_4 = arith.constant 0 : index
    %c0_5 = arith.constant 0 : index
    %5 = vector.load %arg4[%c0_4, %c0_5] : memref<256x128xf32, #tpu.memory_space<vmem>>, vector<256x128xf32>
    %cst = arith.constant dense<0.000000e+00> : vector<16x128xf32>
    %6 = tpu.matmul %4, %5, %cst {dimension_numbers = #tpu.dot_dimension_numbers<[1], [0], [0], [1], [0, 0, 1, 1], [], []>} : vector<16x256xf32>, vector<256x128xf32>, vector<16x128xf32> -> vector<16x128xf32>
    %7 = arith.addf %3, %6 : vector<16x128xf32>
    %c0_6 = arith.constant 0 : index
    %c0_7 = arith.constant 0 : index
    %8 = vector.load %arg7[%c0_6, %c0_7] : memref<16x128xf32, #tpu.memory_space<vmem>>, vector<16x128xf32>
    tpu.vector_store %arg7[%c0_6, %c0_7], %7 {strides = array<i32>} : memref<16x128xf32, #tpu.memory_space<vmem>>, vector<16x128xf32>,
    %c0_i32_8 = arith.constant 0 : i32
    %9 = arith.cmpi eq, %arg2, %c0_i32_8 : i32
    %10 = arith.extui %9 : i1 to i32
    %c0_i32_9 = arith.constant 0 : i32
    %11 = arith.cmpi ne, %10, %c0_i32_9 : i32
    scf.if %11 {
      %c0_10 = arith.constant 0 : index
      %c0_11 = arith.constant 0 : index
      %12 = vector.load %arg7[%c0_10, %c0_11] : memref<16x128xf32, #tpu.memory_space<vmem>>, vector<16x128xf32>
      %c0_12 = arith.constant 0 : index
      %c0_13 = arith.constant 0 : index
      %13 = vector.load %arg5[%c0_12, %c0_13] : memref<1x128xf32, #tpu.memory_space<vmem>>, vector<1x128xf32>
      %14 = vector.broadcast %13 : vector<1x128xf32> to vector<16x128xf32>
      %15 = arith.addf %12, %14 : vector<16x128xf32>
      %c0_14 = arith.constant 0 : index
      %c0_15 = arith.constant 0 : index
      %16 = vector.load %arg6[%c0_14, %c0_15] : memref<16x128xf32, #tpu.memory_space<vmem>>, vector<16x128xf32>
      tpu.vector_store %arg6[%c0_14, %c0_15], %15 {strides = array<i32>} : memref<16x128xf32, #tpu.memory_space<vmem>>, vector<16x128xf32>,
    } else {
    }
    return
  }
  func.func @transform_0(%arg0: i32, %arg1: i32, %arg2: i32) -> (i32, i32) {
    %c0_i32 = arith.constant 0 : i32
    return %arg0, %arg2 : i32, i32
  }
  func.func @transform_1(%arg0: i32, %arg1: i32, %arg2: i32) -> (i32, i32) {
    %c0_i32 = arith.constant 0 : i32
    return %arg2, %arg1 : i32, i32
  }
  func.func @transform_2(%arg0: i32, %arg1: i32, %arg2: i32) -> (i32, i32) {
    %c0_i32 = arith.constant 0 : i32
    %c0_i32_0 = arith.constant 0 : i32
    return %c0_i32, %arg1 : i32, i32
  }
  func.func @transform_3(%arg0: i32, %arg1: i32, %arg2: i32) -> (i32, i32) {
    %c0_i32 = arith.constant 0 : i32
    return %arg0, %arg1 : i32, i32
  }
}

module attributes {stable_mosaic.version = 11 : i64} {
  func.func @_ln_gelu_kernel(%arg0: i32, %arg1: memref<16x32xf32, #tpu.memory_space<vmem>>, %arg2: memref<1x32xf32, #tpu.memory_space<vmem>>, %arg3: memref<1x32xf32, #tpu.memory_space<vmem>>, %arg4: memref<16x32xf32, #tpu.memory_space<vmem>>) attributes {dimension_semantics = [#tpu.dimension_semantics<parallel>], iteration_bounds = array<i64: 1>, scalar_prefetch = 0 : i64, scratch_operands = 0 : i64, tpu.core_type = #tpu.core_type<tc>, window_params = [{transform_indices = @transform_0, window_bounds = array<i64: 16, 32>}, {pipeline_mode = #tpu.pipeline_mode<synchronous>, transform_indices = @transform_1, window_bounds = array<i64: 1, 32>}, {pipeline_mode = #tpu.pipeline_mode<synchronous>, transform_indices = @transform_2, window_bounds = array<i64: 1, 32>}, {transform_indices = @transform_3, window_bounds = array<i64: 16, 32>}]} {
    %c0 = arith.constant 0 : index
    %c0_0 = arith.constant 0 : index
    %0 = vector.load %arg1[%c0, %c0_0] : memref<16x32xf32, #tpu.memory_space<vmem>>, vector<16x32xf32>
    %cst = arith.constant dense<0.000000e+00> : vector<16xf32>
    %1 = vector.multi_reduction <add>, %0, %cst [1] : vector<16x32xf32> to vector<16xf32>
    %2 = vector.shape_cast %1 : vector<16xf32> to vector<16x1xf32>
    %cst_1 = arith.constant 3.200000e+01 : f32
    %3 = vector.broadcast %cst_1 : f32 to vector<16x1xf32>
    %4 = arith.divf %2, %3 : vector<16x1xf32>
    %5 = vector.broadcast %4 : vector<16x1xf32> to vector<16x32xf32>
    %6 = arith.subf %0, %5 : vector<16x32xf32>
    %7 = arith.mulf %6, %6 : vector<16x32xf32>
    %cst_2 = arith.constant dense<0.000000e+00> : vector<16xf32>
    %8 = vector.multi_reduction <add>, %7, %cst_2 [1] : vector<16x32xf32> to vector<16xf32>
    %9 = vector.shape_cast %8 : vector<16xf32> to vector<16x1xf32>
    %cst_3 = arith.constant 3.200000e+01 : f32
    %10 = vector.broadcast %cst_3 : f32 to vector<16x1xf32>
    %11 = arith.divf %9, %10 : vector<16x1xf32>
    %cst_4 = arith.constant 9.99999974E-6 : f32
    %12 = vector.broadcast %cst_4 : f32 to vector<16x1xf32>
    %13 = arith.addf %11, %12 : vector<16x1xf32>
    %14 = math.rsqrt %13 : vector<16x1xf32>
    %15 = vector.broadcast %4 : vector<16x1xf32> to vector<16x32xf32>
    %16 = arith.subf %0, %15 : vector<16x32xf32>
    %17 = vector.broadcast %14 : vector<16x1xf32> to vector<16x32xf32>
    %18 = arith.mulf %16, %17 : vector<16x32xf32>
    %c0_5 = arith.constant 0 : index
    %c0_6 = arith.constant 0 : index
    %19 = vector.load %arg2[%c0_5, %c0_6] : memref<1x32xf32, #tpu.memory_space<vmem>>, vector<1x32xf32>
    %20 = vector.broadcast %19 : vector<1x32xf32> to vector<16x32xf32>
    %21 = arith.mulf %18, %20 : vector<16x32xf32>
    %c0_7 = arith.constant 0 : index
    %c0_8 = arith.constant 0 : index
    %22 = vector.load %arg3[%c0_7, %c0_8] : memref<1x32xf32, #tpu.memory_space<vmem>>, vector<1x32xf32>
    %23 = vector.broadcast %22 : vector<1x32xf32> to vector<16x32xf32>
    %24 = arith.addf %21, %23 : vector<16x32xf32>
    %cst_9 = arith.constant 5.000000e-01 : f32
    %25 = vector.broadcast %cst_9 : f32 to vector<16x32xf32>
    %26 = arith.mulf %25, %24 : vector<16x32xf32>
    %cst_10 = arith.constant 0.707106769 : f32
    %27 = vector.broadcast %cst_10 : f32 to vector<16x32xf32>
    %28 = arith.mulf %24, %27 : vector<16x32xf32>
    %cst_11 = arith.constant 0.000000e+00 : f32
    %29 = vector.broadcast %cst_11 : f32 to vector<16x32xf32>
    %30 = arith.cmpf oge, %28, %29 : vector<16x32xf32>
    %cst_12 = arith.constant 1.000000e+00 : f32
    %cst_13 = arith.constant -1.000000e+00 : f32
    %31 = vector.broadcast %cst_12 : f32 to vector<16x32xf32>
    %32 = vector.broadcast %cst_13 : f32 to vector<16x32xf32>
    %33 = arith.select %30, %31, %32 : vector<16x32xi1>, vector<16x32xf32>
    %34 = math.absf %28 : vector<16x32xf32>
    %cst_14 = arith.constant 0.327591091 : f32
    %35 = vector.broadcast %cst_14 : f32 to vector<16x32xf32>
    %36 = arith.mulf %35, %34 : vector<16x32xf32>
    %cst_15 = arith.constant 1.000000e+00 : f32
    %37 = vector.broadcast %cst_15 : f32 to vector<16x32xf32>
    %38 = arith.addf %37, %36 : vector<16x32xf32>
    %cst_16 = arith.constant 1.000000e+00 : f32
    %39 = vector.broadcast %cst_16 : f32 to vector<16x32xf32>
    %40 = arith.divf %39, %38 : vector<16x32xf32>
    %cst_17 = arith.constant 1.06140542 : f32
    %41 = vector.broadcast %cst_17 : f32 to vector<16x32xf32>
    %42 = arith.mulf %41, %40 : vector<16x32xf32>
    %cst_18 = arith.constant -1.45315206 : f32
    %43 = vector.broadcast %cst_18 : f32 to vector<16x32xf32>
    %44 = arith.addf %42, %43 : vector<16x32xf32>
    %45 = arith.mulf %44, %40 : vector<16x32xf32>
    %cst_19 = arith.constant 1.42141378 : f32
    %46 = vector.broadcast %cst_19 : f32 to vector<16x32xf32>
    %47 = arith.addf %45, %46 : vector<16x32xf32>
    %48 = arith.mulf %47, %40 : vector<16x32xf32>
    %cst_20 = arith.constant -0.284496725 : f32
    %49 = vector.broadcast %cst_20 : f32 to vector<16x32xf32>
    %50 = arith.addf %48, %49 : vector<16x32xf32>
    %51 = arith.mulf %50, %40 : vector<16x32xf32>
    %cst_21 = arith.constant 0.254829586 : f32
    %52 = vector.broadcast %cst_21 : f32 to vector<16x32xf32>
    %53 = arith.addf %51, %52 : vector<16x32xf32>
    %54 = arith.mulf %53, %40 : vector<16x32xf32>
    %cst_22 = arith.constant 0.000000e+00 : f32
    %55 = vector.broadcast %cst_22 : f32 to vector<16x32xf32>
    %56 = arith.subf %55, %34 : vector<16x32xf32>
    %57 = arith.mulf %56, %34 : vector<16x32xf32>
    %58 = math.exp %57 : vector<16x32xf32>
    %59 = arith.mulf %54, %58 : vector<16x32xf32>
    %cst_23 = arith.constant 1.000000e+00 : f32
    %60 = vector.broadcast %cst_23 : f32 to vector<16x32xf32>
    %61 = arith.subf %60, %59 : vector<16x32xf32>
    %62 = arith.mulf %33, %61 : vector<16x32xf32>
    %cst_24 = arith.constant 1.000000e+00 : f32
    %63 = vector.broadcast %cst_24 : f32 to vector<16x32xf32>
    %64 = arith.addf %63, %62 : vector<16x32xf32>
    %65 = arith.mulf %26, %64 : vector<16x32xf32>
    %c0_25 = arith.constant 0 : index
    %c0_26 = arith.constant 0 : index
    %66 = vector.load %arg4[%c0_25, %c0_26] : memref<16x32xf32, #tpu.memory_space<vmem>>, vector<16x32xf32>
    tpu.vector_store %arg4[%c0_25, %c0_26], %65 {strides = array<i32>} : memref<16x32xf32, #tpu.memory_space<vmem>>, vector<16x32xf32>,
    return
  }
  func.func @transform_0(%arg0: i32) -> (i32, i32) {
    %c0_i32 = arith.constant 0 : i32
    %c0_i32_0 = arith.constant 0 : i32
    return %arg0, %c0_i32 : i32, i32
  }
  func.func @transform_1(%arg0: i32) -> (i32, i32) {
    %c0_i32 = arith.constant 0 : i32
    %c0_i32_0 = arith.constant 0 : i32
    %c0_i32_1 = arith.constant 0 : i32
    return %c0_i32, %c0_i32_0 : i32, i32
  }
  func.func @transform_2(%arg0: i32) -> (i32, i32) {
    %c0_i32 = arith.constant 0 : i32
    %c0_i32_0 = arith.constant 0 : i32
    %c0_i32_1 = arith.constant 0 : i32
    return %c0_i32, %c0_i32_0 : i32, i32
  }
  func.func @transform_3(%arg0: i32) -> (i32, i32) {
    %c0_i32 = arith.constant 0 : i32
    %c0_i32_0 = arith.constant 0 : i32
    return %arg0, %c0_i32 : i32, i32
  }
}

module attributes {stable_mosaic.version = 11 : i64} {
  func.func @_matmul_bias_kernel(%arg0: i32, %arg1: i32, %arg2: i32, %arg3: memref<16x128xf32, #tpu.memory_space<vmem>>, %arg4: memref<128x256xf32, #tpu.memory_space<vmem>>, %arg5: memref<1x256xf32, #tpu.memory_space<vmem>>, %arg6: memref<16x256xf32, #tpu.memory_space<vmem>>, %arg7: memref<16x256xf32, #tpu.memory_space<vmem>>) attributes {dimension_semantics = [#tpu.dimension_semantics<parallel>, #tpu.dimension_semantics<parallel>, #tpu.dimension_semantics<arbitrary>], iteration_bounds = array<i64: 1, 1, 1>, scalar_prefetch = 0 : i64, scratch_operands = 1 : i64, tpu.core_type = #tpu.core_type<tc>, window_params = [{transform_indices = @transform_0, window_bounds = array<i64: 16, 128>}, {transform_indices = @transform_1, window_bounds = array<i64: 128, 256>}, {transform_indices = @transform_2, window_bounds = array<i64: 1, 256>}, {transform_indices = @transform_3, window_bounds = array<i64: 16, 256>}]} {
    %c0_i32 = arith.constant 0 : i32
    %0 = arith.cmpi eq, %arg2, %c0_i32 : i32
    %1 = arith.extui %0 : i1 to i32
    %c0_i32_0 = arith.constant 0 : i32
    %2 = arith.cmpi ne, %1, %c0_i32_0 : i32
    scf.if %2 {
      %cst_10 = arith.constant 0.000000e+00 : f32
      %12 = vector.broadcast %cst_10 : f32 to vector<16x256xf32>
      %c0_11 = arith.constant 0 : index
      %c0_12 = arith.constant 0 : index
      %13 = vector.load %arg7[%c0_11, %c0_12] : memref<16x256xf32, #tpu.memory_space<vmem>>, vector<16x256xf32>
      tpu.vector_store %arg7[%c0_11, %c0_12], %12 {strides = array<i32>} : memref<16x256xf32, #tpu.memory_space<vmem>>, vector<16x256xf32>,
    } else {
    }
    %c0 = arith.constant 0 : index
    %c0_1 = arith.constant 0 : index
    %3 = vector.load %arg7[%c0, %c0_1] : memref<16x256xf32, #tpu.memory_space<vmem>>, vector<16x256xf32>
    %c0_2 = arith.constant 0 : index
    %c0_3 = arith.constant 0 : index
    %4 = vector.load %arg3[%c0_2, %c0_3] : memref<16x128xf32, #tpu.memory_space<vmem>>, vector<16x128xf32>
    %c0_4 = arith.constant 0 : index
    %c0_5 = arith.constant 0 : index
    %5 = vector.load %arg4[%c0_4, %c0_5] : memref<128x256xf32, #tpu.memory_space<vmem>>, vector<128x256xf32>
    %cst = arith.constant dense<0.000000e+00> : vector<16x256xf32>
    %6 = tpu.matmul %4, %5, %cst {dimension_numbers = #tpu.dot_dimension_numbers<[1], [0], [0], [1], [0, 0, 1, 1], [], []>} : vector<16x128xf32>, vector<128x256xf32>, vector<16x256xf32> -> vector<16x256xf32>
    %7 = arith.addf %3, %6 : vector<16x256xf32>
    %c0_6 = arith.constant 0 : index
    %c0_7 = arith.constant 0 : index
    %8 = vector.load %arg7[%c0_6, %c0_7] : memref<16x256xf32, #tpu.memory_space<vmem>>, vector<16x256xf32>
    tpu.vector_store %arg7[%c0_6, %c0_7], %7 {strides = array<i32>} : memref<16x256xf32, #tpu.memory_space<vmem>>, vector<16x256xf32>,
    %c0_i32_8 = arith.constant 0 : i32
    %9 = arith.cmpi eq, %arg2, %c0_i32_8 : i32
    %10 = arith.extui %9 : i1 to i32
    %c0_i32_9 = arith.constant 0 : i32
    %11 = arith.cmpi ne, %10, %c0_i32_9 : i32
    scf.if %11 {
      %c0_10 = arith.constant 0 : index
      %c0_11 = arith.constant 0 : index
      %12 = vector.load %arg7[%c0_10, %c0_11] : memref<16x256xf32, #tpu.memory_space<vmem>>, vector<16x256xf32>
      %c0_12 = arith.constant 0 : index
      %c0_13 = arith.constant 0 : index
      %13 = vector.load %arg5[%c0_12, %c0_13] : memref<1x256xf32, #tpu.memory_space<vmem>>, vector<1x256xf32>
      %14 = vector.broadcast %13 : vector<1x256xf32> to vector<16x256xf32>
      %15 = arith.addf %12, %14 : vector<16x256xf32>
      %c0_14 = arith.constant 0 : index
      %c0_15 = arith.constant 0 : index
      %16 = vector.load %arg6[%c0_14, %c0_15] : memref<16x256xf32, #tpu.memory_space<vmem>>, vector<16x256xf32>
      tpu.vector_store %arg6[%c0_14, %c0_15], %15 {strides = array<i32>} : memref<16x256xf32, #tpu.memory_space<vmem>>, vector<16x256xf32>,
    } else {
    }
    return
  }
  func.func @transform_0(%arg0: i32, %arg1: i32, %arg2: i32) -> (i32, i32) {
    %c0_i32 = arith.constant 0 : i32
    return %arg0, %arg2 : i32, i32
  }
  func.func @transform_1(%arg0: i32, %arg1: i32, %arg2: i32) -> (i32, i32) {
    %c0_i32 = arith.constant 0 : i32
    return %arg2, %arg1 : i32, i32
  }
  func.func @transform_2(%arg0: i32, %arg1: i32, %arg2: i32) -> (i32, i32) {
    %c0_i32 = arith.constant 0 : i32
    %c0_i32_0 = arith.constant 0 : i32
    return %c0_i32, %arg1 : i32, i32
  }
  func.func @transform_3(%arg0: i32, %arg1: i32, %arg2: i32) -> (i32, i32) {
    %c0_i32 = arith.constant 0 : i32
    return %arg0, %arg1 : i32, i32
  }
}

module attributes {stable_mosaic.version = 11 : i64} {
  func.func @_bigru_scan_kernel(%arg0: i32, %arg1: memref<8x4x96xf32, #tpu.memory_space<vmem>>, %arg2: memref<32x192xf32, #tpu.memory_space<vmem>>, %arg3: memref<4x96xf32, #tpu.memory_space<vmem>>, %arg4: memref<4x1xf32, #tpu.memory_space<vmem>>, %arg5: memref<8x4x32xf32, #tpu.memory_space<vmem>>, %arg6: memref<4x32xf32, #tpu.memory_space<vmem>>) attributes {dimension_semantics = [#tpu.dimension_semantics<arbitrary>], iteration_bounds = array<i64: 1>, scalar_prefetch = 0 : i64, scratch_operands = 1 : i64, tpu.core_type = #tpu.core_type<tc>, window_params = [{transform_indices = @transform_0, window_bounds = array<i64: 8, 4, 96>}, {pipeline_mode = #tpu.pipeline_mode<synchronous>, transform_indices = @transform_1, window_bounds = array<i64: 32, 192>}, {pipeline_mode = #tpu.pipeline_mode<synchronous>, transform_indices = @transform_2, window_bounds = array<i64: 4, 96>}, {pipeline_mode = #tpu.pipeline_mode<synchronous>, transform_indices = @transform_3, window_bounds = array<i64: 4, 1>}, {transform_indices = @transform_4, window_bounds = array<i64: 8, 4, 32>}]} {
    %c0_i32 = arith.constant 0 : i32
    %0 = arith.cmpi eq, %arg0, %c0_i32 : i32
    %1 = arith.extui %0 : i1 to i32
    %c0_i32_0 = arith.constant 0 : i32
    %2 = arith.cmpi ne, %1, %c0_i32_0 : i32
    scf.if %2 {
      %cst = arith.constant 0.000000e+00 : f32
      %4 = vector.broadcast %cst : f32 to vector<4x32xf32>
      %c0 = arith.constant 0 : index
      %c0_3 = arith.constant 0 : index
      %5 = vector.load %arg6[%c0, %c0_3] : memref<4x32xf32, #tpu.memory_space<vmem>>, vector<4x32xf32>
      tpu.vector_store %arg6[%c0, %c0_3], %4 {strides = array<i32>} : memref<4x32xf32, #tpu.memory_space<vmem>>, vector<4x32xf32>,
    } else {
    }
    %c0_i32_1 = arith.constant 0 : i32
    %c8_i32 = arith.constant 8 : i32
    %3 = arith.addi %c0_i32_1, %c8_i32 : i32
    %c1_i32 = arith.constant 1 : i32
    scf.for %arg7 = %c0_i32_1 to %3 step %c1_i32  : i32 {
      %c0 = arith.constant 0 : index
      %c0_3 = arith.constant 0 : index
      %4 = vector.load %arg6[%c0, %c0_3] : memref<4x32xf32, #tpu.memory_space<vmem>>, vector<4x32xf32>
      %c0_4 = arith.constant 0 : index
      %c0_5 = arith.constant 0 : index
      %5 = vector.load %arg2[%c0_4, %c0_5] : memref<32x192xf32, #tpu.memory_space<vmem>>, vector<32x192xf32>
      %cst = arith.constant dense<0.000000e+00> : vector<4x192xf32>
      %6 = tpu.matmul %4, %5, %cst {dimension_numbers = #tpu.dot_dimension_numbers<[1], [0], [0], [1], [0, 0, 1, 1], [], []>} : vector<4x32xf32>, vector<32x192xf32>, vector<4x192xf32> -> vector<4x192xf32>
      %c0_6 = arith.constant 0 : index
      %c0_7 = arith.constant 0 : index
      %7 = vector.load %arg4[%c0_6, %c0_7] : memref<4x1xf32, #tpu.memory_space<vmem>>, vector<4x1xf32>
      %8 = vector.extract_strided_slice %6 {offsets = [0, 0], sizes = [4, 96], strides = [1, 1]} : vector<4x192xf32> to vector<4x96xf32>
      %9 = vector.broadcast %7 : vector<4x1xf32> to vector<4x96xf32>
      %10 = arith.mulf %9, %8 : vector<4x96xf32>
      %cst_8 = arith.constant 1.000000e+00 : f32
      %11 = vector.broadcast %cst_8 : f32 to vector<4x1xf32>
      %12 = arith.subf %11, %7 : vector<4x1xf32>
      %13 = vector.extract_strided_slice %6 {offsets = [0, 96], sizes = [4, 96], strides = [1, 1]} : vector<4x192xf32> to vector<4x96xf32>
      %14 = vector.broadcast %12 : vector<4x1xf32> to vector<4x96xf32>
      %15 = arith.mulf %14, %13 : vector<4x96xf32>
      %16 = arith.addf %10, %15 : vector<4x96xf32>
      %c0_9 = arith.constant 0 : index
      %c0_10 = arith.constant 0 : index
      %17 = vector.load %arg3[%c0_9, %c0_10] : memref<4x96xf32, #tpu.memory_space<vmem>>, vector<4x96xf32>
      %18 = arith.addf %16, %17 : vector<4x96xf32>
      %19 = arith.index_cast %arg7 : i32 to index
      %c0_11 = arith.constant 0 : index
      %c0_12 = arith.constant 0 : index
      %20 = vector.load %arg1[%19, %c0_11, %c0_12] : memref<8x4x96xf32, #tpu.memory_space<vmem>>, vector<1x4x96xf32>
      %21 = vector.shape_cast %20 : vector<1x4x96xf32> to vector<4x96xf32>
      %22 = vector.extract_strided_slice %21 {offsets = [0, 0], sizes = [4, 32], strides = [1, 1]} : vector<4x96xf32> to vector<4x32xf32>
      %23 = vector.extract_strided_slice %18 {offsets = [0, 0], sizes = [4, 32], strides = [1, 1]} : vector<4x96xf32> to vector<4x32xf32>
      %24 = arith.addf %22, %23 : vector<4x32xf32>
      %25 = arith.negf %24 : vector<4x32xf32>
      %26 = math.exp %25 : vector<4x32xf32>
      %cst_13 = arith.constant 1.000000e+00 : f32
      %27 = vector.broadcast %cst_13 : f32 to vector<4x32xf32>
      %28 = arith.addf %27, %26 : vector<4x32xf32>
      %29 = arith.divf %27, %28 : vector<4x32xf32>
      %30 = vector.extract_strided_slice %21 {offsets = [0, 32], sizes = [4, 32], strides = [1, 1]} : vector<4x96xf32> to vector<4x32xf32>
      %31 = vector.extract_strided_slice %18 {offsets = [0, 32], sizes = [4, 32], strides = [1, 1]} : vector<4x96xf32> to vector<4x32xf32>
      %32 = arith.addf %30, %31 : vector<4x32xf32>
      %33 = arith.negf %32 : vector<4x32xf32>
      %34 = math.exp %33 : vector<4x32xf32>
      %cst_14 = arith.constant 1.000000e+00 : f32
      %35 = vector.broadcast %cst_14 : f32 to vector<4x32xf32>
      %36 = arith.addf %35, %34 : vector<4x32xf32>
      %37 = arith.divf %35, %36 : vector<4x32xf32>
      %38 = vector.extract_strided_slice %21 {offsets = [0, 64], sizes = [4, 32], strides = [1, 1]} : vector<4x96xf32> to vector<4x32xf32>
      %39 = vector.extract_strided_slice %18 {offsets = [0, 64], sizes = [4, 32], strides = [1, 1]} : vector<4x96xf32> to vector<4x32xf32>
      %40 = arith.mulf %29, %39 : vector<4x32xf32>
      %41 = arith.addf %38, %40 : vector<4x32xf32>
      %42 = math.tanh %41 : vector<4x32xf32>
      %cst_15 = arith.constant 1.000000e+00 : f32
      %43 = vector.broadcast %cst_15 : f32 to vector<4x32xf32>
      %44 = arith.subf %43, %37 : vector<4x32xf32>
      %45 = arith.mulf %44, %42 : vector<4x32xf32>
      %46 = arith.mulf %37, %4 : vector<4x32xf32>
      %47 = arith.addf %45, %46 : vector<4x32xf32>
      %c0_16 = arith.constant 0 : index
      %c0_17 = arith.constant 0 : index
      %48 = vector.load %arg6[%c0_16, %c0_17] : memref<4x32xf32, #tpu.memory_space<vmem>>, vector<4x32xf32>
      tpu.vector_store %arg6[%c0_16, %c0_17], %47 {strides = array<i32>} : memref<4x32xf32, #tpu.memory_space<vmem>>, vector<4x32xf32>,
      %49 = arith.index_cast %arg7 : i32 to index
      %c0_18 = arith.constant 0 : index
      %c0_19 = arith.constant 0 : index
      %50 = vector.load %arg5[%49, %c0_18, %c0_19] : memref<8x4x32xf32, #tpu.memory_space<vmem>>, vector<1x4x32xf32>
      %51 = vector.shape_cast %50 : vector<1x4x32xf32> to vector<4x32xf32>
      %52 = vector.shape_cast %47 : vector<4x32xf32> to vector<1x4x32xf32>
      tpu.vector_store %arg5[%49, %c0_18, %c0_19], %52 {strides = array<i32>} : memref<8x4x32xf32, #tpu.memory_space<vmem>>, vector<1x4x32xf32>,
    }
    %c8_i32_2 = arith.constant 8 : i32
    return
  }
  func.func @transform_0(%arg0: i32) -> (i32, i32, i32) {
    %c0_i32 = arith.constant 0 : i32
    %c0_i32_0 = arith.constant 0 : i32
    %c0_i32_1 = arith.constant 0 : i32
    return %arg0, %c0_i32, %c0_i32_0 : i32, i32, i32
  }
  func.func @transform_1(%arg0: i32) -> (i32, i32) {
    %c0_i32 = arith.constant 0 : i32
    %c0_i32_0 = arith.constant 0 : i32
    %c0_i32_1 = arith.constant 0 : i32
    return %c0_i32, %c0_i32_0 : i32, i32
  }
  func.func @transform_2(%arg0: i32) -> (i32, i32) {
    %c0_i32 = arith.constant 0 : i32
    %c0_i32_0 = arith.constant 0 : i32
    %c0_i32_1 = arith.constant 0 : i32
    return %c0_i32, %c0_i32_0 : i32, i32
  }
  func.func @transform_3(%arg0: i32) -> (i32, i32) {
    %c0_i32 = arith.constant 0 : i32
    %c0_i32_0 = arith.constant 0 : i32
    %c0_i32_1 = arith.constant 0 : i32
    return %c0_i32, %c0_i32_0 : i32, i32
  }
  func.func @transform_4(%arg0: i32) -> (i32, i32, i32) {
    %c0_i32 = arith.constant 0 : i32
    %c0_i32_0 = arith.constant 0 : i32
    %c0_i32_1 = arith.constant 0 : i32
    return %arg0, %c0_i32, %c0_i32_0 : i32, i32, i32
  }
}

module attributes {stable_mosaic.version = 11 : i64} {
  func.func @_ln_gelu_kernel(%arg0: i32, %arg1: memref<16x64xf32, #tpu.memory_space<vmem>>, %arg2: memref<1x64xf32, #tpu.memory_space<vmem>>, %arg3: memref<1x64xf32, #tpu.memory_space<vmem>>, %arg4: memref<16x64xf32, #tpu.memory_space<vmem>>) attributes {dimension_semantics = [#tpu.dimension_semantics<parallel>], iteration_bounds = array<i64: 1>, scalar_prefetch = 0 : i64, scratch_operands = 0 : i64, tpu.core_type = #tpu.core_type<tc>, window_params = [{transform_indices = @transform_0, window_bounds = array<i64: 16, 64>}, {pipeline_mode = #tpu.pipeline_mode<synchronous>, transform_indices = @transform_1, window_bounds = array<i64: 1, 64>}, {pipeline_mode = #tpu.pipeline_mode<synchronous>, transform_indices = @transform_2, window_bounds = array<i64: 1, 64>}, {transform_indices = @transform_3, window_bounds = array<i64: 16, 64>}]} {
    %c0 = arith.constant 0 : index
    %c0_0 = arith.constant 0 : index
    %0 = vector.load %arg1[%c0, %c0_0] : memref<16x64xf32, #tpu.memory_space<vmem>>, vector<16x64xf32>
    %cst = arith.constant dense<0.000000e+00> : vector<16xf32>
    %1 = vector.multi_reduction <add>, %0, %cst [1] : vector<16x64xf32> to vector<16xf32>
    %2 = vector.shape_cast %1 : vector<16xf32> to vector<16x1xf32>
    %cst_1 = arith.constant 6.400000e+01 : f32
    %3 = vector.broadcast %cst_1 : f32 to vector<16x1xf32>
    %4 = arith.divf %2, %3 : vector<16x1xf32>
    %5 = vector.broadcast %4 : vector<16x1xf32> to vector<16x64xf32>
    %6 = arith.subf %0, %5 : vector<16x64xf32>
    %7 = arith.mulf %6, %6 : vector<16x64xf32>
    %cst_2 = arith.constant dense<0.000000e+00> : vector<16xf32>
    %8 = vector.multi_reduction <add>, %7, %cst_2 [1] : vector<16x64xf32> to vector<16xf32>
    %9 = vector.shape_cast %8 : vector<16xf32> to vector<16x1xf32>
    %cst_3 = arith.constant 6.400000e+01 : f32
    %10 = vector.broadcast %cst_3 : f32 to vector<16x1xf32>
    %11 = arith.divf %9, %10 : vector<16x1xf32>
    %cst_4 = arith.constant 9.99999974E-6 : f32
    %12 = vector.broadcast %cst_4 : f32 to vector<16x1xf32>
    %13 = arith.addf %11, %12 : vector<16x1xf32>
    %14 = math.rsqrt %13 : vector<16x1xf32>
    %15 = vector.broadcast %4 : vector<16x1xf32> to vector<16x64xf32>
    %16 = arith.subf %0, %15 : vector<16x64xf32>
    %17 = vector.broadcast %14 : vector<16x1xf32> to vector<16x64xf32>
    %18 = arith.mulf %16, %17 : vector<16x64xf32>
    %c0_5 = arith.constant 0 : index
    %c0_6 = arith.constant 0 : index
    %19 = vector.load %arg2[%c0_5, %c0_6] : memref<1x64xf32, #tpu.memory_space<vmem>>, vector<1x64xf32>
    %20 = vector.broadcast %19 : vector<1x64xf32> to vector<16x64xf32>
    %21 = arith.mulf %18, %20 : vector<16x64xf32>
    %c0_7 = arith.constant 0 : index
    %c0_8 = arith.constant 0 : index
    %22 = vector.load %arg3[%c0_7, %c0_8] : memref<1x64xf32, #tpu.memory_space<vmem>>, vector<1x64xf32>
    %23 = vector.broadcast %22 : vector<1x64xf32> to vector<16x64xf32>
    %24 = arith.addf %21, %23 : vector<16x64xf32>
    %cst_9 = arith.constant 5.000000e-01 : f32
    %25 = vector.broadcast %cst_9 : f32 to vector<16x64xf32>
    %26 = arith.mulf %25, %24 : vector<16x64xf32>
    %cst_10 = arith.constant 0.707106769 : f32
    %27 = vector.broadcast %cst_10 : f32 to vector<16x64xf32>
    %28 = arith.mulf %24, %27 : vector<16x64xf32>
    %cst_11 = arith.constant 0.000000e+00 : f32
    %29 = vector.broadcast %cst_11 : f32 to vector<16x64xf32>
    %30 = arith.cmpf oge, %28, %29 : vector<16x64xf32>
    %cst_12 = arith.constant 1.000000e+00 : f32
    %cst_13 = arith.constant -1.000000e+00 : f32
    %31 = vector.broadcast %cst_12 : f32 to vector<16x64xf32>
    %32 = vector.broadcast %cst_13 : f32 to vector<16x64xf32>
    %33 = arith.select %30, %31, %32 : vector<16x64xi1>, vector<16x64xf32>
    %34 = math.absf %28 : vector<16x64xf32>
    %cst_14 = arith.constant 0.327591091 : f32
    %35 = vector.broadcast %cst_14 : f32 to vector<16x64xf32>
    %36 = arith.mulf %35, %34 : vector<16x64xf32>
    %cst_15 = arith.constant 1.000000e+00 : f32
    %37 = vector.broadcast %cst_15 : f32 to vector<16x64xf32>
    %38 = arith.addf %37, %36 : vector<16x64xf32>
    %cst_16 = arith.constant 1.000000e+00 : f32
    %39 = vector.broadcast %cst_16 : f32 to vector<16x64xf32>
    %40 = arith.divf %39, %38 : vector<16x64xf32>
    %cst_17 = arith.constant 1.06140542 : f32
    %41 = vector.broadcast %cst_17 : f32 to vector<16x64xf32>
    %42 = arith.mulf %41, %40 : vector<16x64xf32>
    %cst_18 = arith.constant -1.45315206 : f32
    %43 = vector.broadcast %cst_18 : f32 to vector<16x64xf32>
    %44 = arith.addf %42, %43 : vector<16x64xf32>
    %45 = arith.mulf %44, %40 : vector<16x64xf32>
    %cst_19 = arith.constant 1.42141378 : f32
    %46 = vector.broadcast %cst_19 : f32 to vector<16x64xf32>
    %47 = arith.addf %45, %46 : vector<16x64xf32>
    %48 = arith.mulf %47, %40 : vector<16x64xf32>
    %cst_20 = arith.constant -0.284496725 : f32
    %49 = vector.broadcast %cst_20 : f32 to vector<16x64xf32>
    %50 = arith.addf %48, %49 : vector<16x64xf32>
    %51 = arith.mulf %50, %40 : vector<16x64xf32>
    %cst_21 = arith.constant 0.254829586 : f32
    %52 = vector.broadcast %cst_21 : f32 to vector<16x64xf32>
    %53 = arith.addf %51, %52 : vector<16x64xf32>
    %54 = arith.mulf %53, %40 : vector<16x64xf32>
    %cst_22 = arith.constant 0.000000e+00 : f32
    %55 = vector.broadcast %cst_22 : f32 to vector<16x64xf32>
    %56 = arith.subf %55, %34 : vector<16x64xf32>
    %57 = arith.mulf %56, %34 : vector<16x64xf32>
    %58 = math.exp %57 : vector<16x64xf32>
    %59 = arith.mulf %54, %58 : vector<16x64xf32>
    %cst_23 = arith.constant 1.000000e+00 : f32
    %60 = vector.broadcast %cst_23 : f32 to vector<16x64xf32>
    %61 = arith.subf %60, %59 : vector<16x64xf32>
    %62 = arith.mulf %33, %61 : vector<16x64xf32>
    %cst_24 = arith.constant 1.000000e+00 : f32
    %63 = vector.broadcast %cst_24 : f32 to vector<16x64xf32>
    %64 = arith.addf %63, %62 : vector<16x64xf32>
    %65 = arith.mulf %26, %64 : vector<16x64xf32>
    %c0_25 = arith.constant 0 : index
    %c0_26 = arith.constant 0 : index
    %66 = vector.load %arg4[%c0_25, %c0_26] : memref<16x64xf32, #tpu.memory_space<vmem>>, vector<16x64xf32>
    tpu.vector_store %arg4[%c0_25, %c0_26], %65 {strides = array<i32>} : memref<16x64xf32, #tpu.memory_space<vmem>>, vector<16x64xf32>,
    return
  }
  func.func @transform_0(%arg0: i32) -> (i32, i32) {
    %c0_i32 = arith.constant 0 : i32
    %c0_i32_0 = arith.constant 0 : i32
    return %arg0, %c0_i32 : i32, i32
  }
  func.func @transform_1(%arg0: i32) -> (i32, i32) {
    %c0_i32 = arith.constant 0 : i32
    %c0_i32_0 = arith.constant 0 : i32
    %c0_i32_1 = arith.constant 0 : i32
    return %c0_i32, %c0_i32_0 : i32, i32
  }
  func.func @transform_2(%arg0: i32) -> (i32, i32) {
    %c0_i32 = arith.constant 0 : i32
    %c0_i32_0 = arith.constant 0 : i32
    %c0_i32_1 = arith.constant 0 : i32
    return %c0_i32, %c0_i32_0 : i32, i32
  }
  func.func @transform_3(%arg0: i32) -> (i32, i32) {
    %c0_i32 = arith.constant 0 : i32
    %c0_i32_0 = arith.constant 0 : i32
    return %arg0, %c0_i32 : i32, i32
  }
}

module attributes {stable_mosaic.version = 11 : i64} {
  func.func @_classifier_kernel(%arg0: i32, %arg1: memref<16x64xf32, #tpu.memory_space<vmem>>, %arg2: memref<64x32xf32, #tpu.memory_space<vmem>>, %arg3: memref<1x32xf32, #tpu.memory_space<vmem>>, %arg4: memref<32x128xf32, #tpu.memory_space<vmem>>, %arg5: memref<1x128xf32, #tpu.memory_space<vmem>>, %arg6: memref<16x128xf32, #tpu.memory_space<vmem>>) attributes {dimension_semantics = [#tpu.dimension_semantics<parallel>], iteration_bounds = array<i64: 1>, scalar_prefetch = 0 : i64, scratch_operands = 0 : i64, tpu.core_type = #tpu.core_type<tc>, window_params = [{transform_indices = @transform_0, window_bounds = array<i64: 16, 64>}, {pipeline_mode = #tpu.pipeline_mode<synchronous>, transform_indices = @transform_1, window_bounds = array<i64: 64, 32>}, {pipeline_mode = #tpu.pipeline_mode<synchronous>, transform_indices = @transform_2, window_bounds = array<i64: 1, 32>}, {pipeline_mode = #tpu.pipeline_mode<synchronous>, transform_indices = @transform_3, window_bounds = array<i64: 32, 128>}, {pipeline_mode = #tpu.pipeline_mode<synchronous>, transform_indices = @transform_4, window_bounds = array<i64: 1, 128>}, {transform_indices = @transform_5, window_bounds = array<i64: 16, 128>}]} {
    %c0 = arith.constant 0 : index
    %c0_0 = arith.constant 0 : index
    %0 = vector.load %arg1[%c0, %c0_0] : memref<16x64xf32, #tpu.memory_space<vmem>>, vector<16x64xf32>
    %c0_1 = arith.constant 0 : index
    %c0_2 = arith.constant 0 : index
    %1 = vector.load %arg2[%c0_1, %c0_2] : memref<64x32xf32, #tpu.memory_space<vmem>>, vector<64x32xf32>
    %cst = arith.constant dense<0.000000e+00> : vector<16x32xf32>
    %2 = tpu.matmul %0, %1, %cst {dimension_numbers = #tpu.dot_dimension_numbers<[1], [0], [0], [1], [0, 0, 1, 1], [], []>} : vector<16x64xf32>, vector<64x32xf32>, vector<16x32xf32> -> vector<16x32xf32>
    %c0_3 = arith.constant 0 : index
    %c0_4 = arith.constant 0 : index
    %3 = vector.load %arg3[%c0_3, %c0_4] : memref<1x32xf32, #tpu.memory_space<vmem>>, vector<1x32xf32>
    %4 = vector.broadcast %3 : vector<1x32xf32> to vector<16x32xf32>
    %5 = arith.addf %2, %4 : vector<16x32xf32>
    %cst_5 = arith.constant 5.000000e-01 : f32
    %6 = vector.broadcast %cst_5 : f32 to vector<16x32xf32>
    %7 = arith.mulf %6, %5 : vector<16x32xf32>
    %cst_6 = arith.constant 0.707106769 : f32
    %8 = vector.broadcast %cst_6 : f32 to vector<16x32xf32>
    %9 = arith.mulf %5, %8 : vector<16x32xf32>
    %cst_7 = arith.constant 0.000000e+00 : f32
    %10 = vector.broadcast %cst_7 : f32 to vector<16x32xf32>
    %11 = arith.cmpf oge, %9, %10 : vector<16x32xf32>
    %cst_8 = arith.constant 1.000000e+00 : f32
    %cst_9 = arith.constant -1.000000e+00 : f32
    %12 = vector.broadcast %cst_8 : f32 to vector<16x32xf32>
    %13 = vector.broadcast %cst_9 : f32 to vector<16x32xf32>
    %14 = arith.select %11, %12, %13 : vector<16x32xi1>, vector<16x32xf32>
    %15 = math.absf %9 : vector<16x32xf32>
    %cst_10 = arith.constant 0.327591091 : f32
    %16 = vector.broadcast %cst_10 : f32 to vector<16x32xf32>
    %17 = arith.mulf %16, %15 : vector<16x32xf32>
    %cst_11 = arith.constant 1.000000e+00 : f32
    %18 = vector.broadcast %cst_11 : f32 to vector<16x32xf32>
    %19 = arith.addf %18, %17 : vector<16x32xf32>
    %cst_12 = arith.constant 1.000000e+00 : f32
    %20 = vector.broadcast %cst_12 : f32 to vector<16x32xf32>
    %21 = arith.divf %20, %19 : vector<16x32xf32>
    %cst_13 = arith.constant 1.06140542 : f32
    %22 = vector.broadcast %cst_13 : f32 to vector<16x32xf32>
    %23 = arith.mulf %22, %21 : vector<16x32xf32>
    %cst_14 = arith.constant -1.45315206 : f32
    %24 = vector.broadcast %cst_14 : f32 to vector<16x32xf32>
    %25 = arith.addf %23, %24 : vector<16x32xf32>
    %26 = arith.mulf %25, %21 : vector<16x32xf32>
    %cst_15 = arith.constant 1.42141378 : f32
    %27 = vector.broadcast %cst_15 : f32 to vector<16x32xf32>
    %28 = arith.addf %26, %27 : vector<16x32xf32>
    %29 = arith.mulf %28, %21 : vector<16x32xf32>
    %cst_16 = arith.constant -0.284496725 : f32
    %30 = vector.broadcast %cst_16 : f32 to vector<16x32xf32>
    %31 = arith.addf %29, %30 : vector<16x32xf32>
    %32 = arith.mulf %31, %21 : vector<16x32xf32>
    %cst_17 = arith.constant 0.254829586 : f32
    %33 = vector.broadcast %cst_17 : f32 to vector<16x32xf32>
    %34 = arith.addf %32, %33 : vector<16x32xf32>
    %35 = arith.mulf %34, %21 : vector<16x32xf32>
    %cst_18 = arith.constant 0.000000e+00 : f32
    %36 = vector.broadcast %cst_18 : f32 to vector<16x32xf32>
    %37 = arith.subf %36, %15 : vector<16x32xf32>
    %38 = arith.mulf %37, %15 : vector<16x32xf32>
    %39 = math.exp %38 : vector<16x32xf32>
    %40 = arith.mulf %35, %39 : vector<16x32xf32>
    %cst_19 = arith.constant 1.000000e+00 : f32
    %41 = vector.broadcast %cst_19 : f32 to vector<16x32xf32>
    %42 = arith.subf %41, %40 : vector<16x32xf32>
    %43 = arith.mulf %14, %42 : vector<16x32xf32>
    %cst_20 = arith.constant 1.000000e+00 : f32
    %44 = vector.broadcast %cst_20 : f32 to vector<16x32xf32>
    %45 = arith.addf %44, %43 : vector<16x32xf32>
    %46 = arith.mulf %7, %45 : vector<16x32xf32>
    %c0_21 = arith.constant 0 : index
    %c0_22 = arith.constant 0 : index
    %47 = vector.load %arg4[%c0_21, %c0_22] : memref<32x128xf32, #tpu.memory_space<vmem>>, vector<32x128xf32>
    %cst_23 = arith.constant dense<0.000000e+00> : vector<16x128xf32>
    %48 = tpu.matmul %46, %47, %cst_23 {dimension_numbers = #tpu.dot_dimension_numbers<[1], [0], [0], [1], [0, 0, 1, 1], [], []>} : vector<16x32xf32>, vector<32x128xf32>, vector<16x128xf32> -> vector<16x128xf32>
    %c0_24 = arith.constant 0 : index
    %c0_25 = arith.constant 0 : index
    %49 = vector.load %arg5[%c0_24, %c0_25] : memref<1x128xf32, #tpu.memory_space<vmem>>, vector<1x128xf32>
    %50 = vector.broadcast %49 : vector<1x128xf32> to vector<16x128xf32>
    %51 = arith.addf %48, %50 : vector<16x128xf32>
    %c0_26 = arith.constant 0 : index
    %c0_27 = arith.constant 0 : index
    %52 = vector.load %arg6[%c0_26, %c0_27] : memref<16x128xf32, #tpu.memory_space<vmem>>, vector<16x128xf32>
    tpu.vector_store %arg6[%c0_26, %c0_27], %51 {strides = array<i32>} : memref<16x128xf32, #tpu.memory_space<vmem>>, vector<16x128xf32>,
    return
  }
  func.func @transform_0(%arg0: i32) -> (i32, i32) {
    %c0_i32 = arith.constant 0 : i32
    %c0_i32_0 = arith.constant 0 : i32
    return %arg0, %c0_i32 : i32, i32
  }
  func.func @transform_1(%arg0: i32) -> (i32, i32) {
    %c0_i32 = arith.constant 0 : i32
    %c0_i32_0 = arith.constant 0 : i32
    %c0_i32_1 = arith.constant 0 : i32
    return %c0_i32, %c0_i32_0 : i32, i32
  }
  func.func @transform_2(%arg0: i32) -> (i32, i32) {
    %c0_i32 = arith.constant 0 : i32
    %c0_i32_0 = arith.constant 0 : i32
    %c0_i32_1 = arith.constant 0 : i32
    return %c0_i32, %c0_i32_0 : i32, i32
  }
  func.func @transform_3(%arg0: i32) -> (i32, i32) {
    %c0_i32 = arith.constant 0 : i32
    %c0_i32_0 = arith.constant 0 : i32
    %c0_i32_1 = arith.constant 0 : i32
    return %c0_i32, %c0_i32_0 : i32, i32
  }
  func.func @transform_4(%arg0: i32) -> (i32, i32) {
    %c0_i32 = arith.constant 0 : i32
    %c0_i32_0 = arith.constant 0 : i32
    %c0_i32_1 = arith.constant 0 : i32
    return %c0_i32, %c0_i32_0 : i32, i32
  }
  func.func @transform_5(%arg0: i32) -> (i32, i32) {
    %c0_i32 = arith.constant 0 : i32
    %c0_i32_0 = arith.constant 0 : i32
    return %arg0, %c0_i32 : i32, i32
  }
}

module attributes {stable_mosaic.version = 11 : i64} {
  func.func @_bigru_scan_kernel(%arg0: i32, %arg1: memref<2x16x96xf32, #tpu.memory_space<vmem>>, %arg2: memref<32x192xf32, #tpu.memory_space<vmem>>, %arg3: memref<16x96xf32, #tpu.memory_space<vmem>>, %arg4: memref<16x1xf32, #tpu.memory_space<vmem>>, %arg5: memref<2x16x32xf32, #tpu.memory_space<vmem>>, %arg6: memref<16x32xf32, #tpu.memory_space<vmem>>) attributes {dimension_semantics = [#tpu.dimension_semantics<arbitrary>], iteration_bounds = array<i64: 1>, scalar_prefetch = 0 : i64, scratch_operands = 1 : i64, tpu.core_type = #tpu.core_type<tc>, window_params = [{transform_indices = @transform_0, window_bounds = array<i64: 2, 16, 96>}, {pipeline_mode = #tpu.pipeline_mode<synchronous>, transform_indices = @transform_1, window_bounds = array<i64: 32, 192>}, {pipeline_mode = #tpu.pipeline_mode<synchronous>, transform_indices = @transform_2, window_bounds = array<i64: 16, 96>}, {pipeline_mode = #tpu.pipeline_mode<synchronous>, transform_indices = @transform_3, window_bounds = array<i64: 16, 1>}, {transform_indices = @transform_4, window_bounds = array<i64: 2, 16, 32>}]} {
    %c0_i32 = arith.constant 0 : i32
    %0 = arith.cmpi eq, %arg0, %c0_i32 : i32
    %1 = arith.extui %0 : i1 to i32
    %c0_i32_0 = arith.constant 0 : i32
    %2 = arith.cmpi ne, %1, %c0_i32_0 : i32
    scf.if %2 {
      %cst = arith.constant 0.000000e+00 : f32
      %4 = vector.broadcast %cst : f32 to vector<16x32xf32>
      %c0 = arith.constant 0 : index
      %c0_3 = arith.constant 0 : index
      %5 = vector.load %arg6[%c0, %c0_3] : memref<16x32xf32, #tpu.memory_space<vmem>>, vector<16x32xf32>
      tpu.vector_store %arg6[%c0, %c0_3], %4 {strides = array<i32>} : memref<16x32xf32, #tpu.memory_space<vmem>>, vector<16x32xf32>,
    } else {
    }
    %c0_i32_1 = arith.constant 0 : i32
    %c2_i32 = arith.constant 2 : i32
    %3 = arith.addi %c0_i32_1, %c2_i32 : i32
    %c1_i32 = arith.constant 1 : i32
    scf.for %arg7 = %c0_i32_1 to %3 step %c1_i32  : i32 {
      %c0 = arith.constant 0 : index
      %c0_3 = arith.constant 0 : index
      %4 = vector.load %arg6[%c0, %c0_3] : memref<16x32xf32, #tpu.memory_space<vmem>>, vector<16x32xf32>
      %c0_4 = arith.constant 0 : index
      %c0_5 = arith.constant 0 : index
      %5 = vector.load %arg2[%c0_4, %c0_5] : memref<32x192xf32, #tpu.memory_space<vmem>>, vector<32x192xf32>
      %cst = arith.constant dense<0.000000e+00> : vector<16x192xf32>
      %6 = tpu.matmul %4, %5, %cst {dimension_numbers = #tpu.dot_dimension_numbers<[1], [0], [0], [1], [0, 0, 1, 1], [], []>} : vector<16x32xf32>, vector<32x192xf32>, vector<16x192xf32> -> vector<16x192xf32>
      %c0_6 = arith.constant 0 : index
      %c0_7 = arith.constant 0 : index
      %7 = vector.load %arg4[%c0_6, %c0_7] : memref<16x1xf32, #tpu.memory_space<vmem>>, vector<16x1xf32>
      %8 = vector.extract_strided_slice %6 {offsets = [0, 0], sizes = [16, 96], strides = [1, 1]} : vector<16x192xf32> to vector<16x96xf32>
      %9 = vector.broadcast %7 : vector<16x1xf32> to vector<16x96xf32>
      %10 = arith.mulf %9, %8 : vector<16x96xf32>
      %cst_8 = arith.constant 1.000000e+00 : f32
      %11 = vector.broadcast %cst_8 : f32 to vector<16x1xf32>
      %12 = arith.subf %11, %7 : vector<16x1xf32>
      %13 = vector.extract_strided_slice %6 {offsets = [0, 96], sizes = [16, 96], strides = [1, 1]} : vector<16x192xf32> to vector<16x96xf32>
      %14 = vector.broadcast %12 : vector<16x1xf32> to vector<16x96xf32>
      %15 = arith.mulf %14, %13 : vector<16x96xf32>
      %16 = arith.addf %10, %15 : vector<16x96xf32>
      %c0_9 = arith.constant 0 : index
      %c0_10 = arith.constant 0 : index
      %17 = vector.load %arg3[%c0_9, %c0_10] : memref<16x96xf32, #tpu.memory_space<vmem>>, vector<16x96xf32>
      %18 = arith.addf %16, %17 : vector<16x96xf32>
      %19 = arith.index_cast %arg7 : i32 to index
      %c0_11 = arith.constant 0 : index
      %c0_12 = arith.constant 0 : index
      %20 = vector.load %arg1[%19, %c0_11, %c0_12] : memref<2x16x96xf32, #tpu.memory_space<vmem>>, vector<1x16x96xf32>
      %21 = vector.shape_cast %20 : vector<1x16x96xf32> to vector<16x96xf32>
      %22 = vector.extract_strided_slice %21 {offsets = [0, 0], sizes = [16, 32], strides = [1, 1]} : vector<16x96xf32> to vector<16x32xf32>
      %23 = vector.extract_strided_slice %18 {offsets = [0, 0], sizes = [16, 32], strides = [1, 1]} : vector<16x96xf32> to vector<16x32xf32>
      %24 = arith.addf %22, %23 : vector<16x32xf32>
      %25 = arith.negf %24 : vector<16x32xf32>
      %26 = math.exp %25 : vector<16x32xf32>
      %cst_13 = arith.constant 1.000000e+00 : f32
      %27 = vector.broadcast %cst_13 : f32 to vector<16x32xf32>
      %28 = arith.addf %27, %26 : vector<16x32xf32>
      %29 = arith.divf %27, %28 : vector<16x32xf32>
      %30 = vector.extract_strided_slice %21 {offsets = [0, 32], sizes = [16, 32], strides = [1, 1]} : vector<16x96xf32> to vector<16x32xf32>
      %31 = vector.extract_strided_slice %18 {offsets = [0, 32], sizes = [16, 32], strides = [1, 1]} : vector<16x96xf32> to vector<16x32xf32>
      %32 = arith.addf %30, %31 : vector<16x32xf32>
      %33 = arith.negf %32 : vector<16x32xf32>
      %34 = math.exp %33 : vector<16x32xf32>
      %cst_14 = arith.constant 1.000000e+00 : f32
      %35 = vector.broadcast %cst_14 : f32 to vector<16x32xf32>
      %36 = arith.addf %35, %34 : vector<16x32xf32>
      %37 = arith.divf %35, %36 : vector<16x32xf32>
      %38 = vector.extract_strided_slice %21 {offsets = [0, 64], sizes = [16, 32], strides = [1, 1]} : vector<16x96xf32> to vector<16x32xf32>
      %39 = vector.extract_strided_slice %18 {offsets = [0, 64], sizes = [16, 32], strides = [1, 1]} : vector<16x96xf32> to vector<16x32xf32>
      %40 = arith.mulf %29, %39 : vector<16x32xf32>
      %41 = arith.addf %38, %40 : vector<16x32xf32>
      %42 = math.tanh %41 : vector<16x32xf32>
      %cst_15 = arith.constant 1.000000e+00 : f32
      %43 = vector.broadcast %cst_15 : f32 to vector<16x32xf32>
      %44 = arith.subf %43, %37 : vector<16x32xf32>
      %45 = arith.mulf %44, %42 : vector<16x32xf32>
      %46 = arith.mulf %37, %4 : vector<16x32xf32>
      %47 = arith.addf %45, %46 : vector<16x32xf32>
      %c0_16 = arith.constant 0 : index
      %c0_17 = arith.constant 0 : index
      %48 = vector.load %arg6[%c0_16, %c0_17] : memref<16x32xf32, #tpu.memory_space<vmem>>, vector<16x32xf32>
      tpu.vector_store %arg6[%c0_16, %c0_17], %47 {strides = array<i32>} : memref<16x32xf32, #tpu.memory_space<vmem>>, vector<16x32xf32>,
      %49 = arith.index_cast %arg7 : i32 to index
      %c0_18 = arith.constant 0 : index
      %c0_19 = arith.constant 0 : index
      %50 = vector.load %arg5[%49, %c0_18, %c0_19] : memref<2x16x32xf32, #tpu.memory_space<vmem>>, vector<1x16x32xf32>
      %51 = vector.shape_cast %50 : vector<1x16x32xf32> to vector<16x32xf32>
      %52 = vector.shape_cast %47 : vector<16x32xf32> to vector<1x16x32xf32>
      tpu.vector_store %arg5[%49, %c0_18, %c0_19], %52 {strides = array<i32>} : memref<2x16x32xf32, #tpu.memory_space<vmem>>, vector<1x16x32xf32>,
    }
    %c2_i32_2 = arith.constant 2 : i32
    return
  }
  func.func @transform_0(%arg0: i32) -> (i32, i32, i32) {
    %c0_i32 = arith.constant 0 : i32
    %c0_i32_0 = arith.constant 0 : i32
    %c0_i32_1 = arith.constant 0 : i32
    return %arg0, %c0_i32, %c0_i32_0 : i32, i32, i32
  }
  func.func @transform_1(%arg0: i32) -> (i32, i32) {
    %c0_i32 = arith.constant 0 : i32
    %c0_i32_0 = arith.constant 0 : i32
    %c0_i32_1 = arith.constant 0 : i32
    return %c0_i32, %c0_i32_0 : i32, i32
  }
  func.func @transform_2(%arg0: i32) -> (i32, i32) {
    %c0_i32 = arith.constant 0 : i32
    %c0_i32_0 = arith.constant 0 : i32
    %c0_i32_1 = arith.constant 0 : i32
    return %c0_i32, %c0_i32_0 : i32, i32
  }
  func.func @transform_3(%arg0: i32) -> (i32, i32) {
    %c0_i32 = arith.constant 0 : i32
    %c0_i32_0 = arith.constant 0 : i32
    %c0_i32_1 = arith.constant 0 : i32
    return %c0_i32, %c0_i32_0 : i32, i32
  }
  func.func @transform_4(%arg0: i32) -> (i32, i32, i32) {
    %c0_i32 = arith.constant 0 : i32
    %c0_i32_0 = arith.constant 0 : i32
    %c0_i32_1 = arith.constant 0 : i32
    return %arg0, %c0_i32, %c0_i32_0 : i32, i32, i32
  }
}

</mosaic_0001>

<bundles_post_ra>
// kernel: speech_recognition_model.17
= control target key start
LH: loop header
LB: loop body
LE: loop exit
PB: predicated region body
PF: predicated region fallthrough
CT: control target
= control target key end

     0   :  { %s625_s1 = inlined_call_operand.vmem [shape: f32[128,128], index: 1, kind: input, shape index: {}]   ;;  %s626_s0 = inlined_call_operand.vmem [shape: f32[128,128], index: 0, kind: input, shape index: {}]   ;;  %s627_s2 = inlined_call_operand.vmem [shape: f32[1,128], index: 2, kind: input, shape index: {}]   ;;  %s628_s3 = inlined_call_operand.vmem [shape: f32[128,128], index: 3, kind: output, shape index: {}]  }
   0x1   :  { %v66_v0 = vld [vmem:[%s625_s1] sm:$0xff]  ;;  %v67_v1 = vld [vmem:[%s625_s1 + $0x8] sm:$0xff]  ;;  %v68_v2 = vld [vmem:[%s625_s1 + $0x10] sm:$0xff] }
   0x2   :  { %v410_v3 = vpack.c.bf16 %v67_v1, %v66_v0  ;;  %v69_v4 = vld [vmem:[%s625_s1 + $0x18] sm:$0xff]  ;;  %v70_v6 = vld [vmem:[%s625_s1 + $0x20] sm:$0xff]  ;;  %v71_v7 = vld [vmem:[%s625_s1 + $0x28] sm:$0xff] }
   0x3   :  { %v414_v5 = vpack.c.bf16 %v69_v4, %v68_v2  ;;  %v418_v8 = vpack.c.bf16 %v71_v7, %v70_v6  ;;  %v50_v9 = vld [vmem:[%s626_s0] sm:$0xff]  ;;  %v72_v11 = vld [vmem:[%s625_s1 + $0x30] sm:$0xff]  ;;  %v73_v12 = vld [vmem:[%s625_s1 + $0x38] sm:$0xff] }
   0x4   :  { %411 = vmatprep.subr.bf16.mxu0 %v410_v3  ;;  %442 = vmatprep.subr.bf16.mxu1 %v410_v3  ;;  %v58_v10 = vld [vmem:[%s626_s0 + $0x40] sm:$0xff]  ;;  %v422_v13 = vpack.c.bf16 %v73_v12, %v72_v11  ;;  %v75_v15 = vld [vmem:[%s625_s1 + $0x48] sm:$0xff]  ;;  %v76_v17 = vld [vmem:[%s625_s1 + $0x50] sm:$0xff] }
   0x5   :  { %413 = vmatpush3.bf16.msra.mxu0 %v410_v3  ;;  %450 = vmatpush3.bf16.msra.mxu1 %v410_v3  ;;  %v74_v14 = vld [vmem:[%s625_s1 + $0x40] sm:$0xff]  ;;  %v77_v18 = vld [vmem:[%s625_s1 + $0x58] sm:$0xff]  ;;  %v79_v21 = vld [vmem:[%s625_s1 + $0x68] sm:$0xff] }
   0x6   :  { %415 = vmatprep.subr.bf16.mxu0 %v414_v5  ;;  %443 = vmatprep.subr.bf16.mxu1 %v414_v5  ;;  %v426_v16 = vpack.c.bf16 %v75_v15, %v74_v14  ;;  %v430_v19 = vpack.c.bf16 %v77_v18, %v76_v17  ;;  %v78_v20 = vld [vmem:[%s625_s1 + $0x60] sm:$0xff]  ;;  %v80_v23 = vld [vmem:[%s625_s1 + $0x70] sm:$0xff]  ;;  %v81_v24 = vld [vmem:[%s625_s1 + $0x78] sm:$0xff] }
   0x7   :  { %386 = vmatprep.mubr.f32.mxu0 %v50_v9  ;;  %398 = vmatprep.mubr.f32.mxu1 %v58_v10  ;;  %v434_v22 = vpack.c.bf16 %v79_v21, %v78_v20  ;;  %v438_v25 = vpack.c.bf16 %v81_v24, %v80_v23  ;;  %v51_v26 = vld [vmem:[%s626_s0 + $0x8] sm:$0xff]  ;;  %v52_v28 = vld [vmem:[%s626_s0 + $0x10] sm:$0xff]  ;;  %v53_v30 = vld [vmem:[%s626_s0 + $0x18] sm:$0xff] }
   0x8   :  { %v59_v27 = vld [vmem:[%s626_s0 + $0x48] sm:$0xff]  ;;  %v60_v29 = vld [vmem:[%s626_s0 + $0x50] sm:$0xff]  ;;  %v61_v31 = vld [vmem:[%s626_s0 + $0x58] sm:$0xff] }
   0x9   :  { %417 = vmatpush3.bf16.msra.mxu0 %v414_v5  ;;  %451 = vmatpush3.bf16.msra.mxu1 %v414_v5  ;;  %v54_v32 = vld [vmem:[%s626_s0 + $0x20] sm:$0xff]  ;;  %v55_v34 = vld [vmem:[%s626_s0 + $0x28] sm:$0xff]  ;;  %v56_v36 = vld [vmem:[%s626_s0 + $0x30] sm:$0xff] }
   0xa   :  { %419 = vmatprep.subr.bf16.mxu0 %v418_v8  ;;  %444 = vmatprep.subr.bf16.mxu1 %v418_v8  ;;  %v62_v33 = vld [vmem:[%s626_s0 + $0x60] sm:$0xff]  ;;  %v63_v35 = vld [vmem:[%s626_s0 + $0x68] sm:$0xff]  ;;  %v64_v37 = vld [vmem:[%s626_s0 + $0x70] sm:$0xff] }
   0xb   :  { %v57_v38 = vld [vmem:[%s626_s0 + $0x38] sm:$0xff]  ;;  %v321_v40 = vld [vmem:[%s627_s2] ss:$0 sm:$0xff] }
   0xc   :  { %v65_v39 = vld [vmem:[%s626_s0 + $0x78] sm:$0xff] }
   0xd   :  { %421 = vmatpush3.bf16.msra.mxu0 %v418_v8  ;;  %452 = vmatpush3.bf16.msra.mxu1 %v418_v8 }
   0xe   :  { %423 = vmatprep.subr.bf16.mxu0 %v422_v13  ;;  %445 = vmatprep.subr.bf16.mxu1 %v422_v13 }
  0x11   :  { %425 = vmatpush3.bf16.msra.mxu0 %v422_v13  ;;  %453 = vmatpush3.bf16.msra.mxu1 %v422_v13 }
  0x12   :  { %427 = vmatprep.subr.bf16.mxu0 %v426_v16  ;;  %446 = vmatprep.subr.bf16.mxu1 %v426_v16 }
  0x15   :  { %429 = vmatpush3.bf16.msra.mxu0 %v426_v16  ;;  %454 = vmatpush3.bf16.msra.mxu1 %v426_v16 }
  0x16   :  { %431 = vmatprep.subr.bf16.mxu0 %v430_v19  ;;  %447 = vmatprep.subr.bf16.mxu1 %v430_v19 }
  0x19   :  { %433 = vmatpush3.bf16.msra.mxu0 %v430_v19  ;;  %455 = vmatpush3.bf16.msra.mxu1 %v430_v19 }
  0x1a   :  { %435 = vmatprep.subr.bf16.mxu0 %v434_v22  ;;  %448 = vmatprep.subr.bf16.mxu1 %v434_v22 }
  0x1d   :  { %437 = vmatpush3.bf16.msra.mxu0 %v434_v22  ;;  %456 = vmatpush3.bf16.msra.mxu1 %v434_v22 }
  0x1e   :  { %439 = vmatprep.subr.bf16.mxu0 %v438_v25  ;;  %449 = vmatprep.subr.bf16.mxu1 %v438_v25 }
  0x21   :  { %441 = vmatpush3.bf16.msra.mxu0 %v438_v25  ;;  %457 = vmatpush3.bf16.msra.mxu1 %v438_v25 }
  0x24   :  { %387 = vmatmul.mubr.f32.vlgmr.msra.gmra.mrb[0].mxu0 %v51_v26  ;;  %399 = vmatmul.mubr.f32.vlgmr.msra.gmra.mrb[0].mxu1 %v59_v27 }
  0x25   :  { %389 = vmatprep.mubr.f32.mxu0 %v52_v28  ;;  %401 = vmatprep.mubr.f32.mxu1 %v60_v29 }
  0x28   :  { %390 = vmatmul.mubr.f32.gmra.mrb[2].mxu0 %v53_v30  ;;  %402 = vmatmul.mubr.f32.gmra.mrb[2].mxu1 %v61_v31 }
  0x29   :  { %392 = vmatprep.mubr.f32.mxu0 %v54_v32  ;;  %404 = vmatprep.mubr.f32.mxu1 %v62_v33 }
  0x2c   :  { %393 = vmatmul.mubr.f32.gmra.mrb[4].mxu0 %v55_v34  ;;  %405 = vmatmul.mubr.f32.gmra.mrb[4].mxu1 %v63_v35 }
  0x2d   :  { %395 = vmatprep.mubr.f32.mxu0 %v56_v36  ;;  %407 = vmatprep.mubr.f32.mxu1 %v64_v37 }
  0x30   :  { %396 = vmatmul.mubr.f32.gmra.mrb[6].mxu0 %v57_v38  ;;  %408 = vmatmul.mubr.f32.gmra.mrb[6].mxu1 %v65_v39 }
  0xf7   :  { %v388_v41 = vpop.f32.mrb[0].mxu0  ;;  %v400_v42 = vpop.f32.mrb[0].mxu1 }
  0xf8   :  { %v286_v43 = vadd.f32 %v388_v41, %v321_v40  ;;  %v294_v44 = vadd.f32 %v400_v42, %v321_v40  ;;  %v148_v45 = vpop.f32.mrb[1].mxu0  ;;  %v188_v46 = vpop.f32.mrb[1].mxu1 }
  0xf9   :  { %v285_v47 = vadd.f32 %v321_v40, %v148_v45  ;;  %v293_v48 = vadd.f32 %v321_v40, %v188_v46 }
  0xfa   :  { %302 = vst [vmem:[%s628_s3 + $0x8] sm:$0xff] %v286_v43  ;;  %310 = vst [vmem:[%s628_s3 + $0x48] sm:$0xff] %v294_v44 }
  0xfb   :  { %301 = vst [vmem:[%s628_s3] sm:$0xff] %v285_v47  ;;  %309 = vst [vmem:[%s628_s3 + $0x40] sm:$0xff] %v293_v48  ;;  %v391_v49 = vpop.f32.mrb[2].mxu0  ;;  %v403_v50 = vpop.f32.mrb[2].mxu1 }
  0xfc   :  { %v288_v51 = vadd.f32 %v391_v49, %v321_v40  ;;  %v296_v52 = vadd.f32 %v403_v50, %v321_v40  ;;  %v158_v53 = vpop.f32.mrb[3].mxu0  ;;  %v198_v54 = vpop.f32.mrb[3].mxu1 }
  0xfd   :  { %v287_v55 = vadd.f32 %v321_v40, %v158_v53  ;;  %v295_v56 = vadd.f32 %v321_v40, %v198_v54 }
  0xfe   :  { %304 = vst [vmem:[%s628_s3 + $0x18] sm:$0xff] %v288_v51  ;;  %312 = vst [vmem:[%s628_s3 + $0x58] sm:$0xff] %v296_v52 }
  0xff   :  { %303 = vst [vmem:[%s628_s3 + $0x10] sm:$0xff] %v287_v55  ;;  %311 = vst [vmem:[%s628_s3 + $0x50] sm:$0xff] %v295_v56  ;;  %v394_v57 = vpop.f32.mrb[4].mxu0  ;;  %v406_v58 = vpop.f32.mrb[4].mxu1 }
 0x100   :  { %v290_v59 = vadd.f32 %v394_v57, %v321_v40  ;;  %v298_v60 = vadd.f32 %v406_v58, %v321_v40  ;;  %v168_v61 = vpop.f32.mrb[5].mxu0  ;;  %v208_v62 = vpop.f32.mrb[5].mxu1 }
 0x101   :  { %v289_v63 = vadd.f32 %v321_v40, %v168_v61  ;;  %v297_v0 = vadd.f32 %v321_v40, %v208_v62 }
 0x102   :  { %306 = vst [vmem:[%s628_s3 + $0x28] sm:$0xff] %v290_v59  ;;  %314 = vst [vmem:[%s628_s3 + $0x68] sm:$0xff] %v298_v60 }
 0x103   :  { %305 = vst [vmem:[%s628_s3 + $0x20] sm:$0xff] %v289_v63  ;;  %313 = vst [vmem:[%s628_s3 + $0x60] sm:$0xff] %v297_v0  ;;  %v397_v1 = vpop.f32.mrb[6].mxu0  ;;  %v409_v2 = vpop.f32.mrb[6].mxu1 }
 0x104   :  { %v292_v3 = vadd.f32 %v397_v1, %v321_v40  ;;  %v300_v4 = vadd.f32 %v409_v2, %v321_v40  ;;  %v178_v5 = vpop.f32.mrb[7].mxu0  ;;  %v218_v6 = vpop.f32.mrb[7].mxu1 }
 0x105   :  { %v291_v7 = vadd.f32 %v321_v40, %v178_v5  ;;  %v299_v8 = vadd.f32 %v321_v40, %v218_v6 }
 0x106   :  { %308 = vst [vmem:[%s628_s3 + $0x38] sm:$0xff] %v292_v3  ;;  %316 = vst [vmem:[%s628_s3 + $0x78] sm:$0xff] %v300_v4 }
 0x107   :  { %307 = vst [vmem:[%s628_s3 + $0x30] sm:$0xff] %v291_v7  ;;  %315 = vst [vmem:[%s628_s3 + $0x70] sm:$0xff] %v299_v8 }

// kernel: speech_recognition_model.18
= control target key start
LH: loop header
LB: loop body
LE: loop exit
PB: predicated region body
PF: predicated region fallthrough
CT: control target
= control target key end

     0   :  { %v3763_v0 = vmov 0   ;;  %vm10402_vm0 = vcmask 64512   ;;  %s10261_s1 = inlined_call_operand.vmem [shape: f32[1,8,1], index: 1, kind: input, shape index: {}]   ;;  %s10262_s2 = inlined_call_operand.vmem [shape: f32[1,8,1], index: 2, kind: input, shape index: {}]   ;;  %s10263_s0 = inlined_call_operand.vmem [shape: f32[64,8,8], index: 0, kind: input, shape index: {}]   ;;  %s10264_s3 = inlined_call_operand.vmem [shape: f32[64,8,8], index: 3, kind: output, shape index: {}]  }
   0x1   :  { %3362 = vset.pattern.permute.xlu0 %v3763_v0  ;;  %v1424_v1 = vld [vmem:[%s10261_s1] sm:$0xff]  ;;  %v15_v4 = vld [vmem:[%s10263_s0 + $0x8] sm:$0xff]  ;;  %v16_v5 = vld [vmem:[%s10263_s0 + $0x10] sm:$0xff] }
   0x2   :  { %1427 = vperm.xlu0 %3362, %v1424_v1   ;;  %v1494_v2 = vld [vmem:[%s10262_s2] sm:$0xff]  ;;  %v17_v7 = vld [vmem:[%s10263_s0 + $0x18] sm:$0xff]  ;;  %v86_v8 = vsel %vm10402_vm0, %v15_v4, 0.0  ;;  %v93_v9 = vsel %vm10402_vm0, %v16_v5, 0.0  ;;  %v19_v12 = vld [vmem:[%s10263_s0 + $0x28] sm:$0xff] }
   0x3   :  { %v14_v3 = vld [vmem:[%s10263_s0] sm:$0xff]  ;;  %v87_v13 = vrot.slane %v86_v8, 4  ;;  %v94_v14 = vrot.slane %v93_v9, 4  ;;  %v100_v15 = vsel %vm10402_vm0, %v17_v7, 0.0  ;;  %v20_v16 = vld [vmem:[%s10263_s0 + $0x30] sm:$0xff]  ;;  %v21_v17 = vld [vmem:[%s10263_s0 + $0x38] sm:$0xff] }
   0x4   :  { %v79_v6 = vsel %vm10402_vm0, %v14_v3, 0.0  ;;  %v18_v11 = vld [vmem:[%s10263_s0 + $0x20] sm:$0xff]  ;;  %v114_v21 = vsel %vm10402_vm0, %v19_v12, 0.0  ;;  %v23_v22 = vld [vmem:[%s10263_s0 + $0x48] sm:$0xff]  ;;  %v24_v23 = vld [vmem:[%s10263_s0 + $0x50] sm:$0xff]  ;;  %v101_v25 = vrot.slane %v100_v15, 4 }
   0x5   :  { %v80_v10 = vrot.slane %v79_v6, 4  ;;  %v22_v18 = vld [vmem:[%s10263_s0 + $0x40] sm:$0xff]  ;;  %v107_v20 = vsel %vm10402_vm0, %v18_v11, 0.0  ;;  %v25_v24 = vld [vmem:[%s10263_s0 + $0x58] sm:$0xff]  ;;  %v27_v27 = vld [vmem:[%s10263_s0 + $0x68] sm:$0xff]  ;;  %v88_v28 = vadd.f32 %v87_v13, %v86_v8  ;;  %v95_v29 = vadd.f32 %v94_v14, %v93_v9 }
   0x6   :  { %1497 = vperm.xlu0 %3362, %v1494_v2   ;;  %v26_v26 = vld [vmem:[%s10263_s0 + $0x60] sm:$0xff]  ;;  %v121_v30 = vsel %vm10402_vm0, %v20_v16, 0.0  ;;  %v28_v31 = vld [vmem:[%s10263_s0 + $0x70] sm:$0xff]  ;;  %v108_v32 = vrot.slane %v107_v20, 4  ;;  %v115_v33 = vrot.slane %v114_v21, 4  ;;  %v128_v34 = vsel %vm10402_vm0, %v21_v17, 0.0 }
   0x7   :  { %v81_v19 = vadd.f32 %v80_v10, %v79_v6  ;;  %v135_v35 = vsel %vm10402_vm0, %v22_v18, 0.0  ;;  %v142_v37 = vsel %vm10402_vm0, %v23_v22, 0.0  ;;  %v149_v38 = vsel %vm10402_vm0, %v24_v23, 0.0  ;;  %v29_v48 = vld [vmem:[%s10263_s0 + $0x78] sm:$0xff] }
   0x8   :  { %v156_v39 = vsel %vm10402_vm0, %v25_v24, 0.0  ;;  %v102_v40 = vadd.f32 %v101_v25, %v100_v15  ;;  %v122_v41 = vrot.slane %v121_v30, 4  ;;  %v163_v42 = vsel %vm10402_vm0, %v26_v26, 0.0 }
   0x9   :  { %v82_v36 = vrot.slane %v81_v19, 2  ;;  %v170_v43 = vsel %vm10402_vm0, %v27_v27, 0.0  ;;  %v89_v44 = vrot.slane %v88_v28, 2  ;;  %v129_v45 = vrot.slane %v128_v34, 4 }
   0xa   :  { %v136_v46 = vrot.slane %v135_v35, 4  ;;  %v177_v47 = vsel %vm10402_vm0, %v28_v31, 0.0  ;;  %v96_v49 = vrot.slane %v95_v29, 2  ;;  %v143_v50 = vrot.slane %v142_v37, 4 }
   0xb   :  { %v150_v51 = vrot.slane %v149_v38, 4  ;;  %v157_v52 = vrot.slane %v156_v39, 4  ;;  %v109_v53 = vadd.f32 %v108_v32, %v107_v20  ;;  %v116_v54 = vadd.f32 %v115_v33, %v114_v21  ;;  %v3858_v21 = vld [vmem:[%s10263_s0 + $0x80] sm:$0xff] }
   0xc   :  { %v164_v55 = vrot.slane %v163_v42, 4  ;;  %v171_v56 = vrot.slane %v170_v43, 4  ;;  %v83_v57 = vadd.f32 %v82_v36, %v81_v19  ;;  %v103_v58 = vrot.slane %v102_v40, 2  ;;  %10665 = vst [vmem:[#allocation2_spill] sm:$0xff] %v3858_v21 }
   0xd   :  { %v123_v59 = vadd.f32 %v122_v41, %v121_v30  ;;  %v178_v60 = vrot.slane %v177_v47, 4  ;;  %v90_v61 = vadd.f32 %v89_v44, %v88_v28  ;;  %v130_v62 = vadd.f32 %v129_v45, %v128_v34  ;;  %v3865_v30 = vld [vmem:[%s10263_s0 + $0x88] sm:$0xff] }
   0xe   :  { %v137_v63 = vadd.f32 %v136_v46, %v135_v35  ;;  %v184_v0 = vsel %vm10402_vm0, %v29_v48, 0.0  ;;  %v97_v1 = vadd.f32 %v96_v49, %v95_v29  ;;  %v144_v2 = vadd.f32 %v143_v50, %v142_v37  ;;  %10666 = vst [vmem:[#allocation3_spill] sm:$0xff] %v3865_v30 }
   0xf   :  { %v151_v3 = vadd.f32 %v150_v51, %v149_v38  ;;  %v158_v4 = vadd.f32 %v157_v52, %v156_v39  ;;  %v110_v5 = vrot.slane %v109_v53, 2  ;;  %v117_v6 = vrot.slane %v116_v54, 2  ;;  %v3878_v51 = vld [vmem:[%s10263_s0 + $0x90] sm:$0xff] }
  0x10   :  { %v165_v7 = vadd.f32 %v164_v55, %v163_v42  ;;  %v172_v8 = vadd.f32 %v171_v56, %v170_v43  ;;  %v84_v9 = vrot.slane %v83_v57, 1  ;;  %v124_v10 = vrot.slane %v123_v59, 2  ;;  %10667 = vst [vmem:[#allocation4_spill] sm:$0xff] %v3878_v51  ;;  %v3885_v56 = vld [vmem:[%s10263_s0 + $0x98] sm:$0xff] }
  0x11   :  { %v179_v11 = vadd.f32 %v178_v60, %v177_v47  ;;  %v185_v12 = vrot.slane %v184_v0, 4  ;;  %v91_v13 = vrot.slane %v90_v61, 1  ;;  %v104_v14 = vadd.f32 %v103_v58, %v102_v40  ;;  %10668 = vst [vmem:[#allocation5_spill] sm:$0xff] %v3885_v56 }
  0x12   :  { %v131_v15 = vrot.slane %v130_v62, 2  ;;  %v138_v16 = vrot.slane %v137_v63, 2  ;;  %v98_v17 = vrot.slane %v97_v1, 1  ;;  %v145_v18 = vrot.slane %v144_v2, 2 }
  0x13   :  { %v152_v19 = vrot.slane %v151_v3, 2  ;;  %v159_v20 = vrot.slane %v158_v4, 2  ;;  %v111_v22 = vadd.f32 %v110_v5, %v109_v53  ;;  %v118_v23 = vadd.f32 %v117_v6, %v116_v54 }
  0x14   :  { %v166_v24 = vrot.slane %v165_v7, 2  ;;  %v173_v25 = vrot.slane %v172_v8, 2  ;;  %v3860_v26 = vadd.f32 %v84_v9, %v83_v57  ;;  %v125_v27 = vadd.f32 %v124_v10, %v123_v59 }
  0x15   :  { %v180_v28 = vrot.slane %v179_v11, 2  ;;  %v186_v29 = vadd.f32 %v185_v12, %v184_v0  ;;  %v3867_v31 = vadd.f32 %v91_v13, %v90_v61  ;;  %v105_v32 = vrot.slane %v104_v14, 1  ;;  %v3892_v61 = vld [vmem:[%s10263_s0 + $0xa0] sm:$0xff] }
  0x16   :  { %v132_v33 = vadd.f32 %v131_v15, %v130_v62  ;;  %v139_v34 = vadd.f32 %v138_v16, %v137_v63  ;;  %v146_v35 = vadd.f32 %v145_v18, %v144_v2  ;;  %v153_v36 = vadd.f32 %v152_v19, %v151_v3  ;;  %10669 = vst [vmem:[#allocation6_spill] sm:$0xff] %v3892_v61  ;;  %v3901_v2 = vld [vmem:[%s10263_s0 + $0xa8] sm:$0xff]  ;;  %v3930_v13 = vld [vmem:[%s10263_s0 + $0xc0] sm:$0xff]  ;;  %v3940_v15 = vld [vmem:[%s10263_s0 + $0xd0] sm:$0xff] }
  0x17   :  { %v160_v37 = vadd.f32 %v159_v20, %v158_v4  ;;  %v191_v38 = vsel %vm10402_vm0, %v3858_v21, 0.0  ;;  %v112_v39 = vrot.slane %v111_v22, 1  ;;  %v119_v40 = vrot.slane %v118_v23, 1  ;;  %10670 = vst [vmem:[#allocation7_spill] sm:$0xff] %v3901_v2  ;;  %10673 = vst [vmem:[#allocation10_spill] sm:$0xff] %v3930_v13  ;;  %v3951_v20 = vld [vmem:[%s10263_s0 + $0xd8] sm:$0xff] }
  0x18   :  { %v167_v41 = vadd.f32 %v166_v24, %v165_v7  ;;  %v174_v42 = vadd.f32 %v173_v25, %v172_v8  ;;  %v126_v43 = vrot.slane %v125_v27, 1  ;;  %v181_v44 = vadd.f32 %v180_v28, %v179_v11  ;;  %v3912_v7 = vld [vmem:[%s10263_s0 + $0xb0] sm:$0xff]  ;;  %v3917_v8 = vld [vmem:[%s10263_s0 + $0xb8] sm:$0xff]  ;;  %10675 = vst [vmem:[#allocation12_spill] sm:$0xff] %v3940_v15  ;;  %10677 = vst [vmem:[#allocation14_spill] sm:$0xff] %v3951_v20 }
  0x19   :  { %v187_v45 = vrot.slane %v186_v29, 2  ;;  %v198_v46 = vsel %vm10402_vm0, %v3865_v30, 0.0  ;;  %v3873_v47 = vadd.f32 %v98_v17, %v97_v1  ;;  %v133_v48 = vrot.slane %v132_v33, 1  ;;  %10671 = vst [vmem:[#allocation8_spill] sm:$0xff] %v3912_v7  ;;  %10672 = vst [vmem:[#allocation9_spill] sm:$0xff] %v3917_v8  ;;  %v3965_v28 = vld [vmem:[%s10263_s0 + $0xe8] sm:$0xff] }
  0x1a   :  { %v140_v49 = vrot.slane %v139_v34, 1  ;;  %v192_v50 = vrot.slane %v191_v38, 4  ;;  %v3880_v52 = vadd.f32 %v105_v32, %v104_v14  ;;  %v147_v53 = vrot.slane %v146_v35, 1  ;;  %v3935_v14 = vld [vmem:[%s10263_s0 + $0xc8] sm:$0xff]  ;;  %10680 = vst [vmem:[#allocation17_spill] sm:$0xff] %v3965_v28 }
  0x1b   :  { %v154_v54 = vrot.slane %v153_v36, 1  ;;  %v161_v55 = vrot.slane %v160_v37, 1  ;;  %v3887_v57 = vadd.f32 %v112_v39, %v111_v22  ;;  %v168_v58 = vrot.slane %v167_v41, 1  ;;  %10674 = vst [vmem:[#allocation11_spill] sm:$0xff] %v3935_v14  ;;  %v3956_v22 = vld [vmem:[%s10263_s0 + $0xe0] sm:$0xff] }
  0x1c   :  { %v175_v59 = vrot.slane %v174_v42, 1  ;;  %v199_v60 = vrot.slane %v198_v46, 4  ;;  %v3894_v62 = vadd.f32 %v119_v40, %v118_v23  ;;  %v3896_v63 = vadd.f32 %v126_v43, %v125_v27  ;;  %10678 = vst [vmem:[#allocation15_spill] sm:$0xff] %v3956_v22 }
  0x1d   :  { %v182_v0 = vrot.slane %v181_v44, 1  ;;  %v188_v1 = vadd.f32 %v187_v45, %v186_v29  ;;  %v3903_v3 = vadd.f32 %v133_v48, %v132_v33  ;;  %v3905_v4 = vadd.f32 %v140_v49, %v139_v34  ;;  %v3986_v48 = vld [vmem:[%s10263_s0 + $0xf0] sm:$0xff] }
  0x1e   :  { %v193_v5 = vadd.f32 %v192_v50, %v191_v38  ;;  %v205_v6 = vsel %vm10402_vm0, %v3878_v51, 0.0  ;;  %v3919_v9 = vadd.f32 %v147_v53, %v146_v35  ;;  %v3921_v10 = vadd.f32 %v154_v54, %v153_v36  ;;  %10681 = vst [vmem:[#allocation18_spill] sm:$0xff] %v3986_v48 }
  0x1f   :  { %v3923_v11 = vadd.f32 %v161_v55, %v160_v37  ;;  %v212_v12 = vsel %vm10402_vm0, %v3885_v56, 0.0  ;;  %v3942_v16 = vadd.f32 %v168_v58, %v167_v41  ;;  %v3944_v17 = vadd.f32 %v175_v59, %v174_v42 }
  0x20   :  { %v200_v18 = vadd.f32 %v199_v60, %v198_v46  ;;  %v219_v19 = vsel %vm10402_vm0, %v3892_v61, 0.0  ;;  %v3958_v23 = vadd.f32 %v182_v0, %v181_v44  ;;  %v189_v24 = vrot.slane %v188_v1, 1 }
  0x21   :  { %10676 = vst [vmem:[#allocation13_spill] sm:$0xff] %v3944_v17  ;;  %v206_v25 = vrot.slane %v205_v6, 4  ;;  %v226_v27 = vsel %vm10402_vm0, %v3901_v2, 0.0  ;;  %v194_v29 = vrot.slane %v193_v5, 2  ;;  %v213_v32 = vrot.slane %v212_v12, 4 }
  0x22   :  { %10679 = vst [vmem:[#allocation16_spill] sm:$0xff] %v3958_v23  ;;  %v233_v33 = vsel %vm10402_vm0, %v3912_v7, 0.0  ;;  %v240_v34 = vsel %vm10402_vm0, %v3917_v8, 0.0  ;;  %v220_v35 = vrot.slane %v219_v19, 4  ;;  %v247_v36 = vsel %vm10402_vm0, %v3930_v13, 0.0 }
  0x23   :  { %v254_v37 = vsel %vm10402_vm0, %v3935_v14, 0.0  ;;  %v261_v38 = vsel %vm10402_vm0, %v3940_v15, 0.0  ;;  %v201_v39 = vrot.slane %v200_v18, 2  ;;  %v227_v40 = vrot.slane %v226_v27, 4 }
  0x24   :  { %v268_v41 = vsel %vm10402_vm0, %v3951_v20, 0.0  ;;  %v275_v42 = vsel %vm10402_vm0, %v3956_v22, 0.0  ;;  %v207_v43 = vadd.f32 %v206_v25, %v205_v6  ;;  %v234_v44 = vrot.slane %v233_v33, 4 }
  0x25   :  { %v241_v45 = vrot.slane %v240_v34, 4  ;;  %v282_v46 = vsel %vm10402_vm0, %v3965_v28, 0.0  ;;  %v195_v49 = vadd.f32 %v194_v29, %v193_v5  ;;  %v248_v50 = vrot.slane %v247_v36, 4  ;;  %v3995_v5 = vld [vmem:[%s10263_s0 + $0xf8] sm:$0xff] }
  0x26   :  { %v255_v53 = vrot.slane %v254_v37, 4  ;;  %v262_v54 = vrot.slane %v261_v38, 4  ;;  %v214_v55 = vadd.f32 %v213_v32, %v212_v12  ;;  %v221_v58 = vadd.f32 %v220_v35, %v219_v19  ;;  %10683 = vst [vmem:[#allocation20_spill] sm:$0xff] %v3995_v5 }
  0x27   :  { %v269_v59 = vrot.slane %v268_v41, 4  ;;  %v276_v60 = vrot.slane %v275_v42, 4  ;;  %v3988_v0 = vadd.f32 %v189_v24, %v188_v1  ;;  %v202_v6 = vadd.f32 %v201_v39, %v200_v18 }
  0x28   :  { %v228_v25 = vadd.f32 %v227_v40, %v226_v27  ;;  %v283_v22 = vrot.slane %v282_v46, 4  ;;  %v208_v20 = vrot.slane %v207_v43, 2  ;;  %v235_v28 = vadd.f32 %v234_v44, %v233_v33 }
  0x29   :  { %10682 = vst [vmem:[#allocation19_spill] sm:$0xff] %v3988_v0  ;;  %v242_v15 = vadd.f32 %v241_v45, %v240_v34  ;;  %v289_v14 = vsel %vm10402_vm0, %v3986_v48, 0.0  ;;  %v196_v12 = vrot.slane %v195_v49, 1  ;;  %v249_v19 = vadd.f32 %v248_v50, %v247_v36 }
  0x2a   :  { %v256_v29 = vadd.f32 %v255_v53, %v254_v37  ;;  %v263_v32 = vadd.f32 %v262_v54, %v261_v38  ;;  %v215_v1 = vrot.slane %v214_v55, 2  ;;  %v222_v24 = vrot.slane %v221_v58, 2  ;;  %v4004_v38 = vld [vmem:[%s10263_s0 + $0x100] sm:$0xff] }
  0x2b   :  { %v270_v18 = vadd.f32 %v269_v59, %v268_v41  ;;  %v277_v27 = vadd.f32 %v276_v60, %v275_v42  ;;  %v203_v35 = vrot.slane %v202_v6, 1  ;;  %v229_v39 = vrot.slane %v228_v25, 2  ;;  %10685 = vst [vmem:[#allocation22_spill] sm:$0xff] %v4004_v38 }
  0x2c   :  { %v284_v33 = vadd.f32 %v283_v22, %v282_v46  ;;  %v290_v34 = vrot.slane %v289_v14, 4  ;;  %v209_v40 = vadd.f32 %v208_v20, %v207_v43  ;;  %v236_v44 = vrot.slane %v235_v28, 2 }
  0x2d   :  { %v243_v45 = vrot.slane %v242_v15, 2  ;;  %v296_v48 = vsel %vm10402_vm0, %v3995_v5, 0.0  ;;  %v3999_v13 = vadd.f32 %v196_v12, %v195_v49  ;;  %v250_v8 = vrot.slane %v249_v19, 2 }
  0x2e   :  { %v257_v36 = vrot.slane %v256_v29, 2  ;;  %v264_v37 = vrot.slane %v263_v32, 2  ;;  %v216_v41 = vadd.f32 %v215_v1, %v214_v55  ;;  %v223_v42 = vadd.f32 %v222_v24, %v221_v58  ;;  %v4013_v55 = vld [vmem:[%s10263_s0 + $0x108] sm:$0xff] }
  0x2f   :  { %10684 = vst [vmem:[#allocation21_spill] sm:$0xff] %v3999_v13  ;;  %v271_v22 = vrot.slane %v270_v18, 2  ;;  %v278_v46 = vrot.slane %v277_v27, 2  ;;  %v230_v20 = vadd.f32 %v229_v39, %v228_v25  ;;  %v285_v43 = vrot.slane %v284_v33, 2  ;;  %10687 = vst [vmem:[#allocation24_spill] sm:$0xff] %v4013_v55 }
  0x30   :  { %v291_v50 = vadd.f32 %v290_v34, %v289_v14  ;;  %v297_v53 = vrot.slane %v296_v48, 4  ;;  %v4006_v54 = vadd.f32 %v203_v35, %v202_v6  ;;  %v210_v49 = vrot.slane %v209_v40, 1 }
  0x31   :  { %v237_v59 = vadd.f32 %v236_v44, %v235_v28  ;;  %v244_v60 = vadd.f32 %v243_v45, %v242_v15  ;;  %v251_v12 = vadd.f32 %v250_v8, %v249_v19  ;;  %v258_v5 = vadd.f32 %v257_v36, %v256_v29  ;;  %v4018_v8 = vld [vmem:[%s10263_s0 + $0x110] sm:$0xff] }
  0x32   :  { %10686 = vst [vmem:[#allocation23_spill] sm:$0xff] %v4006_v54  ;;  %v265_v7 = vadd.f32 %v264_v37, %v263_v32  ;;  %v303_v2 = vsel %vm10402_vm0, %v4004_v38, 0.0  ;;  %v217_v58 = vrot.slane %v216_v41, 1  ;;  %v224_v25 = vrot.slane %v223_v42, 1  ;;  %10688 = vst [vmem:[#allocation25_spill] sm:$0xff] %v4018_v8 }
  0x33   :  { %v272_v14 = vadd.f32 %v271_v22, %v270_v18  ;;  %v279_v1 = vadd.f32 %v278_v46, %v277_v27  ;;  %v231_v6 = vrot.slane %v230_v20, 1  ;;  %v286_v24 = vadd.f32 %v285_v43, %v284_v33 }
  0x34   :  { %v292_v35 = vrot.slane %v291_v50, 2  ;;  %v298_v28 = vadd.f32 %v297_v53, %v296_v48  ;;  %v4020_v15 = vadd.f32 %v210_v49, %v209_v40  ;;  %v238_v19 = vrot.slane %v237_v59, 1  ;;  %v4031_v40 = vld [vmem:[%s10263_s0 + $0x118] sm:$0xff] }
  0x35   :  { %v245_v29 = vrot.slane %v244_v60, 1  ;;  %v304_v32 = vrot.slane %v303_v2, 4  ;;  %v252_v39 = vrot.slane %v251_v12, 1  ;;  %v259_v34 = vrot.slane %v258_v5, 1  ;;  %10692 = vst [vmem:[#allocation29_spill] sm:$0xff] %v4031_v40 }
  0x36   :  { %10689 = vst [vmem:[#allocation26_spill] sm:$0xff] %v4020_v15  ;;  %v266_v44 = vrot.slane %v265_v7, 1  ;;  %v310_v18 = vsel %vm10402_vm0, %v4013_v55, 0.0  ;;  %v4024_v27 = vadd.f32 %v217_v58, %v216_v41  ;;  %v4026_v33 = vadd.f32 %v224_v25, %v223_v42  ;;  %v4038_v41 = vld [vmem:[%s10263_s0 + $0x120] sm:$0xff]  ;;  %v4047_v58 = vld [vmem:[%s10263_s0 + $0x128] sm:$0xff] }
  0x37   :  { %v273_v48 = vrot.slane %v272_v14, 1  ;;  %v280_v45 = vrot.slane %v279_v1, 1  ;;  %v287_v36 = vrot.slane %v286_v24, 1  ;;  %v293_v37 = vadd.f32 %v292_v35, %v291_v50  ;;  %10693 = vst [vmem:[#allocation30_spill] sm:$0xff] %v4038_v41  ;;  %10696 = vst [vmem:[#allocation33_spill] sm:$0xff] %v4047_v58  ;;  %v4052_v50 = vld [vmem:[%s10263_s0 + $0x130] sm:$0xff] }
  0x38   :  { %10690 = vst [vmem:[#allocation27_spill] sm:$0xff] %v4024_v27  ;;  %10691 = vst [vmem:[#allocation28_spill] sm:$0xff] %v4026_v33  ;;  %v299_v22 = vrot.slane %v298_v28, 2  ;;  %v317_v46 = vsel %vm10402_vm0, %v4018_v8, 0.0  ;;  %v4040_v42 = vadd.f32 %v231_v6, %v230_v20  ;;  %v4042_v43 = vadd.f32 %v238_v19, %v237_v59  ;;  %v4070_v6 = vld [vmem:[%s10263_s0 + $0x140] sm:$0xff] }
  0x39   :  { %v305_v53 = vadd.f32 %v304_v32, %v303_v2  ;;  %v311_v49 = vrot.slane %v310_v18, 4  ;;  %10697 = vst [vmem:[#allocation34_spill] sm:$0xff] %v4052_v50  ;;  %v4054_v25 = vadd.f32 %v245_v29, %v244_v60  ;;  %v4056_v35 = vadd.f32 %v252_v39, %v251_v12  ;;  %v4065_v2 = vld [vmem:[%s10263_s0 + $0x138] sm:$0xff]  ;;  %10703 = vst [vmem:[#allocation40_spill] sm:$0xff] %v4070_v6  ;;  %v4075_v60 = vld [vmem:[%s10263_s0 + $0x148] sm:$0xff] }
  0x3a   :  { %10694 = vst [vmem:[#allocation31_spill] sm:$0xff] %v4040_v42  ;;  %10695 = vst [vmem:[#allocation32_spill] sm:$0xff] %v4042_v43  ;;  %v4058_v20 = vadd.f32 %v259_v34, %v258_v5  ;;  %v4060_v59 = vadd.f32 %v266_v44, %v265_v7  ;;  %v4077_v12 = vadd.f32 %v273_v48, %v272_v14  ;;  %v318_v7 = vrot.slane %v317_v46, 4  ;;  %v4086_v29 = vld [vmem:[%s10263_s0 + $0x150] sm:$0xff]  ;;  %v4091_v32 = vld [vmem:[%s10263_s0 + $0x158] sm:$0xff] }
  0x3b   :  { %10698 = vst [vmem:[#allocation35_spill] sm:$0xff] %v4054_v25  ;;  %10699 = vst [vmem:[#allocation36_spill] sm:$0xff] %v4056_v35  ;;  %v4079_v5 = vadd.f32 %v280_v45, %v279_v1  ;;  %v324_v19 = vsel %vm10402_vm0, %v4031_v40, 0.0  ;;  %v4093_v39 = vadd.f32 %v287_v36, %v286_v24  ;;  %v294_v14 = vrot.slane %v293_v37, 1  ;;  %v4100_v44 = vld [vmem:[%s10263_s0 + $0x160] sm:$0xff]  ;;  %v4105_v48 = vld [vmem:[%s10263_s0 + $0x168] sm:$0xff] }
  0x3c   :  { %10700 = vst [vmem:[#allocation37_spill] sm:$0xff] %v4058_v20  ;;  %10701 = vst [vmem:[#allocation38_spill] sm:$0xff] %v4060_v59  ;;  %v300_v34 = vadd.f32 %v299_v22, %v298_v28  ;;  %v331_v1 = vsel %vm10402_vm0, %v4038_v41, 0.0  ;;  %v306_v45 = vrot.slane %v305_v53, 2  ;;  %v312_v40 = vadd.f32 %v311_v49, %v310_v18 }
  0x3d   :  { %10702 = vst [vmem:[#allocation39_spill] sm:$0xff] %v4065_v2  ;;  %10704 = vst [vmem:[#allocation41_spill] sm:$0xff] %v4075_v60  ;;  %v338_v24 = vsel %vm10402_vm0, %v4047_v58, 0.0  ;;  %v345_v28 = vsel %vm10402_vm0, %v4052_v50, 0.0  ;;  %v325_v36 = vrot.slane %v324_v19, 4  ;;  %v352_v22 = vsel %vm10402_vm0, %v4065_v2, 0.0 }
  0x3e   :  { %10705 = vst [vmem:[#allocation42_spill] sm:$0xff] %v4077_v12  ;;  %10706 = vst [vmem:[#allocation43_spill] sm:$0xff] %v4079_v5  ;;  %v359_v41 = vsel %vm10402_vm0, %v4070_v6, 0.0  ;;  %v366_v8 = vsel %vm10402_vm0, %v4075_v60, 0.0  ;;  %v319_v55 = vadd.f32 %v318_v7, %v317_v46  ;;  %v332_v38 = vrot.slane %v331_v1, 4 }
  0x3f   :  { %10707 = vst [vmem:[#allocation44_spill] sm:$0xff] %v4086_v29  ;;  %10708 = vst [vmem:[#allocation45_spill] sm:$0xff] %v4091_v32  ;;  %v373_v18 = vsel %vm10402_vm0, %v4086_v29, 0.0  ;;  %v380_v49 = vsel %vm10402_vm0, %v4091_v32, 0.0  ;;  %v339_v58 = vrot.slane %v338_v24, 4  ;;  %v346_v50 = vrot.slane %v345_v28, 4 }
  0x40   :  { %10709 = vst [vmem:[#allocation46_spill] sm:$0xff] %v4093_v39  ;;  %10710 = vst [vmem:[#allocation47_spill] sm:$0xff] %v4100_v44  ;;  %v387_v61 = vsel %vm10402_vm0, %v4100_v44, 0.0  ;;  %v394_v2 = vsel %vm10402_vm0, %v4105_v48, 0.0  ;;  %v307_v6 = vadd.f32 %v306_v45, %v305_v53  ;;  %v353_v56 = vrot.slane %v352_v22, 4  ;;  %v4130_v44 = vld [vmem:[%s10263_s0 + $0x170] sm:$0xff] }
  0x41   :  { %10711 = vst [vmem:[#allocation48_spill] sm:$0xff] %v4105_v48  ;;  %v360_v51 = vrot.slane %v359_v41, 4  ;;  %v367_v60 = vrot.slane %v366_v8, 4  ;;  %v313_v46 = vrot.slane %v312_v40, 2  ;;  %v326_v7 = vadd.f32 %v325_v36, %v324_v19  ;;  %10713 = vst [vmem:[#allocation50_spill] sm:$0xff] %v4130_v44 }
  0x42   :  { %v374_v30 = vrot.slane %v373_v18, 4  ;;  %v381_v21 = vrot.slane %v380_v49, 4  ;;  %v4125_v29 = vadd.f32 %v294_v14, %v293_v37  ;;  %v320_v39 = vrot.slane %v319_v55, 2 }
  0x43   :  { %v388_v32 = vrot.slane %v387_v61, 4  ;;  %v395_v5 = vrot.slane %v394_v2, 4  ;;  %v301_v12 = vrot.slane %v300_v34, 1  ;;  %v333_v48 = vadd.f32 %v332_v38, %v331_v1 }
  0x44   :  { %10712 = vst [vmem:[#allocation49_spill] sm:$0xff] %v4125_v29  ;;  %v340_v53 = vadd.f32 %v339_v58, %v338_v24  ;;  %v347_v45 = vadd.f32 %v346_v50, %v345_v28  ;;  %v308_v59 = vrot.slane %v307_v6, 1  ;;  %v354_v20 = vadd.f32 %v353_v56, %v352_v22  ;;  %v4155_v22 = vld [vmem:[%s10263_s0 + $0x188] sm:$0xff] }
  0x45   :  { %v361_v35 = vadd.f32 %v360_v51, %v359_v41  ;;  %v368_v19 = vadd.f32 %v367_v60, %v366_v8  ;;  %v314_v36 = vadd.f32 %v313_v46, %v312_v40  ;;  %v327_v25 = vrot.slane %v326_v7, 2  ;;  %v4139_v51 = vld [vmem:[%s10263_s0 + $0x178] sm:$0xff]  ;;  %10718 = vst [vmem:[#allocation55_spill] sm:$0xff] %v4155_v22 }
  0x46   :  { %v375_v37 = vadd.f32 %v374_v30, %v373_v18  ;;  %v382_v14 = vadd.f32 %v381_v21, %v380_v49  ;;  %v321_v29 = vadd.f32 %v320_v39, %v319_v55  ;;  %v389_v43 = vadd.f32 %v388_v32, %v387_v61  ;;  %10715 = vst [vmem:[#allocation52_spill] sm:$0xff] %v4139_v51  ;;  %v4146_v61 = vld [vmem:[%s10263_s0 + $0x180] sm:$0xff] }
  0x47   :  { %v396_v42 = vadd.f32 %v395_v5, %v394_v2  ;;  %v401_v33 = vsel %vm10402_vm0, %v4130_v44, 0.0  ;;  %v4134_v27 = vadd.f32 %v301_v12, %v300_v34  ;;  %v334_v15 = vrot.slane %v333_v48, 2  ;;  %10717 = vst [vmem:[#allocation54_spill] sm:$0xff] %v4146_v61 }
  0x48   :  { %v341_v38 = vrot.slane %v340_v53, 2  ;;  %v348_v58 = vrot.slane %v347_v45, 2  ;;  %v4141_v56 = vadd.f32 %v308_v59, %v307_v6  ;;  %v355_v30 = vrot.slane %v354_v20, 2 }
  0x49   :  { %10714 = vst [vmem:[#allocation51_spill] sm:$0xff] %v4134_v27  ;;  %v362_v21 = vrot.slane %v361_v35, 2  ;;  %v369_v55 = vrot.slane %v368_v19, 2  ;;  %v315_v8 = vrot.slane %v314_v36, 1  ;;  %v376_v40 = vrot.slane %v375_v37, 2 }
  0x4a   :  { %10716 = vst [vmem:[#allocation53_spill] sm:$0xff] %v4141_v56  ;;  %v383_v41 = vrot.slane %v382_v14, 2  ;;  %v402_v50 = vrot.slane %v401_v33, 4  ;;  %v322_v2 = vrot.slane %v321_v29, 1  ;;  %v328_v60 = vadd.f32 %v327_v25, %v326_v7 }
  0x4b   :  { %v390_v12 = vrot.slane %v389_v43, 2  ;;  %v397_v5 = vrot.slane %v396_v42, 2  ;;  %v335_v32 = vadd.f32 %v334_v15, %v333_v48  ;;  %v342_v39 = vadd.f32 %v341_v38, %v340_v53 }
  0x4c   :  { %v349_v59 = vadd.f32 %v348_v58, %v347_v45  ;;  %v408_v6 = vsel %vm10402_vm0, %v4139_v51, 0.0  ;;  %v356_v34 = vadd.f32 %v355_v30, %v354_v20  ;;  %v363_v1 = vadd.f32 %v362_v21, %v361_v35 }
  0x4d   :  { %v370_v24 = vadd.f32 %v369_v55, %v368_v19  ;;  %v415_v28 = vsel %vm10402_vm0, %v4146_v61, 0.0  ;;  %v4157_v25 = vadd.f32 %v315_v8, %v314_v36  ;;  %v377_v18 = vadd.f32 %v376_v40, %v375_v37 }
  0x4e   :  { %v384_v15 = vadd.f32 %v383_v41, %v382_v14  ;;  %v403_v48 = vadd.f32 %v402_v50, %v401_v33  ;;  %v329_v49 = vrot.slane %v328_v60, 1  ;;  %v391_v46 = vadd.f32 %v390_v12, %v389_v43  ;;  %v4166_v33 = vld [vmem:[%s10263_s0 + $0x190] sm:$0xff]  ;;  %v4173_v41 = vld [vmem:[%s10263_s0 + $0x198] sm:$0xff] }
  0x4f   :  { %10719 = vst [vmem:[#allocation56_spill] sm:$0xff] %v4157_v25  ;;  %v398_v7 = vadd.f32 %v397_v5, %v396_v42  ;;  %v409_v53 = vrot.slane %v408_v6, 4  ;;  %v336_v20 = vrot.slane %v335_v32, 1  ;;  %v343_v35 = vrot.slane %v342_v39, 1  ;;  %10721 = vst [vmem:[#allocation58_spill] sm:$0xff] %v4166_v33  ;;  %v4182_v5 = vld [vmem:[%s10263_s0 + $0x1a0] sm:$0xff] }
  0x50   :  { %v350_v45 = vrot.slane %v349_v59, 1  ;;  %v416_v19 = vrot.slane %v415_v28, 4  ;;  %v357_v38 = vrot.slane %v356_v34, 1  ;;  %v364_v58 = vrot.slane %v363_v1, 1  ;;  %10723 = vst [vmem:[#allocation60_spill] sm:$0xff] %v4173_v41  ;;  %10726 = vst [vmem:[#allocation63_spill] sm:$0xff] %v4182_v5 }
  0x51   :  { %v371_v30 = vrot.slane %v370_v24, 1  ;;  %v422_v21 = vsel %vm10402_vm0, %v4155_v22, 0.0  ;;  %v4161_v55 = vadd.f32 %v322_v2, %v321_v29  ;;  %v378_v36 = vrot.slane %v377_v18, 1 }
  0x52   :  { %v385_v37 = vrot.slane %v384_v15, 1  ;;  %v404_v14 = vrot.slane %v403_v48, 2  ;;  %v4168_v42 = vadd.f32 %v329_v49, %v328_v60  ;;  %v392_v43 = vrot.slane %v391_v46, 1  ;;  %v4187_v60 = vld [vmem:[%s10263_s0 + $0x1a8] sm:$0xff] }
  0x53   :  { %10720 = vst [vmem:[#allocation57_spill] sm:$0xff] %v4161_v55  ;;  %v399_v8 = vrot.slane %v398_v7, 1  ;;  %v410_v40 = vadd.f32 %v409_v53, %v408_v6  ;;  %v4175_v29 = vadd.f32 %v336_v20, %v335_v32  ;;  %v4177_v50 = vadd.f32 %v343_v35, %v342_v39  ;;  %10727 = vst [vmem:[#allocation64_spill] sm:$0xff] %v4187_v60  ;;  %v4205_v53 = vld [vmem:[%s10263_s0 + $0x1b8] sm:$0xff]  ;;  %v4221_v35 = vld [vmem:[%s10263_s0 + $0x1c8] sm:$0xff] }
  0x54   :  { %10722 = vst [vmem:[#allocation59_spill] sm:$0xff] %v4168_v42  ;;  %v417_v2 = vadd.f32 %v416_v19, %v415_v28  ;;  %v423_v12 = vrot.slane %v422_v21, 4  ;;  %v4189_v6 = vadd.f32 %v350_v45, %v349_v59  ;;  %v4191_v49 = vadd.f32 %v357_v38, %v356_v34  ;;  %v4200_v28 = vld [vmem:[%s10263_s0 + $0x1b0] sm:$0xff]  ;;  %10733 = vst [vmem:[#allocation70_spill] sm:$0xff] %v4205_v53  ;;  %v4210_v59 = vld [vmem:[%s10263_s0 + $0x1c0] sm:$0xff] }
  0x55   :  { %10724 = vst [vmem:[#allocation61_spill] sm:$0xff] %v4175_v29  ;;  %10725 = vst [vmem:[#allocation62_spill] sm:$0xff] %v4177_v50  ;;  %v4193_v32 = vadd.f32 %v364_v58, %v363_v1  ;;  %v4195_v39 = vadd.f32 %v371_v30, %v370_v24  ;;  %v4212_v34 = vadd.f32 %v378_v36, %v377_v18  ;;  %v429_v20 = vsel %vm10402_vm0, %v4166_v33, 0.0  ;;  %v4226_v45 = vld [vmem:[%s10263_s0 + $0x1d0] sm:$0xff]  ;;  %v4237_v38 = vld [vmem:[%s10263_s0 + $0x1d8] sm:$0xff] }
  0x56   :  { %10728 = vst [vmem:[#allocation65_spill] sm:$0xff] %v4189_v6  ;;  %10729 = vst [vmem:[#allocation66_spill] sm:$0xff] %v4191_v49  ;;  %v4214_v1 = vadd.f32 %v385_v37, %v384_v15  ;;  %v405_v24 = vadd.f32 %v404_v14, %v403_v48  ;;  %v4228_v19 = vadd.f32 %v392_v43, %v391_v46  ;;  %v411_v15 = vrot.slane %v410_v40, 2 }
  0x57   :  { %10730 = vst [vmem:[#allocation67_spill] sm:$0xff] %v4193_v32  ;;  %10731 = vst [vmem:[#allocation68_spill] sm:$0xff] %v4195_v39  ;;  %v4230_v18 = vadd.f32 %v399_v8, %v398_v7  ;;  %v436_v48 = vsel %vm10402_vm0, %v4173_v41, 0.0  ;;  %v418_v58 = vrot.slane %v417_v2, 2  ;;  %v424_v30 = vadd.f32 %v423_v12, %v422_v21  ;;  %v4246_v7 = vld [vmem:[%s10263_s0 + $0x1e0] sm:$0xff]  ;;  %v4261_v41 = vld [vmem:[%s10263_s0 + $0x1e8] sm:$0xff] }
  0x58   :  { %10732 = vst [vmem:[#allocation69_spill] sm:$0xff] %v4200_v28  ;;  %10734 = vst [vmem:[#allocation71_spill] sm:$0xff] %v4210_v59  ;;  %v443_v36 = vsel %vm10402_vm0, %v4182_v5, 0.0  ;;  %v450_v46 = vsel %vm10402_vm0, %v4187_v60, 0.0  ;;  %v430_v37 = vrot.slane %v429_v20, 4  ;;  %v457_v14 = vsel %vm10402_vm0, %v4200_v28, 0.0 }
  0x59   :  { %10735 = vst [vmem:[#allocation72_spill] sm:$0xff] %v4212_v34  ;;  %10736 = vst [vmem:[#allocation73_spill] sm:$0xff] %v4214_v1  ;;  %v464_v43 = vsel %vm10402_vm0, %v4205_v53, 0.0  ;;  %v471_v21 = vsel %vm10402_vm0, %v4210_v59, 0.0  ;;  %v406_v8 = vrot.slane %v405_v24, 1  ;;  %v437_v12 = vrot.slane %v436_v48, 4 }
  0x5a   :  { %10737 = vst [vmem:[#allocation74_spill] sm:$0xff] %v4221_v35  ;;  %10738 = vst [vmem:[#allocation75_spill] sm:$0xff] %v4226_v45  ;;  %v478_v60 = vsel %vm10402_vm0, %v4221_v35, 0.0  ;;  %v485_v5 = vsel %vm10402_vm0, %v4226_v45, 0.0  ;;  %v412_v28 = vadd.f32 %v411_v15, %v410_v40  ;;  %v444_v33 = vrot.slane %v443_v36, 4  ;;  %v4268_v59 = vld [vmem:[%s10263_s0 + $0x1f0] sm:$0xff] }
  0x5b   :  { %10739 = vst [vmem:[#allocation76_spill] sm:$0xff] %v4228_v19  ;;  %10740 = vst [vmem:[#allocation77_spill] sm:$0xff] %v4230_v18  ;;  %v451_v22 = vrot.slane %v450_v46, 4  ;;  %v492_v53 = vsel %vm10402_vm0, %v4237_v38, 0.0  ;;  %v458_v35 = vrot.slane %v457_v14, 4  ;;  %v465_v61 = vrot.slane %v464_v43, 4 }
  0x5c   :  { %10741 = vst [vmem:[#allocation78_spill] sm:$0xff] %v4237_v38  ;;  %10742 = vst [vmem:[#allocation79_spill] sm:$0xff] %v4246_v7  ;;  %v472_v51 = vrot.slane %v471_v21, 4  ;;  %v499_v45 = vsel %vm10402_vm0, %v4246_v7, 0.0  ;;  %v4275_v40 = vld [vmem:[%s10263_s0 + $0x1f8] sm:$0xff]  ;;  %v4277_v15 = vadd.f32 %v418_v58, %v417_v2  ;;  %v425_v44 = vrot.slane %v424_v30, 2 }
  0x5d   :  { %10743 = vst [vmem:[#allocation80_spill] sm:$0xff] %v4261_v41  ;;  %10744 = vst [vmem:[#allocation81_spill] sm:$0xff] %v4268_v59  ;;  %v479_v38 = vrot.slane %v478_v60, 4  ;;  %v486_v18 = vrot.slane %v485_v5, 4  ;;  %v431_v19 = vadd.f32 %v430_v37, %v429_v20  ;;  %v438_v1 = vadd.f32 %v437_v12, %v436_v48 }
  0x5e   :  { %10745 = vst [vmem:[#allocation82_spill] sm:$0xff] %v4275_v40  ;;  %v493_v34 = vrot.slane %v492_v53, 4  ;;  %v506_v39 = vsel %vm10402_vm0, %v4261_v41, 0.0  ;;  %v445_v32 = vadd.f32 %v444_v33, %v443_v36  ;;  %v452_v49 = vadd.f32 %v451_v22, %v450_v46 }
  0x5f   :  { %v500_v6 = vrot.slane %v499_v45, 4  ;;  %v513_v7 = vsel %vm10402_vm0, %v4268_v59, 0.0  ;;  %v459_v50 = vadd.f32 %v458_v35, %v457_v14  ;;  %v466_v29 = vadd.f32 %v465_v61, %v464_v43 }
  0x60   :  { %v473_v42 = vadd.f32 %v472_v51, %v471_v21  ;;  %v520_v2 = vsel %vm10402_vm0, %v4275_v40, 0.0  ;;  %v4285_v58 = vadd.f32 %v406_v8, %v405_v24  ;;  %v480_v20 = vadd.f32 %v479_v38, %v478_v60 }
  0x61   :  { %v487_v48 = vadd.f32 %v486_v18, %v485_v5  ;;  %v507_v37 = vrot.slane %v506_v39, 4  ;;  %v413_v12 = vrot.slane %v412_v28, 1  ;;  %v432_v55 = vrot.slane %v431_v19, 2 }
  0x62   :  { %10746 = vst [vmem:[#allocation83_spill] sm:$0xff] %v4285_v58  ;;  %v494_v41 = vadd.f32 %v493_v34, %v492_v53  ;;  %v514_v33 = vrot.slane %v513_v7, 4  ;;  %v439_v22 = vrot.slane %v438_v1, 2  ;;  %v446_v36 = vrot.slane %v445_v32, 2 }
  0x63   :  { %v501_v46 = vadd.f32 %v500_v6, %v499_v45  ;;  %v521_v25 = vrot.slane %v520_v2, 4  ;;  %v453_v59 = vrot.slane %v452_v49, 2  ;;  %v460_v35 = vrot.slane %v459_v50, 2 }
  0x64   :  { %v467_v61 = vrot.slane %v466_v29, 2  ;;  %v474_v51 = vrot.slane %v473_v42, 2  ;;  %v420_v14 = vrot.slane %v4277_v15, 1  ;;  %v481_v43 = vrot.slane %v480_v20, 2 }
  0x65   :  { %v488_v24 = vrot.slane %v487_v48, 2  ;;  %v508_v21 = vadd.f32 %v507_v37, %v506_v39  ;;  %v426_v60 = vadd.f32 %v425_v44, %v424_v30  ;;  %v433_v5 = vadd.f32 %v432_v55, %v431_v19 }
  0x66   :  { %v495_v18 = vrot.slane %v494_v41, 2  ;;  %v515_v38 = vadd.f32 %v514_v33, %v513_v7  ;;  %v440_v8 = vadd.f32 %v439_v22, %v438_v1  ;;  %v447_v53 = vadd.f32 %v446_v36, %v445_v32 }
  0x67   :  { %v502_v34 = vrot.slane %v501_v46, 2  ;;  %v522_v40 = vadd.f32 %v521_v25, %v520_v2  ;;  %v454_v58 = vadd.f32 %v453_v59, %v452_v49  ;;  %v461_v6 = vadd.f32 %v460_v35, %v459_v50 }
  0x68   :  { %v468_v45 = vadd.f32 %v467_v61, %v466_v29  ;;  %v475_v56 = vadd.f32 %v474_v51, %v473_v42  ;;  %v4288_v27 = vadd.f32 %v413_v12, %v412_v28  ;;  %v482_v54 = vadd.f32 %v481_v43, %v480_v20 }
  0x69   :  { %v489_v13 = vadd.f32 %v488_v24, %v487_v48  ;;  %v509_v0 = vrot.slane %v508_v21, 2  ;;  %v427_v23 = vrot.slane %v426_v60, 1  ;;  %v434_v17 = vrot.slane %v433_v5, 1 }
  0x6a   :  { %v496_v39 = vadd.f32 %v495_v18, %v494_v41  ;;  %v516_v44 = vrot.slane %v515_v38, 2  ;;  %v441_v55 = vrot.slane %v440_v8, 1  ;;  %v448_v19 = vrot.slane %v447_v53, 1 }
  0x6b   :  { %v503_v30 = vadd.f32 %v502_v34, %v501_v46  ;;  %v523_v1 = vrot.slane %v522_v40, 2  ;;  %v455_v32 = vrot.slane %v454_v58, 1  ;;  %v462_v7 = vrot.slane %v461_v6, 1  ;;  %v10752_v34 = vld [vmem:[#allocation26_spill] sm:$0xff] }
  0x6c   :  { %v469_v25 = vrot.slane %v468_v45, 1  ;;  %v476_v49 = vrot.slane %v475_v56, 1  ;;  %v4291_v29 = vadd.f32 %v420_v14, %v4277_v15  ;;  %v483_v42 = vrot.slane %v482_v54, 1 }
  0x6d   :  { %v490_v50 = vrot.slane %v489_v13, 1  ;;  %v510_v28 = vadd.f32 %v509_v0, %v508_v21  ;;  %v4293_v59 = vadd.f32 %v427_v23, %v426_v60  ;;  %v4295_v2 = vadd.f32 %v434_v17, %v433_v5  ;;  %v10747_v60 = vld [vmem:[#allocation13_spill] sm:$0xff]  ;;  %v10748_v5 = vld [vmem:[#allocation16_spill] sm:$0xff] }
  0x6e   :  { %v497_v41 = vrot.slane %v496_v39, 1  ;;  %v517_v20 = vadd.f32 %v516_v44, %v515_v38  ;;  %v4297_v48 = vadd.f32 %v441_v55, %v440_v8  ;;  %v4299_v37 = vadd.f32 %v448_v19, %v447_v53  ;;  %v10749_v38 = vld [vmem:[#allocation19_spill] sm:$0xff]  ;;  %v10750_v8 = vld [vmem:[#allocation21_spill] sm:$0xff] }
  0x6f   :  { %v504_v12 = vrot.slane %v503_v30, 1  ;;  %v524_v33 = vadd.f32 %v523_v1, %v522_v40  ;;  %v4301_v22 = vadd.f32 %v455_v32, %v454_v58  ;;  %v4303_v36 = vadd.f32 %v462_v7, %v461_v6  ;;  %v10751_v53 = vld [vmem:[#allocation23_spill] sm:$0xff] }
  0x70   :  { %v4305_v15 = vadd.f32 %v469_v25, %v468_v45  ;;  %v4307_v46 = vadd.f32 %v476_v49, %v475_v56  ;;  %v4309_v23 = vadd.f32 %v483_v42, %v482_v54  ;;  %v4311_v17 = vadd.f32 %v490_v50, %v489_v13  ;;  %v10755_v55 = vld [vmem:[#allocation31_spill] sm:$0xff]  ;;  %v10758_v25 = vld [vmem:[#allocation36_spill] sm:$0xff]  ;;  %v10759_v42 = vld [vmem:[#allocation37_spill] sm:$0xff] }
  0x71   :  { %v511_v0 = vrot.slane %v510_v28, 1  ;;  %v4314_v35 = vmul.f32 0.125, %v3860_v26  ;;  %v4316_v61 = vadd.f32 %v497_v41, %v496_v39  ;;  %v518_v51 = vrot.slane %v517_v20, 1  ;;  %v10754_v39 = vld [vmem:[#allocation28_spill] sm:$0xff]  ;;  %v10757_v32 = vld [vmem:[#allocation35_spill] sm:$0xff] }
  0x72   :  { %v4319_v40 = vmul.f32 0.125, %v3867_v31  ;;  %v4322_v58 = vmul.f32 0.125, %v3873_v47  ;;  %v505_v14 = vadd.f32 %v504_v12, %v503_v30  ;;  %v525_v56 = vrot.slane %v524_v33, 1  ;;  %v10756_v30 = vld [vmem:[#allocation32_spill] sm:$0xff] }
  0x73   :  { %v4325_v54 = vmul.f32 0.125, %v3880_v52  ;;  %v4328_v13 = vmul.f32 0.125, %v3887_v57  ;;  %v4331_v26 = vmul.f32 0.125, %v3894_v62  ;;  %v4334_v43 = vmul.f32 0.125, %v3896_v63 }
  0x74   :  { %v4337_v31 = vmul.f32 0.125, %v3903_v3  ;;  %v4340_v47 = vmul.f32 0.125, %v3905_v4  ;;  %v512_v24 = vadd.f32 %v511_v0, %v510_v28  ;;  %v4343_v21 = vmul.f32 0.125, %v3919_v9  ;;  %v10760_v28 = vld [vmem:[#allocation38_spill] sm:$0xff] }
  0x75   :  { %v4346_v52 = vmul.f32 0.125, %v3921_v10  ;;  %v4349_v57 = vmul.f32 0.125, %v3923_v11  ;;  %v519_v62 = vadd.f32 %v518_v51, %v517_v20  ;;  %v4352_v63 = vmul.f32 0.125, %v3942_v16  ;;  %v10753_v16 = vld [vmem:[#allocation27_spill] sm:$0xff]  ;;  %v10761_v20 = vld [vmem:[#allocation42_spill] sm:$0xff] }
  0x76   :  { %v4355_v3 = vmul.f32 0.125, %v10747_v60  ;;  %v4358_v4 = vmul.f32 0.125, %v10748_v5  ;;  %v526_v18 = vadd.f32 %v525_v56, %v524_v33  ;;  %v4361_v9 = vmul.f32 0.125, %v10749_v38  ;;  %v10762_v33 = vld [vmem:[#allocation43_spill] sm:$0xff]  ;;  %v10763_v51 = vld [vmem:[#allocation46_spill] sm:$0xff]  ;;  %v10764_v60 = vld [vmem:[#allocation49_spill] sm:$0xff] }
  0x77   :  { %v4364_v10 = vmul.f32 0.125, %v10750_v8  ;;  %v4367_v11 = vmul.f32 0.125, %v10751_v53  ;;  %v4370_v6 = vmul.f32 0.125, %v10752_v34  ;;  %v4373_v45 = vmul.f32 0.125, %v10753_v16  ;;  %v10765_v38 = vld [vmem:[#allocation51_spill] sm:$0xff]  ;;  %v10766_v53 = vld [vmem:[#allocation53_spill] sm:$0xff] }
  0x78   :  { %v4376_v44 = vmul.f32 0.125, %v10754_v39  ;;  %v4379_v19 = vmul.f32 0.125, %v10755_v55  ;;  %v4382_v1 = vmul.f32 0.125, %v10756_v30  ;;  %v4385_v7 = vmul.f32 0.125, %v10757_v32  ;;  %v10767_v16 = vld [vmem:[#allocation56_spill] sm:$0xff]  ;;  %v10769_v55 = vld [vmem:[#allocation57_spill] sm:$0xff] }
  0x79   :  { %v4388_v49 = vmul.f32 0.125, %v10758_v25  ;;  %v4391_v50 = vmul.f32 0.125, %v10759_v42  ;;  %v4394_v41 = vmul.f32 0.125, %v10760_v28  ;;  %v4397_v12 = vmul.f32 0.125, %v10761_v20  ;;  %v10771_v32 = vld [vmem:[#allocation59_spill] sm:$0xff]  ;;  %v10773_v42 = vld [vmem:[#allocation61_spill] sm:$0xff] }
  0x7a   :  { %v4400_v0 = vmul.f32 0.125, %v10762_v33  ;;  %v4403_v56 = vmul.f32 0.125, %v10763_v51  ;;  %v4406_v5 = vmul.f32 0.125, %v10764_v60  ;;  %v4409_v8 = vmul.f32 0.125, %v10765_v38  ;;  %v10775_v20 = vld [vmem:[#allocation62_spill] sm:$0xff]  ;;  %v10777_v51 = vld [vmem:[#allocation65_spill] sm:$0xff] }
  0x7b   :  { %v4412_v34 = vmul.f32 0.125, %v10766_v53  ;;  %v4415_v39 = vmul.f32 0.125, %v10767_v16  ;;  %v4418_v30 = vmul.f32 0.125, %v10769_v55  ;;  %v4421_v25 = vmul.f32 0.125, %v10771_v32  ;;  %v10779_v38 = vld [vmem:[#allocation66_spill] sm:$0xff]  ;;  %v10781_v16 = vld [vmem:[#allocation67_spill] sm:$0xff] }
  0x7c   :  { %v4424_v28 = vmul.f32 0.125, %v10773_v42  ;;  %v4427_v33 = vmul.f32 0.125, %v10775_v20  ;;  %v4430_v60 = vmul.f32 0.125, %v10777_v51  ;;  %v4433_v53 = vmul.f32 0.125, %v10779_v38  ;;  %v10782_v55 = vld [vmem:[#allocation68_spill] sm:$0xff]  ;;  %v10784_v42 = vld [vmem:[#allocation73_spill] sm:$0xff] }
  0x7d   :  { %10768 = vst [vmem:[#allocation13_spill] sm:$0xff] %v4415_v39  ;;  %10770 = vst [vmem:[#allocation16_spill] sm:$0xff] %v4418_v30  ;;  %v4436_v39 = vmul.f32 0.125, %v10781_v16  ;;  %v4439_v30 = vmul.f32 0.125, %v10782_v55  ;;  %v10783_v32 = vld [vmem:[#allocation72_spill] sm:$0xff]  ;;  %v10786_v51 = vld [vmem:[#allocation77_spill] sm:$0xff] }
  0x7e   :  { %10772 = vst [vmem:[#allocation19_spill] sm:$0xff] %v4421_v25  ;;  %10774 = vst [vmem:[#allocation21_spill] sm:$0xff] %v4424_v28  ;;  %v4442_v25 = vmul.f32 0.125, %v10783_v32  ;;  %v4445_v28 = vmul.f32 0.125, %v10784_v42  ;;  %v10785_v20 = vld [vmem:[#allocation76_spill] sm:$0xff]  ;;  %v10787_v38 = vld [vmem:[#allocation83_spill] sm:$0xff] }
  0x7f   :  { %10776 = vst [vmem:[#allocation23_spill] sm:$0xff] %v4427_v33  ;;  %10778 = vst [vmem:[#allocation26_spill] sm:$0xff] %v4430_v60  ;;  %v4448_v33 = vmul.f32 0.125, %v10785_v20  ;;  %v4451_v60 = vmul.f32 0.125, %v10786_v51  ;;  %v4457_v16 = vmul.f32 0.125, %v4288_v27  ;;  %v4460_v55 = vmul.f32 0.125, %v4291_v29 }
  0x80   :  { %10780 = vst [vmem:[#allocation27_spill] sm:$0xff] %v4433_v53  ;;  %v4454_v53 = vmul.f32 0.125, %v10787_v38  ;;  %v4463_v32 = vmul.f32 0.125, %v4293_v59  ;;  %v4466_v42 = vmul.f32 0.125, %v4295_v2  ;;  %v4469_v20 = vmul.f32 0.125, %v4297_v48 }
  0x81   :  { %v4472_v51 = vmul.f32 0.125, %v4299_v37  ;;  %v4475_v38 = vmul.f32 0.125, %v4301_v22  ;;  %v4478_v27 = vmul.f32 0.125, %v4303_v36  ;;  %v4481_v29 = vmul.f32 0.125, %v4305_v15 }
  0x82   :  { %v4484_v59 = vmul.f32 0.125, %v4307_v46  ;;  %v4487_v2 = vmul.f32 0.125, %v4309_v23  ;;  %v4490_v48 = vmul.f32 0.125, %v4311_v17  ;;  %v4493_v37 = vmul.f32 0.125, %v4316_v61  ;;  %v3747_v46 = vld [vmem:[%s10263_s0] sm:$0xff]  ;;  %v3748_v17 = vld [vmem:[%s10263_s0 + $0x8] sm:$0xff] }
  0x83   :  { %10788 = vst [vmem:[#allocation28_spill] sm:$0xff] %v4475_v38  ;;  %v4495_v22 = vmul.f32 0.125, %v505_v14  ;;  %v4497_v38 = vmul.f32 0.125, %v512_v24  ;;  %v4499_v36 = vmul.f32 0.125, %v519_v62  ;;  %v4501_v15 = vmul.f32 0.125, %v526_v18  ;;  %v3749_v14 = vld [vmem:[%s10263_s0 + $0x10] sm:$0xff] }
  0x84   :  { %v4507_v23 = vsub.f32 %v3747_v46, %v4314_v35  ;;  %v4513_v61 = vsub.f32 %v3748_v17, %v4319_v40  ;;  %v4519_v24 = vsub.f32 %v3749_v14, %v4322_v58  ;;  %v3750_v62 = vld [vmem:[%s10263_s0 + $0x18] sm:$0xff]  ;;  %v3751_v18 = vld [vmem:[%s10263_s0 + $0x20] sm:$0xff]  ;;  %v3752_v46 = vld [vmem:[%s10263_s0 + $0x28] sm:$0xff] }
  0x85   :  { %v4525_v35 = vsub.f32 %v3750_v62, %v4325_v54  ;;  %v4531_v40 = vsub.f32 %v3751_v18, %v4328_v13  ;;  %v4537_v58 = vsub.f32 %v3752_v46, %v4331_v26  ;;  %v3753_v17 = vld [vmem:[%s10263_s0 + $0x30] sm:$0xff]  ;;  %v3754_v14 = vld [vmem:[%s10263_s0 + $0x38] sm:$0xff]  ;;  %v3755_v62 = vld [vmem:[%s10263_s0 + $0x40] sm:$0xff] }
  0x86   :  { %10789 = vst [vmem:[#allocation31_spill] sm:$0xff] %v4507_v23  ;;  %10790 = vst [vmem:[#allocation32_spill] sm:$0xff] %v4513_v61  ;;  %v4543_v54 = vsub.f32 %v3753_v17, %v4334_v43  ;;  %v4549_v13 = vsub.f32 %v3754_v14, %v4337_v31  ;;  %v4555_v26 = vsub.f32 %v3755_v62, %v4340_v47  ;;  %v3756_v18 = vld [vmem:[%s10263_s0 + $0x48] sm:$0xff]  ;;  %v3757_v46 = vld [vmem:[%s10263_s0 + $0x50] sm:$0xff] }
  0x87   :  { %10791 = vst [vmem:[#allocation35_spill] sm:$0xff] %v4519_v24  ;;  %10792 = vst [vmem:[#allocation36_spill] sm:$0xff] %v4525_v35  ;;  %v4561_v43 = vsub.f32 %v3756_v18, %v4343_v21  ;;  %v4567_v31 = vsub.f32 %v3757_v46, %v4346_v52  ;;  %v3758_v17 = vld [vmem:[%s10263_s0 + $0x58] sm:$0xff]  ;;  %v3759_v14 = vld [vmem:[%s10263_s0 + $0x60] sm:$0xff] }
  0x88   :  { %10793 = vst [vmem:[#allocation37_spill] sm:$0xff] %v4531_v40  ;;  %10794 = vst [vmem:[#allocation38_spill] sm:$0xff] %v4537_v58  ;;  %v4573_v47 = vsub.f32 %v3758_v17, %v4349_v57  ;;  %v4579_v21 = vsub.f32 %v3759_v14, %v4352_v63  ;;  %v3760_v62 = vld [vmem:[%s10263_s0 + $0x68] sm:$0xff]  ;;  %v3761_v18 = vld [vmem:[%s10263_s0 + $0x70] sm:$0xff] }
  0x89   :  { %10795 = vst [vmem:[#allocation42_spill] sm:$0xff] %v4543_v54  ;;  %10796 = vst [vmem:[#allocation43_spill] sm:$0xff] %v4549_v13  ;;  %v4585_v52 = vsub.f32 %v3760_v62, %v4355_v3  ;;  %v4591_v57 = vsub.f32 %v3761_v18, %v4358_v4  ;;  %v3762_v46 = vld [vmem:[%s10263_s0 + $0x78] sm:$0xff]  ;;  %v10805_v17 = vld [vmem:[#allocation2_spill] sm:$0xff] }
  0x8a   :  { %10797 = vst [vmem:[#allocation46_spill] sm:$0xff] %v4555_v26  ;;  %10798 = vst [vmem:[#allocation49_spill] sm:$0xff] %v4561_v43  ;;  %v4597_v63 = vsub.f32 %v3762_v46, %v4361_v9  ;;  %v4601_v14 = vsub.f32 %v10805_v17, %v4364_v10  ;;  %v10807_v3 = vld [vmem:[#allocation3_spill] sm:$0xff]  ;;  %v10811_v4 = vld [vmem:[#allocation5_spill] sm:$0xff] }
  0x8b   :  { %10799 = vst [vmem:[#allocation51_spill] sm:$0xff] %v4567_v31  ;;  %10800 = vst [vmem:[#allocation53_spill] sm:$0xff] %v4573_v47  ;;  %v4605_v62 = vsub.f32 %v10807_v3, %v4367_v11  ;;  %v4613_v18 = vsub.f32 %v10811_v4, %v4373_v45  ;;  %v10815_v46 = vld [vmem:[#allocation7_spill] sm:$0xff]  ;;  %v10817_v17 = vld [vmem:[#allocation8_spill] sm:$0xff] }
  0x8c   :  { %10801 = vst [vmem:[#allocation56_spill] sm:$0xff] %v4579_v21  ;;  %10802 = vst [vmem:[#allocation57_spill] sm:$0xff] %v4585_v52  ;;  %v10809_v52 = vld [vmem:[#allocation4_spill] sm:$0xff]  ;;  %v4621_v10 = vsub.f32 %v10815_v46, %v4379_v19  ;;  %v4625_v11 = vsub.f32 %v10817_v17, %v4382_v1  ;;  %v10819_v3 = vld [vmem:[#allocation9_spill] sm:$0xff] }
  0x8d   :  { %10803 = vst [vmem:[#allocation59_spill] sm:$0xff] %v4591_v57  ;;  %10804 = vst [vmem:[#allocation61_spill] sm:$0xff] %v4597_v63  ;;  %v4609_v21 = vsub.f32 %v10809_v52, %v4370_v6  ;;  %v10813_v57 = vld [vmem:[#allocation6_spill] sm:$0xff]  ;;  %v4629_v6 = vsub.f32 %v10819_v3, %v4385_v7  ;;  %v10823_v4 = vld [vmem:[#allocation11_spill] sm:$0xff] }
  0x8e   :  { %10806 = vst [vmem:[#allocation62_spill] sm:$0xff] %v4601_v14  ;;  %10808 = vst [vmem:[#allocation65_spill] sm:$0xff] %v4605_v62  ;;  %v4617_v9 = vsub.f32 %v10813_v57, %v4376_v44  ;;  %v10821_v52 = vld [vmem:[#allocation10_spill] sm:$0xff]  ;;  %v4637_v44 = vsub.f32 %v10823_v4, %v4391_v50  ;;  %v10825_v57 = vld [vmem:[#allocation12_spill] sm:$0xff] }
  0x8f   :  { %10810 = vst [vmem:[#allocation66_spill] sm:$0xff] %v4609_v21  ;;  %10812 = vst [vmem:[#allocation67_spill] sm:$0xff] %v4613_v18  ;;  %v4633_v45 = vsub.f32 %v10821_v52, %v4388_v49  ;;  %v4641_v19 = vsub.f32 %v10825_v57, %v4394_v41  ;;  %v10827_v46 = vld [vmem:[#allocation14_spill] sm:$0xff]  ;;  %v10829_v17 = vld [vmem:[#allocation15_spill] sm:$0xff] }
  0x90   :  { %10814 = vst [vmem:[#allocation68_spill] sm:$0xff] %v4617_v9  ;;  %10816 = vst [vmem:[#allocation72_spill] sm:$0xff] %v4621_v10  ;;  %v4645_v1 = vsub.f32 %v10827_v46, %v4397_v12  ;;  %v4649_v7 = vsub.f32 %v10829_v17, %v4400_v0  ;;  %v10831_v3 = vld [vmem:[#allocation17_spill] sm:$0xff]  ;;  %v10833_v52 = vld [vmem:[#allocation18_spill] sm:$0xff] }
  0x91   :  { %10818 = vst [vmem:[#allocation73_spill] sm:$0xff] %v4625_v11  ;;  %10820 = vst [vmem:[#allocation76_spill] sm:$0xff] %v4629_v6  ;;  %v4653_v49 = vsub.f32 %v10831_v3, %v4403_v56  ;;  %v4657_v50 = vsub.f32 %v10833_v52, %v4406_v5  ;;  %v10835_v4 = vld [vmem:[#allocation20_spill] sm:$0xff]  ;;  %v10837_v57 = vld [vmem:[#allocation22_spill] sm:$0xff] }
  0x92   :  { %10822 = vst [vmem:[#allocation77_spill] sm:$0xff] %v4633_v45  ;;  %10824 = vst [vmem:[#allocation83_spill] sm:$0xff] %v4637_v44  ;;  %v4661_v41 = vsub.f32 %v10835_v4, %v4409_v8  ;;  %v4665_v12 = vsub.f32 %v10837_v57, %v4412_v34  ;;  %v10839_v46 = vld [vmem:[#allocation13_spill] sm:$0xff]  ;;  %v10842_v17 = vld [vmem:[#allocation16_spill] sm:$0xff] }
  0x93   :  { %10826 = vst [vmem:[#allocation2_spill] sm:$0xff] %v4641_v19  ;;  %10828 = vst [vmem:[#allocation3_spill] sm:$0xff] %v4645_v1  ;;  %v10840_v1 = vld [vmem:[#allocation24_spill] sm:$0xff]  ;;  %v10845_v3 = vld [vmem:[#allocation19_spill] sm:$0xff] }
  0x94   :  { %10830 = vst [vmem:[#allocation4_spill] sm:$0xff] %v4649_v7  ;;  %10832 = vst [vmem:[#allocation5_spill] sm:$0xff] %v4653_v49  ;;  %v4669_v0 = vsub.f32 %v10840_v1, %v10839_v46  ;;  %v10843_v7 = vld [vmem:[#allocation25_spill] sm:$0xff]  ;;  %v10851_v4 = vld [vmem:[#allocation23_spill] sm:$0xff] }
  0x95   :  { %10834 = vst [vmem:[#allocation6_spill] sm:$0xff] %v4657_v50  ;;  %10836 = vst [vmem:[#allocation7_spill] sm:$0xff] %v4661_v41  ;;  %v4673_v56 = vsub.f32 %v10843_v7, %v10842_v17  ;;  %v10846_v49 = vld [vmem:[#allocation29_spill] sm:$0xff]  ;;  %v10849_v50 = vld [vmem:[#allocation30_spill] sm:$0xff] }
  0x96   :  { %10838 = vst [vmem:[#allocation8_spill] sm:$0xff] %v4665_v12  ;;  %10841 = vst [vmem:[#allocation9_spill] sm:$0xff] %v4669_v0  ;;  %v4677_v5 = vsub.f32 %v10846_v49, %v10845_v3  ;;  %v10848_v52 = vld [vmem:[#allocation21_spill] sm:$0xff]  ;;  %v10854_v57 = vld [vmem:[#allocation26_spill] sm:$0xff] }
  0x97   :  { %10844 = vst [vmem:[#allocation10_spill] sm:$0xff] %v4673_v56  ;;  %v4681_v8 = vsub.f32 %v10849_v50, %v10848_v52  ;;  %v10852_v41 = vld [vmem:[#allocation33_spill] sm:$0xff]  ;;  %v10855_v12 = vld [vmem:[#allocation34_spill] sm:$0xff]  ;;  %v10857_v46 = vld [vmem:[#allocation27_spill] sm:$0xff] }
  0x98   :  { %10847 = vst [vmem:[#allocation11_spill] sm:$0xff] %v4677_v5  ;;  %v4685_v34 = vsub.f32 %v10852_v41, %v10851_v4  ;;  %v4689_v1 = vsub.f32 %v10855_v12, %v10854_v57  ;;  %v10858_v0 = vld [vmem:[#allocation39_spill] sm:$0xff]  ;;  %v10860_v17 = vld [vmem:[#allocation40_spill] sm:$0xff]  ;;  %v10862_v3 = vld [vmem:[#allocation41_spill] sm:$0xff] }
  0x99   :  { %10850 = vst [vmem:[#allocation12_spill] sm:$0xff] %v4681_v8  ;;  %v4693_v7 = vsub.f32 %v10858_v0, %v10857_v46  ;;  %v4697_v49 = vsub.f32 %v10860_v17, %v4436_v39  ;;  %v4701_v50 = vsub.f32 %v10862_v3, %v4439_v30  ;;  %v10864_v52 = vld [vmem:[#allocation44_spill] sm:$0xff]  ;;  %v10866_v4 = vld [vmem:[#allocation45_spill] sm:$0xff]  ;;  %v10868_v57 = vld [vmem:[#allocation47_spill] sm:$0xff] }
  0x9a   :  { %10853 = vst [vmem:[#allocation14_spill] sm:$0xff] %v4685_v34  ;;  %10856 = vst [vmem:[#allocation15_spill] sm:$0xff] %v4689_v1  ;;  %v4705_v41 = vsub.f32 %v10864_v52, %v4442_v25  ;;  %v4709_v12 = vsub.f32 %v10866_v4, %v4445_v28  ;;  %v4713_v0 = vsub.f32 %v10868_v57, %v4448_v33  ;;  %v10870_v46 = vld [vmem:[#allocation48_spill] sm:$0xff]  ;;  %v10872_v17 = vld [vmem:[#allocation50_spill] sm:$0xff] }
  0x9b   :  { %10859 = vst [vmem:[#allocation17_spill] sm:$0xff] %v4693_v7  ;;  %10861 = vst [vmem:[#allocation18_spill] sm:$0xff] %v4697_v49  ;;  %v4717_v39 = vsub.f32 %v10870_v46, %v4451_v60  ;;  %v4721_v30 = vsub.f32 %v10872_v17, %v4454_v53  ;;  %v10874_v3 = vld [vmem:[#allocation52_spill] sm:$0xff]  ;;  %v10876_v52 = vld [vmem:[#allocation54_spill] sm:$0xff] }
  0x9c   :  { %10863 = vst [vmem:[#allocation20_spill] sm:$0xff] %v4701_v50  ;;  %10865 = vst [vmem:[#allocation22_spill] sm:$0xff] %v4705_v41  ;;  %v4725_v25 = vsub.f32 %v10874_v3, %v4457_v16  ;;  %v4729_v28 = vsub.f32 %v10876_v52, %v4460_v55  ;;  %v10878_v4 = vld [vmem:[#allocation55_spill] sm:$0xff]  ;;  %v10880_v57 = vld [vmem:[#allocation58_spill] sm:$0xff] }
  0x9d   :  { %10867 = vst [vmem:[#allocation13_spill] sm:$0xff] %v4709_v12  ;;  %10869 = vst [vmem:[#allocation24_spill] sm:$0xff] %v4713_v0  ;;  %v4733_v33 = vsub.f32 %v10878_v4, %v4463_v32  ;;  %v4737_v60 = vsub.f32 %v10880_v57, %v4466_v42  ;;  %v10882_v46 = vld [vmem:[#allocation60_spill] sm:$0xff]  ;;  %v10884_v17 = vld [vmem:[#allocation63_spill] sm:$0xff] }
  0x9e   :  { %10871 = vst [vmem:[#allocation16_spill] sm:$0xff] %v4717_v39  ;;  %10873 = vst [vmem:[#allocation25_spill] sm:$0xff] %v4721_v30  ;;  %v4741_v53 = vsub.f32 %v10882_v46, %v4469_v20  ;;  %v4745_v16 = vsub.f32 %v10884_v17, %v4472_v51  ;;  %v10886_v3 = vld [vmem:[#allocation28_spill] sm:$0xff]  ;;  %v10889_v52 = vld [vmem:[#allocation69_spill] sm:$0xff] }
  0x9f   :  { %10875 = vst [vmem:[#allocation19_spill] sm:$0xff] %v4725_v25  ;;  %10877 = vst [vmem:[#allocation29_spill] sm:$0xff] %v4729_v28  ;;  %v10887_v25 = vld [vmem:[#allocation64_spill] sm:$0xff]  ;;  %v4753_v32 = vsub.f32 %v10889_v52, %v4478_v27  ;;  %v10891_v4 = vld [vmem:[#allocation70_spill] sm:$0xff] }
  0xa0   :  { %10879 = vst [vmem:[#allocation21_spill] sm:$0xff] %v4733_v33  ;;  %10881 = vst [vmem:[#allocation30_spill] sm:$0xff] %v4737_v60  ;;  %v4749_v55 = vsub.f32 %v10887_v25, %v10886_v3  ;;  %v4757_v42 = vsub.f32 %v10891_v4, %v4481_v29  ;;  %v10893_v57 = vld [vmem:[#allocation71_spill] sm:$0xff]  ;;  %v10895_v46 = vld [vmem:[#allocation74_spill] sm:$0xff] }
  0xa1   :  { %10883 = vst [vmem:[#allocation23_spill] sm:$0xff] %v4741_v53  ;;  %10885 = vst [vmem:[#allocation33_spill] sm:$0xff] %v4745_v16  ;;  %v4761_v20 = vsub.f32 %v10893_v57, %v4484_v59  ;;  %v4765_v51 = vsub.f32 %v10895_v46, %v4487_v2  ;;  %v10897_v17 = vld [vmem:[#allocation75_spill] sm:$0xff]  ;;  %v10899_v3 = vld [vmem:[#allocation78_spill] sm:$0xff] }
  0xa2   :  { %10888 = vst [vmem:[#allocation26_spill] sm:$0xff] %v4749_v55  ;;  %10890 = vst [vmem:[#allocation34_spill] sm:$0xff] %v4753_v32  ;;  %v4769_v25 = vsub.f32 %v10897_v17, %v4490_v48  ;;  %v4773_v27 = vsub.f32 %v10899_v3, %v4493_v37  ;;  %v10901_v52 = vld [vmem:[#allocation79_spill] sm:$0xff]  ;;  %v10903_v4 = vld [vmem:[#allocation80_spill] sm:$0xff]  ;;  %v656_v37 = vmul.f32 %v4507_v23, %v4507_v23 }
  0xa3   :  { %10892 = vst [vmem:[#allocation27_spill] sm:$0xff] %v4757_v42  ;;  %10894 = vst [vmem:[#allocation39_spill] sm:$0xff] %v4761_v20  ;;  %v4777_v29 = vsub.f32 %v10901_v52, %v4495_v22  ;;  %v4781_v59 = vsub.f32 %v10903_v4, %v4497_v38  ;;  %v10905_v57 = vld [vmem:[#allocation81_spill] sm:$0xff]  ;;  %v10907_v46 = vld [vmem:[#allocation82_spill] sm:$0xff]  ;;  %v657_v17 = vmul.f32 %v4513_v61, %v4513_v61 }
  0xa4   :  { %10896 = vst [vmem:[#allocation40_spill] sm:$0xff] %v4765_v51  ;;  %10898 = vst [vmem:[#allocation41_spill] sm:$0xff] %v4769_v25  ;;  %v4785_v2 = vsub.f32 %v10905_v57, %v4499_v36  ;;  %v4789_v48 = vsub.f32 %v10907_v46, %v4501_v15  ;;  %v658_v22 = vmul.f32 %v4519_v24, %v4519_v24  ;;  %v10915_v24 = vld [vmem:[#allocation3_spill] sm:$0xff]  ;;  %v10917_v61 = vld [vmem:[#allocation4_spill] sm:$0xff] }
  0xa5   :  { %10900 = vst [vmem:[#allocation44_spill] sm:$0xff] %v4773_v27  ;;  %10902 = vst [vmem:[#allocation45_spill] sm:$0xff] %v4777_v29  ;;  %v659_v38 = vmul.f32 %v4525_v35, %v4525_v35  ;;  %v660_v36 = vmul.f32 %v4531_v40, %v4531_v40  ;;  %v4803_v3 = vmul.f32 %v4537_v58, %v4537_v58  ;;  %v10909_v58 = vld [vmem:[#allocation56_spill] sm:$0xff]  ;;  %v10910_v40 = vld [vmem:[#allocation57_spill] sm:$0xff] }
  0xa6   :  { %10904 = vst [vmem:[#allocation47_spill] sm:$0xff] %v4781_v59  ;;  %10906 = vst [vmem:[#allocation48_spill] sm:$0xff] %v4785_v2  ;;  %v4807_v15 = vmul.f32 %v4543_v54, %v4543_v54  ;;  %v4811_v52 = vmul.f32 %v4549_v13, %v4549_v13  ;;  %v4815_v4 = vmul.f32 %v4555_v26, %v4555_v26  ;;  %v10911_v35 = vld [vmem:[#allocation59_spill] sm:$0xff]  ;;  %v10918_v23 = vld [vmem:[#allocation5_spill] sm:$0xff] }
  0xa7   :  { %10908 = vst [vmem:[#allocation50_spill] sm:$0xff] %v4789_v48  ;;  %v4819_v57 = vmul.f32 %v4561_v43, %v4561_v43  ;;  %v4823_v46 = vmul.f32 %v4567_v31, %v4567_v31  ;;  %v4827_v54 = vmul.f32 %v4573_v47, %v4573_v47  ;;  %v4831_v13 = vmul.f32 %v10909_v58, %v10909_v58 }
  0xa8   :  { %v4835_v26 = vmul.f32 %v10910_v40, %v10910_v40  ;;  %v4839_v43 = vmul.f32 %v10911_v35, %v10911_v35  ;;  %v4843_v31 = vmul.f32 %v4597_v63, %v4597_v63  ;;  %v4847_v47 = vmul.f32 %v4601_v14, %v4601_v14 }
  0xa9   :  { %v4851_v58 = vmul.f32 %v4605_v62, %v4605_v62  ;;  %v4855_v40 = vmul.f32 %v4609_v21, %v4609_v21  ;;  %v4859_v35 = vmul.f32 %v4613_v18, %v4613_v18  ;;  %v4863_v63 = vmul.f32 %v4617_v9, %v4617_v9 }
  0xaa   :  { %v4867_v14 = vmul.f32 %v4621_v10, %v4621_v10  ;;  %v4871_v62 = vmul.f32 %v4625_v11, %v4625_v11  ;;  %v4875_v21 = vmul.f32 %v4629_v6, %v4629_v6  ;;  %v4879_v18 = vmul.f32 %v4633_v45, %v4633_v45 }
  0xab   :  { %v4883_v9 = vmul.f32 %v4637_v44, %v4637_v44  ;;  %v4887_v10 = vmul.f32 %v4641_v19, %v4641_v19  ;;  %v4891_v11 = vmul.f32 %v10915_v24, %v10915_v24  ;;  %v4895_v6 = vmul.f32 %v10917_v61, %v10917_v61 }
  0xac   :  { %10912 = vst [vmem:[#allocation52_spill] sm:$0xff] %v4879_v18  ;;  %v4899_v45 = vmul.f32 %v10918_v23, %v10918_v23  ;;  %v10919_v18 = vld [vmem:[#allocation6_spill] sm:$0xff]  ;;  %v4919_v23 = vmul.f32 %v4673_v56, %v4673_v56  ;;  %v4939_v56 = vmul.f32 %v4693_v7, %v4693_v7  ;;  %v4960_v7 = vmul.f32 %v4713_v0, %v4713_v0 }
  0xad   :  { %10913 = vst [vmem:[#allocation54_spill] sm:$0xff] %v4883_v9  ;;  %10914 = vst [vmem:[#allocation55_spill] sm:$0xff] %v4887_v10  ;;  %v4903_v44 = vmul.f32 %v10919_v18, %v10919_v18  ;;  %v10920_v9 = vld [vmem:[#allocation7_spill] sm:$0xff]  ;;  %v10921_v10 = vld [vmem:[#allocation8_spill] sm:$0xff]  ;;  %v4923_v18 = vmul.f32 %v4677_v5, %v4677_v5  ;;  %v4943_v5 = vmul.f32 %v4697_v49, %v4697_v49 }
  0xae   :  { %10916 = vst [vmem:[#allocation58_spill] sm:$0xff] %v4891_v11  ;;  %v4907_v19 = vmul.f32 %v10920_v9, %v10920_v9  ;;  %v4911_v24 = vmul.f32 %v10921_v10, %v10921_v10  ;;  %v10922_v11 = vld [vmem:[#allocation9_spill] sm:$0xff]  ;;  %v4927_v9 = vmul.f32 %v4681_v8, %v4681_v8  ;;  %v4931_v10 = vmul.f32 %v4685_v34, %v4685_v34 }
  0xaf   :  { %v4915_v61 = vmul.f32 %v10922_v11, %v10922_v11  ;;  %10923 = vst [vmem:[#allocation60_spill] sm:$0xff] %v4923_v18  ;;  %v4935_v11 = vmul.f32 %v4689_v1, %v4689_v1  ;;  %10924 = vst [vmem:[#allocation63_spill] sm:$0xff] %v4939_v56  ;;  %v720_v18 = vsel %vm10402_vm0, %v656_v37, 0.0  ;;  %v4948_v8 = vmul.f32 %v4701_v50, %v4701_v50  ;;  %v10932_v50 = vld [vmem:[#allocation19_spill] sm:$0xff] }
  0xb0   :  { %10925 = vst [vmem:[#allocation28_spill] sm:$0xff] %v4943_v5  ;;  %v4952_v34 = vmul.f32 %v4705_v41, %v4705_v41  ;;  %v4956_v1 = vmul.f32 %v4709_v12, %v4709_v12  ;;  %10929 = vst [vmem:[#allocation71_spill] sm:$0xff] %v4960_v7  ;;  %v4964_v49 = vmul.f32 %v4717_v39, %v4717_v39  ;;  %v721_v0 = vrot.slane %v720_v18, 4 }
  0xb1   :  { %10926 = vst [vmem:[#allocation64_spill] sm:$0xff] %v4948_v8  ;;  %v4968_v37 = vmul.f32 %v4721_v30, %v4721_v30  ;;  %v4972_v41 = vmul.f32 %v10932_v50, %v10932_v50  ;;  %v4977_v12 = vmul.f32 %v4729_v28, %v4729_v28  ;;  %v734_v7 = vsel %vm10402_vm0, %v658_v22, 0.0 }
  0xb2   :  { %10927 = vst [vmem:[#allocation69_spill] sm:$0xff] %v4952_v34  ;;  %10928 = vst [vmem:[#allocation70_spill] sm:$0xff] %v4956_v1  ;;  %v727_v34 = vsel %vm10402_vm0, %v657_v17, 0.0  ;;  %v741_v39 = vsel %vm10402_vm0, %v659_v38, 0.0  ;;  %v4987_v30 = vmul.f32 %v4737_v60, %v4737_v60  ;;  %v4991_v17 = vmul.f32 %v4741_v53, %v4741_v53 }
  0xb3   :  { %10930 = vst [vmem:[#allocation74_spill] sm:$0xff] %v4964_v49  ;;  %10931 = vst [vmem:[#allocation75_spill] sm:$0xff] %v4968_v37  ;;  %v4983_v49 = vmul.f32 %v4733_v33, %v4733_v33  ;;  %v4995_v28 = vmul.f32 %v4745_v16, %v4745_v16  ;;  %v4999_v22 = vmul.f32 %v4749_v55, %v4749_v55  ;;  %v728_v33 = vrot.slane %v727_v34, 4 }
  0xb4   :  { %10933 = vst [vmem:[#allocation78_spill] sm:$0xff] %v4972_v41  ;;  %10934 = vst [vmem:[#allocation79_spill] sm:$0xff] %v4977_v12  ;;  %v5003_v38 = vmul.f32 %v4753_v32, %v4753_v32  ;;  %v748_v60 = vsel %vm10402_vm0, %v660_v36, 0.0  ;;  %v5008_v50 = vmul.f32 %v4757_v42, %v4757_v42  ;;  %v5012_v53 = vmul.f32 %v4761_v20, %v4761_v20 }
  0xb5   :  { %10935 = vst [vmem:[#allocation80_spill] sm:$0xff] %v4983_v49  ;;  %10936 = vst [vmem:[#allocation81_spill] sm:$0xff] %v4987_v30  ;;  %v735_v16 = vrot.slane %v734_v7, 4  ;;  %v5016_v55 = vmul.f32 %v4765_v51, %v4765_v51  ;;  %v5020_v32 = vmul.f32 %v4769_v25, %v4769_v25  ;;  %v5024_v36 = vmul.f32 %v4773_v27, %v4773_v27 }
  0xb6   :  { %10937 = vst [vmem:[#allocation82_spill] sm:$0xff] %v4991_v17  ;;  %10938 = vst [vmem:[#allocation84_spill] sm:$0xff] %v4995_v28  ;;  %v742_v28 = vrot.slane %v741_v39, 4  ;;  %v722_v42 = vadd.f32 %v721_v0, %v720_v18  ;;  %v5032_v20 = vmul.f32 %v4781_v59, %v4781_v59  ;;  %v755_v51 = vsel %vm10402_vm0, %v4803_v3, 0.0 }
  0xb7   :  { %10939 = vst [vmem:[#allocation85_spill] sm:$0xff] %v4999_v22  ;;  %10940 = vst [vmem:[#allocation86_spill] sm:$0xff] %v5003_v38  ;;  %v5038_v25 = vmul.f32 %v4785_v2, %v4785_v2  ;;  %v762_v18 = vsel %vm10402_vm0, %v4807_v15, 0.0  ;;  %v769_v0 = vsel %vm10402_vm0, %v4811_v52, 0.0  ;;  %v776_v59 = vsel %vm10402_vm0, %v4815_v4, 0.0 }
  0xb8   :  { %10941 = vst [vmem:[#allocation87_spill] sm:$0xff] %v5008_v50  ;;  %10942 = vst [vmem:[#allocation88_spill] sm:$0xff] %v5012_v53  ;;  %v5028_v50 = vmul.f32 %v4777_v29, %v4777_v29  ;;  %v749_v53 = vrot.slane %v748_v60, 4  ;;  %v736_v29 = vadd.f32 %v735_v16, %v734_v7  ;;  %v743_v27 = vadd.f32 %v742_v28, %v741_v39 }
  0xb9   :  { %10943 = vst [vmem:[#allocation89_spill] sm:$0xff] %v5016_v55  ;;  %10944 = vst [vmem:[#allocation90_spill] sm:$0xff] %v5020_v32  ;;  %v729_v32 = vadd.f32 %v728_v33, %v727_v34  ;;  %v723_v3 = vrot.slane %v722_v42, 2  ;;  %v790_v2 = vsel %vm10402_vm0, %v4823_v46, 0.0  ;;  %v797_v34 = vsel %vm10402_vm0, %v4827_v54, 0.0 }
  0xba   :  { %10945 = vst [vmem:[#allocation91_spill] sm:$0xff] %v5024_v36  ;;  %10946 = vst [vmem:[#allocation92_spill] sm:$0xff] %v5028_v50  ;;  %v756_v50 = vrot.slane %v755_v51, 4  ;;  %v750_v33 = vadd.f32 %v749_v53, %v748_v60  ;;  %v763_v15 = vrot.slane %v762_v18, 4  ;;  %v804_v7 = vsel %vm10402_vm0, %v4831_v13, 0.0 }
  0xbb   :  { %10947 = vst [vmem:[#allocation93_spill] sm:$0xff] %v5032_v20  ;;  %10948 = vst [vmem:[#allocation94_spill] sm:$0xff] %v5038_v25  ;;  %v783_v20 = vsel %vm10402_vm0, %v4819_v57, 0.0  ;;  %v770_v25 = vrot.slane %v769_v0, 4  ;;  %v777_v39 = vrot.slane %v776_v59, 4  ;;  %v811_v16 = vsel %vm10402_vm0, %v4835_v26, 0.0 }
  0xbc   :  { %v784_v28 = vrot.slane %v783_v20, 4  ;;  %v818_v52 = vsel %vm10402_vm0, %v4839_v43, 0.0  ;;  %v730_v4 = vrot.slane %v729_v32, 2  ;;  %v737_v57 = vrot.slane %v736_v29, 2 }
  0xbd   :  { %v791_v46 = vrot.slane %v790_v2, 4  ;;  %v798_v36 = vrot.slane %v797_v34, 4  ;;  %v724_v55 = vadd.f32 %v723_v3, %v722_v42  ;;  %v744_v54 = vrot.slane %v743_v27, 2 }
  0xbe   :  { %v757_v60 = vadd.f32 %v756_v50, %v755_v51  ;;  %v805_v53 = vrot.slane %v804_v7, 4  ;;  %v5060_v38 = vmul.f32 %v4789_v48, %v4789_v48  ;;  %v764_v13 = vadd.f32 %v763_v15, %v762_v18 }
  0xbf   :  { %v812_v22 = vrot.slane %v811_v16, 4  ;;  %v819_v17 = vrot.slane %v818_v52, 4  ;;  %v751_v30 = vrot.slane %v750_v33, 2  ;;  %v771_v26 = vadd.f32 %v770_v25, %v769_v0 }
  0xc0   :  { %10949 = vst [vmem:[#allocation95_spill] sm:$0xff] %v5060_v38  ;;  %v778_v49 = vadd.f32 %v777_v39, %v776_v59  ;;  %v785_v12 = vadd.f32 %v784_v28, %v783_v20  ;;  %v731_v43 = vadd.f32 %v730_v4, %v729_v32  ;;  %v738_v41 = vadd.f32 %v737_v57, %v736_v29 }
  0xc1   :  { %v792_v37 = vadd.f32 %v791_v46, %v790_v2  ;;  %v799_v1 = vadd.f32 %v798_v36, %v797_v34  ;;  %v725_v8 = vrot.slane %v724_v55, 1  ;;  %v745_v42 = vadd.f32 %v744_v54, %v743_v27 }
  0xc2   :  { %v758_v3 = vrot.slane %v757_v60, 2  ;;  %v806_v50 = vadd.f32 %v805_v53, %v804_v7  ;;  %v765_v51 = vrot.slane %v764_v13, 2  ;;  %v813_v5 = vadd.f32 %v812_v22, %v811_v16 }
  0xc3   :  { %v820_v56 = vadd.f32 %v819_v17, %v818_v52  ;;  %v825_v18 = vsel %vm10402_vm0, %v4843_v31, 0.0  ;;  %v752_v15 = vadd.f32 %v751_v30, %v750_v33  ;;  %v772_v48 = vrot.slane %v771_v26, 2 }
  0xc4   :  { %v779_v38 = vrot.slane %v778_v49, 2  ;;  %v786_v25 = vrot.slane %v785_v12, 2  ;;  %v732_v59 = vrot.slane %v731_v43, 1  ;;  %v739_v20 = vrot.slane %v738_v41, 1 }
  0xc5   :  { %v793_v32 = vrot.slane %v792_v37, 2  ;;  %v800_v29 = vrot.slane %v799_v1, 2  ;;  %v746_v2 = vrot.slane %v745_v42, 1  ;;  %v759_v36 = vadd.f32 %v758_v3, %v757_v60 }
  0xc6   :  { %v807_v0 = vrot.slane %v806_v50, 2  ;;  %v826_v27 = vrot.slane %v825_v18, 4  ;;  %v5064_v34 = vadd.f32 %v725_v8, %v724_v55  ;;  %v766_v7 = vadd.f32 %v765_v51, %v764_v13 }
  0xc7   :  { %v814_v22 = vrot.slane %v813_v5, 2  ;;  %v821_v17 = vrot.slane %v820_v56, 2  ;;  %v753_v39 = vrot.slane %v752_v15, 1  ;;  %v773_v28 = vadd.f32 %v772_v48, %v771_v26 }
  0xc8   :  { %v780_v31 = vadd.f32 %v779_v38, %v778_v49  ;;  %v787_v30 = vadd.f32 %v786_v25, %v785_v12  ;;  %v794_v33 = vadd.f32 %v793_v32, %v792_v37  ;;  %v801_v16 = vadd.f32 %v800_v29, %v799_v1 }
  0xc9   :  { %v832_v52 = vsel %vm10402_vm0, %v4847_v47, 0.0  ;;  %v839_v4 = vsel %vm10402_vm0, %v4851_v58, 0.0  ;;  %v5070_v57 = vadd.f32 %v732_v59, %v731_v43  ;;  %v760_v46 = vrot.slane %v759_v36, 1 }
  0xca   :  { %v808_v8 = vadd.f32 %v807_v0, %v806_v50  ;;  %v827_v55 = vadd.f32 %v826_v27, %v825_v18  ;;  %v5072_v54 = vadd.f32 %v739_v20, %v738_v41  ;;  %v767_v60 = vrot.slane %v766_v7, 1 }
  0xcb   :  { %v815_v53 = vadd.f32 %v814_v22, %v813_v5  ;;  %v822_v48 = vadd.f32 %v821_v17, %v820_v56  ;;  %v5074_v49 = vadd.f32 %v746_v2, %v745_v42  ;;  %v774_v12 = vrot.slane %v773_v28, 1 }
  0xcc   :  { %v833_v1 = vrot.slane %v832_v52, 4  ;;  %v840_v37 = vrot.slane %v839_v4, 4  ;;  %v781_v38 = vrot.slane %v780_v31, 1  ;;  %v788_v47 = vrot.slane %v787_v30, 1 }
  0xcd   :  { %v795_v13 = vrot.slane %v794_v33, 1  ;;  %v802_v26 = vrot.slane %v801_v16, 1  ;;  %v5076_v58 = vadd.f32 %v753_v39, %v752_v15  ;;  %v5078_v43 = vadd.f32 %v760_v46, %v759_v36 }
  0xce   :  { %v809_v3 = vrot.slane %v808_v8, 1  ;;  %v828_v50 = vrot.slane %v827_v55, 2  ;;  %v5080_v41 = vadd.f32 %v767_v60, %v766_v7  ;;  %v816_v51 = vrot.slane %v815_v53, 1  ;;  %v10957_v60 = vld [vmem:[#allocation58_spill] sm:$0xff] }
  0xcf   :  { %v823_v5 = vrot.slane %v822_v48, 1  ;;  %v846_v56 = vsel %vm10402_vm0, %v4855_v40, 0.0  ;;  %v5084_v42 = vadd.f32 %v774_v12, %v773_v28  ;;  %v834_v18 = vadd.f32 %v833_v1, %v832_v52 }
  0xd0   :  { %v841_v25 = vadd.f32 %v840_v37, %v839_v4  ;;  %v853_v59 = vsel %vm10402_vm0, %v4859_v35, 0.0  ;;  %v5088_v15 = vadd.f32 %v781_v38, %v780_v31  ;;  %v5090_v20 = vadd.f32 %v788_v47, %v787_v30  ;;  %v10956_v4 = vld [vmem:[#allocation55_spill] sm:$0xff] }
  0xd1   :  { %v5092_v32 = vadd.f32 %v795_v13, %v794_v33  ;;  %v5094_v29 = vadd.f32 %v802_v26, %v801_v16  ;;  %v5096_v2 = vadd.f32 %v809_v3, %v808_v8  ;;  %v829_v36 = vadd.f32 %v828_v50, %v827_v55  ;;  %v10954_v33 = vld [vmem:[#allocation52_spill] sm:$0xff]  ;;  %v10955_v16 = vld [vmem:[#allocation54_spill] sm:$0xff] }
  0xd2   :  { %v847_v0 = vrot.slane %v846_v56, 4  ;;  %v860_v40 = vsel %vm10402_vm0, %v4863_v63, 0.0  ;;  %v5100_v27 = vadd.f32 %v816_v51, %v815_v53  ;;  %v5102_v7 = vadd.f32 %v823_v5, %v822_v48 }
  0xd3   :  { %10950 = vst [vmem:[#allocation96_spill] sm:$0xff] %v5094_v29  ;;  %10951 = vst [vmem:[#allocation97_spill] sm:$0xff] %v5096_v2  ;;  %v854_v35 = vrot.slane %v853_v59, 4  ;;  %v867_v22 = vsel %vm10402_vm0, %v4867_v14, 0.0  ;;  %v835_v17 = vrot.slane %v834_v18, 2  ;;  %v842_v39 = vrot.slane %v841_v25, 2 }
  0xd4   :  { %10952 = vst [vmem:[#allocation98_spill] sm:$0xff] %v5100_v27  ;;  %10953 = vst [vmem:[#allocation99_spill] sm:$0xff] %v5102_v7  ;;  %v874_v28 = vsel %vm10402_vm0, %v4871_v62, 0.0  ;;  %v881_v31 = vsel %vm10402_vm0, %v4875_v21, 0.0  ;;  %v861_v30 = vrot.slane %v860_v40, 4  ;;  %v888_v63 = vsel %vm10402_vm0, %v10954_v33, 0.0 }
  0xd5   :  { %v895_v52 = vsel %vm10402_vm0, %v10955_v16, 0.0  ;;  %v902_v46 = vsel %vm10402_vm0, %v10956_v4, 0.0  ;;  %v830_v8 = vrot.slane %v829_v36, 1  ;;  %v848_v14 = vadd.f32 %v847_v0, %v846_v56 }
  0xd6   :  { %v868_v55 = vrot.slane %v867_v22, 4  ;;  %v909_v53 = vsel %vm10402_vm0, %v10957_v60, 0.0  ;;  %v875_v62 = vrot.slane %v874_v28, 4  ;;  %v882_v48 = vrot.slane %v881_v31, 4 }
  0xd7   :  { %v916_v21 = vsel %vm10402_vm0, %v4895_v6, 0.0  ;;  %v923_v12 = vsel %vm10402_vm0, %v4899_v45, 0.0  ;;  %v855_v1 = vadd.f32 %v854_v35, %v853_v59  ;;  %v889_v37 = vrot.slane %v888_v63, 4 }
  0xd8   :  { %v896_v38 = vrot.slane %v895_v52, 4  ;;  %v903_v47 = vrot.slane %v902_v46, 4  ;;  %v836_v13 = vadd.f32 %v835_v17, %v834_v18  ;;  %v843_v26 = vadd.f32 %v842_v39, %v841_v25 }
  0xd9   :  { %v862_v3 = vadd.f32 %v861_v30, %v860_v40  ;;  %v910_v50 = vrot.slane %v909_v53, 4  ;;  %v849_v51 = vrot.slane %v848_v14, 2  ;;  %v917_v5 = vrot.slane %v916_v21, 4 }
  0xda   :  { %v924_v56 = vrot.slane %v923_v12, 4  ;;  %v930_v0 = vsel %vm10402_vm0, %v4903_v44, 0.0  ;;  %v5124_v33 = vadd.f32 %v830_v8, %v829_v36  ;;  %v869_v6 = vadd.f32 %v868_v55, %v867_v22 }
  0xdb   :  { %v876_v16 = vadd.f32 %v875_v62, %v874_v28  ;;  %v883_v4 = vadd.f32 %v882_v48, %v881_v31  ;;  %v856_v45 = vrot.slane %v855_v1, 2  ;;  %v890_v59 = vadd.f32 %v889_v37, %v888_v63 }
  0xdc   :  { %v897_v35 = vadd.f32 %v896_v38, %v895_v52  ;;  %v904_v60 = vadd.f32 %v903_v47, %v902_v46  ;;  %v837_v7 = vrot.slane %v836_v13, 1  ;;  %v863_v18 = vrot.slane %v862_v3, 2 }
  0xdd   :  { %v911_v25 = vadd.f32 %v910_v50, %v909_v53  ;;  %v931_v40 = vrot.slane %v930_v0, 4  ;;  %v844_v17 = vrot.slane %v843_v26, 1  ;;  %v850_v39 = vadd.f32 %v849_v51, %v848_v14 }
  0xde   :  { %v918_v30 = vadd.f32 %v917_v5, %v916_v21  ;;  %v925_v27 = vadd.f32 %v924_v56, %v923_v12  ;;  %v870_v2 = vrot.slane %v869_v6, 2  ;;  %v877_v29 = vrot.slane %v876_v16, 2 }
  0xdf   :  { %v884_v44 = vrot.slane %v883_v4, 2  ;;  %v937_v36 = vsel %vm10402_vm0, %v4907_v19, 0.0  ;;  %v857_v22 = vadd.f32 %v856_v45, %v855_v1  ;;  %v891_v28 = vrot.slane %v890_v59, 2 }
  0xe0   :  { %v898_v31 = vrot.slane %v897_v35, 2  ;;  %v905_v63 = vrot.slane %v904_v60, 2  ;;  %v5128_v52 = vadd.f32 %v837_v7, %v836_v13  ;;  %v864_v46 = vadd.f32 %v863_v18, %v862_v3 }
  0xe1   :  { %v912_v8 = vrot.slane %v911_v25, 2  ;;  %v932_v55 = vadd.f32 %v931_v40, %v930_v0  ;;  %v851_v53 = vrot.slane %v850_v39, 1  ;;  %v919_v62 = vrot.slane %v918_v30, 2 }
  0xe2   :  { %v926_v14 = vrot.slane %v925_v27, 2  ;;  %v938_v48 = vrot.slane %v937_v36, 4  ;;  %v5130_v21 = vadd.f32 %v844_v17, %v843_v26  ;;  %v871_v12 = vadd.f32 %v870_v2, %v869_v6 }
  0xe3   :  { %v878_v37 = vadd.f32 %v877_v29, %v876_v16  ;;  %v885_v38 = vadd.f32 %v884_v44, %v883_v4  ;;  %v892_v47 = vadd.f32 %v891_v28, %v890_v59  ;;  %v899_v19 = vadd.f32 %v898_v31, %v897_v35 }
  0xe4   :  { %v906_v1 = vadd.f32 %v905_v63, %v904_v60  ;;  %v944_v50 = vsel %vm10402_vm0, %v4911_v24, 0.0  ;;  %v858_v7 = vrot.slane %v857_v22, 1  ;;  %v865_v13 = vrot.slane %v864_v46, 1 }
  0xe5   :  { %v913_v3 = vadd.f32 %v912_v8, %v911_v25  ;;  %v933_v51 = vrot.slane %v932_v55, 2  ;;  %v5134_v5 = vadd.f32 %v851_v53, %v850_v39  ;;  %v920_v56 = vadd.f32 %v919_v62, %v918_v30  ;;  %v10967_v53 = vld [vmem:[#allocation60_spill] sm:$0xff] }
  0xe6   :  { %v927_v0 = vadd.f32 %v926_v14, %v925_v27  ;;  %v939_v45 = vadd.f32 %v938_v48, %v937_v36  ;;  %v872_v26 = vrot.slane %v871_v12, 1  ;;  %v879_v18 = vrot.slane %v878_v37, 1 }
  0xe7   :  { %v886_v2 = vrot.slane %v885_v38, 1  ;;  %v945_v29 = vrot.slane %v944_v50, 4  ;;  %v893_v6 = vrot.slane %v892_v47, 1  ;;  %v900_v16 = vrot.slane %v899_v19, 1 }
  0xe8   :  { %v907_v4 = vrot.slane %v906_v1, 1  ;;  %v951_v59 = vsel %vm10402_vm0, %v4915_v61, 0.0  ;;  %v5138_v24 = vadd.f32 %v858_v7, %v857_v22  ;;  %v5140_v35 = vadd.f32 %v865_v13, %v864_v46  ;;  %v10971_v13 = vld [vmem:[#allocation28_spill] sm:$0xff] }
  0xe9   :  { %v914_v60 = vrot.slane %v913_v3, 1  ;;  %v934_v25 = vadd.f32 %v933_v51, %v932_v55  ;;  %v921_v40 = vrot.slane %v920_v56, 1  ;;  %v928_v17 = vrot.slane %v927_v0, 1  ;;  %v10972_v51 = vld [vmem:[#allocation64_spill] sm:$0xff] }
  0xea   :  { %10958 = vst [vmem:[#allocation52_spill] sm:$0xff] %v5138_v24  ;;  %10959 = vst [vmem:[#allocation54_spill] sm:$0xff] %v5140_v35  ;;  %v940_v27 = vrot.slane %v939_v45, 2  ;;  %v958_v39 = vsel %vm10402_vm0, %v4919_v23, 0.0  ;;  %v5144_v30 = vadd.f32 %v872_v26, %v871_v12  ;;  %v5146_v44 = vadd.f32 %v879_v18, %v878_v37  ;;  %v10974_v26 = vld [vmem:[#allocation69_spill] sm:$0xff] }
  0xeb   :  { %v946_v36 = vadd.f32 %v945_v29, %v944_v50  ;;  %v952_v28 = vrot.slane %v951_v59, 4  ;;  %v5148_v31 = vadd.f32 %v886_v2, %v885_v38  ;;  %v5150_v61 = vadd.f32 %v893_v6, %v892_v47  ;;  %v10970_v50 = vld [vmem:[#allocation63_spill] sm:$0xff] }
  0xec   :  { %10960 = vst [vmem:[#allocation55_spill] sm:$0xff] %v5144_v30  ;;  %10961 = vst [vmem:[#allocation58_spill] sm:$0xff] %v5146_v44  ;;  %v5152_v22 = vadd.f32 %v900_v16, %v899_v19  ;;  %v5154_v63 = vadd.f32 %v907_v4, %v906_v1  ;;  %v5156_v46 = vadd.f32 %v914_v60, %v913_v3  ;;  %v935_v8 = vrot.slane %v934_v25, 1  ;;  %v10976_v6 = vld [vmem:[#allocation71_spill] sm:$0xff] }
  0xed   :  { %10962 = vst [vmem:[#allocation100_spill] sm:$0xff] %v5148_v31  ;;  %10963 = vst [vmem:[#allocation101_spill] sm:$0xff] %v5150_v61  ;;  %v959_v55 = vrot.slane %v958_v39, 4  ;;  %v965_v23 = vsel %vm10402_vm0, %v10967_v53, 0.0  ;;  %v5160_v62 = vadd.f32 %v921_v40, %v920_v56  ;;  %v5162_v14 = vadd.f32 %v928_v17, %v927_v0  ;;  %v10977_v53 = vld [vmem:[#allocation74_spill] sm:$0xff]  ;;  %v10982_v44 = vld [vmem:[#allocation79_spill] sm:$0xff] }
  0xee   :  { %10964 = vst [vmem:[#allocation102_spill] sm:$0xff] %v5152_v22  ;;  %10965 = vst [vmem:[#allocation103_spill] sm:$0xff] %v5154_v63  ;;  %v941_v48 = vadd.f32 %v940_v27, %v939_v45  ;;  %v972_v12 = vsel %vm10402_vm0, %v4927_v9, 0.0  ;;  %v947_v37 = vrot.slane %v946_v36, 2  ;;  %v953_v38 = vadd.f32 %v952_v28, %v951_v59 }
  0xef   :  { %10966 = vst [vmem:[#allocation104_spill] sm:$0xff] %v5156_v46  ;;  %10968 = vst [vmem:[#allocation60_spill] sm:$0xff] %v5160_v62  ;;  %v979_v47 = vsel %vm10402_vm0, %v4931_v10, 0.0  ;;  %v986_v19 = vsel %vm10402_vm0, %v4935_v11, 0.0  ;;  %v966_v1 = vrot.slane %v965_v23, 4  ;;  %v993_v7 = vsel %vm10402_vm0, %v10970_v50, 0.0 }
  0xf0   :  { %10969 = vst [vmem:[#allocation105_spill] sm:$0xff] %v5162_v14  ;;  %v1000_v3 = vsel %vm10402_vm0, %v10971_v13, 0.0  ;;  %v1007_v56 = vsel %vm10402_vm0, %v10972_v51, 0.0  ;;  %v5176_v0 = vadd.f32 %v935_v8, %v934_v25  ;;  %v960_v9 = vadd.f32 %v959_v55, %v958_v39  ;;  %v10975_v11 = vld [vmem:[#allocation70_spill] sm:$0xff] }
  0xf1   :  { %v973_v45 = vrot.slane %v972_v12, 4  ;;  %v1014_v10 = vsel %vm10402_vm0, %v10974_v26, 0.0  ;;  %v980_v18 = vrot.slane %v979_v47, 4  ;;  %v987_v2 = vrot.slane %v986_v19, 4 }
  0xf2   :  { %10973 = vst [vmem:[#allocation63_spill] sm:$0xff] %v5176_v0  ;;  %v1021_v29 = vsel %vm10402_vm0, %v10975_v11, 0.0  ;;  %v1028_v16 = vsel %vm10402_vm0, %v10976_v6, 0.0  ;;  %v942_v4 = vrot.slane %v941_v48, 1  ;;  %v994_v59 = vrot.slane %v993_v7, 4  ;;  %v10978_v11 = vld [vmem:[#allocation75_spill] sm:$0xff] }
  0xf3   :  { %v1001_v60 = vrot.slane %v1000_v3, 4  ;;  %v1008_v40 = vrot.slane %v1007_v56, 4  ;;  %v948_v17 = vadd.f32 %v947_v37, %v946_v36  ;;  %v954_v25 = vrot.slane %v953_v38, 2 }
  0xf4   :  { %v967_v27 = vadd.f32 %v966_v1, %v965_v23  ;;  %v1015_v39 = vrot.slane %v1014_v10, 4  ;;  %v961_v28 = vrot.slane %v960_v9, 2  ;;  %v1022_v8 = vrot.slane %v1021_v29, 4 }
  0xf5   :  { %v1029_v55 = vrot.slane %v1028_v16, 4  ;;  %v1035_v50 = vsel %vm10402_vm0, %v10977_v53, 0.0  ;;  %v974_v13 = vadd.f32 %v973_v45, %v972_v12  ;;  %v981_v51 = vadd.f32 %v980_v18, %v979_v47 }
  0xf6   :  { %v988_v26 = vadd.f32 %v987_v2, %v986_v19  ;;  %v1042_v6 = vsel %vm10402_vm0, %v10978_v11, 0.0  ;;  %v5188_v0 = vadd.f32 %v942_v4, %v941_v48  ;;  %v995_v14 = vadd.f32 %v994_v59, %v993_v7  ;;  %v10980_v48 = vld [vmem:[#allocation78_spill] sm:$0xff] }
  0xf7   :  { %v1002_v62 = vadd.f32 %v1001_v60, %v1000_v3  ;;  %v1009_v36 = vadd.f32 %v1008_v40, %v1007_v56  ;;  %v955_v37 = vadd.f32 %v954_v25, %v953_v38  ;;  %v968_v23 = vrot.slane %v967_v27, 2 }
  0xf8   :  { %10979 = vst [vmem:[#allocation28_spill] sm:$0xff] %v5188_v0  ;;  %v1016_v1 = vadd.f32 %v1015_v39, %v1014_v10  ;;  %v1036_v46 = vrot.slane %v1035_v50, 4  ;;  %v949_v63 = vrot.slane %v948_v17, 1  ;;  %v1023_v22 = vadd.f32 %v1022_v8, %v1021_v29 }
  0xf9   :  { %v1030_v61 = vadd.f32 %v1029_v55, %v1028_v16  ;;  %v1043_v31 = vrot.slane %v1042_v6, 4  ;;  %v962_v53 = vadd.f32 %v961_v28, %v960_v9  ;;  %v975_v12 = vrot.slane %v974_v13, 2 }
  0xfa   :  { %v982_v47 = vrot.slane %v981_v51, 2  ;;  %v989_v19 = vrot.slane %v988_v26, 2  ;;  %v996_v45 = vrot.slane %v995_v14, 2  ;;  %v1003_v18 = vrot.slane %v1002_v62, 2 }
  0xfb   :  { %v1010_v2 = vrot.slane %v1009_v36, 2  ;;  %v1049_v7 = vsel %vm10402_vm0, %v10980_v48, 0.0  ;;  %v956_v3 = vrot.slane %v955_v37, 1  ;;  %v969_v56 = vadd.f32 %v968_v23, %v967_v27 }
  0xfc   :  { %v1017_v38 = vrot.slane %v1016_v1, 2  ;;  %v1037_v4 = vadd.f32 %v1036_v46, %v1035_v50  ;;  %v5192_v10 = vadd.f32 %v949_v63, %v948_v17  ;;  %v1024_v59 = vrot.slane %v1023_v22, 2 }
  0xfd   :  { %v1031_v29 = vrot.slane %v1030_v61, 2  ;;  %v1044_v16 = vadd.f32 %v1043_v31, %v1042_v6  ;;  %v976_v60 = vadd.f32 %v975_v12, %v974_v13  ;;  %v983_v9 = vadd.f32 %v982_v47, %v981_v51 }
  0xfe   :  { %10981 = vst [vmem:[#allocation64_spill] sm:$0xff] %v5192_v10  ;;  %v990_v40 = vadd.f32 %v989_v19, %v988_v26  ;;  %v1050_v25 = vrot.slane %v1049_v7, 4  ;;  %v963_v39 = vrot.slane %v962_v53, 1  ;;  %v997_v28 = vadd.f32 %v996_v45, %v995_v14 }
  0xff   :  { %v1004_v8 = vadd.f32 %v1003_v18, %v1002_v62  ;;  %v1011_v55 = vadd.f32 %v1010_v2, %v1009_v36  ;;  %v970_v11 = vrot.slane %v969_v56, 1  ;;  %v1018_v0 = vadd.f32 %v1017_v38, %v1016_v1 }
 0x100   :  { %v1038_v48 = vrot.slane %v1037_v4, 2  ;;  %v1056_v27 = vsel %vm10402_vm0, %v10982_v44, 0.0  ;;  %v5196_v46 = vadd.f32 %v956_v3, %v955_v37  ;;  %v1025_v63 = vadd.f32 %v1024_v59, %v1023_v22  ;;  %v10986_v22 = vld [vmem:[#allocation80_spill] sm:$0xff] }
 0x101   :  { %v1032_v17 = vadd.f32 %v1031_v29, %v1030_v61  ;;  %v1045_v50 = vrot.slane %v1044_v16, 2  ;;  %v977_v31 = vrot.slane %v976_v60, 1  ;;  %v984_v13 = vrot.slane %v983_v9, 1 }
 0x102   :  { %10983 = vst [vmem:[#allocation69_spill] sm:$0xff] %v5196_v46  ;;  %v991_v51 = vrot.slane %v990_v40, 1  ;;  %v1051_v26 = vadd.f32 %v1050_v25, %v1049_v7  ;;  %v998_v6 = vrot.slane %v997_v28, 1  ;;  %v1005_v23 = vrot.slane %v1004_v8, 1 }
 0x103   :  { %v1012_v14 = vrot.slane %v1011_v55, 1  ;;  %v1057_v62 = vrot.slane %v1056_v27, 4  ;;  %v5198_v36 = vadd.f32 %v963_v39, %v962_v53  ;;  %v5200_v1 = vadd.f32 %v970_v11, %v969_v56  ;;  %v10997_v39 = vld [vmem:[#allocation82_spill] sm:$0xff]  ;;  %v10998_v11 = vld [vmem:[#allocation84_spill] sm:$0xff] }
 0x104   :  { %v1019_v12 = vrot.slane %v1018_v0, 1  ;;  %v1039_v47 = vadd.f32 %v1038_v48, %v1037_v4  ;;  %v1026_v44 = vrot.slane %v1025_v63, 1  ;;  %v1033_v37 = vrot.slane %v1032_v17, 1  ;;  %v10999_v48 = vld [vmem:[#allocation85_spill] sm:$0xff] }
 0x105   :  { %10984 = vst [vmem:[#allocation70_spill] sm:$0xff] %v5198_v36  ;;  %10985 = vst [vmem:[#allocation71_spill] sm:$0xff] %v5200_v1  ;;  %v1046_v19 = vadd.f32 %v1045_v50, %v1044_v16  ;;  %v1063_v61 = vsel %vm10402_vm0, %v10986_v22, 0.0  ;;  %v5204_v45 = vadd.f32 %v977_v31, %v976_v60  ;;  %v5206_v18 = vadd.f32 %v984_v13, %v983_v9  ;;  %v10994_v16 = vld [vmem:[#allocation81_spill] sm:$0xff] }
 0x106   :  { %v5208_v2 = vadd.f32 %v991_v51, %v990_v40  ;;  %v1052_v7 = vrot.slane %v1051_v26, 2  ;;  %v5210_v3 = vadd.f32 %v998_v6, %v997_v28  ;;  %v5212_v53 = vadd.f32 %v1005_v23, %v1004_v8  ;;  %v11002_v51 = vld [vmem:[#allocation88_spill] sm:$0xff] }
 0x107   :  { %10987 = vst [vmem:[#allocation74_spill] sm:$0xff] %v5204_v45  ;;  %10988 = vst [vmem:[#allocation75_spill] sm:$0xff] %v5206_v18  ;;  %v5214_v56 = vadd.f32 %v1012_v14, %v1011_v55  ;;  %v1058_v38 = vadd.f32 %v1057_v62, %v1056_v27  ;;  %v5216_v4 = vadd.f32 %v1019_v12, %v1018_v0  ;;  %v1040_v59 = vrot.slane %v1039_v47, 1  ;;  %v11000_v27 = vld [vmem:[#allocation86_spill] sm:$0xff]  ;;  %v11004_v62 = vld [vmem:[#allocation89_spill] sm:$0xff] }
 0x108   :  { %10989 = vst [vmem:[#allocation78_spill] sm:$0xff] %v5208_v2  ;;  %10990 = vst [vmem:[#allocation79_spill] sm:$0xff] %v5210_v3  ;;  %v1064_v29 = vrot.slane %v1063_v61, 4  ;;  %v1070_v60 = vsel %vm10402_vm0, %v10994_v16, 0.0  ;;  %v5220_v25 = vadd.f32 %v1026_v44, %v1025_v63  ;;  %v5222_v9 = vadd.f32 %v1033_v37, %v1032_v17  ;;  %v11001_v63 = vld [vmem:[#allocation87_spill] sm:$0xff] }
 0x109   :  { %10991 = vst [vmem:[#allocation80_spill] sm:$0xff] %v5212_v53  ;;  %10992 = vst [vmem:[#allocation106_spill] sm:$0xff] %v5214_v56  ;;  %v1047_v40 = vrot.slane %v1046_v19, 1  ;;  %v1077_v28 = vsel %vm10402_vm0, %v10997_v39, 0.0  ;;  %v1053_v8 = vadd.f32 %v1052_v7, %v1051_v26  ;;  %v1084_v55 = vsel %vm10402_vm0, %v10998_v11, 0.0  ;;  %v11005_v7 = vld [vmem:[#allocation90_spill] sm:$0xff] }
 0x10a   :  { %10993 = vst [vmem:[#allocation107_spill] sm:$0xff] %v5216_v4  ;;  %10995 = vst [vmem:[#allocation81_spill] sm:$0xff] %v5220_v25  ;;  %v1091_v0 = vsel %vm10402_vm0, %v10999_v48, 0.0  ;;  %v1098_v50 = vsel %vm10402_vm0, %v11000_v27, 0.0  ;;  %v1059_v31 = vrot.slane %v1058_v38, 2  ;;  %v1071_v13 = vrot.slane %v1070_v60, 4 }
 0x10b   :  { %10996 = vst [vmem:[#allocation108_spill] sm:$0xff] %v5222_v9  ;;  %v1105_v17 = vsel %vm10402_vm0, %v11001_v63, 0.0  ;;  %v1112_v6 = vsel %vm10402_vm0, %v11002_v51, 0.0  ;;  %v5236_v23 = vadd.f32 %v1040_v59, %v1039_v47  ;;  %v1065_v26 = vadd.f32 %v1064_v29, %v1063_v61  ;;  %v11007_v27 = vld [vmem:[#allocation91_spill] sm:$0xff]  ;;  %v11008_v29 = vld [vmem:[#allocation92_spill] sm:$0xff]  ;;  %v11009_v9 = vld [vmem:[#allocation93_spill] sm:$0xff] }
 0x10c   :  { %v1078_v14 = vrot.slane %v1077_v28, 4  ;;  %v1119_v12 = vsel %vm10402_vm0, %v11004_v62, 0.0  ;;  %v1085_v44 = vrot.slane %v1084_v55, 4  ;;  %v1092_v37 = vrot.slane %v1091_v0, 4  ;;  %v11010_v4 = vld [vmem:[#allocation94_spill] sm:$0xff] }
 0x10d   :  { %11003 = vst [vmem:[#allocation82_spill] sm:$0xff] %v5236_v23  ;;  %v1099_v22 = vrot.slane %v1098_v50, 4  ;;  %v1126_v16 = vsel %vm10402_vm0, %v11005_v7, 0.0  ;;  %v5242_v39 = vadd.f32 %v1047_v40, %v1046_v19  ;;  %v1106_v11 = vrot.slane %v1105_v17, 4 }
 0x10e   :  { %v1113_v48 = vrot.slane %v1112_v6, 4  ;;  %v1133_v63 = vsel %vm10402_vm0, %v11007_v27, 0.0  ;;  %v1054_v47 = vrot.slane %v1053_v8, 1  ;;  %v1072_v59 = vadd.f32 %v1071_v13, %v1070_v60  ;;  %v11011_v60 = vld [vmem:[#allocation95_spill] sm:$0xff] }
 0x10f   :  { %11006 = vst [vmem:[#allocation84_spill] sm:$0xff] %v5242_v39  ;;  %v1120_v61 = vrot.slane %v1119_v12, 4  ;;  %v1140_v51 = vsel %vm10402_vm0, %v11008_v29, 0.0  ;;  %v1079_v62 = vadd.f32 %v1078_v14, %v1077_v28  ;;  %v1127_v23 = vrot.slane %v1126_v16, 4 }
 0x110   :  { %v1147_v25 = vsel %vm10402_vm0, %v11009_v9, 0.0  ;;  %v1154_v19 = vsel %vm10402_vm0, %v11010_v4, 0.0  ;;  %v1086_v40 = vadd.f32 %v1085_v44, %v1084_v55  ;;  %v1093_v7 = vadd.f32 %v1092_v37, %v1091_v0 }
 0x111   :  { %v1100_v39 = vadd.f32 %v1099_v22, %v1098_v50  ;;  %v1134_v56 = vrot.slane %v1133_v63, 4  ;;  %v1107_v53 = vadd.f32 %v1106_v11, %v1105_v17  ;;  %v1114_v27 = vadd.f32 %v1113_v48, %v1112_v6 }
 0x112   :  { %v1141_v3 = vrot.slane %v1140_v51, 4  ;;  %v1161_v13 = vsel %vm10402_vm0, %v11011_v60, 0.0  ;;  %v1060_v2 = vadd.f32 %v1059_v31, %v1058_v38  ;;  %v1121_v29 = vadd.f32 %v1120_v61, %v1119_v12 }
 0x113   :  { %v1148_v28 = vrot.slane %v1147_v25, 4  ;;  %v1155_v14 = vrot.slane %v1154_v19, 4  ;;  %v1066_v18 = vrot.slane %v1065_v26, 2  ;;  %v1073_v45 = vrot.slane %v1072_v59, 2 }
 0x114   :  { %v1080_v9 = vrot.slane %v1079_v62, 2  ;;  %v1128_v1 = vadd.f32 %v1127_v23, %v1126_v16  ;;  %v1087_v36 = vrot.slane %v1086_v40, 2  ;;  %v1094_v4 = vrot.slane %v1093_v7, 2 }
 0x115   :  { %v1135_v55 = vadd.f32 %v1134_v56, %v1133_v63  ;;  %v1162_v0 = vrot.slane %v1161_v13, 4  ;;  %v1101_v50 = vrot.slane %v1100_v39, 2  ;;  %v1108_v44 = vrot.slane %v1107_v53, 2 }
 0x116   :  { %v1115_v17 = vrot.slane %v1114_v27, 2  ;;  %v1142_v6 = vadd.f32 %v1141_v3, %v1140_v51  ;;  %v5254_v37 = vadd.f32 %v1054_v47, %v1053_v8  ;;  %v1122_v22 = vrot.slane %v1121_v29, 2 }
 0x117   :  { %v1149_v11 = vadd.f32 %v1148_v28, %v1147_v25  ;;  %v1156_v38 = vadd.f32 %v1155_v14, %v1154_v19  ;;  %v1067_v31 = vadd.f32 %v1066_v18, %v1065_v26  ;;  %v1074_v12 = vadd.f32 %v1073_v45, %v1072_v59 }
 0x118   :  { %v1081_v48 = vadd.f32 %v1080_v9, %v1079_v62  ;;  %v1129_v61 = vrot.slane %v1128_v1, 2  ;;  %v1088_v60 = vadd.f32 %v1087_v36, %v1086_v40  ;;  %v1095_v46 = vadd.f32 %v1094_v4, %v1093_v7 }
 0x119   :  { %v1136_v23 = vrot.slane %v1135_v55, 2  ;;  %v1163_v16 = vadd.f32 %v1162_v0, %v1161_v13  ;;  %v1102_v10 = vadd.f32 %v1101_v50, %v1100_v39  ;;  %v1109_v56 = vadd.f32 %v1108_v44, %v1107_v53 }
 0x11a   :  { %v1116_v63 = vadd.f32 %v1115_v17, %v1114_v27  ;;  %v1143_v30 = vrot.slane %v1142_v6, 2  ;;  %v1061_v35 = vrot.slane %v1060_v2, 1  ;;  %v1123_v24 = vadd.f32 %v1122_v22, %v1121_v29 }
 0x11b   :  { %v1150_v3 = vrot.slane %v1149_v11, 2  ;;  %v1157_v8 = vrot.slane %v1156_v38, 2  ;;  %v1068_v47 = vrot.slane %v1067_v31, 1  ;;  %v1075_v51 = vrot.slane %v1074_v12, 1 }
 0x11c   :  { %v1082_v25 = vrot.slane %v1081_v48, 1  ;;  %v1130_v19 = vadd.f32 %v1129_v61, %v1128_v1  ;;  %v1089_v18 = vrot.slane %v1088_v60, 1  ;;  %v1096_v45 = vrot.slane %v1095_v46, 1 }
 0x11d   :  { %v1137_v26 = vadd.f32 %v1136_v23, %v1135_v55  ;;  %v1164_v59 = vrot.slane %v1163_v16, 2  ;;  %v1103_v36 = vrot.slane %v1102_v10, 1  ;;  %v1110_v62 = vrot.slane %v1109_v56, 1 }
 0x11e   :  { %v1117_v40 = vrot.slane %v1116_v63, 1  ;;  %v1144_v7 = vadd.f32 %v1143_v30, %v1142_v6  ;;  %v5256_v39 = vadd.f32 %v1061_v35, %v1060_v2  ;;  %v1124_v53 = vrot.slane %v1123_v24, 1 }
 0x11f   :  { %v1151_v27 = vadd.f32 %v1150_v3, %v1149_v11  ;;  %v1158_v13 = vadd.f32 %v1157_v8, %v1156_v38  ;;  %v5258_v29 = vadd.f32 %v1068_v47, %v1067_v31  ;;  %v5260_v28 = vadd.f32 %v1075_v51, %v1074_v12 }
 0x120   :  { %v5262_v14 = vadd.f32 %v1082_v25, %v1081_v48  ;;  %v1131_v1 = vrot.slane %v1130_v19, 1  ;;  %v5264_v9 = vadd.f32 %v1089_v18, %v1088_v60  ;;  %v5266_v4 = vadd.f32 %v1096_v45, %v1095_v46  ;;  %v11016_v25 = vld [vmem:[#allocation52_spill] sm:$0xff]  ;;  %v11017_v18 = vld [vmem:[#allocation54_spill] sm:$0xff] }
 0x121   :  { %v1138_v55 = vrot.slane %v1137_v26, 1  ;;  %v1165_v0 = vadd.f32 %v1164_v59, %v1163_v16  ;;  %v5268_v50 = vadd.f32 %v1103_v36, %v1102_v10  ;;  %v5270_v35 = vadd.f32 %v1110_v62, %v1109_v56  ;;  %v11013_v56 = vld [vmem:[#allocation97_spill] sm:$0xff] }
 0x122   :  { %v5272_v30 = vadd.f32 %v1117_v40, %v1116_v63  ;;  %v1145_v2 = vrot.slane %v1144_v7, 1  ;;  %v5274_v44 = vadd.f32 %v1124_v53, %v1123_v24  ;;  %v1152_v17 = vrot.slane %v1151_v27, 1  ;;  %v11023_v53 = vld [vmem:[#allocation103_spill] sm:$0xff] }
 0x123   :  { %v1159_v6 = vrot.slane %v1158_v13, 1  ;;  %v1168_v22 = vmul.f32 0.125, %v5064_v34  ;;  %v5277_v11 = vadd.f32 %v1131_v1, %v1130_v19  ;;  %v1169_v46 = vmul.f32 0.125, %v5070_v57 }
 0x124   :  { %v1170_v38 = vmul.f32 0.125, %v5072_v54  ;;  %v1171_v10 = vmul.f32 0.125, %v5074_v49  ;;  %v5282_v31 = vadd.f32 %v1138_v55, %v1137_v26  ;;  %v1166_v12 = vrot.slane %v1165_v0, 1  ;;  %v11018_v26 = vld [vmem:[#allocation55_spill] sm:$0xff]  ;;  %v11025_v55 = vld [vmem:[#allocation60_spill] sm:$0xff] }
 0x125   :  { %v1172_v48 = vmul.f32 0.125, %v5076_v58  ;;  %v1173_v24 = vmul.f32 0.125, %v5078_v43  ;;  %v5286_v61 = vadd.f32 %v1145_v2, %v1144_v7  ;;  %v1174_v60 = vmul.f32 0.125, %v5080_v41  ;;  %v11012_v58 = vld [vmem:[#allocation96_spill] sm:$0xff]  ;;  %v11014_v41 = vld [vmem:[#allocation98_spill] sm:$0xff]  ;;  %v11026_v2 = vld [vmem:[#allocation105_spill] sm:$0xff] }
 0x126   :  { %v1175_v34 = vmul.f32 0.125, %v5084_v42  ;;  %v1176_v23 = vmul.f32 0.125, %v5088_v15  ;;  %v5291_v57 = vadd.f32 %v1152_v17, %v1151_v27  ;;  %v5293_v54 = vadd.f32 %v1159_v6, %v1158_v13  ;;  %v11015_v15 = vld [vmem:[#allocation99_spill] sm:$0xff]  ;;  %v11024_v13 = vld [vmem:[#allocation104_spill] sm:$0xff] }
 0x127   :  { %v5296_v49 = vmul.f32 0.125, %v5090_v20  ;;  %v5299_v16 = vmul.f32 0.125, %v5092_v32  ;;  %v5302_v43 = vmul.f32 0.125, %v11012_v58  ;;  %v5305_v63 = vmul.f32 0.125, %v11013_v56  ;;  %v11027_v6 = vld [vmem:[#allocation63_spill] sm:$0xff]  ;;  %v11028_v58 = vld [vmem:[#allocation28_spill] sm:$0xff] }
 0x128   :  { %v5308_v42 = vmul.f32 0.125, %v11014_v41  ;;  %v5311_v3 = vmul.f32 0.125, %v11015_v15  ;;  %v5313_v8 = vadd.f32 %v1166_v12, %v1165_v0  ;;  %v5316_v20 = vmul.f32 0.125, %v5124_v33  ;;  %v11019_v33 = vld [vmem:[#allocation58_spill] sm:$0xff]  ;;  %v11029_v41 = vld [vmem:[#allocation64_spill] sm:$0xff] }
 0x129   :  { %v5319_v32 = vmul.f32 0.125, %v5128_v52  ;;  %v5322_v47 = vmul.f32 0.125, %v5130_v21  ;;  %v5325_v51 = vmul.f32 0.125, %v5134_v5  ;;  %v5328_v19 = vmul.f32 0.125, %v11016_v25  ;;  %v11020_v52 = vld [vmem:[#allocation100_spill] sm:$0xff]  ;;  %v11021_v21 = vld [vmem:[#allocation101_spill] sm:$0xff] }
 0x12a   :  { %v5331_v45 = vmul.f32 0.125, %v11017_v18  ;;  %v5334_v59 = vmul.f32 0.125, %v11018_v26  ;;  %v5337_v36 = vmul.f32 0.125, %v11019_v33  ;;  %v5340_v62 = vmul.f32 0.125, %v11020_v52  ;;  %v11022_v5 = vld [vmem:[#allocation102_spill] sm:$0xff]  ;;  %v11031_v25 = vld [vmem:[#allocation69_spill] sm:$0xff] }
 0x12b   :  { %v5343_v40 = vmul.f32 0.125, %v11021_v21  ;;  %v5346_v7 = vmul.f32 0.125, %v11022_v5  ;;  %v5349_v27 = vmul.f32 0.125, %v11023_v53  ;;  %v5352_v1 = vmul.f32 0.125, %v11024_v13  ;;  %v11033_v26 = vld [vmem:[#allocation70_spill] sm:$0xff]  ;;  %v11035_v52 = vld [vmem:[#allocation71_spill] sm:$0xff] }
 0x12c   :  { %v5355_v0 = vmul.f32 0.125, %v11025_v55  ;;  %v5358_v17 = vmul.f32 0.125, %v11026_v2  ;;  %v5361_v12 = vmul.f32 0.125, %v11027_v6  ;;  %v5364_v56 = vmul.f32 0.125, %v11028_v58  ;;  %v11037_v5 = vld [vmem:[#allocation74_spill] sm:$0xff]  ;;  %v11039_v55 = vld [vmem:[#allocation75_spill] sm:$0xff] }
 0x12d   :  { %v5367_v15 = vmul.f32 0.125, %v11029_v41  ;;  %v5370_v18 = vmul.f32 0.125, %v11031_v25  ;;  %v5373_v33 = vmul.f32 0.125, %v11033_v26  ;;  %v5376_v21 = vmul.f32 0.125, %v11035_v52  ;;  %v11041_v6 = vld [vmem:[#allocation78_spill] sm:$0xff]  ;;  %v11043_v41 = vld [vmem:[#allocation79_spill] sm:$0xff] }
 0x12e   :  { %v5379_v53 = vmul.f32 0.125, %v11037_v5  ;;  %v1232_v13 = vadd.f32 1e-05, %v1168_v22  ;;  %v5382_v2 = vmul.f32 0.125, %v11039_v55  ;;  %v5385_v58 = vmul.f32 0.125, %v11041_v6 }
 0x12f   :  { %11030 = vst [vmem:[#allocation85_spill] sm:$0xff] %v5367_v15  ;;  %11032 = vst [vmem:[#allocation86_spill] sm:$0xff] %v5370_v18  ;;  %v5388_v15 = vmul.f32 0.125, %v11043_v41  ;;  %v1233_v25 = vadd.f32 1e-05, %v1169_v46  ;;  %v11045_v18 = vld [vmem:[#allocation80_spill] sm:$0xff] }
 0x130   :  { %11034 = vst [vmem:[#allocation87_spill] sm:$0xff] %v5373_v33  ;;  %11036 = vst [vmem:[#allocation88_spill] sm:$0xff] %v5376_v21  ;;  %v5391_v26 = vmul.f32 0.125, %v11045_v18  ;;  %v11046_v33 = vld [vmem:[#allocation106_spill] sm:$0xff]  ;;  %v11048_v21 = vld [vmem:[#allocation107_spill] sm:$0xff]  ;;  %3363 = vrsqrt.f32 %v1232_v13 }
 0x131   :  { %11038 = vst [vmem:[#allocation89_spill] sm:$0xff] %v5379_v53  ;;  %11040 = vst [vmem:[#allocation90_spill] sm:$0xff] %v5382_v2  ;;  %v5394_v52 = vmul.f32 0.125, %v11046_v33  ;;  %v5397_v5 = vmul.f32 0.125, %v11048_v21  ;;  %v1234_v22 = vadd.f32 1e-05, %v1170_v38  ;;  %3365 = vrsqrt.f32 %v1233_v25 }
 0x132   :  { %11042 = vst [vmem:[#allocation91_spill] sm:$0xff] %v5385_v58  ;;  %11044 = vst [vmem:[#allocation92_spill] sm:$0xff] %v5388_v15  ;;  %v11049_v53 = vld [vmem:[#allocation81_spill] sm:$0xff]  ;;  %v11050_v2 = vld [vmem:[#allocation108_spill] sm:$0xff]  ;;  %v1235_v46 = vadd.f32 1e-05, %v1171_v10 }
 0x133   :  { %11047 = vst [vmem:[#allocation93_spill] sm:$0xff] %v5394_v52  ;;  %v5400_v55 = vmul.f32 0.125, %v11049_v53  ;;  %v5403_v6 = vmul.f32 0.125, %v11050_v2  ;;  %v11051_v58 = vld [vmem:[#allocation82_spill] sm:$0xff]  ;;  %v11052_v15 = vld [vmem:[#allocation84_spill] sm:$0xff]  ;;  %v5412_v33 = vmul.f32 0.125, %v5254_v37  ;;  %3367 = vrsqrt.f32 %v1234_v22 }
 0x134   :  { %v5406_v41 = vmul.f32 0.125, %v11051_v58  ;;  %v5409_v18 = vmul.f32 0.125, %v11052_v15  ;;  %v1236_v52 = vadd.f32 1e-05, %v1172_v48  ;;  %v5415_v38 = vmul.f32 0.125, %v5256_v39 }
 0x135   :  { %v5418_v21 = vmul.f32 0.125, %v5258_v29  ;;  %v1237_v53 = vadd.f32 1e-05, %v1173_v24  ;;  %v5421_v2 = vmul.f32 0.125, %v5260_v28  ;;  %v5424_v10 = vmul.f32 0.125, %v5262_v14 }
 0x136   :  { %v1238_v15 = vadd.f32 1e-05, %v1174_v60  ;;  %v5427_v37 = vmul.f32 0.125, %v5264_v9  ;;  %v5430_v48 = vmul.f32 0.125, %v5266_v4  ;;  %v1239_v39 = vadd.f32 1e-05, %v1175_v34 }
 0x137   :  { %3369 = vrsqrt.f32 %v1235_v46  ;;  %v5433_v29 = vmul.f32 0.125, %v5268_v50  ;;  %v5436_v24 = vmul.f32 0.125, %v5270_v35  ;;  %v1240_v28 = vadd.f32 1e-05, %v1176_v23  ;;  %v11054_v22 = vld [vmem:[#allocation86_spill] sm:$0xff] }
 0x138   :  { %3371 = vrsqrt.f32 %v1236_v52  ;;  %v5439_v14 = vmul.f32 0.125, %v5272_v30  ;;  %v5442_v60 = vmul.f32 0.125, %v5274_v44  ;;  %v1241_v9 = vadd.f32 1e-05, %v5296_v49 }
 0x139   :  { %3373 = vrsqrt.f32 %v1237_v53  ;;  %v5446_v4 = vmul.f32 0.125, %v5277_v11  ;;  %v5449_v50 = vmul.f32 0.125, %v5282_v31  ;;  %v1242_v35 = vadd.f32 1e-05, %v5299_v16 }
 0x13a   :  { %3375 = vrsqrt.f32 %v1238_v15  ;;  %v5453_v34 = vmul.f32 0.125, %v5286_v61  ;;  %v5456_v30 = vmul.f32 0.125, %v5291_v57  ;;  %v1243_v44 = vadd.f32 1e-05, %v5302_v43  ;;  %v5469_v57 = vpop.eup %3363 }
 0x13b   :  { %3377 = vrsqrt.f32 %v1239_v39  ;;  %v5460_v23 = vmul.f32 0.125, %v5293_v54  ;;  %v5463_v11 = vmul.f32 0.125, %v5313_v8  ;;  %v1244_v31 = vadd.f32 1e-05, %v5305_v63  ;;  %v5474_v8 = vpop.eup %3365  ;;  %v11057_v39 = vld [vmem:[#allocation89_spill] sm:$0xff] }
 0x13c   :  { %3379 = vrsqrt.f32 %v1240_v28  ;;  %v1245_v49 = vadd.f32 1e-05, %v5308_v42  ;;  %v1246_v61 = vadd.f32 1e-05, %v5311_v3  ;;  %v1247_v16 = vadd.f32 1e-05, %v5316_v20 }
 0x13d   :  { %3381 = vrsqrt.f32 %v1241_v9  ;;  %v1248_v43 = vadd.f32 1e-05, %v5319_v32  ;;  %v1249_v54 = vadd.f32 1e-05, %v5322_v47  ;;  %v1250_v13 = vadd.f32 1e-05, %v5325_v51  ;;  %v5479_v20 = vpop.eup %3367 }
 0x13e   :  { %3383 = vrsqrt.f32 %v1242_v35  ;;  %v1251_v63 = vadd.f32 1e-05, %v5328_v19  ;;  %v1252_v42 = vadd.f32 1e-05, %v5331_v45  ;;  %v1253_v3 = vadd.f32 1e-05, %v5334_v59 }
 0x13f   :  { %3385 = vrsqrt.f32 %v1243_v44  ;;  %v1254_v58 = vadd.f32 1e-05, %v5337_v36  ;;  %v1255_v32 = vadd.f32 1e-05, %v5340_v62  ;;  %v1256_v47 = vadd.f32 1e-05, %v5343_v40 }
 0x140   :  { %3387 = vrsqrt.f32 %v1244_v31  ;;  %v1257_v25 = vadd.f32 1e-05, %v5346_v7  ;;  %v5488_v19 = vadd.f32 1e-05, %v5349_v27  ;;  %v5491_v45 = vadd.f32 1e-05, %v5352_v1 }
 0x141   :  { %v5484_v51 = vpop.eup %3369  ;;  %3389 = vrsqrt.f32 %v1245_v49  ;;  %v5496_v36 = vadd.f32 1e-05, %v5355_v0  ;;  %v5499_v62 = vadd.f32 1e-05, %v5358_v17  ;;  %v5502_v40 = vadd.f32 1e-05, %v5361_v12 }
 0x142   :  { %v5493_v59 = vpop.eup %3371  ;;  %3391 = vrsqrt.f32 %v1246_v61  ;;  %v5507_v27 = vadd.f32 1e-05, %v5364_v56  ;;  %v11053_v1 = vld [vmem:[#allocation85_spill] sm:$0xff]  ;;  %v5513_v46 = vadd.f32 1e-05, %v11054_v22  ;;  %v11055_v17 = vld [vmem:[#allocation87_spill] sm:$0xff] }
 0x143   :  { %v5504_v7 = vpop.eup %3373  ;;  %v5510_v52 = vadd.f32 1e-05, %v11053_v1  ;;  %3393 = vrsqrt.f32 %v1247_v16  ;;  %v5518_v53 = vadd.f32 1e-05, %v11055_v17  ;;  %v11056_v12 = vld [vmem:[#allocation88_spill] sm:$0xff]  ;;  %v11058_v9 = vld [vmem:[#allocation90_spill] sm:$0xff] }
 0x144   :  { %v5515_v0 = vpop.eup %3375  ;;  %v5521_v15 = vadd.f32 1e-05, %v11056_v12  ;;  %v5524_v28 = vadd.f32 1e-05, %v11057_v39  ;;  %3395 = vrsqrt.f32 %v1248_v43  ;;  %v5527_v35 = vadd.f32 1e-05, %v11058_v9 }
 0x145   :  { %v3378_v56 = vpop.eup %3377  ;;  %v11059_v44 = vld [vmem:[#allocation91_spill] sm:$0xff]  ;;  %v11060_v49 = vld [vmem:[#allocation92_spill] sm:$0xff]  ;;  %3397 = vrsqrt.f32 %v1249_v54  ;;  %v5536_v1 = vadd.f32 1e-05, %v5391_v26  ;;  %v11061_v22 = vld [vmem:[#allocation93_spill] sm:$0xff] }
 0x146   :  { %v5530_v31 = vadd.f32 1e-05, %v11059_v44  ;;  %v5533_v61 = vadd.f32 1e-05, %v11060_v49  ;;  %v3380_v16 = vpop.eup %3379  ;;  %v5539_v17 = vadd.f32 1e-05, %v11061_v22  ;;  %3399 = vrsqrt.f32 %v1250_v13 }
 0x147   :  { %v5542_v43 = vadd.f32 1e-05, %v5397_v5  ;;  %v3382_v12 = vpop.eup %3381  ;;  %v5545_v39 = vadd.f32 1e-05, %v5400_v55  ;;  %v5548_v9 = vadd.f32 1e-05, %v5403_v6  ;;  %3401 = vrsqrt.f32 %v1251_v63 }
 0x148   :  { %v5551_v54 = vadd.f32 1e-05, %v5406_v41  ;;  %v3384_v26 = vpop.eup %3383  ;;  %v5554_v44 = vadd.f32 1e-05, %v5409_v18  ;;  %v5557_v49 = vadd.f32 1e-05, %v5412_v33  ;;  %3403 = vrsqrt.f32 %v1252_v42 }
 0x149   :  { %v5560_v5 = vadd.f32 1e-05, %v5415_v38  ;;  %v3386_v55 = vpop.eup %3385  ;;  %v5563_v13 = vadd.f32 1e-05, %v5418_v21  ;;  %v5566_v6 = vadd.f32 1e-05, %v5421_v2  ;;  %3405 = vrsqrt.f32 %v1253_v3 }
 0x14a   :  { %v5569_v41 = vadd.f32 1e-05, %v5424_v10  ;;  %v3388_v18 = vpop.eup %3387  ;;  %v5572_v63 = vadd.f32 1e-05, %v5427_v37  ;;  %v5575_v33 = vadd.f32 1e-05, %v5430_v48  ;;  %3407 = vrsqrt.f32 %v1254_v58 }
 0x14b   :  { %v5578_v38 = vadd.f32 1e-05, %v5433_v29  ;;  %v3390_v21 = vpop.eup %3389  ;;  %v5581_v42 = vadd.f32 1e-05, %v5436_v24  ;;  %v5584_v2 = vadd.f32 1e-05, %v5439_v14  ;;  %3409 = vrsqrt.f32 %v1255_v32 }
 0x14c   :  { %v5587_v10 = vadd.f32 1e-05, %v5442_v60  ;;  %v3392_v37 = vpop.eup %3391  ;;  %v5590_v3 = vadd.f32 1e-05, %v5446_v4  ;;  %v5593_v48 = vadd.f32 1e-05, %v5449_v50  ;;  %3411 = vrsqrt.f32 %v1256_v47 }
 0x14d   :  { %11062 = vst [vmem:[#allocation94_spill] sm:$0xff] %v5584_v2  ;;  %v5596_v29 = vadd.f32 1e-05, %v5453_v34  ;;  %v3394_v24 = vpop.eup %3393  ;;  %v5599_v58 = vadd.f32 1e-05, %v5456_v30  ;;  %3413 = vrsqrt.f32 %v1257_v25  ;;  %v11070_v50 = vld [vmem:[#allocation31_spill] sm:$0xff] }
 0x14e   :  { %11063 = vst [vmem:[#allocation95_spill] sm:$0xff] %v5587_v10  ;;  %11064 = vst [vmem:[#allocation96_spill] sm:$0xff] %v5590_v3  ;;  %v5602_v14 = vadd.f32 1e-05, %v5460_v23  ;;  %v5605_v60 = vadd.f32 1e-05, %v5463_v11  ;;  %v3396_v4 = vpop.eup %3395  ;;  %3415 = vrsqrt.f32 %v5488_v19  ;;  %v1360_v32 = vmul.f32 %v5469_v57, %v11070_v50 }
 0x14f   :  { %11065 = vst [vmem:[#allocation97_spill] sm:$0xff] %v5593_v48  ;;  %11066 = vst [vmem:[#allocation98_spill] sm:$0xff] %v5596_v29  ;;  %v11071_v34 = vld [vmem:[#allocation32_spill] sm:$0xff]  ;;  %v11072_v22 = vld [vmem:[#allocation35_spill] sm:$0xff]  ;;  %v5614_v29 = vpop.permute.xlu0 %1427  ;;  %3417 = vrsqrt.f32 %v5491_v45 }
 0x150   :  { %11067 = vst [vmem:[#allocation99_spill] sm:$0xff] %v5599_v58  ;;  %11068 = vst [vmem:[#allocation52_spill] sm:$0xff] %v5602_v14  ;;  %v1361_v47 = vmul.f32 %v5474_v8, %v11071_v34  ;;  %v1362_v30 = vmul.f32 %v5479_v20, %v11072_v22  ;;  %v3398_v58 = vpop.eup %3397  ;;  %v11074_v23 = vld [vmem:[#allocation36_spill] sm:$0xff]  ;;  %v11075_v25 = vld [vmem:[#allocation37_spill] sm:$0xff]  ;;  %3419 = vrsqrt.f32 %v5496_v36 }
 0x151   :  { %11069 = vst [vmem:[#allocation54_spill] sm:$0xff] %v5605_v60  ;;  %11073 = vst [vmem:[#allocation55_spill] sm:$0xff] %v5614_v29  ;;  %v1363_v11 = vmul.f32 %v5484_v51, %v11074_v23  ;;  %v1364_v19 = vmul.f32 %v5493_v59, %v11075_v25  ;;  %v11076_v60 = vld [vmem:[#allocation38_spill] sm:$0xff]  ;;  %v3400_v50 = vpop.eup %3399  ;;  %v11078_v34 = vld [vmem:[#allocation43_spill] sm:$0xff]  ;;  %3421 = vrsqrt.f32 %v5499_v62 }
 0x152   :  { %v1365_v57 = vmul.f32 %v5504_v7, %v11076_v60  ;;  %v11077_v8 = vld [vmem:[#allocation42_spill] sm:$0xff]  ;;  %v1367_v22 = vmul.f32 %v3378_v56, %v11078_v34  ;;  %v3402_v45 = vpop.eup %3401  ;;  %v11080_v51 = vld [vmem:[#allocation49_spill] sm:$0xff]  ;;  %v11081_v3 = vld [vmem:[#allocation51_spill] sm:$0xff]  ;;  %3423 = vrsqrt.f32 %v5502_v40  ;;  %v5636_v56 = vmul.f32 %v5614_v29, %v1360_v32 }
 0x153   :  { %v1366_v20 = vmul.f32 %v5515_v0, %v11077_v8  ;;  %v11079_v14 = vld [vmem:[#allocation46_spill] sm:$0xff]  ;;  %v1369_v23 = vmul.f32 %v3382_v12, %v11080_v51  ;;  %v1370_v59 = vmul.f32 %v3384_v26, %v11081_v3  ;;  %v11082_v25 = vld [vmem:[#allocation53_spill] sm:$0xff]  ;;  %v3404_v7 = vpop.eup %3403  ;;  %v11083_v36 = vld [vmem:[#allocation56_spill] sm:$0xff]  ;;  %3425 = vrsqrt.f32 %v5507_v27 }
 0x154   :  { %v1368_v48 = vmul.f32 %v3380_v16, %v11079_v14  ;;  %v1371_v10 = vmul.f32 %v3386_v55, %v11082_v25  ;;  %v1372_v60 = vmul.f32 %v3388_v18, %v11083_v36  ;;  %v11084_v2 = vld [vmem:[#allocation57_spill] sm:$0xff]  ;;  %v3406_v16 = vpop.eup %3405  ;;  %v11085_v62 = vld [vmem:[#allocation59_spill] sm:$0xff]  ;;  %v5641_v12 = vmul.f32 %v5614_v29, %v1361_v47 }
 0x155   :  { %v1373_v0 = vmul.f32 %v3390_v21, %v11084_v2  ;;  %v1374_v14 = vmul.f32 %v3392_v37, %v11085_v62  ;;  %v5644_v26 = vmul.f32 %v5614_v29, %v1362_v30  ;;  %v3408_v55 = vpop.eup %3407  ;;  %3427 = vrsqrt.f32 %v5510_v52  ;;  %v11086_v40 = vld [vmem:[#allocation61_spill] sm:$0xff]  ;;  %v11087_v37 = vld [vmem:[#allocation62_spill] sm:$0xff] }
 0x156   :  { %v1375_v18 = vmul.f32 %v3394_v24, %v11086_v40  ;;  %v5649_v21 = vmul.f32 %v5614_v29, %v1363_v11  ;;  %v5652_v2 = vmul.f32 %v5614_v29, %v1364_v19  ;;  %v3410_v27 = vpop.eup %3409  ;;  %3429 = vrsqrt.f32 %v5513_v46  ;;  %v11088_v24 = vld [vmem:[#allocation65_spill] sm:$0xff] }
 0x157   :  { %v1376_v3 = vmul.f32 %v3396_v4, %v11087_v37  ;;  %v5657_v32 = vmul.f32 %v5614_v29, %v1365_v57  ;;  %v5660_v47 = vmul.f32 %v5614_v29, %v1366_v20  ;;  %v3412_v52 = vpop.eup %3411  ;;  %3431 = vrsqrt.f32 %v5518_v53  ;;  %v11089_v4 = vld [vmem:[#allocation66_spill] sm:$0xff] }
 0x158   :  { %v1377_v30 = vmul.f32 %v3398_v58, %v11088_v24  ;;  %v5665_v11 = vmul.f32 %v5614_v29, %v1367_v22  ;;  %v5668_v19 = vmul.f32 %v5614_v29, %v1368_v48  ;;  %v3414_v46 = vpop.eup %3413  ;;  %3433 = vrsqrt.f32 %v5521_v15  ;;  %v11090_v58 = vld [vmem:[#allocation67_spill] sm:$0xff] }
 0x159   :  { %v1378_v57 = vmul.f32 %v3400_v50, %v11089_v4  ;;  %v5673_v8 = vmul.f32 %v5614_v29, %v1369_v23  ;;  %v5676_v20 = vmul.f32 %v5614_v29, %v1370_v59  ;;  %v3416_v53 = vpop.eup %3415  ;;  %3435 = vrsqrt.f32 %v5524_v28  ;;  %v11091_v50 = vld [vmem:[#allocation68_spill] sm:$0xff]  ;;  %v11093_v28 = vld [vmem:[#allocation73_spill] sm:$0xff] }
 0x15a   :  { %v1379_v34 = vmul.f32 %v3402_v45, %v11090_v58  ;;  %v5681_v22 = vmul.f32 %v5614_v29, %v1371_v10  ;;  %v5684_v48 = vmul.f32 %v5614_v29, %v1372_v60  ;;  %v3418_v15 = vpop.eup %3417  ;;  %3437 = vrsqrt.f32 %v5527_v35  ;;  %v11092_v23 = vld [vmem:[#allocation72_spill] sm:$0xff]  ;;  %v11095_v35 = vld [vmem:[#allocation77_spill] sm:$0xff] }
 0x15b   :  { %v1380_v51 = vmul.f32 %v3404_v7, %v11091_v50  ;;  %v1381_v25 = vmul.f32 %v3406_v16, %v11092_v23  ;;  %v5690_v59 = vmul.f32 %v5614_v29, %v1373_v0  ;;  %v3420_v36 = vpop.eup %3419  ;;  %3439 = vrsqrt.f32 %v5530_v31  ;;  %v11094_v10 = vld [vmem:[#allocation76_spill] sm:$0xff]  ;;  %v5706_v31 = vpop.permute.xlu0 %1497 }
 0x15c   :  { %v1382_v45 = vmul.f32 %v3408_v55, %v11093_v28  ;;  %v1383_v62 = vmul.f32 %v3410_v27, %v11094_v10  ;;  %v5696_v60 = vmul.f32 %v5614_v29, %v1374_v14  ;;  %v3422_v40 = vpop.eup %3421  ;;  %3441 = vrsqrt.f32 %v5533_v61  ;;  %11096 = vst [vmem:[#allocation58_spill] sm:$0xff] %v5706_v31 }
 0x15d   :  { %v1384_v7 = vmul.f32 %v3412_v52, %v11095_v35  ;;  %v5701_v16 = vmul.f32 %v5614_v29, %v1375_v18  ;;  %v5704_v0 = vmul.f32 %v5614_v29, %v1376_v3  ;;  %v3424_v37 = vpop.eup %3423  ;;  %3443 = vrsqrt.f32 %v5536_v1  ;;  %v11097_v18 = vld [vmem:[#allocation83_spill] sm:$0xff] }
 0x15e   :  { %v5710_v55 = vmul.f32 %v5614_v29, %v1377_v30  ;;  %v5713_v14 = vmul.f32 %v5614_v29, %v1378_v57  ;;  %v5716_v61 = vmul.f32 %v5614_v29, %v1379_v34  ;;  %v3426_v27 = vpop.eup %3425  ;;  %3445 = vrsqrt.f32 %v5539_v17  ;;  %v11098_v30 = vld [vmem:[#allocation2_spill] sm:$0xff] }
 0x15f   :  { %v1385_v3 = vmul.f32 %v3414_v46, %v11097_v18  ;;  %v5721_v52 = vmul.f32 %v5614_v29, %v1380_v51  ;;  %v5724_v24 = vmul.f32 %v5614_v29, %v1381_v25  ;;  %v3428_v1 = vpop.eup %3427  ;;  %3447 = vrsqrt.f32 %v5542_v43  ;;  %v11099_v46 = vld [vmem:[#allocation3_spill] sm:$0xff]  ;;  %v11101_v25 = vld [vmem:[#allocation5_spill] sm:$0xff] }
 0x160   :  { %v1386_v4 = vmul.f32 %v3416_v53, %v11098_v30  ;;  %v5729_v57 = vmul.f32 %v5614_v29, %v1382_v45  ;;  %v5732_v58 = vmul.f32 %v5614_v29, %v1383_v62  ;;  %v3430_v17 = vpop.eup %3429  ;;  %3449 = vrsqrt.f32 %v5545_v39  ;;  %v11100_v53 = vld [vmem:[#allocation4_spill] sm:$0xff] }
 0x161   :  { %v1387_v34 = vmul.f32 %v3418_v15, %v11099_v46  ;;  %v5737_v50 = vmul.f32 %v5614_v29, %v1384_v7  ;;  %v5741_v51 = vadd.f32 %v5706_v31, %v5636_v56  ;;  %v3432_v43 = vpop.eup %3431  ;;  %3451 = vrsqrt.f32 %v5548_v9  ;;  %v11102_v15 = vld [vmem:[#allocation6_spill] sm:$0xff]  ;;  %v11104_v7 = vld [vmem:[#allocation8_spill] sm:$0xff] }
 0x162   :  { %v1388_v23 = vmul.f32 %v3420_v36, %v11100_v53  ;;  %v1389_v28 = vmul.f32 %v3422_v40, %v11101_v25  ;;  %v5748_v45 = vadd.f32 %v5706_v31, %v5641_v12  ;;  %v3434_v39 = vpop.eup %3433  ;;  %3453 = vrsqrt.f32 %v5551_v54  ;;  %v11103_v36 = vld [vmem:[#allocation7_spill] sm:$0xff]  ;;  %v11106_v46 = vld [vmem:[#allocation10_spill] sm:$0xff]  ;;  %v11108_v25 = vld [vmem:[#allocation12_spill] sm:$0xff] }
 0x163   :  { %v1390_v10 = vmul.f32 %v3424_v37, %v11102_v15  ;;  %v5753_v62 = vmul.f32 %v5614_v29, %v1385_v3  ;;  %v5757_v56 = vadd.f32 %v5706_v31, %v5644_v26  ;;  %v3436_v9 = vpop.eup %3435  ;;  %3455 = vrsqrt.f32 %v5554_v44  ;;  %v11107_v53 = vld [vmem:[#allocation11_spill] sm:$0xff]  ;;  %v11109_v15 = vld [vmem:[#allocation14_spill] sm:$0xff] }
 0x164   :  { %v1391_v40 = vmul.f32 %v3426_v27, %v11103_v36  ;;  %v5762_v12 = vmul.f32 %v5614_v29, %v1386_v4  ;;  %v5766_v54 = vadd.f32 %v5706_v31, %v5649_v21  ;;  %v3438_v35 = vpop.eup %3437  ;;  %3457 = vrsqrt.f32 %v5557_v49 }
 0x165   :  { %v1392_v37 = vmul.f32 %v3428_v1, %v11104_v7  ;;  %v5771_v26 = vmul.f32 %v5614_v29, %v1387_v34  ;;  %v5775_v44 = vadd.f32 %v5706_v31, %v5652_v2  ;;  %v3440_v27 = vpop.eup %3439  ;;  %3459 = vrsqrt.f32 %v5560_v5  ;;  %v11105_v1 = vld [vmem:[#allocation9_spill] sm:$0xff] }
 0x166   :  { %v5779_v18 = vmul.f32 %v5614_v29, %v1388_v23  ;;  %v5782_v21 = vmul.f32 %v5614_v29, %v1389_v28  ;;  %v5786_v49 = vadd.f32 %v5706_v31, %v5657_v32  ;;  %v3442_v3 = vpop.eup %3441  ;;  %3461 = vrsqrt.f32 %v5563_v13 }
 0x167   :  { %v1393_v30 = vmul.f32 %v3430_v17, %v11105_v1  ;;  %v5791_v2 = vmul.f32 %v5614_v29, %v1390_v10  ;;  %v5795_v5 = vadd.f32 %v5706_v31, %v5660_v47  ;;  %v3444_v4 = vpop.eup %3443  ;;  %3463 = vrsqrt.f32 %v5566_v6  ;;  %v11113_v1 = vld [vmem:[#allocation94_spill] sm:$0xff] }
 0x168   :  { %v1394_v34 = vmul.f32 %v3432_v43, %v11106_v46  ;;  %v5800_v32 = vmul.f32 %v5614_v29, %v1391_v40  ;;  %v5804_v13 = vadd.f32 %v5706_v31, %v5665_v11  ;;  %v3446_v17 = vpop.eup %3445  ;;  %3465 = vrsqrt.f32 %v5569_v41  ;;  %v11114_v46 = vld [vmem:[#allocation95_spill] sm:$0xff] }
 0x169   :  { %v1395_v23 = vmul.f32 %v3434_v39, %v11107_v53  ;;  %v5809_v47 = vmul.f32 %v5614_v29, %v1392_v37  ;;  %v5813_v6 = vadd.f32 %v5706_v31, %v5668_v19  ;;  %v3448_v43 = vpop.eup %3447  ;;  %3467 = vrsqrt.f32 %v5572_v63  ;;  %v11110_v39 = vld [vmem:[#allocation15_spill] sm:$0xff]  ;;  %v11112_v37 = vld [vmem:[#allocation18_spill] sm:$0xff] }
 0x16a   :  { %v1396_v28 = vmul.f32 %v3436_v9, %v11108_v25  ;;  %v1397_v11 = vmul.f32 %v3438_v35, %v11109_v15  ;;  %v5820_v10 = vadd.f32 %v5706_v31, %v5673_v8  ;;  %v3450_v41 = vpop.eup %3449  ;;  %3469 = vrsqrt.f32 %v5575_v33  ;;  %v11111_v9 = vld [vmem:[#allocation17_spill] sm:$0xff]  ;;  %v11117_v15 = vld [vmem:[#allocation22_spill] sm:$0xff] }
 0x16b   :  { %v1398_v36 = vmul.f32 %v3440_v27, %v11110_v39  ;;  %v5825_v40 = vmul.f32 %v5614_v29, %v1393_v30  ;;  %v5829_v19 = vadd.f32 %v5706_v31, %v5676_v20  ;;  %v3452_v63 = vpop.eup %3451  ;;  %3471 = vrsqrt.f32 %v5578_v38 }
 0x16c   :  { %v1399_v35 = vmul.f32 %v3442_v3, %v11111_v9  ;;  %v5834_v8 = vmul.f32 %v5614_v29, %v1394_v34  ;;  %v5838_v33 = vadd.f32 %v5706_v31, %v5681_v22  ;;  %v3454_v7 = vpop.eup %3453  ;;  %3473 = vrsqrt.f32 %v5581_v42  ;;  %v11115_v34 = vld [vmem:[#allocation20_spill] sm:$0xff]  ;;  %v11119_v9 = vld [vmem:[#allocation97_spill] sm:$0xff] }
 0x16d   :  { %v1400_v27 = vmul.f32 %v3444_v4, %v11112_v37  ;;  %v5843_v20 = vmul.f32 %v5614_v29, %v1395_v23  ;;  %v5847_v38 = vadd.f32 %v5706_v31, %v5684_v48  ;;  %v3456_v3 = vpop.eup %3455  ;;  %3475 = vrsqrt.f32 %v11113_v1 }
 0x16e   :  { %v5851_v30 = vmul.f32 %v5614_v29, %v1396_v28  ;;  %v5854_v22 = vmul.f32 %v5614_v29, %v1397_v11  ;;  %v5858_v42 = vadd.f32 %v5706_v31, %v5690_v59  ;;  %v3458_v4 = vpop.eup %3457  ;;  %3477 = vrsqrt.f32 %v11114_v46  ;;  %v11116_v28 = vld [vmem:[#allocation96_spill] sm:$0xff]  ;;  %v11122_v46 = vld [vmem:[#allocation98_spill] sm:$0xff] }
 0x16f   :  { %v1401_v53 = vmul.f32 %v3446_v17, %v11115_v34  ;;  %v5863_v48 = vmul.f32 %v5614_v29, %v1398_v36  ;;  %v5867_v23 = vadd.f32 %v5706_v31, %v5696_v60  ;;  %v3460_v25 = vpop.eup %3459  ;;  %3479 = vrsqrt.f32 %v11116_v28  ;;  %v11120_v36 = vld [vmem:[#allocation13_spill] sm:$0xff]  ;;  %v11124_v28 = vld [vmem:[#allocation16_spill] sm:$0xff] }
 0x170   :  { %v1402_v11 = vmul.f32 %v3448_v43, %v11117_v15  ;;  %v5872_v59 = vmul.f32 %v5614_v29, %v1399_v35  ;;  %v5876_v39 = vadd.f32 %v5706_v31, %v5701_v16  ;;  %v3462_v17 = vpop.eup %3461  ;;  %3481 = vrsqrt.f32 %v11119_v9  ;;  %v11123_v35 = vld [vmem:[#allocation24_spill] sm:$0xff] }
 0x171   :  { %v1403_v37 = vmul.f32 %v3450_v41, %v11120_v36  ;;  %v5881_v60 = vmul.f32 %v5614_v29, %v1400_v27  ;;  %v5885_v1 = vadd.f32 %v5706_v31, %v5704_v0  ;;  %v3464_v43 = vpop.eup %3463  ;;  %3483 = vrsqrt.f32 %v11122_v46  ;;  %v11126_v41 = vld [vmem:[#allocation99_spill] sm:$0xff]  ;;  %v11127_v27 = vld [vmem:[#allocation25_spill] sm:$0xff] }
 0x172   :  { %11118 = vst [vmem:[#allocation100_spill] sm:$0xff] %v5876_v39  ;;  %v1404_v34 = vmul.f32 %v3452_v63, %v11123_v35  ;;  %v1405_v16 = vmul.f32 %v3454_v7, %v11124_v28  ;;  %v5892_v15 = vadd.f32 %v5706_v31, %v5710_v55  ;;  %v3466_v9 = vpop.eup %3465  ;;  %3485 = vrsqrt.f32 %v11126_v41  ;;  %v11128_v63 = vld [vmem:[#allocation52_spill] sm:$0xff]  ;;  %v11129_v7 = vld [vmem:[#allocation19_spill] sm:$0xff]  ;;  %v11130_v28 = vld [vmem:[#allocation29_spill] sm:$0xff] }
 0x173   :  { %11121 = vst [vmem:[#allocation101_spill] sm:$0xff] %v5885_v1  ;;  %v1406_v36 = vmul.f32 %v3456_v3, %v11127_v27  ;;  %v5897_v39 = vmul.f32 %v5614_v29, %v1401_v53  ;;  %v5901_v0 = vadd.f32 %v5706_v31, %v5713_v14  ;;  %v3468_v46 = vpop.eup %3467  ;;  %3487 = vrsqrt.f32 %v11128_v63  ;;  %v11131_v1 = vld [vmem:[#allocation21_spill] sm:$0xff]  ;;  %v11134_v63 = vld [vmem:[#allocation30_spill] sm:$0xff] }
 0x174   :  { %11125 = vst [vmem:[#allocation102_spill] sm:$0xff] %v5892_v15  ;;  %v1407_v35 = vmul.f32 %v3458_v4, %v11129_v7  ;;  %v1408_v55 = vmul.f32 %v3460_v25, %v11130_v28  ;;  %v5907_v15 = vmul.f32 %v5614_v29, %v1402_v11  ;;  %v3470_v41 = vpop.eup %3469  ;;  %v1409_v3 = vmul.f32 %v3462_v17, %v11131_v1  ;;  %v11136_v1 = vld [vmem:[#allocation23_spill] sm:$0xff] }
 0x175   :  { %v5911_v53 = vmul.f32 %v5614_v29, %v1403_v37  ;;  %v5915_v14 = vadd.f32 %v5706_v31, %v5716_v61  ;;  %v5919_v27 = vadd.f32 %v5706_v31, %v5721_v52  ;;  %v3472_v4 = vpop.eup %3471  ;;  %v1410_v25 = vmul.f32 %v3464_v43, %v11134_v63  ;;  %v11138_v63 = vld [vmem:[#allocation33_spill] sm:$0xff] }
 0x176   :  { %v1474_v11 = vmul.f32 %v5614_v29, %v1404_v34  ;;  %v1475_v7 = vmul.f32 %v5614_v29, %v1405_v16  ;;  %v5926_v17 = vadd.f32 %v5706_v31, %v5724_v24  ;;  %v3474_v37 = vpop.eup %3473  ;;  %v1411_v28 = vmul.f32 %v3466_v9, %v11136_v1  ;;  %v11140_v1 = vld [vmem:[#allocation26_spill] sm:$0xff] }
 0x177   :  { %11132 = vst [vmem:[#allocation103_spill] sm:$0xff] %v5915_v14  ;;  %11133 = vst [vmem:[#allocation104_spill] sm:$0xff] %v5919_v27  ;;  %v1476_v61 = vmul.f32 %v5614_v29, %v1406_v36  ;;  %v5932_v52 = vadd.f32 %v5706_v31, %v5729_v57  ;;  %v5936_v43 = vadd.f32 %v5706_v31, %v5732_v58  ;;  %v3476_v34 = vpop.eup %3475 }
 0x178   :  { %11135 = vst [vmem:[#allocation60_spill] sm:$0xff] %v5926_v17  ;;  %v1412_v16 = vmul.f32 %v3468_v46, %v11138_v63  ;;  %v1477_v27 = vmul.f32 %v5614_v29, %v1407_v35  ;;  %v1478_v24 = vmul.f32 %v5614_v29, %v1408_v55  ;;  %v5943_v9 = vadd.f32 %v5706_v31, %v5737_v50  ;;  %v3478_v36 = vpop.eup %3477  ;;  %v11143_v63 = vld [vmem:[#allocation54_spill] sm:$0xff] }
 0x179   :  { %11137 = vst [vmem:[#allocation105_spill] sm:$0xff] %v5936_v43  ;;  %v1413_v17 = vmul.f32 %v3470_v41, %v11140_v1  ;;  %v1479_v57 = vmul.f32 %v5614_v29, %v1409_v3  ;;  %v5949_v58 = vadd.f32 %v5706_v31, %v5753_v62  ;;  %v5953_v46 = vadd.f32 %v5706_v31, %v5762_v12  ;;  %v3480_v35 = vpop.eup %3479  ;;  %v11144_v55 = vld [vmem:[#allocation34_spill] sm:$0xff]  ;;  %v11145_v1 = vld [vmem:[#allocation27_spill] sm:$0xff] }
 0x17a   :  { %11139 = vst [vmem:[#allocation63_spill] sm:$0xff] %v5943_v9  ;;  %3489 = vrsqrt.f32 %v11143_v63  ;;  %v1414_v43 = vmul.f32 %v3472_v4, %v11144_v55  ;;  %v1480_v50 = vmul.f32 %v5614_v29, %v1410_v25  ;;  %v5960_v41 = vadd.f32 %v5706_v31, %v5771_v26  ;;  %v3482_v3 = vpop.eup %3481  ;;  %v11147_v55 = vld [vmem:[#allocation39_spill] sm:$0xff] }
 0x17b   :  { %11141 = vst [vmem:[#allocation28_spill] sm:$0xff] %v5949_v58  ;;  %11142 = vst [vmem:[#allocation64_spill] sm:$0xff] %v5953_v46  ;;  %v1415_v9 = vmul.f32 %v3474_v37, %v11145_v1  ;;  %v1481_v62 = vmul.f32 %v5614_v29, %v1411_v28  ;;  %v5966_v12 = vadd.f32 %v5706_v31, %v5779_v18  ;;  %v3484_v4 = vpop.eup %3483  ;;  %v11149_v18 = vld [vmem:[#allocation40_spill] sm:$0xff] }
 0x17c   :  { %v5970_v63 = vadd.f32 %v5706_v31, %v5782_v21  ;;  %v1416_v25 = vmul.f32 %v3476_v34, %v11147_v55  ;;  %v1482_v46 = vmul.f32 %v5614_v29, %v1412_v16  ;;  %v5976_v26 = vadd.f32 %v5706_v31, %v5791_v2  ;;  %v3486_v28 = vpop.eup %3485  ;;  %v11152_v2 = vld [vmem:[#allocation41_spill] sm:$0xff] }
 0x17d   :  { %11146 = vst [vmem:[#allocation69_spill] sm:$0xff] %v5966_v12  ;;  %v5980_v37 = vadd.f32 %v5706_v31, %v5800_v32  ;;  %v1417_v1 = vmul.f32 %v3478_v36, %v11149_v18  ;;  %v1483_v12 = vmul.f32 %v5614_v29, %v1413_v17  ;;  %v5986_v21 = vadd.f32 %v5706_v31, %v5809_v47  ;;  %v3488_v16 = vpop.eup %3487  ;;  %v11153_v36 = vld [vmem:[#allocation44_spill] sm:$0xff]  ;;  %v11154_v18 = vld [vmem:[#allocation45_spill] sm:$0xff] }
 0x17e   :  { %11148 = vst [vmem:[#allocation70_spill] sm:$0xff] %v5976_v26  ;;  %v5990_v34 = vadd.f32 %v5706_v31, %v5825_v40  ;;  %v1418_v55 = vmul.f32 %v3480_v35, %v11152_v2  ;;  %v1484_v26 = vmul.f32 %v5614_v29, %v1414_v43  ;;  %v5996_v32 = vadd.f32 %v5706_v31, %v5834_v8  ;;  %v11155_v35 = vld [vmem:[#allocation47_spill] sm:$0xff] }
 0x17f   :  { %11150 = vst [vmem:[#allocation71_spill] sm:$0xff] %v5986_v21  ;;  %v6000_v17 = vadd.f32 %v5706_v31, %v5843_v20  ;;  %v1419_v47 = vmul.f32 %v3482_v3, %v11153_v36  ;;  %v1420_v21 = vmul.f32 %v3484_v4, %v11154_v18  ;;  %v1485_v40 = vmul.f32 %v5614_v29, %v1415_v9  ;;  %v11156_v3 = vld [vmem:[#allocation48_spill] sm:$0xff] }
 0x180   :  { %11151 = vst [vmem:[#allocation74_spill] sm:$0xff] %v5990_v34  ;;  %v6007_v34 = vadd.f32 %v5706_v31, %v5851_v30  ;;  %v1421_v43 = vmul.f32 %v3486_v28, %v11155_v35  ;;  %v1486_v2 = vmul.f32 %v5614_v29, %v1416_v25  ;;  %v6013_v8 = vadd.f32 %v5706_v31, %v5854_v22 }
 0x181   :  { %v6017_v20 = vadd.f32 %v5706_v31, %v5863_v48  ;;  %v1422_v4 = vmul.f32 %v3488_v16, %v11156_v3  ;;  %v1487_v9 = vmul.f32 %v5614_v29, %v1417_v1  ;;  %v6023_v30 = vadd.f32 %v5706_v31, %v5872_v59 }
 0x182   :  { %v6027_v28 = vadd.f32 %v5706_v31, %v5881_v60  ;;  %v1488_v25 = vmul.f32 %v5614_v29, %v1418_v55  ;;  %v6032_v22 = vadd.f32 %v5706_v31, %v5897_v39  ;;  %v6036_v48 = vadd.f32 %v5706_v31, %v5907_v15 }
 0x183   :  { %v6040_v1 = vadd.f32 %v5706_v31, %v5911_v53  ;;  %v1489_v59 = vmul.f32 %v5614_v29, %v1419_v47  ;;  %v1490_v16 = vmul.f32 %v5614_v29, %v1420_v21  ;;  %v6045_v60 = vadd.f32 %v5706_v31, %v1474_v11 }
 0x184   :  { %v6048_v55 = vadd.f32 %v5706_v31, %v1475_v7  ;;  %v6050_v39 = vpop.eup %3489  ;;  %v1491_v36 = vmul.f32 %v5614_v29, %v1421_v43  ;;  %v6054_v15 = vadd.f32 %v5706_v31, %v1476_v61  ;;  %v6057_v53 = vadd.f32 %v5706_v31, %v1477_v27 }
 0x185   :  { %11157 = vst [vmem:[#allocation75_spill] sm:$0xff] %v6050_v39  ;;  %v6060_v47 = vadd.f32 %v5706_v31, %v1478_v24  ;;  %v1492_v21 = vmul.f32 %v5614_v29, %v1422_v4  ;;  %v6064_v11 = vadd.f32 %v5706_v31, %v1479_v57  ;;  %v6067_v7 = vadd.f32 %v5706_v31, %v1480_v50  ;;  %v11183_v29 = vld [vmem:[#allocation60_spill] sm:$0xff]  ;;  %v11186_v39 = vld [vmem:[#allocation105_spill] sm:$0xff] }
 0x186   :  { %v6070_v18 = vadd.f32 %v5706_v31, %v1481_v62  ;;  %v6073_v61 = vadd.f32 %v5706_v31, %v1482_v46  ;;  %v6076_v27 = vadd.f32 %v5706_v31, %v1483_v12  ;;  %v6079_v24 = vadd.f32 %v5706_v31, %v1484_v26 }
 0x187   :  { %v6082_v35 = vadd.f32 %v5706_v31, %v1485_v40  ;;  %v6085_v57 = vadd.f32 %v5706_v31, %v1486_v2  ;;  %v6088_v50 = vadd.f32 %v5706_v31, %v1487_v9  ;;  %v6091_v62 = vadd.f32 %v5706_v31, %v1488_v25 }
 0x188   :  { %v6094_v46 = vadd.f32 %v5706_v31, %v1489_v59  ;;  %v6097_v12 = vadd.f32 %v5706_v31, %v1490_v16  ;;  %v6100_v26 = vadd.f32 %v5706_v31, %v1491_v36  ;;  %v6103_v40 = vadd.f32 %v5706_v31, %v1492_v21  ;;  %v11181_v31 = vld [vmem:[#allocation104_spill] sm:$0xff] }
 0x189   :  { %v6106_v43 = vmul.f32 0.5, %v5741_v51  ;;  %v6109_v2 = vmul.f32 0.5, %v5748_v45  ;;  %v6112_v3 = vmul.f32 0.5, %v5757_v56  ;;  %v6115_v4 = vmul.f32 0.5, %v5766_v54 }
 0x18a   :  { %v6118_v9 = vmul.f32 0.5, %v5775_v44  ;;  %v6121_v25 = vmul.f32 0.5, %v5786_v49  ;;  %v6124_v59 = vmul.f32 0.5, %v5795_v5  ;;  %v6127_v16 = vmul.f32 0.5, %v5804_v13 }
 0x18b   :  { %11158 = vst [vmem:[#allocation78_spill] sm:$0xff] %v6106_v43  ;;  %11159 = vst [vmem:[#allocation79_spill] sm:$0xff] %v6109_v2  ;;  %v6130_v36 = vmul.f32 0.5, %v5813_v6  ;;  %v6133_v21 = vmul.f32 0.5, %v5820_v10  ;;  %v11175_v2 = vld [vmem:[#allocation101_spill] sm:$0xff]  ;;  %v11177_v43 = vld [vmem:[#allocation102_spill] sm:$0xff] }
 0x18c   :  { %11160 = vst [vmem:[#allocation80_spill] sm:$0xff] %v6112_v3  ;;  %11161 = vst [vmem:[#allocation106_spill] sm:$0xff] %v6115_v4  ;;  %v6136_v4 = vmul.f32 0.5, %v5829_v19  ;;  %v11173_v3 = vld [vmem:[#allocation100_spill] sm:$0xff] }
 0x18d   :  { %11162 = vst [vmem:[#allocation107_spill] sm:$0xff] %v6118_v9  ;;  %11163 = vst [vmem:[#allocation81_spill] sm:$0xff] %v6121_v25  ;;  %v6139_v9 = vmul.f32 0.5, %v5838_v33  ;;  %v6142_v25 = vmul.f32 0.5, %v5847_v38 }
 0x18e   :  { %11164 = vst [vmem:[#allocation108_spill] sm:$0xff] %v6124_v59  ;;  %11165 = vst [vmem:[#allocation82_spill] sm:$0xff] %v6127_v16  ;;  %v6145_v59 = vmul.f32 0.5, %v5858_v42  ;;  %v6148_v16 = vmul.f32 0.5, %v5867_v23 }
 0x18f   :  { %11166 = vst [vmem:[#allocation84_spill] sm:$0xff] %v6130_v36  ;;  %11167 = vst [vmem:[#allocation85_spill] sm:$0xff] %v6133_v21  ;;  %v6151_v36 = vmul.f32 0.5, %v11173_v3  ;;  %v6154_v21 = vmul.f32 0.5, %v11175_v2 }
 0x190   :  { %11168 = vst [vmem:[#allocation86_spill] sm:$0xff] %v6136_v4  ;;  %11169 = vst [vmem:[#allocation87_spill] sm:$0xff] %v6139_v9  ;;  %v6157_v4 = vmul.f32 0.5, %v11177_v43  ;;  %v6160_v9 = vmul.f32 0.5, %v5901_v0  ;;  %v11188_v43 = vld [vmem:[#allocation63_spill] sm:$0xff] }
 0x191   :  { %11170 = vst [vmem:[#allocation88_spill] sm:$0xff] %v6142_v25  ;;  %11171 = vst [vmem:[#allocation89_spill] sm:$0xff] %v6145_v59  ;;  %v6163_v25 = vmul.f32 0.5, %v5915_v14  ;;  %v6166_v59 = vmul.f32 0.5, %v11181_v31  ;;  %v11191_v14 = vld [vmem:[#allocation64_spill] sm:$0xff] }
 0x192   :  { %11172 = vst [vmem:[#allocation90_spill] sm:$0xff] %v6148_v16  ;;  %11174 = vst [vmem:[#allocation91_spill] sm:$0xff] %v6151_v36  ;;  %v6169_v16 = vmul.f32 0.5, %v11183_v29  ;;  %v6172_v36 = vmul.f32 0.5, %v5932_v52  ;;  %v11194_v29 = vld [vmem:[#allocation69_spill] sm:$0xff] }
 0x193   :  { %11176 = vst [vmem:[#allocation92_spill] sm:$0xff] %v6154_v21  ;;  %11178 = vst [vmem:[#allocation93_spill] sm:$0xff] %v6157_v4  ;;  %v6175_v21 = vmul.f32 0.5, %v11186_v39  ;;  %v6178_v4 = vmul.f32 0.5, %v11188_v43  ;;  %v11197_v39 = vld [vmem:[#allocation70_spill] sm:$0xff] }
 0x194   :  { %11179 = vst [vmem:[#allocation31_spill] sm:$0xff] %v6160_v9  ;;  %11180 = vst [vmem:[#allocation32_spill] sm:$0xff] %v6163_v25  ;;  %v6181_v9 = vmul.f32 0.5, %v5949_v58  ;;  %v6184_v25 = vmul.f32 0.5, %v11191_v14  ;;  %v11200_v58 = vld [vmem:[#allocation71_spill] sm:$0xff]  ;;  %v11202_v14 = vld [vmem:[#allocation74_spill] sm:$0xff] }
 0x195   :  { %11182 = vst [vmem:[#allocation35_spill] sm:$0xff] %v6166_v59  ;;  %11184 = vst [vmem:[#allocation36_spill] sm:$0xff] %v6169_v16  ;;  %v6187_v59 = vmul.f32 0.5, %v5960_v41  ;;  %v6190_v16 = vmul.f32 0.5, %v11194_v29 }
 0x196   :  { %11185 = vst [vmem:[#allocation37_spill] sm:$0xff] %v6172_v36  ;;  %11187 = vst [vmem:[#allocation38_spill] sm:$0xff] %v6175_v21  ;;  %v6193_v36 = vmul.f32 0.5, %v5970_v63  ;;  %v6196_v21 = vmul.f32 0.5, %v11197_v39 }
 0x197   :  { %11189 = vst [vmem:[#allocation42_spill] sm:$0xff] %v6178_v4  ;;  %11190 = vst [vmem:[#allocation43_spill] sm:$0xff] %v6181_v9  ;;  %v6199_v4 = vmul.f32 0.5, %v5980_v37  ;;  %v6202_v9 = vmul.f32 0.5, %v11200_v58 }
 0x198   :  { %11192 = vst [vmem:[#allocation46_spill] sm:$0xff] %v6184_v25  ;;  %11193 = vst [vmem:[#allocation49_spill] sm:$0xff] %v6187_v59  ;;  %v6205_v25 = vmul.f32 0.5, %v11202_v14  ;;  %v6208_v59 = vmul.f32 0.5, %v5996_v32 }
 0x199   :  { %11195 = vst [vmem:[#allocation51_spill] sm:$0xff] %v6190_v16  ;;  %11196 = vst [vmem:[#allocation53_spill] sm:$0xff] %v6193_v36  ;;  %v6211_v16 = vmul.f32 0.5, %v6000_v17  ;;  %v6214_v36 = vmul.f32 0.5, %v6007_v34 }
 0x19a   :  { %11198 = vst [vmem:[#allocation56_spill] sm:$0xff] %v6196_v21  ;;  %11199 = vst [vmem:[#allocation57_spill] sm:$0xff] %v6199_v4  ;;  %v6217_v21 = vmul.f32 0.5, %v6013_v8  ;;  %v6220_v4 = vmul.f32 0.5, %v6017_v20 }
 0x19b   :  { %11201 = vst [vmem:[#allocation59_spill] sm:$0xff] %v6202_v9  ;;  %11203 = vst [vmem:[#allocation61_spill] sm:$0xff] %v6205_v25  ;;  %v6223_v9 = vmul.f32 0.5, %v6023_v30  ;;  %v6226_v25 = vmul.f32 0.5, %v6027_v28 }
 0x19c   :  { %11204 = vst [vmem:[#allocation62_spill] sm:$0xff] %v6208_v59  ;;  %11205 = vst [vmem:[#allocation65_spill] sm:$0xff] %v6211_v16  ;;  %v6229_v59 = vmul.f32 0.5, %v6032_v22  ;;  %v6232_v16 = vmul.f32 0.5, %v6036_v48 }
 0x19d   :  { %11206 = vst [vmem:[#allocation66_spill] sm:$0xff] %v6214_v36  ;;  %11207 = vst [vmem:[#allocation67_spill] sm:$0xff] %v6217_v21  ;;  %v6235_v36 = vmul.f32 0.5, %v6040_v1  ;;  %v6238_v21 = vmul.f32 0.5, %v6045_v60 }
 0x19e   :  { %11208 = vst [vmem:[#allocation68_spill] sm:$0xff] %v6220_v4  ;;  %11209 = vst [vmem:[#allocation72_spill] sm:$0xff] %v6223_v9  ;;  %v6241_v4 = vmul.f32 0.5, %v6048_v55  ;;  %v6244_v9 = vmul.f32 0.5, %v6054_v15 }
 0x19f   :  { %11210 = vst [vmem:[#allocation73_spill] sm:$0xff] %v6226_v25  ;;  %11211 = vst [vmem:[#allocation76_spill] sm:$0xff] %v6229_v59  ;;  %v6247_v25 = vmul.f32 0.5, %v6057_v53  ;;  %v6250_v59 = vmul.f32 0.5, %v6060_v47 }
 0x1a0   :  { %11212 = vst [vmem:[#allocation77_spill] sm:$0xff] %v6232_v16  ;;  %11213 = vst [vmem:[#allocation83_spill] sm:$0xff] %v6235_v36  ;;  %v6253_v16 = vmul.f32 0.5, %v6064_v11  ;;  %v6256_v36 = vmul.f32 0.5, %v6067_v7 }
 0x1a1   :  { %11214 = vst [vmem:[#allocation2_spill] sm:$0xff] %v6238_v21  ;;  %11215 = vst [vmem:[#allocation3_spill] sm:$0xff] %v6241_v4  ;;  %v6259_v21 = vmul.f32 0.5, %v6070_v18  ;;  %v6262_v4 = vmul.f32 0.5, %v6073_v61 }
 0x1a2   :  { %11216 = vst [vmem:[#allocation4_spill] sm:$0xff] %v6244_v9  ;;  %11217 = vst [vmem:[#allocation5_spill] sm:$0xff] %v6247_v25  ;;  %v6265_v9 = vmul.f32 0.5, %v6076_v27  ;;  %v6268_v25 = vmul.f32 0.5, %v6079_v24 }
 0x1a3   :  { %11218 = vst [vmem:[#allocation6_spill] sm:$0xff] %v6250_v59  ;;  %11219 = vst [vmem:[#allocation7_spill] sm:$0xff] %v6253_v16  ;;  %v6271_v59 = vmul.f32 0.5, %v6082_v35  ;;  %v6274_v16 = vmul.f32 0.5, %v6085_v57 }
 0x1a4   :  { %11220 = vst [vmem:[#allocation8_spill] sm:$0xff] %v6256_v36  ;;  %11221 = vst [vmem:[#allocation9_spill] sm:$0xff] %v6259_v21  ;;  %v6277_v36 = vmul.f32 0.5, %v6088_v50  ;;  %v6280_v21 = vmul.f32 0.5, %v6091_v62 }
 0x1a5   :  { %11222 = vst [vmem:[#allocation10_spill] sm:$0xff] %v6262_v4  ;;  %11223 = vst [vmem:[#allocation11_spill] sm:$0xff] %v6265_v9  ;;  %v6283_v4 = vmul.f32 0.5, %v6094_v46  ;;  %v6286_v9 = vmul.f32 0.5, %v6097_v12 }
 0x1a6   :  { %11224 = vst [vmem:[#allocation12_spill] sm:$0xff] %v6268_v25  ;;  %11225 = vst [vmem:[#allocation14_spill] sm:$0xff] %v6271_v59  ;;  %v6289_v25 = vmul.f32 0.5, %v6100_v26  ;;  %v6292_v59 = vmul.f32 0.5, %v6103_v40 }
 0x1a7   :  { %11226 = vst [vmem:[#allocation15_spill] sm:$0xff] %v6274_v16  ;;  %11227 = vst [vmem:[#allocation17_spill] sm:$0xff] %v6277_v36  ;;  %v6295_v16 = vmul.f32 0.70710677, %v5741_v51  ;;  %v6298_v36 = vmul.f32 0.70710677, %v5748_v45 }
 0x1a8   :  { %11228 = vst [vmem:[#allocation18_spill] sm:$0xff] %v6280_v21  ;;  %11229 = vst [vmem:[#allocation94_spill] sm:$0xff] %v6283_v4  ;;  %v6301_v21 = vmul.f32 0.70710677, %v5757_v56  ;;  %v6304_v4 = vmul.f32 0.70710677, %v5766_v54 }
 0x1a9   :  { %11230 = vst [vmem:[#allocation95_spill] sm:$0xff] %v6286_v9  ;;  %11231 = vst [vmem:[#allocation20_spill] sm:$0xff] %v6289_v25  ;;  %v6307_v9 = vmul.f32 0.70710677, %v5775_v44  ;;  %v6310_v25 = vmul.f32 0.70710677, %v5786_v49 }
 0x1aa   :  { %11232 = vst [vmem:[#allocation96_spill] sm:$0xff] %v6292_v59  ;;  %v6313_v59 = vmul.f32 0.70710677, %v5795_v5  ;;  %v6316_v51 = vmul.f32 0.70710677, %v5804_v13  ;;  %vm1692_vm1 = vcmp.ge.f32.partialorder %v6295_v16, 0.0 }
 0x1ab   :  { %v6319_v45 = vmul.f32 0.70710677, %v5813_v6  ;;  %v6322_v56 = vmul.f32 0.70710677, %v5820_v10  ;;  %v6325_v54 = vmul.f32 0.70710677, %v5829_v19 }
 0x1ac   :  { %v6328_v44 = vmul.f32 0.70710677, %v5838_v33  ;;  %v6331_v49 = vmul.f32 0.70710677, %v5847_v38  ;;  %v6334_v5 = vmul.f32 0.70710677, %v5858_v42 }
 0x1ad   :  { %11233 = vst [vmem:[#allocation22_spill] sm:$0xff] %v6325_v54  ;;  %v6337_v13 = vmul.f32 0.70710677, %v5867_v23  ;;  %v6340_v6 = vmul.f32 0.70710677, %v11173_v3  ;;  %v11237_v19 = vld [vmem:[#allocation102_spill] sm:$0xff] }
 0x1ae   :  { %11234 = vst [vmem:[#allocation97_spill] sm:$0xff] %v6331_v49  ;;  %v6343_v10 = vmul.f32 0.70710677, %v11175_v2  ;;  %v6346_v54 = vmul.f32 0.70710677, %v11237_v19  ;;  %v11239_v38 = vld [vmem:[#allocation103_spill] sm:$0xff] }
 0x1af   :  { %11235 = vst [vmem:[#allocation13_spill] sm:$0xff] %v6337_v13  ;;  %v6349_v33 = vmul.f32 0.70710677, %v5901_v0  ;;  %v6352_v49 = vmul.f32 0.70710677, %v11239_v38  ;;  %v11241_v23 = vld [vmem:[#allocation60_spill] sm:$0xff] }
 0x1b0   :  { %11236 = vst [vmem:[#allocation98_spill] sm:$0xff] %v6343_v10  ;;  %v6355_v42 = vmul.f32 0.70710677, %v11181_v31  ;;  %v6358_v13 = vmul.f32 0.70710677, %v11241_v23  ;;  %v11242_v2 = vld [vmem:[#allocation105_spill] sm:$0xff] }
 0x1b1   :  { %11238 = vst [vmem:[#allocation24_spill] sm:$0xff] %v6349_v33  ;;  %11240 = vst [vmem:[#allocation16_spill] sm:$0xff] %v6352_v49  ;;  %v6361_v3 = vmul.f32 0.70710677, %v5932_v52  ;;  %v6364_v10 = vmul.f32 0.70710677, %v11242_v2 }
 0x1b2   :  { %v6367_v19 = vmul.f32 0.70710677, %v11188_v43  ;;  %v11244_v0 = vld [vmem:[#allocation28_spill] sm:$0xff]  ;;  %v6376_v31 = vmul.f32 0.70710677, %v5960_v41  ;;  %vm1693_vm2 = vcmp.ge.f32.partialorder %v6298_v36, 0.0 }
 0x1b3   :  { %v6370_v33 = vmul.f32 0.70710677, %v11244_v0  ;;  %v11246_v38 = vld [vmem:[#allocation64_spill] sm:$0xff]  ;;  %v6379_v23 = vmul.f32 0.70710677, %v11194_v29  ;;  %v11247_v0 = vld [vmem:[#allocation50_spill] sm:$0xff] }
 0x1b4   :  { %11243 = vst [vmem:[#allocation99_spill] sm:$0xff] %v6367_v19  ;;  %v6373_v49 = vmul.f32 0.70710677, %v11246_v38  ;;  %v6382_v52 = vmul.f32 0.70710677, %v5970_v63  ;;  %vm1694_vm3 = vcmp.ge.f32.partialorder %v6301_v21, 0.0 }
 0x1b5   :  { %11245 = vst [vmem:[#allocation25_spill] sm:$0xff] %v6370_v33  ;;  %v6385_v2 = vmul.f32 0.70710677, %v11197_v39  ;;  %v6388_v43 = vmul.f32 0.70710677, %v5980_v37  ;;  %v11248_v33 = vld [vmem:[#allocation75_spill] sm:$0xff] }
 0x1b6   :  { %v1423_v19 = vmul.f32 %v11248_v33, %v11247_v0  ;;  %v6393_v38 = vmul.f32 0.70710677, %v11200_v58  ;;  %v6396_v41 = vmul.f32 0.70710677, %v11202_v14  ;;  %v6399_v29 = vmul.f32 0.70710677, %v5996_v32 }
 0x1b7   :  { %v6402_v63 = vmul.f32 0.70710677, %v6000_v17  ;;  %v6405_v39 = vmul.f32 0.70710677, %v6007_v34  ;;  %v6408_v37 = vmul.f32 0.70710677, %v6013_v8 }
 0x1b8   :  { %11249 = vst [vmem:[#allocation52_spill] sm:$0xff] %v6393_v38  ;;  %11250 = vst [vmem:[#allocation19_spill] sm:$0xff] %v6399_v29  ;;  %v6411_v33 = vmul.f32 0.70710677, %v6017_v20  ;;  %v6414_v58 = vmul.f32 0.70710677, %v6023_v30 }
 0x1b9   :  { %11251 = vst [vmem:[#allocation29_spill] sm:$0xff] %v6402_v63  ;;  %11252 = vst [vmem:[#allocation21_spill] sm:$0xff] %v6405_v39  ;;  %v6417_v14 = vmul.f32 0.70710677, %v6027_v28  ;;  %v6420_v32 = vmul.f32 0.70710677, %v6032_v22 }
 0x1ba   :  { %11253 = vst [vmem:[#allocation30_spill] sm:$0xff] %v6411_v33  ;;  %11254 = vst [vmem:[#allocation23_spill] sm:$0xff] %v6414_v58  ;;  %v6423_v17 = vmul.f32 0.70710677, %v6036_v48  ;;  %v6426_v34 = vmul.f32 0.70710677, %v6040_v1 }
 0x1bb   :  { %11255 = vst [vmem:[#allocation33_spill] sm:$0xff] %v6417_v14  ;;  %v11257_v8 = vld [vmem:[#allocation55_spill] sm:$0xff]  ;;  %v6430_v20 = vmul.f32 0.70710677, %v6045_v60  ;;  %v6433_v30 = vmul.f32 0.70710677, %v6048_v55 }
 0x1bc   :  { %11256 = vst [vmem:[#allocation26_spill] sm:$0xff] %v6426_v34  ;;  %v1493_v0 = vmul.f32 %v11257_v8, %v1423_v19  ;;  %v6436_v28 = vmul.f32 0.70710677, %v6054_v15  ;;  %v6439_v22 = vmul.f32 0.70710677, %v6057_v53  ;;  %v11259_v34 = vld [vmem:[#allocation58_spill] sm:$0xff] }
 0x1bd   :  { %11258 = vst [vmem:[#allocation54_spill] sm:$0xff] %v6430_v20  ;;  %v6442_v48 = vmul.f32 0.70710677, %v6060_v47  ;;  %v6445_v1 = vmul.f32 0.70710677, %v6064_v11  ;;  %vm1695_vm4 = vcmp.ge.f32.partialorder %v6304_v4, 0.0 }
 0x1be   :  { %v1563_v19 = vadd.f32 %v11259_v34, %v1493_v0  ;;  %v6449_v60 = vmul.f32 0.70710677, %v6067_v7  ;;  %v6452_v55 = vmul.f32 0.70710677, %v6070_v18  ;;  %v6455_v15 = vmul.f32 0.70710677, %v6073_v61 }
 0x1bf   :  { %v6458_v53 = vmul.f32 0.70710677, %v6076_v27  ;;  %v6461_v47 = vmul.f32 0.70710677, %v6079_v24  ;;  %v6464_v11 = vmul.f32 0.70710677, %v6082_v35 }
 0x1c0   :  { %v6467_v34 = vmul.f32 0.70710677, %v6085_v57  ;;  %v6470_v7 = vmul.f32 0.70710677, %v6088_v50  ;;  %v6473_v18 = vmul.f32 0.70710677, %v6091_v62 }
 0x1c1   :  { %v6476_v61 = vmul.f32 0.70710677, %v6094_v46  ;;  %v6479_v27 = vmul.f32 0.70710677, %v6097_v12  ;;  %v6482_v24 = vmul.f32 0.70710677, %v6100_v26 }
 0x1c2   :  { %v6484_v35 = vmul.f32 0.5, %v1563_v19  ;;  %v6487_v57 = vmul.f32 0.70710677, %v6103_v40  ;;  %v6489_v8 = vmul.f32 0.70710677, %v1563_v19  ;;  %vm1696_vm5 = vcmp.ge.f32.partialorder %v6307_v9, 0.0 }
 0x1c3   :  { %11260 = vst [vmem:[#allocation34_spill] sm:$0xff] %v6482_v24  ;;  %vm1697_vm6 = vcmp.ge.f32.partialorder %v6310_v25, 0.0  ;;  %v11263_v50 = vld [vmem:[#allocation22_spill] sm:$0xff]  ;;  %v11264_v62 = vld [vmem:[#allocation97_spill] sm:$0xff]  ;;  %v11267_v26 = vld [vmem:[#allocation24_spill] sm:$0xff]  ;;  %vm1727_vm0 = vcmp.ge.f32.partialorder %v6402_v63, 0.0 }
 0x1c4   :  { %11261 = vst [vmem:[#allocation27_spill] sm:$0xff] %v6484_v35  ;;  %11262 = vst [vmem:[#allocation39_spill] sm:$0xff] %v6487_v57  ;;  %v11265_v46 = vld [vmem:[#allocation13_spill] sm:$0xff]  ;;  %v11266_v12 = vld [vmem:[#allocation98_spill] sm:$0xff]  ;;  %vm1728_vm7 = vcmp.ge.f32.partialorder %v6405_v39, 0.0  ;;  %vm1729_vm8 = vcmp.ge.f32.partialorder %v6408_v37, 0.0 }
 0x1c5   :  { %v11268_v40 = vld [vmem:[#allocation16_spill] sm:$0xff]  ;;  %v11269_v0 = vld [vmem:[#allocation99_spill] sm:$0xff]  ;;  %v11270_v19 = vld [vmem:[#allocation25_spill] sm:$0xff]  ;;  %vm1730_vm9 = vcmp.ge.f32.partialorder %v6411_v33, 0.0  ;;  %vm1731_vm10 = vcmp.ge.f32.partialorder %v6414_v58, 0.0  ;;  %vm1732_vm11 = vcmp.ge.f32.partialorder %v6417_v14, 0.0 }
 0x1c6   :  { %v11271_v35 = vld [vmem:[#allocation26_spill] sm:$0xff]  ;;  %v3764_v29 = vmov -1.0   ;;  %v6542_v33 = vand.u32 2147483647, %v6295_v16  ;;  %v6545_v58 = vand.u32 2147483647, %v6298_v36 }
 0x1c7   :  { %v6539_v39 = vsel %vm1692_vm1, 1.0, %v3764_v29  ;;  %vm1737_vm12 = vcmp.ge.f32.partialorder %v6433_v30, 0.0  ;;  %vm1738_vm13 = vcmp.ge.f32.partialorder %v6436_v28, 0.0  ;;  %v6554_v20 = vsel %vm1693_vm2, 1.0, %v3764_v29 }
 0x1c8   :  { %11272 = vst [vmem:[#allocation40_spill] sm:$0xff] %v6539_v39  ;;  %11273 = vst [vmem:[#allocation41_spill] sm:$0xff] %v6542_v33  ;;  %v6559_v16 = vsel %vm1694_vm3, 1.0, %v3764_v29  ;;  %v6564_v39 = vsel %vm1695_vm4, 1.0, %v3764_v29  ;;  %vm1741_vm1 = vcmp.ge.f32.partialorder %v6445_v1, 0.0  ;;  %v6578_v36 = vsel %vm1697_vm6, 1.0, %v3764_v29 }
 0x1c9   :  { %11274 = vst [vmem:[#allocation44_spill] sm:$0xff] %v6545_v58  ;;  %11275 = vst [vmem:[#allocation45_spill] sm:$0xff] %v6554_v20  ;;  %v6569_v58 = vsel %vm1696_vm5, 1.0, %v3764_v29  ;;  %vm11280_vm3 = vcmp.ge.f32.partialorder %v6313_v59, 0.0  ;;  %vm11282_vm4 = vcmp.ge.f32.partialorder %v6316_v51, 0.0  ;;  %vm11284_vm5 = vcmp.ge.f32.partialorder %v6319_v45, 0.0 }
 0x1ca   :  { %11276 = vst [vmem:[#allocation47_spill] sm:$0xff] %v6559_v16  ;;  %11277 = vst [vmem:[#allocation48_spill] sm:$0xff] %v6564_v39  ;;  %v6583_v39 = vsel %vm11280_vm3, 1.0, %v3764_v29  ;;  %v6593_v16 = vsel %vm11284_vm5, 1.0, %v3764_v29  ;;  %vm11286_vm3 = vcmp.ge.f32.partialorder %v6322_v56, 0.0  ;;  %vm11290_vm5 = vcmp.ge.f32.partialorder %v6328_v44, 0.0 }
 0x1cb   :  { %11278 = vst [vmem:[#allocation100_spill] sm:$0xff] %v6569_v58  ;;  %11279 = vst [vmem:[#allocation101_spill] sm:$0xff] %v6578_v36  ;;  %v6588_v58 = vsel %vm11282_vm4, 1.0, %v3764_v29  ;;  %vm11288_vm4 = vcmp.ge.f32.partialorder %v11263_v50, 0.0  ;;  %vm11292_vm15 = vcmp.ge.f32.partialorder %v11264_v62, 0.0  ;;  %vm1749_vm2 = vcmp.ge.f32.partialorder %v6470_v7, 0.0 }
 0x1cc   :  { %11281 = vst [vmem:[#allocation104_spill] sm:$0xff] %v6583_v39  ;;  %11283 = vst [vmem:[#allocation63_spill] sm:$0xff] %v6588_v58  ;;  %v6602_v39 = vsel %vm11286_vm3, 1.0, %v3764_v29  ;;  %v6607_v58 = vsel %vm11288_vm4, 1.0, %v3764_v29  ;;  %v6617_v36 = vsel %vm11292_vm15, 1.0, %v3764_v29  ;;  %vm11294_vm4 = vcmp.ge.f32.partialorder %v6334_v5, 0.0 }
 0x1cd   :  { %11285 = vst [vmem:[#allocation69_spill] sm:$0xff] %v6593_v16  ;;  %11287 = vst [vmem:[#allocation70_spill] sm:$0xff] %v6602_v39  ;;  %v6612_v16 = vsel %vm11290_vm5, 1.0, %v3764_v29  ;;  %vm11296_vm5 = vcmp.ge.f32.partialorder %v11265_v46, 0.0  ;;  %vm11298_vm15 = vcmp.ge.f32.partialorder %v6340_v6, 0.0  ;;  %vm11300_vm6 = vcmp.ge.f32.partialorder %v11266_v12, 0.0 }
 0x1ce   :  { %11289 = vst [vmem:[#allocation71_spill] sm:$0xff] %v6607_v58  ;;  %11291 = vst [vmem:[#allocation74_spill] sm:$0xff] %v6612_v16  ;;  %v6626_v58 = vsel %vm11294_vm4, 1.0, %v3764_v29  ;;  %v6631_v16 = vsel %vm11296_vm5, 1.0, %v3764_v29  ;;  %v6641_v39 = vsel %vm11300_vm6, 1.0, %v3764_v29  ;;  %vm1753_vm14 = vcmp.ge.f32.partialorder %v6482_v24, 0.0 }
 0x1cf   :  { %11293 = vst [vmem:[#allocation102_spill] sm:$0xff] %v6617_v36  ;;  %11295 = vst [vmem:[#allocation103_spill] sm:$0xff] %v6626_v58  ;;  %v6636_v36 = vsel %vm11298_vm15, 1.0, %v3764_v29  ;;  %vm11302_vm5 = vcmp.ge.f32.partialorder %v6346_v54, 0.0  ;;  %vm11304_vm15 = vcmp.ge.f32.partialorder %v11267_v26, 0.0  ;;  %vm11306_vm6 = vcmp.ge.f32.partialorder %v11268_v40, 0.0 }
 0x1d0   :  { %11297 = vst [vmem:[#allocation60_spill] sm:$0xff] %v6631_v16  ;;  %11299 = vst [vmem:[#allocation105_spill] sm:$0xff] %v6636_v36  ;;  %v6649_v16 = vsel %vm11302_vm5, 1.0, %v3764_v29  ;;  %v6654_v36 = vsel %vm11304_vm15, 1.0, %v3764_v29  ;;  %vm11308_vm4 = vcmp.ge.f32.partialorder %v6355_v42, 0.0  ;;  %vm11310_vm3 = vcmp.ge.f32.partialorder %v6358_v13, 0.0 }
 0x1d1   :  { %11301 = vst [vmem:[#allocation28_spill] sm:$0xff] %v6641_v39  ;;  %11303 = vst [vmem:[#allocation64_spill] sm:$0xff] %v6649_v16  ;;  %v6659_v39 = vsel %vm11306_vm6, 1.0, %v3764_v29  ;;  %v6664_v58 = vsel %vm11308_vm4, 1.0, %v3764_v29  ;;  %v6669_v20 = vsel %vm11310_vm3, 1.0, %v3764_v29  ;;  %vm11312_vm5 = vcmp.ge.f32.partialorder %v6361_v3, 0.0 }
 0x1d2   :  { %11305 = vst [vmem:[#allocation50_spill] sm:$0xff] %v6654_v36  ;;  %11307 = vst [vmem:[#allocation75_spill] sm:$0xff] %v6659_v39  ;;  %v6674_v16 = vsel %vm11312_vm5, 1.0, %v3764_v29  ;;  %vm11314_vm15 = vcmp.ge.f32.partialorder %v6364_v10, 0.0  ;;  %vm11316_vm6 = vcmp.ge.f32.partialorder %v11269_v0, 0.0  ;;  %vm11318_vm4 = vcmp.ge.f32.partialorder %v11270_v19, 0.0 }
 0x1d3   :  { %11309 = vst [vmem:[#allocation55_spill] sm:$0xff] %v6664_v58  ;;  %11311 = vst [vmem:[#allocation58_spill] sm:$0xff] %v6669_v20  ;;  %v6679_v36 = vsel %vm11314_vm15, 1.0, %v3764_v29  ;;  %v6684_v39 = vsel %vm11316_vm6, 1.0, %v3764_v29  ;;  %v6689_v58 = vsel %vm11318_vm4, 1.0, %v3764_v29  ;;  %vm11320_vm3 = vcmp.ge.f32.partialorder %v6373_v49, 0.0 }
 0x1d4   :  { %11313 = vst [vmem:[#allocation22_spill] sm:$0xff] %v6674_v16  ;;  %11315 = vst [vmem:[#allocation97_spill] sm:$0xff] %v6679_v36  ;;  %v6694_v20 = vsel %vm11320_vm3, 1.0, %v3764_v29  ;;  %vm11322_vm5 = vcmp.ge.f32.partialorder %v6376_v31, 0.0  ;;  %vm11324_vm15 = vcmp.ge.f32.partialorder %v6379_v23, 0.0  ;;  %vm11326_vm6 = vcmp.ge.f32.partialorder %v6382_v52, 0.0 }
 0x1d5   :  { %11317 = vst [vmem:[#allocation13_spill] sm:$0xff] %v6684_v39  ;;  %11319 = vst [vmem:[#allocation98_spill] sm:$0xff] %v6689_v58  ;;  %v6699_v16 = vsel %vm11322_vm5, 1.0, %v3764_v29  ;;  %v6704_v36 = vsel %vm11324_vm15, 1.0, %v3764_v29  ;;  %v6709_v39 = vsel %vm11326_vm6, 1.0, %v3764_v29  ;;  %vm11328_vm4 = vcmp.ge.f32.partialorder %v6385_v2, 0.0 }
 0x1d6   :  { %11321 = vst [vmem:[#allocation24_spill] sm:$0xff] %v6694_v20  ;;  %11323 = vst [vmem:[#allocation16_spill] sm:$0xff] %v6699_v16  ;;  %v6714_v58 = vsel %vm11328_vm4, 1.0, %v3764_v29  ;;  %vm11330_vm3 = vcmp.ge.f32.partialorder %v6388_v43, 0.0  ;;  %vm11332_vm5 = vcmp.ge.f32.partialorder %v6393_v38, 0.0  ;;  %vm11334_vm15 = vcmp.ge.f32.partialorder %v6396_v41, 0.0 }
 0x1d7   :  { %11325 = vst [vmem:[#allocation99_spill] sm:$0xff] %v6704_v36  ;;  %11327 = vst [vmem:[#allocation25_spill] sm:$0xff] %v6709_v39  ;;  %v6719_v20 = vsel %vm11330_vm3, 1.0, %v3764_v29  ;;  %v6724_v16 = vsel %vm11332_vm5, 1.0, %v3764_v29  ;;  %v6729_v36 = vsel %vm11334_vm15, 1.0, %v3764_v29  ;;  %v11336_v39 = vld [vmem:[#allocation19_spill] sm:$0xff] }
 0x1d8   :  { %11329 = vst [vmem:[#allocation26_spill] sm:$0xff] %v6714_v58  ;;  %11331 = vst [vmem:[#allocation109_spill] sm:$0xff] %v6719_v20  ;;  %vm11337_vm6 = vcmp.ge.f32.partialorder %v11336_v39, 0.0  ;;  %v6739_v58 = vsel %vm1727_vm0, 1.0, %v3764_v29  ;;  %v11340_v20 = vld [vmem:[#allocation21_spill] sm:$0xff]  ;;  %v6744_v38 = vsel %vm1728_vm7, 1.0, %v3764_v29 }
 0x1d9   :  { %11333 = vst [vmem:[#allocation110_spill] sm:$0xff] %v6724_v16  ;;  %11335 = vst [vmem:[#allocation111_spill] sm:$0xff] %v6729_v36  ;;  %v6734_v33 = vsel %vm11337_vm6, 1.0, %v3764_v29  ;;  %v6749_v16 = vsel %vm1729_vm8, 1.0, %v3764_v29  ;;  %v11343_v36 = vld [vmem:[#allocation30_spill] sm:$0xff]  ;;  %v6754_v39 = vsel %vm1730_vm9, 1.0, %v3764_v29 }
 0x1da   :  { %11338 = vst [vmem:[#allocation112_spill] sm:$0xff] %v6734_v33  ;;  %11339 = vst [vmem:[#allocation113_spill] sm:$0xff] %v6739_v58  ;;  %v11345_v33 = vld [vmem:[#allocation23_spill] sm:$0xff]  ;;  %v6759_v63 = vsel %vm1731_vm10, 1.0, %v3764_v29  ;;  %v6764_v58 = vsel %vm1732_vm11, 1.0, %v3764_v29  ;;  %vm11348_vm0 = vcmp.ge.f32.partialorder %v6420_v32, 0.0 }
 0x1db   :  { %11341 = vst [vmem:[#allocation21_spill] sm:$0xff] %v6744_v38  ;;  %11342 = vst [vmem:[#allocation114_spill] sm:$0xff] %v6749_v16  ;;  %v6769_v38 = vsel %vm11348_vm0, 1.0, %v3764_v29  ;;  %vm11350_vm7 = vcmp.ge.f32.partialorder %v6423_v17, 0.0  ;;  %vm11352_vm8 = vcmp.ge.f32.partialorder %v11271_v35, 0.0  ;;  %vm11359_vm10 = vcmp.ge.f32.partialorder %v6439_v22, 0.0 }
 0x1dc   :  { %11344 = vst [vmem:[#allocation30_spill] sm:$0xff] %v6754_v39  ;;  %11346 = vst [vmem:[#allocation23_spill] sm:$0xff] %v6759_v63  ;;  %v6774_v16 = vsel %vm11350_vm7, 1.0, %v3764_v29  ;;  %v6779_v39 = vsel %vm11352_vm8, 1.0, %v3764_v29  ;;  %v11354_v63 = vld [vmem:[#allocation54_spill] sm:$0xff]  ;;  %vm11361_vm11 = vcmp.ge.f32.partialorder %v6442_v48, 0.0 }
 0x1dd   :  { %11347 = vst [vmem:[#allocation115_spill] sm:$0xff] %v6764_v58  ;;  %11349 = vst [vmem:[#allocation116_spill] sm:$0xff] %v6769_v38  ;;  %vm11355_vm9 = vcmp.ge.f32.partialorder %v11354_v63, 0.0  ;;  %v6789_v58 = vsel %vm1737_vm12, 1.0, %v3764_v29  ;;  %v6794_v38 = vsel %vm1738_vm13, 1.0, %v3764_v29  ;;  %vm11364_vm12 = vcmp.ge.f32.partialorder %v6449_v60, 0.0 }
 0x1de   :  { %11351 = vst [vmem:[#allocation117_spill] sm:$0xff] %v6774_v16  ;;  %11353 = vst [vmem:[#allocation118_spill] sm:$0xff] %v6779_v39  ;;  %v6784_v14 = vsel %vm11355_vm9, 1.0, %v3764_v29  ;;  %v6799_v16 = vsel %vm11359_vm10, 1.0, %v3764_v29  ;;  %v6804_v39 = vsel %vm11361_vm11, 1.0, %v3764_v29  ;;  %vm11366_vm13 = vcmp.ge.f32.partialorder %v6452_v55, 0.0 }
 0x1df   :  { %11356 = vst [vmem:[#allocation54_spill] sm:$0xff] %v6784_v14  ;;  %11357 = vst [vmem:[#allocation119_spill] sm:$0xff] %v6789_v58  ;;  %v6809_v14 = vsel %vm1741_vm1, 1.0, %v3764_v29  ;;  %v6814_v58 = vsel %vm11364_vm12, 1.0, %v3764_v29  ;;  %vm11368_vm4 = vcmp.ge.f32.partialorder %v6455_v15, 0.0  ;;  %vm11370_vm3 = vcmp.ge.f32.partialorder %v6458_v53, 0.0 }
 0x1e0   :  { %11358 = vst [vmem:[#allocation120_spill] sm:$0xff] %v6794_v38  ;;  %11360 = vst [vmem:[#allocation121_spill] sm:$0xff] %v6799_v16  ;;  %v6819_v38 = vsel %vm11366_vm13, 1.0, %v3764_v29  ;;  %v6824_v16 = vsel %vm11368_vm4, 1.0, %v3764_v29  ;;  %vm11372_vm1 = vcmp.ge.f32.partialorder %v6461_v47, 0.0  ;;  %vm11374_vm5 = vcmp.ge.f32.partialorder %v6464_v11, 0.0 }
 0x1e1   :  { %11362 = vst [vmem:[#allocation122_spill] sm:$0xff] %v6804_v39  ;;  %11363 = vst [vmem:[#allocation123_spill] sm:$0xff] %v6809_v14  ;;  %v6829_v39 = vsel %vm11370_vm3, 1.0, %v3764_v29  ;;  %v6834_v14 = vsel %vm11372_vm1, 1.0, %v3764_v29  ;;  %vm11376_vm15 = vcmp.ge.f32.partialorder %v6467_v34, 0.0  ;;  %vm11379_vm6 = vcmp.ge.f32.partialorder %v6473_v18, 0.0 }
 0x1e2   :  { %11365 = vst [vmem:[#allocation124_spill] sm:$0xff] %v6814_v58  ;;  %11367 = vst [vmem:[#allocation125_spill] sm:$0xff] %v6819_v38  ;;  %v6839_v58 = vsel %vm11374_vm5, 1.0, %v3764_v29  ;;  %v6844_v38 = vsel %vm11376_vm15, 1.0, %v3764_v29  ;;  %vm11381_vm0 = vcmp.ge.f32.partialorder %v6476_v61, 0.0  ;;  %vm11383_vm7 = vcmp.ge.f32.partialorder %v6479_v27, 0.0 }
 0x1e3   :  { %11369 = vst [vmem:[#allocation126_spill] sm:$0xff] %v6824_v16  ;;  %11371 = vst [vmem:[#allocation127_spill] sm:$0xff] %v6829_v39  ;;  %v6849_v16 = vsel %vm1749_vm2, 1.0, %v3764_v29  ;;  %v6854_v39 = vsel %vm11379_vm6, 1.0, %v3764_v29  ;;  %vm11386_vm2 = vcmp.ge.f32.partialorder %v6487_v57, 0.0  ;;  %vm11388_vm8 = vcmp.ge.f32.partialorder %v6489_v8, 0.0 }
 0x1e4   :  { %11373 = vst [vmem:[#allocation128_spill] sm:$0xff] %v6834_v14  ;;  %11375 = vst [vmem:[#allocation129_spill] sm:$0xff] %v6839_v58  ;;  %v6859_v14 = vsel %vm11381_vm0, 1.0, %v3764_v29  ;;  %v6864_v58 = vsel %vm11383_vm7, 1.0, %v3764_v29  ;;  %v6888_v24 = vand.u32 2147483647, %v6307_v9 }
 0x1e5   :  { %11377 = vst [vmem:[#allocation130_spill] sm:$0xff] %v6844_v38  ;;  %11378 = vst [vmem:[#allocation131_spill] sm:$0xff] %v6849_v16  ;;  %v6869_v38 = vsel %vm1753_vm14, 1.0, %v3764_v29  ;;  %v6874_v16 = vsel %vm11386_vm2, 1.0, %v3764_v29  ;;  %v6894_v57 = vand.u32 2147483647, %v6313_v59 }
 0x1e6   :  { %11380 = vst [vmem:[#allocation132_spill] sm:$0xff] %v6854_v39  ;;  %11382 = vst [vmem:[#allocation133_spill] sm:$0xff] %v6859_v14  ;;  %v6879_v39 = vsel %vm11388_vm8, 1.0, %v3764_v29  ;;  %v6882_v14 = vand.u32 2147483647, %v6301_v21  ;;  %vm12366_vm14 = vcmask 64512  }
 0x1e7   :  { %11384 = vst [vmem:[#allocation134_spill] sm:$0xff] %v6864_v58  ;;  %11385 = vst [vmem:[#allocation135_spill] sm:$0xff] %v6869_v38  ;;  %v6885_v58 = vand.u32 2147483647, %v6304_v4  ;;  %v6891_v38 = vand.u32 2147483647, %v6310_v25 }
 0x1e8   :  { %11387 = vst [vmem:[#allocation136_spill] sm:$0xff] %v6874_v16  ;;  %11389 = vst [vmem:[#allocation137_spill] sm:$0xff] %v6879_v39  ;;  %v6897_v16 = vand.u32 2147483647, %v6316_v51  ;;  %v6900_v29 = vand.u32 2147483647, %v6319_v45 }
 0x1e9   :  { %11390 = vst [vmem:[#allocation138_spill] sm:$0xff] %v6882_v14  ;;  %11391 = vst [vmem:[#allocation139_spill] sm:$0xff] %v6885_v58  ;;  %v6903_v21 = vand.u32 2147483647, %v6322_v56  ;;  %v6906_v4 = vand.u32 2147483647, %v11263_v50 }
 0x1ea   :  { %11392 = vst [vmem:[#allocation140_spill] sm:$0xff] %v6888_v24  ;;  %11393 = vst [vmem:[#allocation141_spill] sm:$0xff] %v6891_v38  ;;  %v6909_v9 = vand.u32 2147483647, %v6328_v44  ;;  %v6912_v25 = vand.u32 2147483647, %v11264_v62 }
 0x1eb   :  { %11394 = vst [vmem:[#allocation142_spill] sm:$0xff] %v6894_v57  ;;  %11395 = vst [vmem:[#allocation143_spill] sm:$0xff] %v6897_v16  ;;  %v6915_v59 = vand.u32 2147483647, %v6334_v5  ;;  %v6918_v51 = vand.u32 2147483647, %v11265_v46 }
 0x1ec   :  { %11396 = vst [vmem:[#allocation144_spill] sm:$0xff] %v6900_v29  ;;  %11397 = vst [vmem:[#allocation145_spill] sm:$0xff] %v6903_v21  ;;  %v6921_v45 = vand.u32 2147483647, %v6340_v6  ;;  %v6924_v56 = vand.u32 2147483647, %v11266_v12 }
 0x1ed   :  { %11398 = vst [vmem:[#allocation146_spill] sm:$0xff] %v6906_v4  ;;  %11399 = vst [vmem:[#allocation147_spill] sm:$0xff] %v6909_v9  ;;  %v6927_v50 = vand.u32 2147483647, %v6346_v54  ;;  %v6930_v44 = vand.u32 2147483647, %v11267_v26 }
 0x1ee   :  { %11400 = vst [vmem:[#allocation148_spill] sm:$0xff] %v6912_v25  ;;  %11401 = vst [vmem:[#allocation149_spill] sm:$0xff] %v6915_v59  ;;  %v6933_v62 = vand.u32 2147483647, %v11268_v40  ;;  %v6936_v5 = vand.u32 2147483647, %v6355_v42 }
 0x1ef   :  { %11402 = vst [vmem:[#allocation150_spill] sm:$0xff] %v6918_v51  ;;  %11403 = vst [vmem:[#allocation151_spill] sm:$0xff] %v6921_v45  ;;  %v6939_v46 = vand.u32 2147483647, %v6358_v13  ;;  %v6942_v6 = vand.u32 2147483647, %v6361_v3 }
 0x1f0   :  { %11404 = vst [vmem:[#allocation152_spill] sm:$0xff] %v6924_v56  ;;  %11405 = vst [vmem:[#allocation153_spill] sm:$0xff] %v6927_v50  ;;  %v6945_v12 = vand.u32 2147483647, %v6364_v10  ;;  %v6948_v54 = vand.u32 2147483647, %v11269_v0 }
 0x1f1   :  { %11406 = vst [vmem:[#allocation154_spill] sm:$0xff] %v6930_v44  ;;  %11407 = vst [vmem:[#allocation155_spill] sm:$0xff] %v6933_v62  ;;  %v6951_v26 = vand.u32 2147483647, %v11270_v19  ;;  %v6954_v40 = vand.u32 2147483647, %v6373_v49 }
 0x1f2   :  { %11408 = vst [vmem:[#allocation156_spill] sm:$0xff] %v6936_v5  ;;  %11409 = vst [vmem:[#allocation157_spill] sm:$0xff] %v6939_v46  ;;  %v6957_v42 = vand.u32 2147483647, %v6376_v31  ;;  %v6960_v13 = vand.u32 2147483647, %v6379_v23 }
 0x1f3   :  { %11410 = vst [vmem:[#allocation158_spill] sm:$0xff] %v6942_v6  ;;  %11411 = vst [vmem:[#allocation159_spill] sm:$0xff] %v6945_v12  ;;  %v6963_v3 = vand.u32 2147483647, %v6382_v52  ;;  %v6966_v10 = vand.u32 2147483647, %v6385_v2 }
 0x1f4   :  { %11412 = vst [vmem:[#allocation160_spill] sm:$0xff] %v6948_v54  ;;  %11413 = vst [vmem:[#allocation161_spill] sm:$0xff] %v6951_v26  ;;  %v6969_v0 = vand.u32 2147483647, %v6388_v43  ;;  %v11420_v19 = vld [vmem:[#allocation52_spill] sm:$0xff]  ;;  %v11423_v31 = vld [vmem:[#allocation19_spill] sm:$0xff] }
 0x1f5   :  { %11414 = vst [vmem:[#allocation162_spill] sm:$0xff] %v6954_v40  ;;  %11415 = vst [vmem:[#allocation163_spill] sm:$0xff] %v6957_v42  ;;  %v6972_v39 = vand.u32 2147483647, %v11420_v19  ;;  %v6975_v49 = vand.u32 2147483647, %v6396_v41 }
 0x1f6   :  { %11416 = vst [vmem:[#allocation164_spill] sm:$0xff] %v6960_v13  ;;  %11417 = vst [vmem:[#allocation165_spill] sm:$0xff] %v6963_v3  ;;  %v6978_v42 = vand.u32 2147483647, %v11423_v31  ;;  %v11425_v23 = vld [vmem:[#allocation29_spill] sm:$0xff] }
 0x1f7   :  { %11418 = vst [vmem:[#allocation166_spill] sm:$0xff] %v6966_v10  ;;  %11419 = vst [vmem:[#allocation167_spill] sm:$0xff] %v6969_v0  ;;  %v6981_v13 = vand.u32 2147483647, %v11425_v23  ;;  %v6984_v52 = vand.u32 2147483647, %v11340_v20 }
 0x1f8   :  { %11421 = vst [vmem:[#allocation52_spill] sm:$0xff] %v6972_v39  ;;  %11422 = vst [vmem:[#allocation168_spill] sm:$0xff] %v6975_v49  ;;  %v6987_v2 = vand.u32 2147483647, %v6408_v37  ;;  %v6990_v43 = vand.u32 2147483647, %v11343_v36 }
 0x1f9   :  { %11424 = vst [vmem:[#allocation19_spill] sm:$0xff] %v6978_v42  ;;  %11426 = vst [vmem:[#allocation29_spill] sm:$0xff] %v6981_v13  ;;  %v6993_v19 = vand.u32 2147483647, %v11345_v33  ;;  %v11431_v41 = vld [vmem:[#allocation33_spill] sm:$0xff] }
 0x1fa   :  { %11427 = vst [vmem:[#allocation169_spill] sm:$0xff] %v6984_v52  ;;  %11428 = vst [vmem:[#allocation170_spill] sm:$0xff] %v6987_v2  ;;  %v6996_v49 = vand.u32 2147483647, %v11431_v41  ;;  %v6999_v31 = vand.u32 2147483647, %v6420_v32 }
 0x1fb   :  { %11429 = vst [vmem:[#allocation171_spill] sm:$0xff] %v6990_v43  ;;  %11430 = vst [vmem:[#allocation172_spill] sm:$0xff] %v6993_v19  ;;  %v7002_v23 = vand.u32 2147483647, %v6423_v17  ;;  %v7005_v20 = vand.u32 2147483647, %v11271_v35 }
 0x1fc   :  { %11432 = vst [vmem:[#allocation33_spill] sm:$0xff] %v6996_v49  ;;  %11433 = vst [vmem:[#allocation173_spill] sm:$0xff] %v6999_v31  ;;  %v7008_v37 = vand.u32 2147483647, %v11354_v63  ;;  %v7011_v36 = vand.u32 2147483647, %v6433_v30 }
 0x1fd   :  { %11434 = vst [vmem:[#allocation174_spill] sm:$0xff] %v7002_v23  ;;  %11435 = vst [vmem:[#allocation175_spill] sm:$0xff] %v7005_v20  ;;  %v7014_v33 = vand.u32 2147483647, %v6436_v28  ;;  %v7017_v41 = vand.u32 2147483647, %v6439_v22 }
 0x1fe   :  { %11436 = vst [vmem:[#allocation176_spill] sm:$0xff] %v7008_v37  ;;  %11437 = vst [vmem:[#allocation177_spill] sm:$0xff] %v7011_v36  ;;  %v7020_v32 = vand.u32 2147483647, %v6442_v48  ;;  %v7023_v17 = vand.u32 2147483647, %v6445_v1 }
 0x1ff   :  { %11438 = vst [vmem:[#allocation178_spill] sm:$0xff] %v7014_v33  ;;  %11439 = vst [vmem:[#allocation179_spill] sm:$0xff] %v7017_v41  ;;  %v7026_v35 = vand.u32 2147483647, %v6449_v60  ;;  %v7029_v63 = vand.u32 2147483647, %v6452_v55 }
 0x200   :  { %11440 = vst [vmem:[#allocation180_spill] sm:$0xff] %v7020_v32  ;;  %11441 = vst [vmem:[#allocation181_spill] sm:$0xff] %v7023_v17  ;;  %v7032_v30 = vand.u32 2147483647, %v6455_v15  ;;  %v7035_v28 = vand.u32 2147483647, %v6458_v53 }
 0x201   :  { %11442 = vst [vmem:[#allocation182_spill] sm:$0xff] %v7026_v35  ;;  %11443 = vst [vmem:[#allocation183_spill] sm:$0xff] %v7029_v63  ;;  %v7038_v22 = vand.u32 2147483647, %v6461_v47  ;;  %v7041_v48 = vand.u32 2147483647, %v6464_v11 }
 0x202   :  { %11444 = vst [vmem:[#allocation184_spill] sm:$0xff] %v7032_v30  ;;  %11445 = vst [vmem:[#allocation185_spill] sm:$0xff] %v7035_v28  ;;  %v7044_v1 = vand.u32 2147483647, %v6467_v34  ;;  %v7047_v60 = vand.u32 2147483647, %v6470_v7 }
 0x203   :  { %11446 = vst [vmem:[#allocation186_spill] sm:$0xff] %v7038_v22  ;;  %11447 = vst [vmem:[#allocation187_spill] sm:$0xff] %v7041_v48  ;;  %v7050_v55 = vand.u32 2147483647, %v6473_v18  ;;  %v7053_v15 = vand.u32 2147483647, %v6476_v61 }
 0x204   :  { %11448 = vst [vmem:[#allocation188_spill] sm:$0xff] %v7044_v1  ;;  %11449 = vst [vmem:[#allocation189_spill] sm:$0xff] %v7047_v60  ;;  %v7056_v53 = vand.u32 2147483647, %v6479_v27  ;;  %v11453_v47 = vld [vmem:[#allocation34_spill] sm:$0xff]  ;;  %v11455_v11 = vld [vmem:[#allocation39_spill] sm:$0xff] }
 0x205   :  { %11450 = vst [vmem:[#allocation190_spill] sm:$0xff] %v7050_v55  ;;  %11451 = vst [vmem:[#allocation191_spill] sm:$0xff] %v7053_v15  ;;  %v7059_v22 = vand.u32 2147483647, %v11453_v47  ;;  %v7062_v48 = vand.u32 2147483647, %v11455_v11 }
 0x206   :  { %11452 = vst [vmem:[#allocation192_spill] sm:$0xff] %v7056_v53  ;;  %v7065_v34 = vand.u32 2147483647, %v6489_v8  ;;  %v11458_v7 = vld [vmem:[#allocation41_spill] sm:$0xff]  ;;  %v11459_v18 = vld [vmem:[#allocation44_spill] sm:$0xff]  ;;  %vm12367_vm9 = vmmov %vm12366_vm14 }
 0x207   :  { %11454 = vst [vmem:[#allocation34_spill] sm:$0xff] %v7059_v22  ;;  %11456 = vst [vmem:[#allocation39_spill] sm:$0xff] %v7062_v48  ;;  %v7068_v60 = vmul.f32 0.3275911, %v11458_v7  ;;  %v7071_v55 = vmul.f32 0.3275911, %v11459_v18 }
 0x208   :  { %11457 = vst [vmem:[#allocation193_spill] sm:$0xff] %v7065_v34  ;;  %v7074_v61 = vmul.f32 0.3275911, %v6882_v14  ;;  %v7077_v27 = vmul.f32 0.3275911, %v6885_v58  ;;  %vm12372_vm10 = vmmov %vm12367_vm9 }
 0x209   :  { %v7080_v47 = vmul.f32 0.3275911, %v6888_v24  ;;  %v7083_v11 = vmul.f32 0.3275911, %v6891_v38  ;;  %v7086_v8 = vmul.f32 0.3275911, %v6894_v57  ;;  %vm12373_vm11 = vmmov %vm12367_vm9 }
 0x20a   :  { %v7089_v7 = vmul.f32 0.3275911, %v6897_v16  ;;  %v7092_v18 = vmul.f32 0.3275911, %v6900_v29  ;;  %v7095_v14 = vmul.f32 0.3275911, %v6903_v21  ;;  %vm12374_vm12 = vmmov %vm12367_vm9 }
 0x20b   :  { %v7098_v58 = vmul.f32 0.3275911, %v6906_v4  ;;  %v7101_v24 = vmul.f32 0.3275911, %v6909_v9  ;;  %v7104_v38 = vmul.f32 0.3275911, %v6912_v25  ;;  %vm12375_vm13 = vmmov %vm12367_vm9 }
 0x20c   :  { %v7107_v57 = vmul.f32 0.3275911, %v6915_v59  ;;  %v7110_v16 = vmul.f32 0.3275911, %v6918_v51  ;;  %v7113_v29 = vmul.f32 0.3275911, %v6921_v45  ;;  %vm12380_vm4 = vmmov %vm12367_vm9 }
 0x20d   :  { %v7116_v21 = vmul.f32 0.3275911, %v6924_v56  ;;  %v7119_v4 = vmul.f32 0.3275911, %v6927_v50  ;;  %v7122_v9 = vmul.f32 0.3275911, %v6930_v44  ;;  %vm12381_vm3 = vmmov %vm12380_vm4 }
 0x20e   :  { %v7125_v25 = vmul.f32 0.3275911, %v6933_v62  ;;  %v7128_v59 = vmul.f32 0.3275911, %v6936_v5  ;;  %v7131_v51 = vmul.f32 0.3275911, %v6939_v46  ;;  %vm12382_vm1 = vmmov %vm12381_vm3 }
 0x20f   :  { %v7134_v45 = vmul.f32 0.3275911, %v6942_v6  ;;  %v7137_v56 = vmul.f32 0.3275911, %v6945_v12  ;;  %v7140_v50 = vmul.f32 0.3275911, %v6948_v54  ;;  %vm12383_vm5 = vmmov %vm12382_vm1 }
 0x210   :  { %11460 = vst [vmem:[#allocation194_spill] sm:$0xff] %v7128_v59  ;;  %11461 = vst [vmem:[#allocation195_spill] sm:$0xff] %v7131_v51  ;;  %v7143_v44 = vmul.f32 0.3275911, %v6951_v26  ;;  %v7146_v62 = vmul.f32 0.3275911, %v6954_v40 }
 0x211   :  { %v11463_v5 = vld [vmem:[#allocation163_spill] sm:$0xff]  ;;  %v11464_v46 = vld [vmem:[#allocation164_spill] sm:$0xff]  ;;  %v7155_v6 = vmul.f32 0.3275911, %v6963_v3  ;;  %v7158_v12 = vmul.f32 0.3275911, %v6966_v10  ;;  %vm12388_vm15 = vmmov %vm12382_vm1 }
 0x212   :  { %11462 = vst [vmem:[#allocation196_spill] sm:$0xff] %v7146_v62  ;;  %v7149_v59 = vmul.f32 0.3275911, %v11463_v5  ;;  %v7152_v51 = vmul.f32 0.3275911, %v11464_v46  ;;  %v11465_v40 = vld [vmem:[#allocation168_spill] sm:$0xff]  ;;  %vm12389_vm6 = vmmov %vm12382_vm1 }
 0x213   :  { %v7161_v54 = vmul.f32 0.3275911, %v6969_v0  ;;  %v7164_v26 = vmul.f32 0.3275911, %v6972_v39  ;;  %v7167_v62 = vmul.f32 0.3275911, %v11465_v40  ;;  %vm12390_vm0 = vmmov %vm12382_vm1 }
 0x214   :  { %v7170_v5 = vmul.f32 0.3275911, %v6978_v42  ;;  %v7173_v46 = vmul.f32 0.3275911, %v6981_v13  ;;  %v7176_v3 = vmul.f32 0.3275911, %v6984_v52  ;;  %vm12391_vm7 = vmmov %vm12390_vm0 }
 0x215   :  { %v7179_v10 = vmul.f32 0.3275911, %v6987_v2  ;;  %v7182_v0 = vmul.f32 0.3275911, %v6990_v43  ;;  %v7185_v39 = vmul.f32 0.3275911, %v6993_v19  ;;  %vm12396_vm2 = vmmov %vm12390_vm0 }
 0x216   :  { %v7188_v40 = vmul.f32 0.3275911, %v6996_v49  ;;  %v7191_v42 = vmul.f32 0.3275911, %v6999_v31  ;;  %v7194_v13 = vmul.f32 0.3275911, %v7002_v23  ;;  %vm12397_vm8 = vmmov %vm12390_vm0 }
 0x217   :  { %v7197_v52 = vmul.f32 0.3275911, %v7005_v20  ;;  %v7200_v2 = vmul.f32 0.3275911, %v7008_v37  ;;  %v7203_v43 = vmul.f32 0.3275911, %v7011_v36 }
 0x218   :  { %v7206_v19 = vmul.f32 0.3275911, %v7014_v33  ;;  %v7209_v49 = vmul.f32 0.3275911, %v7017_v41  ;;  %v7212_v31 = vmul.f32 0.3275911, %v7020_v32 }
 0x219   :  { %v7215_v23 = vmul.f32 0.3275911, %v7023_v17  ;;  %v7218_v20 = vmul.f32 0.3275911, %v7026_v35  ;;  %v7221_v37 = vmul.f32 0.3275911, %v7029_v63 }
 0x21a   :  { %11466 = vst [vmem:[#allocation197_spill] sm:$0xff] %v7209_v49  ;;  %11467 = vst [vmem:[#allocation198_spill] sm:$0xff] %v7212_v31  ;;  %v7224_v36 = vmul.f32 0.3275911, %v7032_v30  ;;  %v7227_v33 = vmul.f32 0.3275911, %v7035_v28 }
 0x21b   :  { %11468 = vst [vmem:[#allocation199_spill] sm:$0xff] %v7218_v20  ;;  %11469 = vst [vmem:[#allocation200_spill] sm:$0xff] %v7221_v37  ;;  %v11470_v41 = vld [vmem:[#allocation186_spill] sm:$0xff]  ;;  %v11471_v32 = vld [vmem:[#allocation187_spill] sm:$0xff]  ;;  %v7236_v17 = vmul.f32 0.3275911, %v7044_v1 }
 0x21c   :  { %v7230_v49 = vmul.f32 0.3275911, %v11470_v41  ;;  %v7233_v31 = vmul.f32 0.3275911, %v11471_v32  ;;  %v11472_v35 = vld [vmem:[#allocation189_spill] sm:$0xff]  ;;  %v11473_v63 = vld [vmem:[#allocation190_spill] sm:$0xff] }
 0x21d   :  { %v7239_v20 = vmul.f32 0.3275911, %v11472_v35  ;;  %v7242_v37 = vmul.f32 0.3275911, %v11473_v63  ;;  %v7245_v30 = vmul.f32 0.3275911, %v7053_v15 }
 0x21e   :  { %v7248_v28 = vmul.f32 0.3275911, %v7056_v53  ;;  %v7251_v41 = vmul.f32 0.3275911, %v7059_v22  ;;  %v7254_v32 = vmul.f32 0.3275911, %v7062_v48 }
 0x21f   :  { %11474 = vst [vmem:[#allocation201_spill] sm:$0xff] %v7242_v37  ;;  %v7257_v1 = vmul.f32 0.3275911, %v7065_v34  ;;  %v1948_v35 = vadd.f32 1.0, %v7068_v60  ;;  %v1949_v63 = vadd.f32 1.0, %v7071_v55  ;;  %v1950_v37 = vadd.f32 1.0, %v7074_v61 }
 0x220   :  { %11475 = vst [vmem:[#allocation202_spill] sm:$0xff] %v7248_v28  ;;  %11476 = vst [vmem:[#allocation203_spill] sm:$0xff] %v7254_v32  ;;  %v1951_v15 = vadd.f32 1.0, %v7077_v27  ;;  %v1952_v53 = vadd.f32 1.0, %v7080_v47  ;;  %v1953_v28 = vadd.f32 1.0, %v7083_v11  ;;  %v1954_v22 = vadd.f32 1.0, %v7086_v8 }
 0x221   :  { %v1955_v48 = vadd.f32 1.0, %v7089_v7  ;;  %v1956_v32 = vadd.f32 1.0, %v7092_v18  ;;  %v1957_v34 = vadd.f32 1.0, %v7095_v14  ;;  %v7270_v60 = vadd.f32 1.0, %v7098_v58 }
 0x222   :  { %v7273_v55 = vadd.f32 1.0, %v7101_v24  ;;  %v7276_v61 = vadd.f32 1.0, %v7104_v38  ;;  %v7279_v27 = vadd.f32 1.0, %v7107_v57  ;;  %v7282_v47 = vadd.f32 1.0, %v7110_v16  ;;  %v11477_v57 = vld [vmem:[#allocation194_spill] sm:$0xff]  ;;  %v11478_v16 = vld [vmem:[#allocation195_spill] sm:$0xff] }
 0x223   :  { %v7285_v7 = vadd.f32 1.0, %v7113_v29  ;;  %v7288_v14 = vadd.f32 1.0, %v7116_v21  ;;  %v7291_v58 = vadd.f32 1.0, %v7119_v4  ;;  %v7294_v24 = vadd.f32 1.0, %v7122_v9 }
 0x224   :  { %v7297_v38 = vadd.f32 1.0, %v7125_v25  ;;  %v7300_v18 = vadd.f32 1.0, %v11477_v57  ;;  %v7303_v11 = vadd.f32 1.0, %v11478_v16  ;;  %v7306_v29 = vadd.f32 1.0, %v7134_v45  ;;  %v11479_v25 = vld [vmem:[#allocation196_spill] sm:$0xff] }
 0x225   :  { %v7309_v21 = vadd.f32 1.0, %v7137_v56  ;;  %v7312_v4 = vadd.f32 1.0, %v7140_v50  ;;  %v7315_v9 = vadd.f32 1.0, %v7143_v44  ;;  %v7318_v8 = vadd.f32 1.0, %v11479_v25 }
 0x226   :  { %v7321_v57 = vadd.f32 1.0, %v7149_v59  ;;  %v7324_v16 = vadd.f32 1.0, %v7152_v51  ;;  %v7327_v45 = vadd.f32 1.0, %v7155_v6  ;;  %v7330_v56 = vadd.f32 1.0, %v7158_v12 }
 0x227   :  { %v7333_v50 = vadd.f32 1.0, %v7161_v54  ;;  %v7336_v44 = vadd.f32 1.0, %v7164_v26  ;;  %3491 = vrcp.f32 %v1948_v35  ;;  %v7339_v25 = vadd.f32 1.0, %v7167_v62  ;;  %v11482_v35 = vld [vmem:[#allocation199_spill] sm:$0xff] }
 0x228   :  { %v7342_v59 = vadd.f32 1.0, %v7170_v5  ;;  %v7345_v51 = vadd.f32 1.0, %v7173_v46  ;;  %3493 = vrcp.f32 %v1949_v63  ;;  %v7348_v6 = vadd.f32 1.0, %v7176_v3  ;;  %v11483_v63 = vld [vmem:[#allocation200_spill] sm:$0xff] }
 0x229   :  { %v7351_v12 = vadd.f32 1.0, %v7179_v10  ;;  %v7354_v54 = vadd.f32 1.0, %v7182_v0  ;;  %3495 = vrcp.f32 %v1950_v37  ;;  %v7357_v62 = vadd.f32 1.0, %v7185_v39  ;;  %v11480_v0 = vld [vmem:[#allocation197_spill] sm:$0xff]  ;;  %v11481_v37 = vld [vmem:[#allocation198_spill] sm:$0xff] }
 0x22a   :  { %v7360_v5 = vadd.f32 1.0, %v7188_v40  ;;  %v7363_v46 = vadd.f32 1.0, %v7191_v42  ;;  %3497 = vrcp.f32 %v1951_v15  ;;  %v7366_v26 = vadd.f32 1.0, %v7194_v13 }
 0x22b   :  { %v7369_v3 = vadd.f32 1.0, %v7197_v52  ;;  %v7372_v10 = vadd.f32 1.0, %v7200_v2  ;;  %3499 = vrcp.f32 %v1952_v53  ;;  %v7375_v39 = vadd.f32 1.0, %v7203_v43 }
 0x22c   :  { %v7378_v40 = vadd.f32 1.0, %v7206_v19  ;;  %v7381_v42 = vadd.f32 1.0, %v11480_v0  ;;  %3501 = vrcp.f32 %v1953_v28  ;;  %v7384_v13 = vadd.f32 1.0, %v11481_v37  ;;  %v11484_v0 = vld [vmem:[#allocation201_spill] sm:$0xff] }
 0x22d   :  { %v7387_v52 = vadd.f32 1.0, %v7215_v23  ;;  %v7390_v2 = vadd.f32 1.0, %v11482_v35  ;;  %3503 = vrcp.f32 %v1954_v22  ;;  %v7393_v43 = vadd.f32 1.0, %v11483_v63 }
 0x22e   :  { %v7396_v19 = vadd.f32 1.0, %v7224_v36  ;;  %v7399_v15 = vadd.f32 1.0, %v7227_v33  ;;  %3505 = vrcp.f32 %v1955_v48  ;;  %v7402_v28 = vadd.f32 1.0, %v7230_v49  ;;  %v11488_v49 = vld [vmem:[#allocation202_spill] sm:$0xff] }
 0x22f   :  { %v7405_v23 = vadd.f32 1.0, %v7233_v31  ;;  %v7408_v53 = vadd.f32 1.0, %v7236_v17  ;;  %3507 = vrcp.f32 %v1956_v32  ;;  %v7411_v22 = vadd.f32 1.0, %v7239_v20  ;;  %v11491_v17 = vld [vmem:[#allocation203_spill] sm:$0xff] }
 0x230   :  { %v7414_v36 = vadd.f32 1.0, %v11484_v0  ;;  %v7417_v33 = vadd.f32 1.0, %v7245_v30  ;;  %3509 = vrcp.f32 %v1957_v34  ;;  %v7422_v37 = vadd.f32 1.0, %v11488_v49 }
 0x231   :  { %v7419_v48 = vpop.eup %3491  ;;  %v7425_v31 = vadd.f32 1.0, %v7251_v41  ;;  %v7428_v32 = vadd.f32 1.0, %v11491_v17  ;;  %3511 = vrcp.f32 %v7270_v60  ;;  %v7434_v35 = vadd.f32 1.0, %v7257_v1 }
 0x232   :  { %11485 = vst [vmem:[#allocation194_spill] sm:$0xff] %v7414_v36  ;;  %11486 = vst [vmem:[#allocation195_spill] sm:$0xff] %v7417_v33  ;;  %v7431_v20 = vpop.eup %3493  ;;  %3513 = vrcp.f32 %v7273_v55  ;;  %v2140_v30 = vmul.f32 1.0614054, %v7419_v48 }
 0x233   :  { %11487 = vst [vmem:[#allocation196_spill] sm:$0xff] %v7419_v48  ;;  %11489 = vst [vmem:[#allocation197_spill] sm:$0xff] %v7422_v37  ;;  %v7439_v0 = vpop.eup %3495  ;;  %3515 = vrcp.f32 %v7276_v61  ;;  %v2141_v41 = vmul.f32 1.0614054, %v7431_v20 }
 0x234   :  { %11490 = vst [vmem:[#allocation198_spill] sm:$0xff] %v7425_v31  ;;  %11492 = vst [vmem:[#allocation199_spill] sm:$0xff] %v7428_v32  ;;  %v7445_v31 = vpop.eup %3497  ;;  %3517 = vrcp.f32 %v7279_v27  ;;  %v2142_v1 = vmul.f32 1.0614054, %v7439_v0  ;;  %v2204_v55 = vadd.f32 -1.4531521, %v2140_v30 }
 0x235   :  { %11493 = vst [vmem:[#allocation200_spill] sm:$0xff] %v7431_v20  ;;  %11494 = vst [vmem:[#allocation201_spill] sm:$0xff] %v7434_v35  ;;  %v7450_v63 = vpop.eup %3499  ;;  %3519 = vrcp.f32 %v7282_v47  ;;  %v2143_v61 = vmul.f32 1.0614054, %v7445_v31  ;;  %v2205_v34 = vadd.f32 -1.4531521, %v2141_v41 }
 0x236   :  { %11496 = vst [vmem:[#allocation202_spill] sm:$0xff] %v7439_v0  ;;  %11499 = vst [vmem:[#allocation203_spill] sm:$0xff] %v7445_v31  ;;  %v7455_v49 = vpop.eup %3501  ;;  %3521 = vrcp.f32 %v7285_v7  ;;  %v2144_v27 = vmul.f32 1.0614054, %v7450_v63  ;;  %v2206_v32 = vadd.f32 -1.4531521, %v2142_v1  ;;  %v7465_v41 = vmul.f32 %v7419_v48, %v2204_v55 }
 0x237   :  { %11501 = vst [vmem:[#allocation204_spill] sm:$0xff] %v7450_v63  ;;  %11503 = vst [vmem:[#allocation205_spill] sm:$0xff] %v7455_v49  ;;  %v7460_v36 = vpop.eup %3503  ;;  %3523 = vrcp.f32 %v7288_v14  ;;  %v2145_v47 = vmul.f32 1.0614054, %v7455_v49  ;;  %v2207_v37 = vadd.f32 -1.4531521, %v2143_v61  ;;  %v7472_v1 = vmul.f32 %v7431_v20, %v2205_v34 }
 0x238   :  { %11505 = vst [vmem:[#allocation206_spill] sm:$0xff] %v7460_v36  ;;  %v7467_v17 = vpop.eup %3505  ;;  %3525 = vrcp.f32 %v7291_v58  ;;  %v2146_v7 = vmul.f32 1.0614054, %v7460_v36  ;;  %v2208_v33 = vadd.f32 -1.4531521, %v2144_v27  ;;  %v7479_v55 = vmul.f32 %v7439_v0, %v2206_v32 }
 0x239   :  { %11506 = vst [vmem:[#allocation207_spill] sm:$0xff] %v7467_v17  ;;  %v7474_v30 = vpop.eup %3507  ;;  %3527 = vrcp.f32 %v7294_v24  ;;  %v2147_v14 = vmul.f32 1.0614054, %v7467_v17  ;;  %v2209_v61 = vadd.f32 -1.4531521, %v2145_v47  ;;  %v7486_v34 = vmul.f32 %v7445_v31, %v2207_v37 }
 0x23a   :  { %11507 = vst [vmem:[#allocation208_spill] sm:$0xff] %v7474_v30  ;;  %v7481_v60 = vpop.eup %3509  ;;  %3529 = vrcp.f32 %v7297_v38  ;;  %v2148_v58 = vmul.f32 1.0614054, %v7474_v30  ;;  %v2210_v27 = vadd.f32 -1.4531521, %v2146_v7  ;;  %v7493_v32 = vmul.f32 %v7450_v63, %v2208_v33 }
 0x23b   :  { %11508 = vst [vmem:[#allocation209_spill] sm:$0xff] %v7481_v60  ;;  %v7488_v35 = vpop.eup %3511  ;;  %3531 = vrcp.f32 %v7300_v18  ;;  %v2149_v24 = vmul.f32 1.0614054, %v7481_v60  ;;  %v2211_v47 = vadd.f32 -1.4531521, %v2147_v14  ;;  %v7500_v37 = vmul.f32 %v7455_v49, %v2209_v61 }
 0x23c   :  { %11509 = vst [vmem:[#allocation210_spill] sm:$0xff] %v7488_v35  ;;  %v7495_v0 = vpop.eup %3513  ;;  %3533 = vrcp.f32 %v7303_v11  ;;  %v2150_v38 = vmul.f32 1.0614054, %v7488_v35  ;;  %v2212_v7 = vadd.f32 -1.4531521, %v2148_v58  ;;  %v7507_v33 = vmul.f32 %v7460_v36, %v2210_v27 }
 0x23d   :  { %11510 = vst [vmem:[#allocation211_spill] sm:$0xff] %v7495_v0  ;;  %v7502_v31 = vpop.eup %3515  ;;  %3535 = vrcp.f32 %v7306_v29  ;;  %v2151_v18 = vmul.f32 1.0614054, %v7495_v0  ;;  %v2213_v14 = vadd.f32 -1.4531521, %v2149_v24  ;;  %v7514_v61 = vmul.f32 %v7467_v17, %v2211_v47 }
 0x23e   :  { %11511 = vst [vmem:[#allocation212_spill] sm:$0xff] %v7502_v31  ;;  %v7509_v63 = vpop.eup %3517  ;;  %3537 = vrcp.f32 %v7309_v21  ;;  %v2152_v11 = vmul.f32 1.0614054, %v7502_v31  ;;  %v2214_v58 = vadd.f32 -1.4531521, %v2150_v38  ;;  %v7521_v27 = vmul.f32 %v7474_v30, %v2212_v7 }
 0x23f   :  { %11512 = vst [vmem:[#allocation213_spill] sm:$0xff] %v7509_v63  ;;  %v7516_v49 = vpop.eup %3519  ;;  %3539 = vrcp.f32 %v7312_v4  ;;  %v2153_v29 = vmul.f32 1.0614054, %v7509_v63  ;;  %v2215_v24 = vadd.f32 -1.4531521, %v2151_v18  ;;  %v7528_v47 = vmul.f32 %v7481_v60, %v2213_v14 }
 0x240   :  { %11513 = vst [vmem:[#allocation214_spill] sm:$0xff] %v7516_v49  ;;  %v7523_v36 = vpop.eup %3521  ;;  %3541 = vrcp.f32 %v7315_v9  ;;  %v2154_v21 = vmul.f32 1.0614054, %v7516_v49  ;;  %v2216_v38 = vadd.f32 -1.4531521, %v2152_v11  ;;  %v7535_v7 = vmul.f32 %v7488_v35, %v2214_v58 }
 0x241   :  { %11514 = vst [vmem:[#allocation215_spill] sm:$0xff] %v7523_v36  ;;  %v7530_v17 = vpop.eup %3523  ;;  %3543 = vrcp.f32 %v7318_v8  ;;  %v2155_v4 = vmul.f32 1.0614054, %v7523_v36  ;;  %v2217_v18 = vadd.f32 -1.4531521, %v2153_v29  ;;  %v7542_v14 = vmul.f32 %v7495_v0, %v2215_v24 }
 0x242   :  { %11515 = vst [vmem:[#allocation216_spill] sm:$0xff] %v7530_v17  ;;  %v7537_v30 = vpop.eup %3525  ;;  %3545 = vrcp.f32 %v7321_v57  ;;  %v2156_v9 = vmul.f32 1.0614054, %v7530_v17  ;;  %v2218_v11 = vadd.f32 -1.4531521, %v2154_v21  ;;  %v7549_v58 = vmul.f32 %v7502_v31, %v2216_v38 }
 0x243   :  { %11516 = vst [vmem:[#allocation217_spill] sm:$0xff] %v7537_v30  ;;  %v7544_v60 = vpop.eup %3527  ;;  %3547 = vrcp.f32 %v7324_v16  ;;  %v2157_v8 = vmul.f32 1.0614054, %v7537_v30  ;;  %v2219_v29 = vadd.f32 -1.4531521, %v2155_v4  ;;  %v7556_v24 = vmul.f32 %v7509_v63, %v2217_v18 }
 0x244   :  { %11517 = vst [vmem:[#allocation218_spill] sm:$0xff] %v7544_v60  ;;  %v7551_v35 = vpop.eup %3529  ;;  %3549 = vrcp.f32 %v7327_v45  ;;  %v2158_v57 = vmul.f32 1.0614054, %v7544_v60  ;;  %v2220_v21 = vadd.f32 -1.4531521, %v2156_v9  ;;  %v7563_v38 = vmul.f32 %v7516_v49, %v2218_v11 }
 0x245   :  { %11518 = vst [vmem:[#allocation219_spill] sm:$0xff] %v7551_v35  ;;  %v7558_v0 = vpop.eup %3531  ;;  %3551 = vrcp.f32 %v7330_v56  ;;  %v2159_v16 = vmul.f32 1.0614054, %v7551_v35  ;;  %v2221_v4 = vadd.f32 -1.4531521, %v2157_v8  ;;  %v7570_v18 = vmul.f32 %v7523_v36, %v2219_v29 }
 0x246   :  { %11519 = vst [vmem:[#allocation220_spill] sm:$0xff] %v7558_v0  ;;  %v7565_v31 = vpop.eup %3533  ;;  %3553 = vrcp.f32 %v7333_v50  ;;  %v2160_v45 = vmul.f32 1.0614054, %v7558_v0  ;;  %v2222_v9 = vadd.f32 -1.4531521, %v2158_v57  ;;  %v7577_v11 = vmul.f32 %v7530_v17, %v2220_v21 }
 0x247   :  { %11520 = vst [vmem:[#allocation221_spill] sm:$0xff] %v7565_v31  ;;  %v7572_v63 = vpop.eup %3535  ;;  %3555 = vrcp.f32 %v7336_v44  ;;  %v2161_v56 = vmul.f32 1.0614054, %v7565_v31  ;;  %v2223_v8 = vadd.f32 -1.4531521, %v2159_v16  ;;  %v7584_v29 = vmul.f32 %v7537_v30, %v2221_v4 }
 0x248   :  { %11521 = vst [vmem:[#allocation222_spill] sm:$0xff] %v7572_v63  ;;  %v7579_v49 = vpop.eup %3537  ;;  %3557 = vrcp.f32 %v7339_v25  ;;  %v2162_v50 = vmul.f32 1.0614054, %v7572_v63  ;;  %v2224_v57 = vadd.f32 -1.4531521, %v2160_v45  ;;  %v7591_v21 = vmul.f32 %v7544_v60, %v2222_v9 }
 0x249   :  { %11522 = vst [vmem:[#allocation223_spill] sm:$0xff] %v7579_v49  ;;  %v7586_v36 = vpop.eup %3539  ;;  %3559 = vrcp.f32 %v7342_v59  ;;  %v2163_v44 = vmul.f32 1.0614054, %v7579_v49  ;;  %v2225_v16 = vadd.f32 -1.4531521, %v2161_v56  ;;  %v7598_v4 = vmul.f32 %v7551_v35, %v2223_v8 }
 0x24a   :  { %11523 = vst [vmem:[#allocation224_spill] sm:$0xff] %v7586_v36  ;;  %v7593_v17 = vpop.eup %3541  ;;  %3561 = vrcp.f32 %v7345_v51  ;;  %v2164_v25 = vmul.f32 1.0614054, %v7586_v36  ;;  %v2226_v45 = vadd.f32 -1.4531521, %v2162_v50  ;;  %v7605_v9 = vmul.f32 %v7558_v0, %v2224_v57 }
 0x24b   :  { %11524 = vst [vmem:[#allocation225_spill] sm:$0xff] %v7593_v17  ;;  %v7600_v30 = vpop.eup %3543  ;;  %3563 = vrcp.f32 %v7348_v6  ;;  %v2165_v59 = vmul.f32 1.0614054, %v7593_v17  ;;  %v2227_v56 = vadd.f32 -1.4531521, %v2163_v44  ;;  %v7612_v8 = vmul.f32 %v7565_v31, %v2225_v16 }
 0x24c   :  { %11525 = vst [vmem:[#allocation226_spill] sm:$0xff] %v7600_v30  ;;  %v7607_v60 = vpop.eup %3545  ;;  %3565 = vrcp.f32 %v7351_v12  ;;  %v2166_v51 = vmul.f32 1.0614054, %v7600_v30  ;;  %v2228_v50 = vadd.f32 -1.4531521, %v2164_v25  ;;  %v7619_v57 = vmul.f32 %v7572_v63, %v2226_v45 }
 0x24d   :  { %11526 = vst [vmem:[#allocation227_spill] sm:$0xff] %v7607_v60  ;;  %v7614_v35 = vpop.eup %3547  ;;  %3567 = vrcp.f32 %v7354_v54  ;;  %v2167_v6 = vmul.f32 1.0614054, %v7607_v60  ;;  %v2229_v44 = vadd.f32 -1.4531521, %v2165_v59  ;;  %v7626_v16 = vmul.f32 %v7579_v49, %v2227_v56 }
 0x24e   :  { %11527 = vst [vmem:[#allocation228_spill] sm:$0xff] %v7614_v35  ;;  %v7621_v0 = vpop.eup %3549  ;;  %3569 = vrcp.f32 %v7357_v62  ;;  %v2168_v12 = vmul.f32 1.0614054, %v7614_v35  ;;  %v2230_v25 = vadd.f32 -1.4531521, %v2166_v51  ;;  %v7633_v45 = vmul.f32 %v7586_v36, %v2228_v50 }
 0x24f   :  { %11528 = vst [vmem:[#allocation229_spill] sm:$0xff] %v7621_v0  ;;  %v7628_v31 = vpop.eup %3551  ;;  %3571 = vrcp.f32 %v7360_v5  ;;  %v2169_v54 = vmul.f32 1.0614054, %v7621_v0  ;;  %v2231_v59 = vadd.f32 -1.4531521, %v2167_v6  ;;  %v7640_v56 = vmul.f32 %v7593_v17, %v2229_v44 }
 0x250   :  { %11529 = vst [vmem:[#allocation230_spill] sm:$0xff] %v7628_v31  ;;  %v7635_v63 = vpop.eup %3553  ;;  %3573 = vrcp.f32 %v7363_v46  ;;  %v2170_v62 = vmul.f32 1.0614054, %v7628_v31  ;;  %v2232_v51 = vadd.f32 -1.4531521, %v2168_v12  ;;  %v7647_v50 = vmul.f32 %v7600_v30, %v2230_v25 }
 0x251   :  { %11530 = vst [vmem:[#allocation231_spill] sm:$0xff] %v7635_v63  ;;  %v7642_v49 = vpop.eup %3555  ;;  %3575 = vrcp.f32 %v7366_v26  ;;  %v2171_v5 = vmul.f32 1.0614054, %v7635_v63  ;;  %v2233_v6 = vadd.f32 -1.4531521, %v2169_v54  ;;  %v7654_v44 = vmul.f32 %v7607_v60, %v2231_v59 }
 0x252   :  { %11531 = vst [vmem:[#allocation232_spill] sm:$0xff] %v7642_v49  ;;  %v7649_v36 = vpop.eup %3557  ;;  %3577 = vrcp.f32 %v7369_v3  ;;  %v2172_v46 = vmul.f32 1.0614054, %v7642_v49  ;;  %v2234_v12 = vadd.f32 -1.4531521, %v2170_v62  ;;  %v7661_v25 = vmul.f32 %v7614_v35, %v2232_v51 }
 0x253   :  { %11532 = vst [vmem:[#allocation233_spill] sm:$0xff] %v7649_v36  ;;  %v7656_v17 = vpop.eup %3559  ;;  %3579 = vrcp.f32 %v7372_v10  ;;  %v2173_v26 = vmul.f32 1.0614054, %v7649_v36  ;;  %v2235_v54 = vadd.f32 -1.4531521, %v2171_v5  ;;  %v7668_v59 = vmul.f32 %v7621_v0, %v2233_v6 }
 0x254   :  { %11533 = vst [vmem:[#allocation234_spill] sm:$0xff] %v7656_v17  ;;  %v7663_v30 = vpop.eup %3561  ;;  %3581 = vrcp.f32 %v7375_v39  ;;  %v2174_v3 = vmul.f32 1.0614054, %v7656_v17  ;;  %v2236_v62 = vadd.f32 -1.4531521, %v2172_v46  ;;  %v7675_v51 = vmul.f32 %v7628_v31, %v2234_v12 }
 0x255   :  { %11534 = vst [vmem:[#allocation235_spill] sm:$0xff] %v7663_v30  ;;  %v7670_v60 = vpop.eup %3563  ;;  %3583 = vrcp.f32 %v7378_v40  ;;  %v2175_v10 = vmul.f32 1.0614054, %v7663_v30  ;;  %v2237_v5 = vadd.f32 -1.4531521, %v2173_v26  ;;  %v7682_v6 = vmul.f32 %v7635_v63, %v2235_v54 }
 0x256   :  { %11535 = vst [vmem:[#allocation236_spill] sm:$0xff] %v7670_v60  ;;  %v7677_v35 = vpop.eup %3565  ;;  %3585 = vrcp.f32 %v7381_v42  ;;  %v2176_v39 = vmul.f32 1.0614054, %v7670_v60  ;;  %v2238_v46 = vadd.f32 -1.4531521, %v2174_v3  ;;  %v7689_v12 = vmul.f32 %v7642_v49, %v2236_v62 }
 0x257   :  { %11536 = vst [vmem:[#allocation237_spill] sm:$0xff] %v7677_v35  ;;  %v7684_v0 = vpop.eup %3567  ;;  %3587 = vrcp.f32 %v7384_v13  ;;  %v2177_v40 = vmul.f32 1.0614054, %v7677_v35  ;;  %v2239_v26 = vadd.f32 -1.4531521, %v2175_v10  ;;  %v7696_v54 = vmul.f32 %v7649_v36, %v2237_v5 }
 0x258   :  { %11537 = vst [vmem:[#allocation238_spill] sm:$0xff] %v7684_v0  ;;  %v7691_v31 = vpop.eup %3569  ;;  %3589 = vrcp.f32 %v7387_v52  ;;  %v2178_v42 = vmul.f32 1.0614054, %v7684_v0  ;;  %v2240_v3 = vadd.f32 -1.4531521, %v2176_v39  ;;  %v7703_v62 = vmul.f32 %v7656_v17, %v2238_v46 }
 0x259   :  { %11538 = vst [vmem:[#allocation239_spill] sm:$0xff] %v7691_v31  ;;  %v7698_v63 = vpop.eup %3571  ;;  %3591 = vrcp.f32 %v7390_v2  ;;  %v2179_v13 = vmul.f32 1.0614054, %v7691_v31  ;;  %v2241_v10 = vadd.f32 -1.4531521, %v2177_v40  ;;  %v7710_v5 = vmul.f32 %v7663_v30, %v2239_v26 }
 0x25a   :  { %11539 = vst [vmem:[#allocation240_spill] sm:$0xff] %v7698_v63  ;;  %v7705_v49 = vpop.eup %3573  ;;  %3593 = vrcp.f32 %v7393_v43  ;;  %v2180_v52 = vmul.f32 1.0614054, %v7698_v63  ;;  %v2242_v39 = vadd.f32 -1.4531521, %v2178_v42  ;;  %v7717_v46 = vmul.f32 %v7670_v60, %v2240_v3 }
 0x25b   :  { %11540 = vst [vmem:[#allocation241_spill] sm:$0xff] %v7705_v49  ;;  %v7712_v36 = vpop.eup %3575  ;;  %3595 = vrcp.f32 %v7396_v19  ;;  %v2181_v2 = vmul.f32 1.0614054, %v7705_v49  ;;  %v2243_v40 = vadd.f32 -1.4531521, %v2179_v13  ;;  %v7724_v26 = vmul.f32 %v7677_v35, %v2241_v10 }
 0x25c   :  { %11541 = vst [vmem:[#allocation242_spill] sm:$0xff] %v7712_v36  ;;  %v7719_v17 = vpop.eup %3577  ;;  %3597 = vrcp.f32 %v7399_v15  ;;  %v2182_v43 = vmul.f32 1.0614054, %v7712_v36  ;;  %v2244_v42 = vadd.f32 -1.4531521, %v2180_v52  ;;  %v7731_v3 = vmul.f32 %v7684_v0, %v2242_v39 }
 0x25d   :  { %11542 = vst [vmem:[#allocation243_spill] sm:$0xff] %v7719_v17  ;;  %v7726_v30 = vpop.eup %3579  ;;  %3599 = vrcp.f32 %v7402_v28  ;;  %v2183_v19 = vmul.f32 1.0614054, %v7719_v17  ;;  %v2245_v13 = vadd.f32 -1.4531521, %v2181_v2  ;;  %v7738_v10 = vmul.f32 %v7691_v31, %v2243_v40 }
 0x25e   :  { %11543 = vst [vmem:[#allocation244_spill] sm:$0xff] %v7726_v30  ;;  %v7733_v60 = vpop.eup %3581  ;;  %3601 = vrcp.f32 %v7405_v23  ;;  %v2184_v15 = vmul.f32 1.0614054, %v7726_v30  ;;  %v2246_v52 = vadd.f32 -1.4531521, %v2182_v43  ;;  %v7745_v39 = vmul.f32 %v7698_v63, %v2244_v42 }
 0x25f   :  { %11544 = vst [vmem:[#allocation245_spill] sm:$0xff] %v7733_v60  ;;  %11545 = vst [vmem:[#allocation246_spill] sm:$0xff] %v7738_v10  ;;  %v7740_v35 = vpop.eup %3583  ;;  %3603 = vrcp.f32 %v7408_v53  ;;  %v2185_v28 = vmul.f32 1.0614054, %v7733_v60  ;;  %v2247_v2 = vadd.f32 -1.4531521, %v2183_v19  ;;  %v7752_v40 = vmul.f32 %v7705_v49, %v2245_v13 }
 0x260   :  { %11546 = vst [vmem:[#allocation247_spill] sm:$0xff] %v7740_v35  ;;  %11547 = vst [vmem:[#allocation248_spill] sm:$0xff] %v7745_v39  ;;  %v7747_v0 = vpop.eup %3585  ;;  %3605 = vrcp.f32 %v7411_v22  ;;  %v2186_v23 = vmul.f32 1.0614054, %v7740_v35  ;;  %v2248_v43 = vadd.f32 -1.4531521, %v2184_v15  ;;  %v7759_v42 = vmul.f32 %v7712_v36, %v2246_v52 }
 0x261   :  { %11548 = vst [vmem:[#allocation249_spill] sm:$0xff] %v7747_v0  ;;  %11549 = vst [vmem:[#allocation250_spill] sm:$0xff] %v7752_v40  ;;  %v7754_v31 = vpop.eup %3587  ;;  %v11551_v10 = vld [vmem:[#allocation194_spill] sm:$0xff]  ;;  %v2187_v53 = vmul.f32 1.0614054, %v7747_v0  ;;  %v11554_v39 = vld [vmem:[#allocation195_spill] sm:$0xff]  ;;  %v7766_v13 = vmul.f32 %v7719_v17, %v2247_v2 }
 0x262   :  { %11550 = vst [vmem:[#allocation251_spill] sm:$0xff] %v7754_v31  ;;  %3607 = vrcp.f32 %v11551_v10  ;;  %v2249_v19 = vadd.f32 -1.4531521, %v2185_v28  ;;  %11552 = vst [vmem:[#allocation194_spill] sm:$0xff] %v7759_v42  ;;  %v7761_v63 = vpop.eup %3589  ;;  %v2188_v22 = vmul.f32 1.0614054, %v7754_v31  ;;  %v7773_v52 = vmul.f32 %v7726_v30, %v2248_v43 }
 0x263   :  { %11553 = vst [vmem:[#allocation252_spill] sm:$0xff] %v7761_v63  ;;  %3609 = vrcp.f32 %v11554_v39  ;;  %v2250_v15 = vadd.f32 -1.4531521, %v2186_v23  ;;  %11555 = vst [vmem:[#allocation195_spill] sm:$0xff] %v7766_v13  ;;  %v7768_v49 = vpop.eup %3591  ;;  %v11557_v40 = vld [vmem:[#allocation197_spill] sm:$0xff]  ;;  %v11560_v42 = vld [vmem:[#allocation198_spill] sm:$0xff] }
 0x264   :  { %11556 = vst [vmem:[#allocation253_spill] sm:$0xff] %v7768_v49  ;;  %3611 = vrcp.f32 %v11557_v40  ;;  %v2189_v10 = vmul.f32 1.0614054, %v7761_v63  ;;  %v2251_v28 = vadd.f32 -1.4531521, %v2187_v53  ;;  %11558 = vst [vmem:[#allocation197_spill] sm:$0xff] %v7773_v52  ;;  %v7775_v36 = vpop.eup %3593  ;;  %v7780_v2 = vmul.f32 %v7733_v60, %v2249_v19 }
 0x265   :  { %11559 = vst [vmem:[#allocation254_spill] sm:$0xff] %v7775_v36  ;;  %3613 = vrcp.f32 %v11560_v42  ;;  %v2190_v39 = vmul.f32 1.0614054, %v7768_v49  ;;  %v2252_v23 = vadd.f32 -1.4531521, %v2188_v22  ;;  %v7782_v17 = vpop.eup %3595  ;;  %v11563_v13 = vld [vmem:[#allocation199_spill] sm:$0xff]  ;;  %v7787_v43 = vmul.f32 %v7740_v35, %v2250_v15 }
 0x266   :  { %11561 = vst [vmem:[#allocation198_spill] sm:$0xff] %v7780_v2  ;;  %11562 = vst [vmem:[#allocation255_spill] sm:$0xff] %v7782_v17  ;;  %3615 = vrcp.f32 %v11563_v13  ;;  %v2191_v40 = vmul.f32 1.0614054, %v7775_v36  ;;  %v2253_v53 = vadd.f32 -1.4531521, %v2189_v10  ;;  %v7789_v30 = vpop.eup %3597  ;;  %v7794_v19 = vmul.f32 %v7747_v0, %v2251_v28 }
 0x267   :  { %11564 = vst [vmem:[#allocation199_spill] sm:$0xff] %v7787_v43  ;;  %11565 = vst [vmem:[#allocation256_spill] sm:$0xff] %v7789_v30  ;;  %v11566_v52 = vld [vmem:[#allocation201_spill] sm:$0xff]  ;;  %v2192_v42 = vmul.f32 1.0614054, %v7782_v17  ;;  %v7796_v60 = vpop.eup %3599  ;;  %v7800_v10 = vmul.f32 %v7754_v31, %v2252_v23 }
 0x268   :  { %3617 = vrcp.f32 %v11566_v52  ;;  %v2254_v22 = vadd.f32 -1.4531521, %v2190_v39  ;;  %11567 = vst [vmem:[#allocation201_spill] sm:$0xff] %v7796_v60  ;;  %v2193_v13 = vmul.f32 1.0614054, %v7789_v30  ;;  %v7805_v35 = vpop.eup %3601  ;;  %v7809_v39 = vmul.f32 %v7761_v63, %v2253_v53 }
 0x269   :  { %v2255_v2 = vadd.f32 -1.4531521, %v2191_v40  ;;  %11568 = vst [vmem:[#allocation257_spill] sm:$0xff] %v7800_v10  ;;  %v7803_v15 = vadd.f32 1.4214138, %v7465_v41  ;;  %11569 = vst [vmem:[#allocation258_spill] sm:$0xff] %v7805_v35  ;;  %v7814_v0 = vpop.eup %3603 }
 0x26a   :  { %v2194_v52 = vmul.f32 1.0614054, %v7796_v60  ;;  %v2256_v43 = vadd.f32 -1.4531521, %v2192_v42  ;;  %11570 = vst [vmem:[#allocation259_spill] sm:$0xff] %v7809_v39  ;;  %11571 = vst [vmem:[#allocation260_spill] sm:$0xff] %v7814_v0  ;;  %v7818_v31 = vmul.f32 %v7768_v49, %v2254_v22  ;;  %v7823_v10 = vpop.eup %3605 }
 0x26b   :  { %v7812_v28 = vadd.f32 1.4214138, %v7472_v1  ;;  %v2195_v40 = vmul.f32 1.0614054, %v7805_v35  ;;  %v2257_v23 = vadd.f32 -1.4531521, %v2193_v13  ;;  %v7827_v63 = vmul.f32 %v7775_v36, %v2255_v2 }
 0x26c   :  { %11572 = vst [vmem:[#allocation261_spill] sm:$0xff] %v7818_v31  ;;  %v7821_v41 = vadd.f32 1.4214138, %v7479_v55  ;;  %11573 = vst [vmem:[#allocation262_spill] sm:$0xff] %v7823_v10  ;;  %v2196_v42 = vmul.f32 1.0614054, %v7814_v0  ;;  %v7832_v39 = vpop.eup %3607  ;;  %v7836_v49 = vmul.f32 %v7782_v17, %v2256_v43 }
 0x26d   :  { %v2258_v53 = vadd.f32 -1.4531521, %v2194_v52  ;;  %11574 = vst [vmem:[#allocation263_spill] sm:$0xff] %v7827_v63  ;;  %v7830_v1 = vadd.f32 1.4214138, %v7486_v34  ;;  %11575 = vst [vmem:[#allocation264_spill] sm:$0xff] %v7832_v39  ;;  %v7841_v31 = vpop.eup %3609  ;;  %v7845_v36 = vmul.f32 %v7789_v30, %v2257_v23 }
 0x26e   :  { %v2197_v13 = vmul.f32 1.0614054, %v7823_v10  ;;  %v2259_v22 = vadd.f32 -1.4531521, %v2195_v40  ;;  %11576 = vst [vmem:[#allocation265_spill] sm:$0xff] %v7836_v49  ;;  %11577 = vst [vmem:[#allocation266_spill] sm:$0xff] %v7841_v31  ;;  %v7850_v63 = vpop.eup %3611 }
 0x26f   :  { %v7839_v55 = vadd.f32 1.4214138, %v7493_v32  ;;  %v2198_v52 = vmul.f32 1.0614054, %v7832_v39  ;;  %v2260_v2 = vadd.f32 -1.4531521, %v2196_v42  ;;  %v7854_v17 = vmul.f32 %v7796_v60, %v2258_v53  ;;  %v7859_v49 = vpop.eup %3613 }
 0x270   :  { %11578 = vst [vmem:[#allocation267_spill] sm:$0xff] %v7845_v36  ;;  %v7848_v34 = vadd.f32 1.4214138, %v7500_v37  ;;  %11579 = vst [vmem:[#allocation268_spill] sm:$0xff] %v7850_v63  ;;  %v2199_v40 = vmul.f32 1.0614054, %v7841_v31  ;;  %v7863_v30 = vmul.f32 %v7805_v35, %v2259_v22  ;;  %v7868_v36 = vpop.eup %3615 }
 0x271   :  { %v2261_v43 = vadd.f32 -1.4531521, %v2197_v13  ;;  %11580 = vst [vmem:[#allocation269_spill] sm:$0xff] %v7854_v17  ;;  %v7857_v32 = vadd.f32 1.4214138, %v7507_v33  ;;  %11581 = vst [vmem:[#allocation270_spill] sm:$0xff] %v7859_v49  ;;  %v7872_v60 = vmul.f32 %v7814_v0, %v2260_v2 }
 0x272   :  { %v2200_v42 = vmul.f32 1.0614054, %v7850_v63  ;;  %v2262_v23 = vadd.f32 -1.4531521, %v2198_v52  ;;  %11582 = vst [vmem:[#allocation271_spill] sm:$0xff] %v7863_v30  ;;  %11583 = vst [vmem:[#allocation272_spill] sm:$0xff] %v7868_v36  ;;  %v7877_v17 = vpop.eup %3617 }
 0x273   :  { %v7866_v37 = vadd.f32 1.4214138, %v7514_v61  ;;  %v2201_v13 = vmul.f32 1.0614054, %v7859_v49  ;;  %v2263_v53 = vadd.f32 -1.4531521, %v2199_v40  ;;  %v7881_v35 = vmul.f32 %v7823_v10, %v2261_v43 }
 0x274   :  { %11584 = vst [vmem:[#allocation273_spill] sm:$0xff] %v7872_v60  ;;  %v7875_v33 = vadd.f32 1.4214138, %v7521_v27  ;;  %11585 = vst [vmem:[#allocation274_spill] sm:$0xff] %v7877_v17  ;;  %v2202_v52 = vmul.f32 1.0614054, %v7868_v36  ;;  %v7888_v2 = vmul.f32 %v7832_v39, %v2262_v23 }
 0x275   :  { %v2264_v22 = vadd.f32 -1.4531521, %v2200_v42  ;;  %v7884_v61 = vadd.f32 1.4214138, %v7528_v47  ;;  %v2203_v30 = vmul.f32 1.0614054, %v7877_v17  ;;  %v7894_v60 = vmul.f32 %v7841_v31, %v2263_v53 }
 0x276   :  { %v2265_v40 = vadd.f32 -1.4531521, %v2201_v13  ;;  %v7891_v27 = vadd.f32 1.4214138, %v7535_v7  ;;  %v2266_v0 = vadd.f32 -1.4531521, %v2202_v52 }
 0x277   :  { %v7897_v42 = vadd.f32 1.4214138, %v7542_v14  ;;  %v7900_v43 = vadd.f32 1.4214138, %v7549_v58  ;;  %v2267_v47 = vadd.f32 -1.4531521, %v2203_v30  ;;  %v7903_v10 = vmul.f32 %v7850_v63, %v2264_v22 }
 0x278   :  { %v7906_v23 = vadd.f32 1.4214138, %v7556_v24  ;;  %v7909_v7 = vadd.f32 1.4214138, %v7563_v38  ;;  %v2329_v13 = vmul.f32 %v7859_v49, %v2265_v40  ;;  %v7913_v53 = vadd.f32 1.4214138, %v7570_v18 }
 0x279   :  { %v7916_v14 = vadd.f32 1.4214138, %v7577_v11  ;;  %v7919_v58 = vadd.f32 1.4214138, %v7584_v29  ;;  %v2330_v30 = vmul.f32 %v7868_v36, %v2266_v0  ;;  %v7923_v52 = vadd.f32 1.4214138, %v7591_v21 }
 0x27a   :  { %v7926_v24 = vadd.f32 1.4214138, %v7598_v4  ;;  %v7929_v38 = vadd.f32 1.4214138, %v7605_v9  ;;  %v2331_v18 = vmul.f32 %v7877_v17, %v2267_v47  ;;  %v7933_v22 = vadd.f32 1.4214138, %v7612_v8 }
 0x27b   :  { %v7936_v11 = vadd.f32 1.4214138, %v7619_v57  ;;  %v7939_v29 = vadd.f32 1.4214138, %v7626_v16  ;;  %v7942_v0 = vadd.f32 1.4214138, %v7633_v45  ;;  %v7952_v9 = vmul.f32 %v7419_v48, %v7803_v15 }
 0x27c   :  { %v7945_v21 = vadd.f32 1.4214138, %v7640_v56  ;;  %v7948_v4 = vadd.f32 1.4214138, %v7647_v50  ;;  %v7955_v8 = vadd.f32 1.4214138, %v7654_v44  ;;  %v7965_v45 = vmul.f32 %v7431_v20, %v7812_v28 }
 0x27d   :  { %11586 = vst [vmem:[#allocation275_spill] sm:$0xff] %v7952_v9  ;;  %v7958_v57 = vadd.f32 1.4214138, %v7661_v25  ;;  %v7961_v16 = vadd.f32 1.4214138, %v7668_v59  ;;  %v11591_v40 = vld [vmem:[#allocation202_spill] sm:$0xff] }
 0x27e   :  { %11587 = vst [vmem:[#allocation276_spill] sm:$0xff] %v7955_v8  ;;  %11590 = vst [vmem:[#allocation279_spill] sm:$0xff] %v7965_v45  ;;  %v2362_v56 = vadd.f32 1.4214138, %v7675_v51  ;;  %v2363_v50 = vadd.f32 1.4214138, %v7682_v6  ;;  %v7972_v44 = vmul.f32 %v11591_v40, %v7821_v41 }
 0x27f   :  { %11588 = vst [vmem:[#allocation277_spill] sm:$0xff] %v7958_v57  ;;  %11589 = vst [vmem:[#allocation278_spill] sm:$0xff] %v7961_v16  ;;  %v2364_v15 = vadd.f32 1.4214138, %v7689_v12  ;;  %v2365_v25 = vadd.f32 1.4214138, %v7696_v54 }
 0x280   :  { %11592 = vst [vmem:[#allocation280_spill] sm:$0xff] %v7972_v44  ;;  %v2366_v47 = vadd.f32 1.4214138, %v7703_v62  ;;  %v2367_v59 = vadd.f32 1.4214138, %v7710_v5  ;;  %v11593_v48 = vld [vmem:[#allocation203_spill] sm:$0xff] }
 0x281   :  { %v7979_v28 = vmul.f32 %v11593_v48, %v7830_v1  ;;  %v2368_v51 = vadd.f32 1.4214138, %v7717_v46  ;;  %v2369_v6 = vadd.f32 1.4214138, %v7724_v26  ;;  %v2370_v12 = vadd.f32 1.4214138, %v7731_v3 }
 0x282   :  { %v11595_v20 = vld [vmem:[#allocation204_spill] sm:$0xff]  ;;  %v11597_v40 = vld [vmem:[#allocation246_spill] sm:$0xff]  ;;  %v11600_v17 = vld [vmem:[#allocation205_spill] sm:$0xff] }
 0x283   :  { %11594 = vst [vmem:[#allocation281_spill] sm:$0xff] %v7979_v28  ;;  %v7986_v41 = vmul.f32 %v11595_v20, %v7839_v55  ;;  %v2371_v54 = vadd.f32 1.4214138, %v11597_v40  ;;  %v11598_v44 = vld [vmem:[#allocation248_spill] sm:$0xff]  ;;  %v11599_v45 = vld [vmem:[#allocation250_spill] sm:$0xff]  ;;  %v7993_v1 = vmul.f32 %v11600_v17, %v7848_v34  ;;  %v11603_v28 = vld [vmem:[#allocation195_spill] sm:$0xff] }
 0x284   :  { %v2372_v62 = vadd.f32 1.4214138, %v11598_v44  ;;  %v2373_v5 = vadd.f32 1.4214138, %v11599_v45  ;;  %v11602_v48 = vld [vmem:[#allocation194_spill] sm:$0xff]  ;;  %v11604_v9 = vld [vmem:[#allocation197_spill] sm:$0xff] }
 0x285   :  { %11596 = vst [vmem:[#allocation282_spill] sm:$0xff] %v7986_v41  ;;  %11601 = vst [vmem:[#allocation246_spill] sm:$0xff] %v7993_v1  ;;  %v2374_v46 = vadd.f32 1.4214138, %v11602_v48  ;;  %v2375_v26 = vadd.f32 1.4214138, %v11603_v28 }
 0x286   :  { %v2376_v3 = vadd.f32 1.4214138, %v11604_v9  ;;  %v11605_v36 = vld [vmem:[#allocation206_spill] sm:$0xff]  ;;  %v11608_v41 = vld [vmem:[#allocation199_spill] sm:$0xff]  ;;  %v2379_v45 = vadd.f32 1.4214138, %v7794_v19 }
 0x287   :  { %v8000_v55 = vmul.f32 %v11605_v36, %v7857_v32  ;;  %v11607_v20 = vld [vmem:[#allocation198_spill] sm:$0xff]  ;;  %v2378_v44 = vadd.f32 1.4214138, %v11608_v41  ;;  %v11609_v49 = vld [vmem:[#allocation207_spill] sm:$0xff]  ;;  %v11611_v17 = vld [vmem:[#allocation257_spill] sm:$0xff] }
 0x288   :  { %v2377_v40 = vadd.f32 1.4214138, %v11607_v20  ;;  %v8007_v34 = vmul.f32 %v11609_v49, %v7866_v37  ;;  %v2380_v48 = vadd.f32 1.4214138, %v11611_v17  ;;  %v11612_v1 = vld [vmem:[#allocation259_spill] sm:$0xff]  ;;  %v11613_v63 = vld [vmem:[#allocation261_spill] sm:$0xff] }
 0x289   :  { %11606 = vst [vmem:[#allocation248_spill] sm:$0xff] %v8000_v55  ;;  %v2381_v28 = vadd.f32 1.4214138, %v11612_v1  ;;  %v2382_v9 = vadd.f32 1.4214138, %v11613_v63  ;;  %v11614_v31 = vld [vmem:[#allocation208_spill] sm:$0xff] }
 0x28a   :  { %11610 = vst [vmem:[#allocation250_spill] sm:$0xff] %v8007_v34  ;;  %v8014_v32 = vmul.f32 %v11614_v31, %v7875_v33  ;;  %v11615_v36 = vld [vmem:[#allocation263_spill] sm:$0xff]  ;;  %v11616_v55 = vld [vmem:[#allocation265_spill] sm:$0xff]  ;;  %v11623_v8 = vld [vmem:[#allocation210_spill] sm:$0xff] }
 0x28b   :  { %v2383_v20 = vadd.f32 1.4214138, %v11615_v36  ;;  %v2384_v41 = vadd.f32 1.4214138, %v11616_v55  ;;  %v11617_v39 = vld [vmem:[#allocation267_spill] sm:$0xff]  ;;  %v11618_v16 = vld [vmem:[#allocation209_spill] sm:$0xff]  ;;  %v8028_v33 = vmul.f32 %v11623_v8, %v7891_v27 }
 0x28c   :  { %v2385_v19 = vadd.f32 1.4214138, %v11617_v39  ;;  %v8021_v37 = vmul.f32 %v11618_v16, %v7884_v61  ;;  %v11620_v49 = vld [vmem:[#allocation269_spill] sm:$0xff]  ;;  %v11621_v34 = vld [vmem:[#allocation271_spill] sm:$0xff]  ;;  %v2389_v36 = vadd.f32 1.4214138, %v7881_v35 }
 0x28d   :  { %v2386_v17 = vadd.f32 1.4214138, %v11620_v49  ;;  %v2387_v1 = vadd.f32 1.4214138, %v11621_v34  ;;  %v11622_v57 = vld [vmem:[#allocation273_spill] sm:$0xff]  ;;  %v11624_v31 = vld [vmem:[#allocation211_spill] sm:$0xff] }
 0x28e   :  { %11619 = vst [vmem:[#allocation194_spill] sm:$0xff] %v8021_v37  ;;  %v2388_v63 = vadd.f32 1.4214138, %v11622_v57  ;;  %v2390_v55 = vadd.f32 1.4214138, %v7888_v2  ;;  %v8035_v61 = vmul.f32 %v11624_v31, %v7897_v42  ;;  %v11625_v57 = vld [vmem:[#allocation212_spill] sm:$0xff] }
 0x28f   :  { %v2391_v39 = vadd.f32 1.4214138, %v7894_v60  ;;  %v2392_v49 = vadd.f32 1.4214138, %v7903_v10  ;;  %v2393_v16 = vadd.f32 1.4214138, %v2329_v13  ;;  %v8040_v37 = vmul.f32 %v11625_v57, %v7900_v43 }
 0x290   :  { %v2394_v34 = vadd.f32 1.4214138, %v2330_v30  ;;  %v2395_v27 = vadd.f32 1.4214138, %v2331_v18  ;;  %v11626_v8 = vld [vmem:[#allocation213_spill] sm:$0xff]  ;;  %v11627_v2 = vld [vmem:[#allocation214_spill] sm:$0xff] }
 0x291   :  { %v8044_v35 = vmul.f32 %v11626_v8, %v7906_v23  ;;  %v8048_v60 = vmul.f32 %v11627_v2, %v7909_v7  ;;  %v11628_v42 = vld [vmem:[#allocation215_spill] sm:$0xff]  ;;  %v11629_v10 = vld [vmem:[#allocation216_spill] sm:$0xff]  ;;  %v11630_v43 = vld [vmem:[#allocation217_spill] sm:$0xff] }
 0x292   :  { %v8052_v31 = vmul.f32 %v11628_v42, %v7913_v53  ;;  %v8056_v13 = vmul.f32 %v11629_v10, %v7916_v14  ;;  %v8060_v30 = vmul.f32 %v11630_v43, %v7919_v58  ;;  %v11631_v18 = vld [vmem:[#allocation218_spill] sm:$0xff]  ;;  %v11632_v8 = vld [vmem:[#allocation219_spill] sm:$0xff]  ;;  %v11633_v2 = vld [vmem:[#allocation220_spill] sm:$0xff] }
 0x293   :  { %v8064_v23 = vmul.f32 %v11631_v18, %v7923_v52  ;;  %v8068_v7 = vmul.f32 %v11632_v8, %v7926_v24  ;;  %v8072_v53 = vmul.f32 %v11633_v2, %v7929_v38  ;;  %v11634_v42 = vld [vmem:[#allocation221_spill] sm:$0xff]  ;;  %v11635_v10 = vld [vmem:[#allocation222_spill] sm:$0xff]  ;;  %v11637_v43 = vld [vmem:[#allocation223_spill] sm:$0xff] }
 0x294   :  { %v8076_v14 = vmul.f32 %v11634_v42, %v7933_v22  ;;  %v8080_v58 = vmul.f32 %v11635_v10, %v7936_v11  ;;  %v8084_v52 = vmul.f32 %v11637_v43, %v7939_v29  ;;  %v11639_v18 = vld [vmem:[#allocation224_spill] sm:$0xff]  ;;  %v11641_v8 = vld [vmem:[#allocation225_spill] sm:$0xff]  ;;  %v11642_v2 = vld [vmem:[#allocation226_spill] sm:$0xff] }
 0x295   :  { %v8088_v24 = vmul.f32 %v11639_v18, %v7942_v0  ;;  %v8092_v38 = vmul.f32 %v11641_v8, %v7945_v21  ;;  %v8096_v22 = vmul.f32 %v11642_v2, %v7948_v4  ;;  %v11644_v42 = vld [vmem:[#allocation276_spill] sm:$0xff]  ;;  %v11645_v57 = vld [vmem:[#allocation227_spill] sm:$0xff]  ;;  %v11647_v10 = vld [vmem:[#allocation277_spill] sm:$0xff] }
 0x296   :  { %11636 = vst [vmem:[#allocation195_spill] sm:$0xff] %v8080_v58  ;;  %11638 = vst [vmem:[#allocation197_spill] sm:$0xff] %v8084_v52  ;;  %v8100_v11 = vmul.f32 %v11645_v57, %v11644_v42  ;;  %v11648_v58 = vld [vmem:[#allocation228_spill] sm:$0xff]  ;;  %v11649_v43 = vld [vmem:[#allocation278_spill] sm:$0xff] }
 0x297   :  { %11640 = vst [vmem:[#allocation198_spill] sm:$0xff] %v8088_v24  ;;  %11643 = vst [vmem:[#allocation199_spill] sm:$0xff] %v8096_v22  ;;  %v8104_v29 = vmul.f32 %v11648_v58, %v11647_v10  ;;  %v11650_v52 = vld [vmem:[#allocation229_spill] sm:$0xff]  ;;  %v11651_v18 = vld [vmem:[#allocation230_spill] sm:$0xff] }
 0x298   :  { %11646 = vst [vmem:[#allocation257_spill] sm:$0xff] %v8100_v11  ;;  %v8108_v0 = vmul.f32 %v11650_v52, %v11649_v43  ;;  %v8111_v24 = vmul.f32 %v11651_v18, %v2362_v56  ;;  %v11652_v21 = vld [vmem:[#allocation231_spill] sm:$0xff]  ;;  %v11653_v4 = vld [vmem:[#allocation232_spill] sm:$0xff]  ;;  %v11654_v22 = vld [vmem:[#allocation233_spill] sm:$0xff] }
 0x299   :  { %v8114_v8 = vmul.f32 %v11652_v21, %v2363_v50  ;;  %v8117_v2 = vmul.f32 %v11653_v4, %v2364_v15  ;;  %v8120_v42 = vmul.f32 %v11654_v22, %v2365_v25  ;;  %v11655_v57 = vld [vmem:[#allocation234_spill] sm:$0xff]  ;;  %v11656_v10 = vld [vmem:[#allocation235_spill] sm:$0xff]  ;;  %v11657_v43 = vld [vmem:[#allocation236_spill] sm:$0xff] }
 0x29a   :  { %v8123_v11 = vmul.f32 %v11655_v57, %v2366_v47  ;;  %v8126_v58 = vmul.f32 %v11656_v10, %v2367_v59  ;;  %v8129_v52 = vmul.f32 %v11657_v43, %v2368_v51  ;;  %v11658_v56 = vld [vmem:[#allocation237_spill] sm:$0xff]  ;;  %v11659_v50 = vld [vmem:[#allocation238_spill] sm:$0xff]  ;;  %v11660_v15 = vld [vmem:[#allocation239_spill] sm:$0xff] }
 0x29b   :  { %v8132_v18 = vmul.f32 %v11658_v56, %v2369_v6  ;;  %v8135_v21 = vmul.f32 %v11659_v50, %v2370_v12  ;;  %v8138_v4 = vmul.f32 %v11660_v15, %v2371_v54  ;;  %v11661_v25 = vld [vmem:[#allocation240_spill] sm:$0xff]  ;;  %v11662_v47 = vld [vmem:[#allocation241_spill] sm:$0xff]  ;;  %v11663_v59 = vld [vmem:[#allocation242_spill] sm:$0xff] }
 0x29c   :  { %v8141_v22 = vmul.f32 %v11661_v25, %v2372_v62  ;;  %v8144_v57 = vmul.f32 %v11662_v47, %v2373_v5  ;;  %v8147_v10 = vmul.f32 %v11663_v59, %v2374_v46  ;;  %v11664_v51 = vld [vmem:[#allocation243_spill] sm:$0xff]  ;;  %v11665_v6 = vld [vmem:[#allocation244_spill] sm:$0xff]  ;;  %v11666_v12 = vld [vmem:[#allocation245_spill] sm:$0xff] }
 0x29d   :  { %v8150_v43 = vmul.f32 %v11664_v51, %v2375_v26  ;;  %v8153_v56 = vmul.f32 %v11665_v6, %v2376_v3  ;;  %v8156_v50 = vmul.f32 %v11666_v12, %v2377_v40  ;;  %v11667_v54 = vld [vmem:[#allocation247_spill] sm:$0xff]  ;;  %v11668_v62 = vld [vmem:[#allocation249_spill] sm:$0xff]  ;;  %v11670_v46 = vld [vmem:[#allocation252_spill] sm:$0xff] }
 0x29e   :  { %v8159_v15 = vmul.f32 %v11667_v54, %v2378_v44  ;;  %v8162_v25 = vmul.f32 %v11668_v62, %v2379_v45  ;;  %v11669_v5 = vld [vmem:[#allocation251_spill] sm:$0xff]  ;;  %v8168_v59 = vmul.f32 %v11670_v46, %v2381_v28  ;;  %v11671_v26 = vld [vmem:[#allocation253_spill] sm:$0xff]  ;;  %v11672_v3 = vld [vmem:[#allocation254_spill] sm:$0xff] }
 0x29f   :  { %v8165_v47 = vmul.f32 %v11669_v5, %v2380_v48  ;;  %v8171_v51 = vmul.f32 %v11671_v26, %v2382_v9  ;;  %v8174_v6 = vmul.f32 %v11672_v3, %v2383_v20  ;;  %v11673_v40 = vld [vmem:[#allocation255_spill] sm:$0xff]  ;;  %v11674_v44 = vld [vmem:[#allocation256_spill] sm:$0xff]  ;;  %v11675_v45 = vld [vmem:[#allocation201_spill] sm:$0xff] }
 0x2a0   :  { %v8177_v12 = vmul.f32 %v11673_v40, %v2384_v41  ;;  %v8180_v54 = vmul.f32 %v11674_v44, %v2385_v19  ;;  %v8183_v62 = vmul.f32 %v11675_v45, %v2386_v17  ;;  %v11676_v48 = vld [vmem:[#allocation258_spill] sm:$0xff]  ;;  %v11677_v28 = vld [vmem:[#allocation260_spill] sm:$0xff] }
 0x2a1   :  { %v8186_v5 = vmul.f32 %v11676_v48, %v2387_v1  ;;  %v8189_v46 = vmul.f32 %v11677_v28, %v2388_v63  ;;  %v11679_v9 = vld [vmem:[#allocation262_spill] sm:$0xff]  ;;  %v11681_v20 = vld [vmem:[#allocation264_spill] sm:$0xff]  ;;  %v11691_v63 = vld [vmem:[#allocation275_spill] sm:$0xff] }
 0x2a2   :  { %v8192_v26 = vmul.f32 %v11679_v9, %v2389_v36  ;;  %v8195_v3 = vmul.f32 %v11681_v20, %v2390_v55  ;;  %v11683_v41 = vld [vmem:[#allocation266_spill] sm:$0xff]  ;;  %v11685_v19 = vld [vmem:[#allocation268_spill] sm:$0xff]  ;;  %v2460_v28 = vadd.f32 -0.28449672, %v11691_v63  ;;  %v11694_v9 = vld [vmem:[#allocation279_spill] sm:$0xff] }
 0x2a3   :  { %11678 = vst [vmem:[#allocation259_spill] sm:$0xff] %v8189_v46  ;;  %v8198_v40 = vmul.f32 %v11683_v41, %v2391_v39  ;;  %v8201_v44 = vmul.f32 %v11685_v19, %v2392_v49  ;;  %v11687_v17 = vld [vmem:[#allocation270_spill] sm:$0xff]  ;;  %v11689_v1 = vld [vmem:[#allocation272_spill] sm:$0xff]  ;;  %v2461_v55 = vadd.f32 -0.28449672, %v11694_v9  ;;  %v11696_v39 = vld [vmem:[#allocation281_spill] sm:$0xff] }
 0x2a4   :  { %11680 = vst [vmem:[#allocation261_spill] sm:$0xff] %v8192_v26  ;;  %11682 = vst [vmem:[#allocation263_spill] sm:$0xff] %v8195_v3  ;;  %v8204_v45 = vmul.f32 %v11687_v17, %v2393_v16  ;;  %v8207_v48 = vmul.f32 %v11689_v1, %v2394_v34  ;;  %v11692_v46 = vld [vmem:[#allocation274_spill] sm:$0xff]  ;;  %v11695_v20 = vld [vmem:[#allocation280_spill] sm:$0xff]  ;;  %v2463_v41 = vadd.f32 -0.28449672, %v11696_v39 }
 0x2a5   :  { %11684 = vst [vmem:[#allocation265_spill] sm:$0xff] %v8198_v40  ;;  %11686 = vst [vmem:[#allocation267_spill] sm:$0xff] %v8201_v44  ;;  %v8211_v36 = vmul.f32 %v11692_v46, %v2395_v27  ;;  %v2462_v3 = vadd.f32 -0.28449672, %v11695_v20  ;;  %v11697_v40 = vld [vmem:[#allocation282_spill] sm:$0xff]  ;;  %v11699_v16 = vld [vmem:[#allocation248_spill] sm:$0xff] }
 0x2a6   :  { %11688 = vst [vmem:[#allocation269_spill] sm:$0xff] %v8204_v45  ;;  %11690 = vst [vmem:[#allocation271_spill] sm:$0xff] %v8207_v48  ;;  %v2464_v49 = vadd.f32 -0.28449672, %v11697_v40  ;;  %v11698_v19 = vld [vmem:[#allocation246_spill] sm:$0xff]  ;;  %v11700_v45 = vld [vmem:[#allocation41_spill] sm:$0xff] }
 0x2a7   :  { %11693 = vst [vmem:[#allocation273_spill] sm:$0xff] %v8211_v36  ;;  %v2465_v44 = vadd.f32 -0.28449672, %v11698_v19  ;;  %v2466_v17 = vadd.f32 -0.28449672, %v11699_v16  ;;  %v11701_v34 = vsub.f32 0.0, %v11700_v45 }
 0x2a8   :  { %v11703_v63 = vld [vmem:[#allocation250_spill] sm:$0xff]  ;;  %v2468_v46 = vadd.f32 -0.28449672, %v8014_v32  ;;  %v11705_v20 = vld [vmem:[#allocation196_spill] sm:$0xff]  ;;  %v2470_v40 = vadd.f32 -0.28449672, %v8028_v33 }
 0x2a9   :  { %v8222_v1 = vmul.f32 %v11701_v34, %v11700_v45  ;;  %v2467_v27 = vadd.f32 -0.28449672, %v11703_v63  ;;  %v11704_v9 = vld [vmem:[#allocation194_spill] sm:$0xff]  ;;  %v8228_v48 = vmul.f32 %v11705_v20, %v2460_v28  ;;  %v2471_v19 = vadd.f32 -0.28449672, %v8035_v61  ;;  %v11707_v16 = vld [vmem:[#allocation200_spill] sm:$0xff] }
 0x2aa   :  { %v2469_v36 = vadd.f32 -0.28449672, %v11704_v9  ;;  %v2472_v39 = vadd.f32 -0.28449672, %v8040_v37  ;;  %v8234_v26 = vmul.f32 %v11707_v16, %v2461_v55  ;;  %v2473_v45 = vadd.f32 -0.28449672, %v8044_v35 }
 0x2ab   :  { %11702 = vst [vmem:[#allocation276_spill] sm:$0xff] %v8222_v1  ;;  %11706 = vst [vmem:[#allocation277_spill] sm:$0xff] %v8228_v48  ;;  %v2474_v34 = vadd.f32 -0.28449672, %v8048_v60  ;;  %v2475_v32 = vadd.f32 -0.28449672, %v8052_v31 }
 0x2ac   :  { %11708 = vst [vmem:[#allocation278_spill] sm:$0xff] %v8234_v26  ;;  %v11709_v63 = vld [vmem:[#allocation202_spill] sm:$0xff]  ;;  %v2476_v28 = vadd.f32 -0.28449672, %v8056_v13  ;;  %v2477_v33 = vadd.f32 -0.28449672, %v8060_v30 }
 0x2ad   :  { %v8240_v9 = vmul.f32 %v11709_v63, %v2462_v3  ;;  %v2478_v61 = vadd.f32 -0.28449672, %v8064_v23  ;;  %v11711_v1 = vld [vmem:[#allocation203_spill] sm:$0xff]  ;;  %v2479_v55 = vadd.f32 -0.28449672, %v8068_v7  ;;  %v11713_v16 = vld [vmem:[#allocation204_spill] sm:$0xff] }
 0x2ae   :  { %v8246_v37 = vmul.f32 %v11711_v1, %v2463_v41  ;;  %v2480_v35 = vadd.f32 -0.28449672, %v8072_v53  ;;  %v2481_v60 = vadd.f32 -0.28449672, %v8076_v14  ;;  %v8252_v31 = vmul.f32 %v11713_v16, %v2464_v49  ;;  %v11714_v3 = vld [vmem:[#allocation195_spill] sm:$0xff]  ;;  %v11715_v20 = vld [vmem:[#allocation197_spill] sm:$0xff] }
 0x2af   :  { %11710 = vst [vmem:[#allocation275_spill] sm:$0xff] %v8240_v9  ;;  %v2482_v63 = vadd.f32 -0.28449672, %v11714_v3  ;;  %v2483_v13 = vadd.f32 -0.28449672, %v11715_v20  ;;  %v11716_v9 = vld [vmem:[#allocation198_spill] sm:$0xff] }
 0x2b0   :  { %11712 = vst [vmem:[#allocation279_spill] sm:$0xff] %v8246_v37  ;;  %v2484_v30 = vadd.f32 -0.28449672, %v11716_v9  ;;  %v11717_v26 = vld [vmem:[#allocation205_spill] sm:$0xff]  ;;  %v2485_v41 = vadd.f32 -0.28449672, %v8092_v38 }
 0x2b1   :  { %v8258_v23 = vmul.f32 %v11717_v26, %v2465_v44  ;;  %v11718_v1 = vld [vmem:[#allocation199_spill] sm:$0xff]  ;;  %v11719_v37 = vld [vmem:[#allocation257_spill] sm:$0xff]  ;;  %v11720_v48 = vld [vmem:[#allocation206_spill] sm:$0xff]  ;;  %v2488_v49 = vadd.f32 -0.28449672, %v8104_v29 }
 0x2b2   :  { %v2486_v7 = vadd.f32 -0.28449672, %v11718_v1  ;;  %v2487_v53 = vadd.f32 -0.28449672, %v11719_v37  ;;  %v8264_v14 = vmul.f32 %v11720_v48, %v2466_v17  ;;  %v2489_v3 = vadd.f32 -0.28449672, %v8108_v0 }
 0x2b3   :  { %v2490_v20 = vadd.f32 -0.28449672, %v8111_v24  ;;  %v11721_v16 = vld [vmem:[#allocation207_spill] sm:$0xff]  ;;  %v2491_v44 = vadd.f32 -0.28449672, %v8114_v8  ;;  %v11722_v26 = vld [vmem:[#allocation208_spill] sm:$0xff] }
 0x2b4   :  { %v8270_v9 = vmul.f32 %v11721_v16, %v2467_v27  ;;  %v2492_v38 = vadd.f32 -0.28449672, %v8117_v2  ;;  %v2493_v1 = vadd.f32 -0.28449672, %v8120_v42  ;;  %v8276_v37 = vmul.f32 %v11722_v26, %v2468_v46  ;;  %v11724_v48 = vld [vmem:[#allocation209_spill] sm:$0xff]  ;;  %v11726_v16 = vld [vmem:[#allocation210_spill] sm:$0xff] }
 0x2b5   :  { %v2494_v17 = vadd.f32 -0.28449672, %v8123_v11  ;;  %v2495_v29 = vadd.f32 -0.28449672, %v8126_v58  ;;  %v2496_v0 = vadd.f32 -0.28449672, %v8129_v52  ;;  %v8282_v24 = vmul.f32 %v11724_v48, %v2469_v36 }
 0x2b6   :  { %11723 = vst [vmem:[#allocation280_spill] sm:$0xff] %v8276_v37  ;;  %v2497_v27 = vadd.f32 -0.28449672, %v8132_v18  ;;  %v2498_v8 = vadd.f32 -0.28449672, %v8135_v21  ;;  %v8288_v42 = vmul.f32 %v11726_v16, %v2470_v40  ;;  %v11728_v26 = vld [vmem:[#allocation211_spill] sm:$0xff] }
 0x2b7   :  { %11725 = vst [vmem:[#allocation281_spill] sm:$0xff] %v8282_v24  ;;  %v2499_v2 = vadd.f32 -0.28449672, %v8138_v4  ;;  %v2500_v46 = vadd.f32 -0.28449672, %v8141_v22  ;;  %v8294_v52 = vmul.f32 %v11728_v26, %v2471_v19  ;;  %v11730_v48 = vld [vmem:[#allocation212_spill] sm:$0xff] }
 0x2b8   :  { %11727 = vst [vmem:[#allocation282_spill] sm:$0xff] %v8288_v42  ;;  %v2501_v11 = vadd.f32 -0.28449672, %v8144_v57  ;;  %v2502_v58 = vadd.f32 -0.28449672, %v8147_v10  ;;  %v8300_v4 = vmul.f32 %v11730_v48, %v2472_v39  ;;  %v11732_v16 = vld [vmem:[#allocation213_spill] sm:$0xff] }
 0x2b9   :  { %11729 = vst [vmem:[#allocation246_spill] sm:$0xff] %v8294_v52  ;;  %v2503_v36 = vadd.f32 -0.28449672, %v8150_v43  ;;  %v2504_v18 = vadd.f32 -0.28449672, %v8153_v56  ;;  %v8306_v10 = vmul.f32 %v11732_v16, %v2473_v45  ;;  %v11734_v26 = vld [vmem:[#allocation214_spill] sm:$0xff] }
 0x2ba   :  { %v2505_v21 = vadd.f32 -0.28449672, %v8156_v50  ;;  %11731 = vst [vmem:[#allocation248_spill] sm:$0xff] %v8300_v4  ;;  %v2506_v40 = vadd.f32 -0.28449672, %v8159_v15  ;;  %v8312_v50 = vmul.f32 %v11734_v26, %v2474_v34  ;;  %v11736_v48 = vld [vmem:[#allocation215_spill] sm:$0xff] }
 0x2bb   :  { %v2507_v22 = vadd.f32 -0.28449672, %v8162_v25  ;;  %v2508_v57 = vadd.f32 -0.28449672, %v8165_v47  ;;  %11733 = vst [vmem:[#allocation41_spill] sm:$0xff] %v8306_v10  ;;  %v8318_v47 = vmul.f32 %v11736_v48, %v2475_v32  ;;  %v11738_v16 = vld [vmem:[#allocation259_spill] sm:$0xff] }
 0x2bc   :  { %v2509_v19 = vadd.f32 -0.28449672, %v8168_v59  ;;  %v2510_v43 = vadd.f32 -0.28449672, %v8171_v51  ;;  %v2511_v56 = vadd.f32 -0.28449672, %v8174_v6 }
 0x2bd   :  { %11735 = vst [vmem:[#allocation250_spill] sm:$0xff] %v8312_v50  ;;  %v2512_v39 = vadd.f32 -0.28449672, %v8177_v12  ;;  %v2513_v15 = vadd.f32 -0.28449672, %v8180_v54  ;;  %11737 = vst [vmem:[#allocation194_spill] sm:$0xff] %v8318_v47 }
 0x2be   :  { %v2514_v25 = vadd.f32 -0.28449672, %v8183_v62  ;;  %v2515_v45 = vadd.f32 -0.28449672, %v8186_v5  ;;  %v2516_v59 = vadd.f32 -0.28449672, %v11738_v16 }
 0x2bf   :  { %v11739_v10 = vld [vmem:[#allocation261_spill] sm:$0xff]  ;;  %v11740_v4 = vld [vmem:[#allocation216_spill] sm:$0xff]  ;;  %v11742_v34 = vld [vmem:[#allocation263_spill] sm:$0xff] }
 0x2c0   :  { %v2517_v51 = vadd.f32 -0.28449672, %v11739_v10  ;;  %v8324_v6 = vmul.f32 %v11740_v4, %v2476_v28  ;;  %v2518_v26 = vadd.f32 -0.28449672, %v11742_v34  ;;  %v11743_v50 = vld [vmem:[#allocation265_spill] sm:$0xff]  ;;  %v11744_v52 = vld [vmem:[#allocation267_spill] sm:$0xff] }
 0x2c1   :  { %v2519_v12 = vadd.f32 -0.28449672, %v11743_v50  ;;  %v2520_v54 = vadd.f32 -0.28449672, %v11744_v52  ;;  %v11745_v42 = vld [vmem:[#allocation217_spill] sm:$0xff]  ;;  %v11748_v47 = vld [vmem:[#allocation271_spill] sm:$0xff] }
 0x2c2   :  { %11741 = vst [vmem:[#allocation195_spill] sm:$0xff] %v8324_v6  ;;  %v8330_v62 = vmul.f32 %v11745_v42, %v2477_v33  ;;  %v11747_v32 = vld [vmem:[#allocation269_spill] sm:$0xff]  ;;  %v2522_v5 = vadd.f32 -0.28449672, %v11748_v47  ;;  %v11750_v37 = vld [vmem:[#allocation218_spill] sm:$0xff]  ;;  %v11751_v28 = vld [vmem:[#allocation219_spill] sm:$0xff] }
 0x2c3   :  { %v2521_v48 = vadd.f32 -0.28449672, %v11747_v32  ;;  %v11749_v24 = vld [vmem:[#allocation273_spill] sm:$0xff]  ;;  %v8336_v10 = vmul.f32 %v11750_v37, %v2478_v61  ;;  %v8339_v4 = vmul.f32 %v11751_v28, %v2479_v55  ;;  %v11752_v34 = vld [vmem:[#allocation220_spill] sm:$0xff]  ;;  %v11754_v33 = vld [vmem:[#allocation222_spill] sm:$0xff] }
 0x2c4   :  { %11746 = vst [vmem:[#allocation197_spill] sm:$0xff] %v8330_v62  ;;  %v2523_v16 = vadd.f32 -0.28449672, %v11749_v24  ;;  %v8342_v6 = vmul.f32 %v11752_v34, %v2480_v35  ;;  %v11753_v50 = vld [vmem:[#allocation221_spill] sm:$0xff]  ;;  %v8348_v42 = vmul.f32 %v11754_v33, %v2482_v63  ;;  %v11755_v32 = vld [vmem:[#allocation223_spill] sm:$0xff]  ;;  %v11756_v47 = vld [vmem:[#allocation224_spill] sm:$0xff] }
 0x2c5   :  { %v8345_v52 = vmul.f32 %v11753_v50, %v2481_v60  ;;  %v8351_v62 = vmul.f32 %v11755_v32, %v2483_v13  ;;  %v8354_v24 = vmul.f32 %v11756_v47, %v2484_v30  ;;  %v11757_v61 = vld [vmem:[#allocation225_spill] sm:$0xff]  ;;  %v11758_v55 = vld [vmem:[#allocation226_spill] sm:$0xff]  ;;  %v11759_v35 = vld [vmem:[#allocation227_spill] sm:$0xff] }
 0x2c6   :  { %v8357_v37 = vmul.f32 %v11757_v61, %v2485_v41  ;;  %v8360_v28 = vmul.f32 %v11758_v55, %v2486_v7  ;;  %v8363_v34 = vmul.f32 %v11759_v35, %v2487_v53  ;;  %v11760_v60 = vld [vmem:[#allocation228_spill] sm:$0xff]  ;;  %v11761_v63 = vld [vmem:[#allocation229_spill] sm:$0xff]  ;;  %v11762_v13 = vld [vmem:[#allocation230_spill] sm:$0xff] }
 0x2c7   :  { %v8366_v50 = vmul.f32 %v11760_v60, %v2488_v49  ;;  %v8369_v33 = vmul.f32 %v11761_v63, %v2489_v3  ;;  %v8372_v32 = vmul.f32 %v11762_v13, %v2490_v20  ;;  %v11763_v30 = vld [vmem:[#allocation231_spill] sm:$0xff]  ;;  %v11764_v41 = vld [vmem:[#allocation232_spill] sm:$0xff]  ;;  %v11765_v7 = vld [vmem:[#allocation233_spill] sm:$0xff] }
 0x2c8   :  { %v8375_v47 = vmul.f32 %v11763_v30, %v2491_v44  ;;  %v8378_v61 = vmul.f32 %v11764_v41, %v2492_v38  ;;  %v8381_v55 = vmul.f32 %v11765_v7, %v2493_v1  ;;  %v11766_v53 = vld [vmem:[#allocation234_spill] sm:$0xff]  ;;  %v11767_v49 = vld [vmem:[#allocation235_spill] sm:$0xff]  ;;  %v11768_v3 = vld [vmem:[#allocation236_spill] sm:$0xff] }
 0x2c9   :  { %v8384_v35 = vmul.f32 %v11766_v53, %v2494_v17  ;;  %v8387_v60 = vmul.f32 %v11767_v49, %v2495_v29  ;;  %v8390_v63 = vmul.f32 %v11768_v3, %v2496_v0  ;;  %v11769_v20 = vld [vmem:[#allocation237_spill] sm:$0xff]  ;;  %v11770_v44 = vld [vmem:[#allocation238_spill] sm:$0xff]  ;;  %v11771_v38 = vld [vmem:[#allocation239_spill] sm:$0xff] }
 0x2ca   :  { %v8393_v13 = vmul.f32 %v11769_v20, %v2497_v27  ;;  %v8396_v30 = vmul.f32 %v11770_v44, %v2498_v8  ;;  %v8399_v41 = vmul.f32 %v11771_v38, %v2499_v2  ;;  %v11772_v1 = vld [vmem:[#allocation240_spill] sm:$0xff]  ;;  %v11773_v17 = vld [vmem:[#allocation241_spill] sm:$0xff]  ;;  %v11774_v29 = vld [vmem:[#allocation242_spill] sm:$0xff] }
 0x2cb   :  { %v8402_v7 = vmul.f32 %v11772_v1, %v2500_v46  ;;  %v8405_v53 = vmul.f32 %v11773_v17, %v2501_v11  ;;  %v8408_v49 = vmul.f32 %v11774_v29, %v2502_v58  ;;  %v11775_v0 = vld [vmem:[#allocation243_spill] sm:$0xff]  ;;  %v11776_v27 = vld [vmem:[#allocation244_spill] sm:$0xff]  ;;  %v11777_v8 = vld [vmem:[#allocation245_spill] sm:$0xff] }
 0x2cc   :  { %v8411_v3 = vmul.f32 %v11775_v0, %v2503_v36  ;;  %v8414_v20 = vmul.f32 %v11776_v27, %v2504_v18  ;;  %v8417_v44 = vmul.f32 %v11777_v8, %v2505_v21  ;;  %v11778_v2 = vld [vmem:[#allocation247_spill] sm:$0xff]  ;;  %v11779_v46 = vld [vmem:[#allocation249_spill] sm:$0xff]  ;;  %v11781_v58 = vld [vmem:[#allocation252_spill] sm:$0xff] }
 0x2cd   :  { %v8420_v38 = vmul.f32 %v11778_v2, %v2506_v40  ;;  %v8423_v1 = vmul.f32 %v11779_v46, %v2507_v22  ;;  %v11780_v11 = vld [vmem:[#allocation251_spill] sm:$0xff]  ;;  %v8429_v29 = vmul.f32 %v11781_v58, %v2509_v19  ;;  %v11782_v36 = vld [vmem:[#allocation253_spill] sm:$0xff]  ;;  %v11783_v18 = vld [vmem:[#allocation254_spill] sm:$0xff] }
 0x2ce   :  { %v8426_v17 = vmul.f32 %v11780_v11, %v2508_v57  ;;  %v8432_v0 = vmul.f32 %v11782_v36, %v2510_v43  ;;  %v8435_v27 = vmul.f32 %v11783_v18, %v2511_v56  ;;  %v11784_v21 = vld [vmem:[#allocation255_spill] sm:$0xff]  ;;  %v11786_v40 = vld [vmem:[#allocation256_spill] sm:$0xff]  ;;  %v11788_v22 = vld [vmem:[#allocation201_spill] sm:$0xff] }
 0x2cf   :  { %v8438_v8 = vmul.f32 %v11784_v21, %v2512_v39  ;;  %v8441_v2 = vmul.f32 %v11786_v40, %v2513_v15  ;;  %v8444_v46 = vmul.f32 %v11788_v22, %v2514_v25  ;;  %v11790_v57 = vld [vmem:[#allocation258_spill] sm:$0xff]  ;;  %v11792_v19 = vld [vmem:[#allocation260_spill] sm:$0xff] }
 0x2d0   :  { %v8447_v11 = vmul.f32 %v11790_v57, %v2515_v45  ;;  %v8450_v58 = vmul.f32 %v11792_v19, %v2516_v59  ;;  %v11794_v43 = vld [vmem:[#allocation262_spill] sm:$0xff]  ;;  %v11796_v56 = vld [vmem:[#allocation264_spill] sm:$0xff] }
 0x2d1   :  { %11785 = vst [vmem:[#allocation198_spill] sm:$0xff] %v8438_v8  ;;  %11787 = vst [vmem:[#allocation199_spill] sm:$0xff] %v8441_v2  ;;  %v8453_v36 = vmul.f32 %v11794_v43, %v2517_v51  ;;  %v8456_v18 = vmul.f32 %v11796_v56, %v2518_v26  ;;  %v11798_v39 = vld [vmem:[#allocation266_spill] sm:$0xff]  ;;  %v11800_v15 = vld [vmem:[#allocation268_spill] sm:$0xff] }
 0x2d2   :  { %11789 = vst [vmem:[#allocation257_spill] sm:$0xff] %v8444_v46  ;;  %11791 = vst [vmem:[#allocation259_spill] sm:$0xff] %v8447_v11  ;;  %v8459_v21 = vmul.f32 %v11798_v39, %v2519_v12  ;;  %v8462_v40 = vmul.f32 %v11800_v15, %v2520_v54  ;;  %v11802_v25 = vld [vmem:[#allocation270_spill] sm:$0xff]  ;;  %v11804_v45 = vld [vmem:[#allocation272_spill] sm:$0xff]  ;;  %v2592_v54 = vadd.f32 0.2548296, %v8252_v31 }
 0x2d3   :  { %11793 = vst [vmem:[#allocation261_spill] sm:$0xff] %v8450_v58  ;;  %11795 = vst [vmem:[#allocation263_spill] sm:$0xff] %v8453_v36  ;;  %v8465_v22 = vmul.f32 %v11802_v25, %v2521_v48  ;;  %v8468_v57 = vmul.f32 %v11804_v45, %v2522_v5  ;;  %v11806_v59 = vld [vmem:[#allocation274_spill] sm:$0xff]  ;;  %v11808_v51 = vld [vmem:[#allocation277_spill] sm:$0xff]  ;;  %v2593_v15 = vadd.f32 0.2548296, %v8258_v23 }
 0x2d4   :  { %11797 = vst [vmem:[#allocation265_spill] sm:$0xff] %v8456_v18  ;;  %11799 = vst [vmem:[#allocation267_spill] sm:$0xff] %v8459_v21  ;;  %v8471_v19 = vmul.f32 %v11806_v59, %v2523_v16  ;;  %v2588_v43 = vadd.f32 0.2548296, %v11808_v51  ;;  %v11809_v36 = vld [vmem:[#allocation278_spill] sm:$0xff]  ;;  %v11810_v56 = vld [vmem:[#allocation275_spill] sm:$0xff] }
 0x2d5   :  { %11801 = vst [vmem:[#allocation269_spill] sm:$0xff] %v8462_v40  ;;  %11803 = vst [vmem:[#allocation271_spill] sm:$0xff] %v8465_v22  ;;  %v2589_v26 = vadd.f32 0.2548296, %v11809_v36  ;;  %v2590_v18 = vadd.f32 0.2548296, %v11810_v56 }
 0x2d6   :  { %11805 = vst [vmem:[#allocation273_spill] sm:$0xff] %v8468_v57  ;;  %11807 = vst [vmem:[#allocation283_spill] sm:$0xff] %v8471_v19  ;;  %v11811_v12 = vld [vmem:[#allocation279_spill] sm:$0xff]  ;;  %v11812_v48 = vld [vmem:[#allocation44_spill] sm:$0xff]  ;;  %v2594_v16 = vadd.f32 0.2548296, %v8264_v14 }
 0x2d7   :  { %v2591_v39 = vadd.f32 0.2548296, %v11811_v12  ;;  %v11813_v25 = vsub.f32 0.0, %v11812_v48  ;;  %v2595_v59 = vadd.f32 0.2548296, %v8270_v9  ;;  %v11815_v51 = vld [vmem:[#allocation280_spill] sm:$0xff] }
 0x2d8   :  { %v2596_v45 = vadd.f32 0.2548296, %v11815_v51  ;;  %v11816_v36 = vld [vmem:[#allocation138_spill] sm:$0xff]  ;;  %v11819_v12 = vld [vmem:[#allocation281_spill] sm:$0xff]  ;;  %v11822_v21 = vld [vmem:[#allocation196_spill] sm:$0xff] }
 0x2d9   :  { %v8482_v5 = vmul.f32 %v11813_v25, %v11812_v48  ;;  %v11817_v56 = vsub.f32 0.0, %v11816_v36  ;;  %v2597_v31 = vadd.f32 0.2548296, %v11819_v12  ;;  %v11820_v57 = vld [vmem:[#allocation282_spill] sm:$0xff]  ;;  %v8496_v25 = vmul.f32 %v11822_v21, %v2588_v43  ;;  %v11824_v48 = vld [vmem:[#allocation248_spill] sm:$0xff]  ;;  %v11831_v2 = vld [vmem:[#allocation197_spill] sm:$0xff] }
 0x2da   :  { %v2598_v23 = vadd.f32 0.2548296, %v11820_v57  ;;  %v11821_v22 = vld [vmem:[#allocation246_spill] sm:$0xff]  ;;  %v2600_v14 = vadd.f32 0.2548296, %v11824_v48  ;;  %v11827_v11 = vld [vmem:[#allocation200_spill] sm:$0xff] }
 0x2db   :  { %11814 = vst [vmem:[#allocation277_spill] sm:$0xff] %v8482_v5  ;;  %v8490_v19 = vmul.f32 %v11817_v56, %v11816_v36  ;;  %v2599_v40 = vadd.f32 0.2548296, %v11821_v22  ;;  %11823 = vst [vmem:[#allocation275_spill] sm:$0xff] %v8496_v25  ;;  %v11825_v5 = vld [vmem:[#allocation41_spill] sm:$0xff]  ;;  %v11826_v58 = vld [vmem:[#allocation250_spill] sm:$0xff]  ;;  %v8502_v46 = vmul.f32 %v11827_v11, %v2589_v26 }
 0x2dc   :  { %v2601_v9 = vadd.f32 0.2548296, %v11825_v5  ;;  %v2602_v51 = vadd.f32 0.2548296, %v11826_v58  ;;  %v11829_v36 = vld [vmem:[#allocation194_spill] sm:$0xff]  ;;  %v11834_v48 = vld [vmem:[#allocation203_spill] sm:$0xff] }
 0x2dd   :  { %11818 = vst [vmem:[#allocation278_spill] sm:$0xff] %v8490_v19  ;;  %11828 = vst [vmem:[#allocation279_spill] sm:$0xff] %v8502_v46  ;;  %v2603_v56 = vadd.f32 0.2548296, %v11829_v36  ;;  %v11830_v19 = vld [vmem:[#allocation195_spill] sm:$0xff]  ;;  %v11832_v8 = vld [vmem:[#allocation202_spill] sm:$0xff]  ;;  %v8514_v58 = vmul.f32 %v11834_v48, %v2591_v39 }
 0x2de   :  { %v2604_v12 = vadd.f32 0.2548296, %v11830_v19  ;;  %v2605_v57 = vadd.f32 0.2548296, %v11831_v2  ;;  %v8508_v22 = vmul.f32 %v11832_v8, %v2590_v18  ;;  %v2606_v21 = vadd.f32 0.2548296, %v8336_v10 }
 0x2df   :  { %v2607_v43 = vadd.f32 0.2548296, %v8339_v4  ;;  %v2608_v5 = vadd.f32 0.2548296, %v8342_v6  ;;  %11835 = vst [vmem:[#allocation280_spill] sm:$0xff] %v8514_v58  ;;  %v11836_v36 = vld [vmem:[#allocation204_spill] sm:$0xff] }
 0x2e0   :  { %11833 = vst [vmem:[#allocation44_spill] sm:$0xff] %v8508_v22  ;;  %v2609_v11 = vadd.f32 0.2548296, %v8345_v52  ;;  %v2610_v26 = vadd.f32 0.2548296, %v8348_v42  ;;  %v8520_v2 = vmul.f32 %v11836_v36, %v2592_v54  ;;  %v11838_v18 = vld [vmem:[#allocation205_spill] sm:$0xff] }
 0x2e1   :  { %v2611_v19 = vadd.f32 0.2548296, %v8351_v62  ;;  %v2612_v8 = vadd.f32 0.2548296, %v8354_v24  ;;  %v2613_v10 = vadd.f32 0.2548296, %v8357_v37  ;;  %v8526_v6 = vmul.f32 %v11838_v18, %v2593_v15 }
 0x2e2   :  { %11837 = vst [vmem:[#allocation138_spill] sm:$0xff] %v8520_v2  ;;  %v2614_v4 = vadd.f32 0.2548296, %v8360_v28  ;;  %v2615_v39 = vadd.f32 0.2548296, %v8363_v34  ;;  %v11840_v48 = vld [vmem:[#allocation206_spill] sm:$0xff] }
 0x2e3   :  { %11839 = vst [vmem:[#allocation281_spill] sm:$0xff] %v8526_v6  ;;  %v2616_v52 = vadd.f32 0.2548296, %v8366_v50  ;;  %v2617_v42 = vadd.f32 0.2548296, %v8369_v33  ;;  %v8532_v62 = vmul.f32 %v11840_v48, %v2594_v16  ;;  %v11842_v36 = vld [vmem:[#allocation207_spill] sm:$0xff] }
 0x2e4   :  { %v2618_v54 = vadd.f32 0.2548296, %v8372_v32  ;;  %v2619_v24 = vadd.f32 0.2548296, %v8375_v47  ;;  %v2620_v37 = vadd.f32 0.2548296, %v8378_v61  ;;  %v8538_v28 = vmul.f32 %v11842_v36, %v2595_v59 }
 0x2e5   :  { %11841 = vst [vmem:[#allocation282_spill] sm:$0xff] %v8532_v62  ;;  %v2621_v15 = vadd.f32 0.2548296, %v8381_v55  ;;  %v2622_v34 = vadd.f32 0.2548296, %v8384_v35  ;;  %v11844_v18 = vld [vmem:[#allocation208_spill] sm:$0xff] }
 0x2e6   :  { %11843 = vst [vmem:[#allocation246_spill] sm:$0xff] %v8538_v28  ;;  %v2623_v50 = vadd.f32 0.2548296, %v8387_v60  ;;  %v8544_v33 = vmul.f32 %v11844_v18, %v2596_v45  ;;  %v2624_v16 = vadd.f32 0.2548296, %v8390_v63  ;;  %v11846_v48 = vld [vmem:[#allocation209_spill] sm:$0xff] }
 0x2e7   :  { %v2625_v32 = vadd.f32 0.2548296, %v8393_v13  ;;  %v2626_v47 = vadd.f32 0.2548296, %v8396_v30  ;;  %v8550_v61 = vmul.f32 %v11846_v48, %v2597_v31  ;;  %v2627_v59 = vadd.f32 0.2548296, %v8399_v41 }
 0x2e8   :  { %11845 = vst [vmem:[#allocation196_spill] sm:$0xff] %v8544_v33  ;;  %v2628_v55 = vadd.f32 0.2548296, %v8402_v7  ;;  %v2629_v35 = vadd.f32 0.2548296, %v8405_v53  ;;  %v11848_v36 = vld [vmem:[#allocation210_spill] sm:$0xff] }
 0x2e9   :  { %11847 = vst [vmem:[#allocation248_spill] sm:$0xff] %v8550_v61  ;;  %v8556_v60 = vmul.f32 %v11848_v36, %v2598_v23  ;;  %v2630_v45 = vadd.f32 0.2548296, %v8408_v49  ;;  %v2631_v63 = vadd.f32 0.2548296, %v8411_v3  ;;  %v11850_v18 = vld [vmem:[#allocation211_spill] sm:$0xff] }
 0x2ea   :  { %v2632_v13 = vadd.f32 0.2548296, %v8414_v20  ;;  %v8562_v30 = vmul.f32 %v11850_v18, %v2599_v40  ;;  %v2633_v31 = vadd.f32 0.2548296, %v8417_v44  ;;  %v2634_v41 = vadd.f32 0.2548296, %v8420_v38 }
 0x2eb   :  { %11849 = vst [vmem:[#allocation41_spill] sm:$0xff] %v8556_v60  ;;  %v2635_v7 = vadd.f32 0.2548296, %v8423_v1  ;;  %v11852_v48 = vld [vmem:[#allocation212_spill] sm:$0xff]  ;;  %v2636_v23 = vadd.f32 0.2548296, %v8426_v17 }
 0x2ec   :  { %11851 = vst [vmem:[#allocation250_spill] sm:$0xff] %v8562_v30  ;;  %v8568_v53 = vmul.f32 %v11852_v48, %v2600_v14  ;;  %v2637_v49 = vadd.f32 0.2548296, %v8429_v29  ;;  %v2638_v3 = vadd.f32 0.2548296, %v8432_v0  ;;  %v11854_v36 = vld [vmem:[#allocation213_spill] sm:$0xff] }
 0x2ed   :  { %v8574_v20 = vmul.f32 %v11854_v36, %v2601_v9  ;;  %v2639_v40 = vadd.f32 0.2548296, %v8435_v27  ;;  %v11856_v18 = vld [vmem:[#allocation198_spill] sm:$0xff]  ;;  %v11857_v30 = vld [vmem:[#allocation199_spill] sm:$0xff]  ;;  %v11860_v14 = vld [vmem:[#allocation257_spill] sm:$0xff] }
 0x2ee   :  { %11853 = vst [vmem:[#allocation200_spill] sm:$0xff] %v8568_v53  ;;  %v2640_v44 = vadd.f32 0.2548296, %v11856_v18  ;;  %v2641_v38 = vadd.f32 0.2548296, %v11857_v30  ;;  %v11858_v60 = vld [vmem:[#allocation214_spill] sm:$0xff] }
 0x2ef   :  { %11855 = vst [vmem:[#allocation194_spill] sm:$0xff] %v8574_v20  ;;  %v8580_v1 = vmul.f32 %v11858_v60, %v2602_v51  ;;  %v2642_v48 = vadd.f32 0.2548296, %v11860_v14  ;;  %v11861_v53 = vld [vmem:[#allocation259_spill] sm:$0xff]  ;;  %v11862_v61 = vld [vmem:[#allocation261_spill] sm:$0xff]  ;;  %v11868_v62 = vld [vmem:[#allocation216_spill] sm:$0xff] }
 0x2f0   :  { %v2643_v17 = vadd.f32 0.2548296, %v11861_v53  ;;  %v2644_v29 = vadd.f32 0.2548296, %v11862_v61  ;;  %v11863_v33 = vld [vmem:[#allocation215_spill] sm:$0xff]  ;;  %v11866_v20 = vld [vmem:[#allocation265_spill] sm:$0xff]  ;;  %v8592_v30 = vmul.f32 %v11868_v62, %v2604_v12 }
 0x2f1   :  { %11859 = vst [vmem:[#allocation195_spill] sm:$0xff] %v8580_v1  ;;  %v8586_v0 = vmul.f32 %v11863_v33, %v2603_v56  ;;  %v11865_v9 = vld [vmem:[#allocation263_spill] sm:$0xff]  ;;  %v2646_v27 = vadd.f32 0.2548296, %v11866_v20  ;;  %v11870_v51 = vld [vmem:[#allocation269_spill] sm:$0xff]  ;;  %v11999_v46 = vld [vmem:[#allocation170_spill] sm:$0xff] }
 0x2f2   :  { %v2645_v36 = vadd.f32 0.2548296, %v11865_v9  ;;  %v11867_v28 = vld [vmem:[#allocation267_spill] sm:$0xff]  ;;  %11869 = vst [vmem:[#allocation202_spill] sm:$0xff] %v8592_v30  ;;  %v2648_v60 = vadd.f32 0.2548296, %v11870_v51 }
 0x2f3   :  { %11864 = vst [vmem:[#allocation197_spill] sm:$0xff] %v8586_v0  ;;  %v2647_v18 = vadd.f32 0.2548296, %v11867_v28  ;;  %v11871_v1 = vld [vmem:[#allocation271_spill] sm:$0xff]  ;;  %v11872_v6 = vld [vmem:[#allocation273_spill] sm:$0xff]  ;;  %v11876_v0 = vld [vmem:[#allocation218_spill] sm:$0xff] }
 0x2f4   :  { %v2649_v14 = vadd.f32 0.2548296, %v11871_v1  ;;  %v2650_v53 = vadd.f32 0.2548296, %v11872_v6  ;;  %v11873_v2 = vld [vmem:[#allocation217_spill] sm:$0xff]  ;;  %v11875_v56 = vld [vmem:[#allocation283_spill] sm:$0xff]  ;;  %v8602_v9 = vmul.f32 %v11876_v0, %v2606_v21 }
 0x2f5   :  { %v8598_v61 = vmul.f32 %v11873_v2, %v2605_v57  ;;  %v2651_v33 = vadd.f32 0.2548296, %v11875_v56  ;;  %v11878_v20 = vld [vmem:[#allocation219_spill] sm:$0xff]  ;;  %v11880_v28 = vld [vmem:[#allocation220_spill] sm:$0xff]  ;;  %v11882_v62 = vld [vmem:[#allocation221_spill] sm:$0xff]  ;;  %v2753_v25 = vsub.f32 0.0, %v11999_v46 }
 0x2f6   :  { %11877 = vst [vmem:[#allocation204_spill] sm:$0xff] %v8602_v9  ;;  %v8605_v58 = vmul.f32 %v11878_v20, %v2607_v43  ;;  %v8608_v12 = vmul.f32 %v11880_v28, %v2608_v5  ;;  %v8611_v51 = vmul.f32 %v11882_v62, %v2609_v11  ;;  %v11884_v1 = vld [vmem:[#allocation222_spill] sm:$0xff]  ;;  %v11886_v6 = vld [vmem:[#allocation223_spill] sm:$0xff]  ;;  %v11888_v2 = vld [vmem:[#allocation224_spill] sm:$0xff] }
 0x2f7   :  { %11874 = vst [vmem:[#allocation203_spill] sm:$0xff] %v8598_v61  ;;  %v8614_v30 = vmul.f32 %v11884_v1, %v2610_v26  ;;  %v8617_v57 = vmul.f32 %v11886_v6, %v2611_v19  ;;  %v8620_v56 = vmul.f32 %v11888_v2, %v2612_v8  ;;  %v11890_v21 = vld [vmem:[#allocation225_spill] sm:$0xff]  ;;  %v11892_v43 = vld [vmem:[#allocation226_spill] sm:$0xff]  ;;  %v11894_v5 = vld [vmem:[#allocation227_spill] sm:$0xff] }
 0x2f8   :  { %11879 = vst [vmem:[#allocation205_spill] sm:$0xff] %v8605_v58  ;;  %11881 = vst [vmem:[#allocation206_spill] sm:$0xff] %v8608_v12  ;;  %v8623_v0 = vmul.f32 %v11890_v21, %v2613_v10  ;;  %v8626_v20 = vmul.f32 %v11892_v43, %v2614_v4  ;;  %v8629_v28 = vmul.f32 %v11894_v5, %v2615_v39  ;;  %v11896_v11 = vld [vmem:[#allocation228_spill] sm:$0xff]  ;;  %v11898_v26 = vld [vmem:[#allocation229_spill] sm:$0xff] }
 0x2f9   :  { %11883 = vst [vmem:[#allocation207_spill] sm:$0xff] %v8611_v51  ;;  %11885 = vst [vmem:[#allocation208_spill] sm:$0xff] %v8614_v30  ;;  %v8632_v62 = vmul.f32 %v11896_v11, %v2616_v52  ;;  %v8635_v1 = vmul.f32 %v11898_v26, %v2617_v42  ;;  %v11900_v19 = vld [vmem:[#allocation230_spill] sm:$0xff]  ;;  %v11902_v8 = vld [vmem:[#allocation231_spill] sm:$0xff] }
 0x2fa   :  { %11887 = vst [vmem:[#allocation209_spill] sm:$0xff] %v8617_v57  ;;  %11889 = vst [vmem:[#allocation210_spill] sm:$0xff] %v8620_v56  ;;  %v8638_v6 = vmul.f32 %v11900_v19, %v2618_v54  ;;  %v8641_v2 = vmul.f32 %v11902_v8, %v2619_v24  ;;  %v11904_v10 = vld [vmem:[#allocation232_spill] sm:$0xff]  ;;  %v11906_v4 = vld [vmem:[#allocation233_spill] sm:$0xff] }
 0x2fb   :  { %11891 = vst [vmem:[#allocation211_spill] sm:$0xff] %v8623_v0  ;;  %11893 = vst [vmem:[#allocation212_spill] sm:$0xff] %v8626_v20  ;;  %v8644_v21 = vmul.f32 %v11904_v10, %v2620_v37  ;;  %v8647_v43 = vmul.f32 %v11906_v4, %v2621_v15  ;;  %v11908_v39 = vld [vmem:[#allocation234_spill] sm:$0xff]  ;;  %v11910_v52 = vld [vmem:[#allocation235_spill] sm:$0xff] }
 0x2fc   :  { %11895 = vst [vmem:[#allocation213_spill] sm:$0xff] %v8629_v28  ;;  %11897 = vst [vmem:[#allocation198_spill] sm:$0xff] %v8632_v62  ;;  %v8650_v5 = vmul.f32 %v11908_v39, %v2622_v34  ;;  %v8653_v11 = vmul.f32 %v11910_v52, %v2623_v50  ;;  %v11912_v42 = vld [vmem:[#allocation236_spill] sm:$0xff]  ;;  %v11914_v54 = vld [vmem:[#allocation237_spill] sm:$0xff] }
 0x2fd   :  { %11899 = vst [vmem:[#allocation199_spill] sm:$0xff] %v8635_v1  ;;  %11901 = vst [vmem:[#allocation214_spill] sm:$0xff] %v8638_v6  ;;  %v8656_v26 = vmul.f32 %v11912_v42, %v2624_v16  ;;  %v8659_v19 = vmul.f32 %v11914_v54, %v2625_v32  ;;  %v11916_v24 = vld [vmem:[#allocation238_spill] sm:$0xff]  ;;  %v11918_v37 = vld [vmem:[#allocation239_spill] sm:$0xff] }
 0x2fe   :  { %11903 = vst [vmem:[#allocation257_spill] sm:$0xff] %v8641_v2  ;;  %11905 = vst [vmem:[#allocation259_spill] sm:$0xff] %v8644_v21  ;;  %v8662_v8 = vmul.f32 %v11916_v24, %v2626_v47  ;;  %v8665_v10 = vmul.f32 %v11918_v37, %v2627_v59  ;;  %v11920_v15 = vld [vmem:[#allocation240_spill] sm:$0xff]  ;;  %v11922_v34 = vld [vmem:[#allocation241_spill] sm:$0xff] }
 0x2ff   :  { %11907 = vst [vmem:[#allocation261_spill] sm:$0xff] %v8647_v43  ;;  %11909 = vst [vmem:[#allocation215_spill] sm:$0xff] %v8650_v5  ;;  %v8668_v4 = vmul.f32 %v11920_v15, %v2628_v55  ;;  %v8671_v39 = vmul.f32 %v11922_v34, %v2629_v35  ;;  %v11924_v50 = vld [vmem:[#allocation242_spill] sm:$0xff]  ;;  %v11926_v16 = vld [vmem:[#allocation243_spill] sm:$0xff] }
 0x300   :  { %11911 = vst [vmem:[#allocation263_spill] sm:$0xff] %v8653_v11  ;;  %11913 = vst [vmem:[#allocation265_spill] sm:$0xff] %v8656_v26  ;;  %v8674_v52 = vmul.f32 %v11924_v50, %v2630_v45  ;;  %v8677_v42 = vmul.f32 %v11926_v16, %v2631_v63  ;;  %v11928_v32 = vld [vmem:[#allocation244_spill] sm:$0xff]  ;;  %v11930_v47 = vld [vmem:[#allocation245_spill] sm:$0xff] }
 0x301   :  { %11915 = vst [vmem:[#allocation267_spill] sm:$0xff] %v8659_v19  ;;  %11917 = vst [vmem:[#allocation216_spill] sm:$0xff] %v8662_v8  ;;  %v8680_v54 = vmul.f32 %v11928_v32, %v2632_v13  ;;  %v8683_v24 = vmul.f32 %v11930_v47, %v2633_v31  ;;  %v11932_v59 = vld [vmem:[#allocation247_spill] sm:$0xff]  ;;  %v11934_v55 = vld [vmem:[#allocation249_spill] sm:$0xff] }
 0x302   :  { %11919 = vst [vmem:[#allocation269_spill] sm:$0xff] %v8665_v10  ;;  %11921 = vst [vmem:[#allocation271_spill] sm:$0xff] %v8668_v4  ;;  %v8686_v37 = vmul.f32 %v11932_v59, %v2634_v41  ;;  %v8689_v15 = vmul.f32 %v11934_v55, %v2635_v7  ;;  %v11936_v35 = vld [vmem:[#allocation251_spill] sm:$0xff]  ;;  %v11938_v45 = vld [vmem:[#allocation252_spill] sm:$0xff] }
 0x303   :  { %11923 = vst [vmem:[#allocation273_spill] sm:$0xff] %v8671_v39  ;;  %11925 = vst [vmem:[#allocation217_spill] sm:$0xff] %v8674_v52  ;;  %v8692_v34 = vmul.f32 %v11936_v35, %v2636_v23  ;;  %v8695_v50 = vmul.f32 %v11938_v45, %v2637_v49  ;;  %v11940_v63 = vld [vmem:[#allocation253_spill] sm:$0xff]  ;;  %v11942_v13 = vld [vmem:[#allocation254_spill] sm:$0xff] }
 0x304   :  { %11927 = vst [vmem:[#allocation283_spill] sm:$0xff] %v8677_v42  ;;  %11929 = vst [vmem:[#allocation218_spill] sm:$0xff] %v8680_v54  ;;  %v8698_v16 = vmul.f32 %v11940_v63, %v2638_v3  ;;  %v8701_v32 = vmul.f32 %v11942_v13, %v2639_v40  ;;  %v11944_v31 = vld [vmem:[#allocation255_spill] sm:$0xff]  ;;  %v11946_v41 = vld [vmem:[#allocation256_spill] sm:$0xff] }
 0x305   :  { %11931 = vst [vmem:[#allocation219_spill] sm:$0xff] %v8683_v24  ;;  %11933 = vst [vmem:[#allocation220_spill] sm:$0xff] %v8686_v37  ;;  %v8704_v47 = vmul.f32 %v11944_v31, %v2640_v44  ;;  %v8707_v59 = vmul.f32 %v11946_v41, %v2641_v38  ;;  %v11948_v7 = vld [vmem:[#allocation201_spill] sm:$0xff]  ;;  %v11950_v23 = vld [vmem:[#allocation258_spill] sm:$0xff] }
 0x306   :  { %11935 = vst [vmem:[#allocation221_spill] sm:$0xff] %v8689_v15  ;;  %11937 = vst [vmem:[#allocation222_spill] sm:$0xff] %v8692_v34  ;;  %v8710_v55 = vmul.f32 %v11948_v7, %v2642_v48  ;;  %v8713_v35 = vmul.f32 %v11950_v23, %v2643_v17  ;;  %v11952_v49 = vld [vmem:[#allocation260_spill] sm:$0xff]  ;;  %v11954_v3 = vld [vmem:[#allocation262_spill] sm:$0xff] }
 0x307   :  { %11939 = vst [vmem:[#allocation223_spill] sm:$0xff] %v8695_v50  ;;  %11941 = vst [vmem:[#allocation224_spill] sm:$0xff] %v8698_v16  ;;  %v8716_v45 = vmul.f32 %v11952_v49, %v2644_v29  ;;  %v8719_v63 = vmul.f32 %v11954_v3, %v2645_v36  ;;  %v11956_v40 = vld [vmem:[#allocation264_spill] sm:$0xff]  ;;  %v11958_v44 = vld [vmem:[#allocation266_spill] sm:$0xff] }
 0x308   :  { %11943 = vst [vmem:[#allocation225_spill] sm:$0xff] %v8701_v32  ;;  %11945 = vst [vmem:[#allocation226_spill] sm:$0xff] %v8704_v47  ;;  %v8722_v13 = vmul.f32 %v11956_v40, %v2646_v27  ;;  %v8725_v31 = vmul.f32 %v11958_v44, %v2647_v18  ;;  %v11960_v38 = vld [vmem:[#allocation268_spill] sm:$0xff]  ;;  %v11962_v48 = vld [vmem:[#allocation270_spill] sm:$0xff] }
 0x309   :  { %11947 = vst [vmem:[#allocation227_spill] sm:$0xff] %v8707_v59  ;;  %11949 = vst [vmem:[#allocation228_spill] sm:$0xff] %v8710_v55  ;;  %v8728_v41 = vmul.f32 %v11960_v38, %v2648_v60  ;;  %v8731_v7 = vmul.f32 %v11962_v48, %v2649_v14  ;;  %v11964_v17 = vld [vmem:[#allocation272_spill] sm:$0xff]  ;;  %v11966_v29 = vld [vmem:[#allocation274_spill] sm:$0xff] }
 0x30a   :  { %11951 = vst [vmem:[#allocation229_spill] sm:$0xff] %v8713_v35  ;;  %11953 = vst [vmem:[#allocation230_spill] sm:$0xff] %v8716_v45  ;;  %v8734_v23 = vmul.f32 %v11964_v17, %v2650_v53  ;;  %v8737_v49 = vmul.f32 %v11966_v29, %v2651_v33  ;;  %v11968_v36 = vld [vmem:[#allocation142_spill] sm:$0xff]  ;;  %v11970_v40 = vld [vmem:[#allocation144_spill] sm:$0xff] }
 0x30b   :  { %11955 = vst [vmem:[#allocation231_spill] sm:$0xff] %v8719_v63  ;;  %11957 = vst [vmem:[#allocation232_spill] sm:$0xff] %v8722_v13  ;;  %v2722_v3 = vsub.f32 0.0, %v11968_v36  ;;  %v11969_v63 = vld [vmem:[#allocation143_spill] sm:$0xff]  ;;  %v2724_v13 = vsub.f32 0.0, %v11970_v40  ;;  %v11971_v18 = vld [vmem:[#allocation145_spill] sm:$0xff] }
 0x30c   :  { %11959 = vst [vmem:[#allocation233_spill] sm:$0xff] %v8725_v31  ;;  %11961 = vst [vmem:[#allocation234_spill] sm:$0xff] %v8728_v41  ;;  %v2723_v27 = vsub.f32 0.0, %v11969_v63  ;;  %v2725_v44 = vsub.f32 0.0, %v11971_v18  ;;  %v11972_v31 = vld [vmem:[#allocation146_spill] sm:$0xff]  ;;  %v11973_v38 = vld [vmem:[#allocation147_spill] sm:$0xff] }
 0x30d   :  { %11963 = vst [vmem:[#allocation235_spill] sm:$0xff] %v8731_v7  ;;  %11965 = vst [vmem:[#allocation236_spill] sm:$0xff] %v8734_v23  ;;  %v2726_v60 = vsub.f32 0.0, %v11972_v31  ;;  %v2727_v41 = vsub.f32 0.0, %v11973_v38  ;;  %v11974_v14 = vld [vmem:[#allocation148_spill] sm:$0xff]  ;;  %v11975_v7 = vld [vmem:[#allocation149_spill] sm:$0xff] }
 0x30e   :  { %11967 = vst [vmem:[#allocation237_spill] sm:$0xff] %v8737_v49  ;;  %v2728_v48 = vsub.f32 0.0, %v11974_v14  ;;  %v2729_v53 = vsub.f32 0.0, %v11975_v7  ;;  %v11976_v17 = vld [vmem:[#allocation150_spill] sm:$0xff]  ;;  %v11977_v33 = vld [vmem:[#allocation151_spill] sm:$0xff]  ;;  %v11978_v49 = vld [vmem:[#allocation152_spill] sm:$0xff] }
 0x30f   :  { %v2730_v23 = vsub.f32 0.0, %v11976_v17  ;;  %v2731_v29 = vsub.f32 0.0, %v11977_v33  ;;  %v2732_v45 = vsub.f32 0.0, %v11978_v49  ;;  %v11979_v35 = vld [vmem:[#allocation153_spill] sm:$0xff]  ;;  %v11980_v59 = vld [vmem:[#allocation154_spill] sm:$0xff]  ;;  %v11981_v32 = vld [vmem:[#allocation155_spill] sm:$0xff] }
 0x310   :  { %v2733_v55 = vsub.f32 0.0, %v11979_v35  ;;  %v2734_v47 = vsub.f32 0.0, %v11980_v59  ;;  %v2735_v16 = vsub.f32 0.0, %v11981_v32  ;;  %v11982_v50 = vld [vmem:[#allocation156_spill] sm:$0xff]  ;;  %v11983_v15 = vld [vmem:[#allocation157_spill] sm:$0xff]  ;;  %v11984_v24 = vld [vmem:[#allocation158_spill] sm:$0xff] }
 0x311   :  { %v2736_v34 = vsub.f32 0.0, %v11982_v50  ;;  %v2737_v37 = vsub.f32 0.0, %v11983_v15  ;;  %v2738_v54 = vsub.f32 0.0, %v11984_v24  ;;  %v11985_v42 = vld [vmem:[#allocation159_spill] sm:$0xff]  ;;  %v11986_v39 = vld [vmem:[#allocation160_spill] sm:$0xff]  ;;  %v11987_v10 = vld [vmem:[#allocation161_spill] sm:$0xff] }
 0x312   :  { %v2739_v52 = vsub.f32 0.0, %v11985_v42  ;;  %v2740_v4 = vsub.f32 0.0, %v11986_v39  ;;  %v2741_v8 = vsub.f32 0.0, %v11987_v10  ;;  %v11988_v19 = vld [vmem:[#allocation162_spill] sm:$0xff]  ;;  %v11989_v11 = vld [vmem:[#allocation163_spill] sm:$0xff]  ;;  %v11990_v43 = vld [vmem:[#allocation164_spill] sm:$0xff] }
 0x313   :  { %v2742_v26 = vsub.f32 0.0, %v11988_v19  ;;  %v2743_v5 = vsub.f32 0.0, %v11989_v11  ;;  %v2744_v21 = vsub.f32 0.0, %v11990_v43  ;;  %v11991_v2 = vld [vmem:[#allocation165_spill] sm:$0xff]  ;;  %v11992_v1 = vld [vmem:[#allocation166_spill] sm:$0xff]  ;;  %v11993_v28 = vld [vmem:[#allocation167_spill] sm:$0xff] }
 0x314   :  { %v2745_v6 = vsub.f32 0.0, %v11991_v2  ;;  %v2746_v62 = vsub.f32 0.0, %v11992_v1  ;;  %v2747_v20 = vsub.f32 0.0, %v11993_v28  ;;  %v11994_v0 = vld [vmem:[#allocation52_spill] sm:$0xff]  ;;  %v11996_v51 = vld [vmem:[#allocation19_spill] sm:$0xff]  ;;  %v11997_v58 = vld [vmem:[#allocation29_spill] sm:$0xff] }
 0x315   :  { %v2748_v56 = vsub.f32 0.0, %v11994_v0  ;;  %v11995_v57 = vld [vmem:[#allocation168_spill] sm:$0xff]  ;;  %v2750_v12 = vsub.f32 0.0, %v11996_v51  ;;  %v2751_v9 = vsub.f32 0.0, %v11997_v58  ;;  %v11998_v61 = vld [vmem:[#allocation169_spill] sm:$0xff]  ;;  %v12000_v11 = vld [vmem:[#allocation171_spill] sm:$0xff] }
 0x316   :  { %v2749_v30 = vsub.f32 0.0, %v11995_v57  ;;  %v2752_v22 = vsub.f32 0.0, %v11998_v61  ;;  %v2754_v43 = vsub.f32 0.0, %v12000_v11  ;;  %v12001_v19 = vld [vmem:[#allocation172_spill] sm:$0xff]  ;;  %v12002_v10 = vld [vmem:[#allocation33_spill] sm:$0xff]  ;;  %v12004_v42 = vld [vmem:[#allocation174_spill] sm:$0xff] }
 0x317   :  { %v2755_v2 = vsub.f32 0.0, %v12001_v19  ;;  %v2756_v1 = vsub.f32 0.0, %v12002_v10  ;;  %v12003_v39 = vld [vmem:[#allocation173_spill] sm:$0xff]  ;;  %v2758_v0 = vsub.f32 0.0, %v12004_v42  ;;  %v12005_v24 = vld [vmem:[#allocation175_spill] sm:$0xff]  ;;  %v12006_v15 = vld [vmem:[#allocation176_spill] sm:$0xff] }
 0x318   :  { %v2757_v28 = vsub.f32 0.0, %v12003_v39  ;;  %v2759_v57 = vsub.f32 0.0, %v12005_v24  ;;  %v2760_v51 = vsub.f32 0.0, %v12006_v15  ;;  %v12007_v50 = vld [vmem:[#allocation177_spill] sm:$0xff]  ;;  %v12008_v32 = vld [vmem:[#allocation178_spill] sm:$0xff]  ;;  %v12009_v59 = vld [vmem:[#allocation179_spill] sm:$0xff] }
 0x319   :  { %v2761_v58 = vsub.f32 0.0, %v12007_v50  ;;  %v2762_v61 = vsub.f32 0.0, %v12008_v32  ;;  %v2763_v46 = vsub.f32 0.0, %v12009_v59  ;;  %v12010_v35 = vld [vmem:[#allocation180_spill] sm:$0xff]  ;;  %v12011_v49 = vld [vmem:[#allocation181_spill] sm:$0xff]  ;;  %v12012_v33 = vld [vmem:[#allocation182_spill] sm:$0xff] }
 0x31a   :  { %v2764_v11 = vsub.f32 0.0, %v12010_v35  ;;  %v2765_v19 = vsub.f32 0.0, %v12011_v49  ;;  %v2766_v10 = vsub.f32 0.0, %v12012_v33  ;;  %v12013_v17 = vld [vmem:[#allocation183_spill] sm:$0xff]  ;;  %v12014_v7 = vld [vmem:[#allocation184_spill] sm:$0xff]  ;;  %v12015_v14 = vld [vmem:[#allocation185_spill] sm:$0xff] }
 0x31b   :  { %v2767_v39 = vsub.f32 0.0, %v12013_v17  ;;  %v2768_v42 = vsub.f32 0.0, %v12014_v7  ;;  %v2769_v24 = vsub.f32 0.0, %v12015_v14  ;;  %v12016_v38 = vld [vmem:[#allocation186_spill] sm:$0xff]  ;;  %v12017_v31 = vld [vmem:[#allocation187_spill] sm:$0xff]  ;;  %v12018_v18 = vld [vmem:[#allocation188_spill] sm:$0xff] }
 0x31c   :  { %v2770_v15 = vsub.f32 0.0, %v12016_v38  ;;  %v2771_v50 = vsub.f32 0.0, %v12017_v31  ;;  %v2772_v32 = vsub.f32 0.0, %v12018_v18  ;;  %v12019_v40 = vld [vmem:[#allocation189_spill] sm:$0xff]  ;;  %v12020_v63 = vld [vmem:[#allocation190_spill] sm:$0xff]  ;;  %v12021_v36 = vld [vmem:[#allocation191_spill] sm:$0xff] }
 0x31d   :  { %v2773_v59 = vsub.f32 0.0, %v12019_v40  ;;  %v2774_v35 = vsub.f32 0.0, %v12020_v63  ;;  %v2775_v49 = vsub.f32 0.0, %v12021_v36  ;;  %v12022_v33 = vld [vmem:[#allocation192_spill] sm:$0xff]  ;;  %v12023_v7 = vld [vmem:[#allocation34_spill] sm:$0xff]  ;;  %v12024_v38 = vld [vmem:[#allocation39_spill] sm:$0xff] }
 0x31e   :  { %v2776_v17 = vsub.f32 0.0, %v12022_v33  ;;  %v2777_v14 = vsub.f32 0.0, %v12023_v7  ;;  %v2778_v31 = vsub.f32 0.0, %v12024_v38  ;;  %v12026_v63 = vld [vmem:[#allocation139_spill] sm:$0xff]  ;;  %v12029_v7 = vld [vmem:[#allocation140_spill] sm:$0xff]  ;;  %v12032_v40 = vld [vmem:[#allocation141_spill] sm:$0xff] }
 0x31f   :  { %v12027_v36 = vsub.f32 0.0, %v12026_v63  ;;  %v12030_v38 = vsub.f32 0.0, %v12029_v7 }
 0x321   :  { %v8800_v33 = vmul.f32 %v12027_v36, %v12026_v63  ;;  %v8805_v18 = vmul.f32 %v12030_v38, %v12029_v7  ;;  %v12033_v36 = vsub.f32 0.0, %v12032_v40  ;;  %v12037_v38 = vld [vmem:[#allocation143_spill] sm:$0xff] }
 0x323   :  { %12028 = vst [vmem:[#allocation238_spill] sm:$0xff] %v8800_v33  ;;  %12031 = vst [vmem:[#allocation239_spill] sm:$0xff] %v8805_v18  ;;  %v8810_v63 = vmul.f32 %v12033_v36, %v12032_v40  ;;  %v12035_v33 = vld [vmem:[#allocation142_spill] sm:$0xff]  ;;  %v8816_v18 = vmul.f32 %v2723_v27, %v12037_v38  ;;  %v12039_v36 = vld [vmem:[#allocation144_spill] sm:$0xff] }
 0x324   :  { %v8813_v7 = vmul.f32 %v2722_v3, %v12035_v33  ;;  %v8819_v40 = vmul.f32 %v2724_v13, %v12039_v36  ;;  %v12043_v33 = vld [vmem:[#allocation146_spill] sm:$0xff]  ;;  %v12045_v27 = vld [vmem:[#allocation147_spill] sm:$0xff]  ;;  %v12049_v36 = vld [vmem:[#allocation149_spill] sm:$0xff] }
 0x325   :  { %12034 = vst [vmem:[#allocation240_spill] sm:$0xff] %v8810_v63  ;;  %12038 = vst [vmem:[#allocation242_spill] sm:$0xff] %v8816_v18  ;;  %v12041_v63 = vld [vmem:[#allocation145_spill] sm:$0xff]  ;;  %v8828_v38 = vmul.f32 %v2727_v41, %v12045_v27  ;;  %v12047_v18 = vld [vmem:[#allocation148_spill] sm:$0xff] }
 0x326   :  { %12036 = vst [vmem:[#allocation241_spill] sm:$0xff] %v8813_v7  ;;  %12040 = vst [vmem:[#allocation243_spill] sm:$0xff] %v8819_v40  ;;  %v8822_v3 = vmul.f32 %v2725_v44, %v12041_v63  ;;  %v8825_v7 = vmul.f32 %v2726_v60, %v12043_v33  ;;  %v8831_v13 = vmul.f32 %v2728_v48, %v12047_v18  ;;  %v12050_v44 = vld [vmem:[#allocation150_spill] sm:$0xff]  ;;  %v12052_v60 = vld [vmem:[#allocation152_spill] sm:$0xff] }
 0x327   :  { %12046 = vst [vmem:[#allocation247_spill] sm:$0xff] %v8828_v38  ;;  %v8834_v40 = vmul.f32 %v2729_v53, %v12049_v36  ;;  %v8837_v63 = vmul.f32 %v2730_v23, %v12050_v44  ;;  %v12053_v27 = vld [vmem:[#allocation153_spill] sm:$0xff]  ;;  %v12054_v38 = vld [vmem:[#allocation154_spill] sm:$0xff]  ;;  %v12055_v48 = vld [vmem:[#allocation155_spill] sm:$0xff] }
 0x328   :  { %12042 = vst [vmem:[#allocation244_spill] sm:$0xff] %v8822_v3  ;;  %12044 = vst [vmem:[#allocation245_spill] sm:$0xff] %v8825_v7  ;;  %v12051_v3 = vld [vmem:[#allocation151_spill] sm:$0xff]  ;;  %v8843_v7 = vmul.f32 %v2732_v45, %v12052_v60  ;;  %v8846_v41 = vmul.f32 %v2733_v55, %v12053_v27  ;;  %v8849_v18 = vmul.f32 %v2734_v47, %v12054_v38  ;;  %v12056_v53 = vld [vmem:[#allocation156_spill] sm:$0xff] }
 0x329   :  { %12048 = vst [vmem:[#allocation249_spill] sm:$0xff] %v8831_v13  ;;  %v8840_v33 = vmul.f32 %v2731_v29, %v12051_v3  ;;  %v8852_v13 = vmul.f32 %v2735_v16, %v12055_v48  ;;  %v8855_v36 = vmul.f32 %v2736_v34, %v12056_v53  ;;  %v12057_v23 = vld [vmem:[#allocation157_spill] sm:$0xff]  ;;  %v12058_v29 = vld [vmem:[#allocation158_spill] sm:$0xff]  ;;  %v12059_v45 = vld [vmem:[#allocation159_spill] sm:$0xff] }
 0x32a   :  { %v8858_v44 = vmul.f32 %v2737_v37, %v12057_v23  ;;  %v8861_v3 = vmul.f32 %v2738_v54, %v12058_v29  ;;  %v8864_v60 = vmul.f32 %v2739_v52, %v12059_v45  ;;  %v12060_v55 = vld [vmem:[#allocation160_spill] sm:$0xff]  ;;  %v12061_v47 = vld [vmem:[#allocation161_spill] sm:$0xff]  ;;  %v12062_v16 = vld [vmem:[#allocation162_spill] sm:$0xff] }
 0x32b   :  { %v8867_v27 = vmul.f32 %v2740_v4, %v12060_v55  ;;  %v8870_v38 = vmul.f32 %v2741_v8, %v12061_v47  ;;  %v8873_v48 = vmul.f32 %v2742_v26, %v12062_v16  ;;  %v12063_v34 = vld [vmem:[#allocation163_spill] sm:$0xff]  ;;  %v12064_v37 = vld [vmem:[#allocation164_spill] sm:$0xff]  ;;  %v12065_v54 = vld [vmem:[#allocation165_spill] sm:$0xff] }
 0x32c   :  { %v8876_v53 = vmul.f32 %v2743_v5, %v12063_v34  ;;  %v8879_v23 = vmul.f32 %v2744_v21, %v12064_v37  ;;  %v8882_v29 = vmul.f32 %v2745_v6, %v12065_v54  ;;  %v12066_v52 = vld [vmem:[#allocation166_spill] sm:$0xff]  ;;  %v12067_v4 = vld [vmem:[#allocation167_spill] sm:$0xff]  ;;  %v12068_v8 = vld [vmem:[#allocation52_spill] sm:$0xff] }
 0x32d   :  { %v8885_v45 = vmul.f32 %v2746_v62, %v12066_v52  ;;  %v8888_v55 = vmul.f32 %v2747_v20, %v12067_v4  ;;  %v8891_v47 = vmul.f32 %v2748_v56, %v12068_v8  ;;  %v12069_v26 = vld [vmem:[#allocation168_spill] sm:$0xff]  ;;  %v12070_v5 = vld [vmem:[#allocation19_spill] sm:$0xff]  ;;  %v12071_v21 = vld [vmem:[#allocation29_spill] sm:$0xff] }
 0x32e   :  { %v8894_v16 = vmul.f32 %v2749_v30, %v12069_v26  ;;  %v8897_v34 = vmul.f32 %v2750_v12, %v12070_v5  ;;  %v8900_v37 = vmul.f32 %v2751_v9, %v12071_v21  ;;  %v12072_v6 = vld [vmem:[#allocation169_spill] sm:$0xff]  ;;  %v12073_v62 = vld [vmem:[#allocation170_spill] sm:$0xff]  ;;  %v12074_v20 = vld [vmem:[#allocation171_spill] sm:$0xff] }
 0x32f   :  { %v8903_v54 = vmul.f32 %v2752_v22, %v12072_v6  ;;  %v8906_v52 = vmul.f32 %v2753_v25, %v12073_v62  ;;  %v8909_v4 = vmul.f32 %v2754_v43, %v12074_v20  ;;  %v12075_v56 = vld [vmem:[#allocation172_spill] sm:$0xff]  ;;  %v12076_v30 = vld [vmem:[#allocation33_spill] sm:$0xff]  ;;  %v12078_v9 = vld [vmem:[#allocation174_spill] sm:$0xff] }
 0x330   :  { %v8912_v8 = vmul.f32 %v2755_v2, %v12075_v56  ;;  %v8915_v26 = vmul.f32 %v2756_v1, %v12076_v30  ;;  %v12077_v12 = vld [vmem:[#allocation173_spill] sm:$0xff]  ;;  %v8921_v21 = vmul.f32 %v2758_v0, %v12078_v9  ;;  %v12079_v22 = vld [vmem:[#allocation175_spill] sm:$0xff]  ;;  %v12080_v25 = vld [vmem:[#allocation176_spill] sm:$0xff] }
 0x331   :  { %v8918_v5 = vmul.f32 %v2757_v28, %v12077_v12  ;;  %v8924_v6 = vmul.f32 %v2759_v57, %v12079_v22  ;;  %v8927_v62 = vmul.f32 %v2760_v51, %v12080_v25  ;;  %v12081_v43 = vld [vmem:[#allocation177_spill] sm:$0xff]  ;;  %v12082_v2 = vld [vmem:[#allocation178_spill] sm:$0xff]  ;;  %v12083_v1 = vld [vmem:[#allocation179_spill] sm:$0xff] }
 0x332   :  { %v8930_v20 = vmul.f32 %v2761_v58, %v12081_v43  ;;  %v8933_v56 = vmul.f32 %v2762_v61, %v12082_v2  ;;  %v8936_v30 = vmul.f32 %v2763_v46, %v12083_v1  ;;  %v12084_v28 = vld [vmem:[#allocation180_spill] sm:$0xff]  ;;  %v12085_v0 = vld [vmem:[#allocation181_spill] sm:$0xff]  ;;  %v12086_v57 = vld [vmem:[#allocation182_spill] sm:$0xff] }
 0x333   :  { %v8939_v12 = vmul.f32 %v2764_v11, %v12084_v28  ;;  %v8942_v9 = vmul.f32 %v2765_v19, %v12085_v0  ;;  %v8945_v22 = vmul.f32 %v2766_v10, %v12086_v57  ;;  %v12087_v51 = vld [vmem:[#allocation183_spill] sm:$0xff]  ;;  %v12088_v58 = vld [vmem:[#allocation184_spill] sm:$0xff]  ;;  %v12089_v61 = vld [vmem:[#allocation185_spill] sm:$0xff] }
 0x334   :  { %v8948_v25 = vmul.f32 %v2767_v39, %v12087_v51  ;;  %v8951_v43 = vmul.f32 %v2768_v42, %v12088_v58  ;;  %v8954_v2 = vmul.f32 %v2769_v24, %v12089_v61  ;;  %v12090_v46 = vld [vmem:[#allocation186_spill] sm:$0xff]  ;;  %v12091_v11 = vld [vmem:[#allocation187_spill] sm:$0xff]  ;;  %v12093_v19 = vld [vmem:[#allocation188_spill] sm:$0xff] }
 0x335   :  { %v8957_v1 = vmul.f32 %v2770_v15, %v12090_v46  ;;  %v8960_v28 = vmul.f32 %v2771_v50, %v12091_v11  ;;  %v8963_v0 = vmul.f32 %v2772_v32, %v12093_v19  ;;  %v12095_v10 = vld [vmem:[#allocation189_spill] sm:$0xff]  ;;  %v12097_v39 = vld [vmem:[#allocation190_spill] sm:$0xff]  ;;  %v12099_v42 = vld [vmem:[#allocation191_spill] sm:$0xff] }
 0x336   :  { %v8966_v57 = vmul.f32 %v2773_v59, %v12095_v10  ;;  %v8969_v51 = vmul.f32 %v2774_v35, %v12097_v39  ;;  %v8972_v58 = vmul.f32 %v2775_v49, %v12099_v42  ;;  %v12101_v24 = vld [vmem:[#allocation192_spill] sm:$0xff]  ;;  %v12103_v15 = vld [vmem:[#allocation34_spill] sm:$0xff]  ;;  %v12105_v50 = vld [vmem:[#allocation39_spill] sm:$0xff] }
 0x337   :  { %12092 = vst [vmem:[#allocation251_spill] sm:$0xff] %v8960_v28  ;;  %12094 = vst [vmem:[#allocation252_spill] sm:$0xff] %v8963_v0  ;;  %v8975_v61 = vmul.f32 %v2776_v17, %v12101_v24  ;;  %v8978_v46 = vmul.f32 %v2777_v14, %v12103_v15  ;;  %v8981_v11 = vmul.f32 %v2778_v31, %v12105_v50  ;;  %v12107_v32 = vld [vmem:[#allocation276_spill] sm:$0xff]  ;;  %v12108_v0 = vld [vmem:[#allocation277_spill] sm:$0xff] }
 0x338   :  { %12096 = vst [vmem:[#allocation253_spill] sm:$0xff] %v8966_v57  ;;  %12098 = vst [vmem:[#allocation254_spill] sm:$0xff] %v8969_v51  ;;  %v2844_v19 = vmul.f32 1.442695, %v12107_v32  ;;  %v2846_v59 = vmul.f32 1.442695, %v12108_v0 }
 0x339   :  { %12100 = vst [vmem:[#allocation255_spill] sm:$0xff] %v8972_v58  ;;  %12102 = vst [vmem:[#allocation256_spill] sm:$0xff] %v8975_v61  ;;  %v12109_v10 = vld [vmem:[#allocation278_spill] sm:$0xff]  ;;  %v12110_v35 = vld [vmem:[#allocation193_spill] sm:$0xff] }
 0x33a   :  { %12104 = vst [vmem:[#allocation201_spill] sm:$0xff] %v8978_v46  ;;  %12106 = vst [vmem:[#allocation258_spill] sm:$0xff] %v8981_v11  ;;  %v2848_v57 = vmul.f32 1.442695, %v12109_v10  ;;  %v12111_v39 = vsub.f32 0.0, %v12110_v35  ;;  %v12113_v42 = vld [vmem:[#allocation238_spill] sm:$0xff]  ;;  %3619 = vpow2.f32 %v2844_v19 }
 0x33b   :  { %v2850_v17 = vmul.f32 1.442695, %v12113_v42  ;;  %v12114_v24 = vld [vmem:[#allocation239_spill] sm:$0xff]  ;;  %v12115_v14 = vld [vmem:[#allocation240_spill] sm:$0xff]  ;;  %v12116_v31 = vld [vmem:[#allocation241_spill] sm:$0xff]  ;;  %3621 = vpow2.f32 %v2846_v59 }
 0x33c   :  { %v8989_v49 = vmul.f32 %v12111_v39, %v12110_v35  ;;  %v2852_v61 = vmul.f32 1.442695, %v12114_v24  ;;  %v2854_v15 = vmul.f32 1.442695, %v12115_v14  ;;  %v2856_v50 = vmul.f32 1.442695, %v12116_v31 }
 0x33d   :  { %v12117_v11 = vld [vmem:[#allocation242_spill] sm:$0xff]  ;;  %v12118_v46 = vld [vmem:[#allocation243_spill] sm:$0xff]  ;;  %v12119_v10 = vld [vmem:[#allocation244_spill] sm:$0xff]  ;;  %3623 = vpow2.f32 %v2848_v57  ;;  %v2870_v24 = vmul.f32 1.442695, %v8834_v40 }
 0x33e   :  { %12112 = vst [vmem:[#allocation260_spill] sm:$0xff] %v8989_v49  ;;  %v2858_v32 = vmul.f32 1.442695, %v12117_v11  ;;  %v2860_v0 = vmul.f32 1.442695, %v12118_v46  ;;  %v12120_v51 = vld [vmem:[#allocation245_spill] sm:$0xff]  ;;  %3625 = vpow2.f32 %v2850_v17 }
 0x33f   :  { %v2862_v58 = vmul.f32 1.442695, %v12119_v10  ;;  %v2864_v28 = vmul.f32 1.442695, %v12120_v51  ;;  %v12121_v35 = vld [vmem:[#allocation247_spill] sm:$0xff]  ;;  %v12122_v42 = vld [vmem:[#allocation249_spill] sm:$0xff]  ;;  %3627 = vpow2.f32 %v2852_v61 }
 0x340   :  { %v2866_v39 = vmul.f32 1.442695, %v12121_v35  ;;  %v2868_v49 = vmul.f32 1.442695, %v12122_v42  ;;  %v2872_v19 = vmul.f32 1.442695, %v8837_v63  ;;  %3629 = vpow2.f32 %v2854_v15 }
 0x341   :  { %v2874_v14 = vmul.f32 1.442695, %v8840_v33  ;;  %v2876_v11 = vmul.f32 1.442695, %v8843_v7  ;;  %v2878_v46 = vmul.f32 1.442695, %v8846_v41  ;;  %3631 = vpow2.f32 %v2856_v50 }
 0x342   :  { %v9007_v59 = vmul.f32 1.442695, %v8849_v18  ;;  %v9010_v51 = vmul.f32 1.442695, %v8852_v13  ;;  %v9013_v57 = vmul.f32 1.442695, %v8855_v36  ;;  %3633 = vpow2.f32 %v2858_v32 }
 0x343   :  { %v9016_v40 = vmul.f32 1.442695, %v8858_v44  ;;  %v9019_v63 = vmul.f32 1.442695, %v8861_v3  ;;  %v9022_v7 = vmul.f32 1.442695, %v8864_v60  ;;  %3635 = vpow2.f32 %v2860_v0 }
 0x344   :  { %v9025_v33 = vmul.f32 1.442695, %v8867_v27  ;;  %v9028_v13 = vmul.f32 1.442695, %v8870_v38  ;;  %v9031_v41 = vmul.f32 1.442695, %v8873_v48  ;;  %3637 = vpow2.f32 %v2862_v58 }
 0x345   :  { %v9034_v18 = vmul.f32 1.442695, %v8876_v53  ;;  %v9037_v36 = vmul.f32 1.442695, %v8879_v23  ;;  %v9040_v44 = vmul.f32 1.442695, %v8882_v29  ;;  %v3620_v23 = vpop.eup %3619  ;;  %3639 = vpow2.f32 %v2864_v28 }
 0x346   :  { %v9043_v3 = vmul.f32 1.442695, %v8885_v45  ;;  %v9046_v60 = vmul.f32 1.442695, %v8888_v55  ;;  %v9049_v27 = vmul.f32 1.442695, %v8891_v47  ;;  %v3622_v47 = vpop.eup %3621  ;;  %3641 = vpow2.f32 %v2866_v39 }
 0x347   :  { %v9052_v38 = vmul.f32 1.442695, %v8894_v16  ;;  %v9055_v48 = vmul.f32 1.442695, %v8897_v34  ;;  %v9058_v53 = vmul.f32 1.442695, %v8900_v37  ;;  %v3624_v28 = vpop.eup %3623  ;;  %3643 = vpow2.f32 %v2868_v49 }
 0x348   :  { %v9061_v29 = vmul.f32 1.442695, %v8903_v54  ;;  %v9064_v45 = vmul.f32 1.442695, %v8906_v52  ;;  %v9067_v55 = vmul.f32 1.442695, %v8909_v4  ;;  %v3626_v58 = vpop.eup %3625  ;;  %3645 = vpow2.f32 %v2870_v24 }
 0x349   :  { %v9070_v16 = vmul.f32 1.442695, %v8912_v8  ;;  %v9073_v34 = vmul.f32 1.442695, %v8915_v26  ;;  %v9076_v37 = vmul.f32 1.442695, %v8918_v5  ;;  %v3628_v61 = vpop.eup %3627  ;;  %3647 = vpow2.f32 %v2872_v19 }
 0x34a   :  { %v9079_v54 = vmul.f32 1.442695, %v8921_v21  ;;  %v9082_v52 = vmul.f32 1.442695, %v8924_v6  ;;  %v9085_v4 = vmul.f32 1.442695, %v8927_v62  ;;  %v3630_v49 = vpop.eup %3629  ;;  %3649 = vpow2.f32 %v2874_v14 }
 0x34b   :  { %v9088_v8 = vmul.f32 1.442695, %v8930_v20  ;;  %v9091_v26 = vmul.f32 1.442695, %v8933_v56  ;;  %v9094_v5 = vmul.f32 1.442695, %v8936_v30  ;;  %v3632_v17 = vpop.eup %3631  ;;  %3651 = vpow2.f32 %v2876_v11 }
 0x34c   :  { %v9097_v21 = vmul.f32 1.442695, %v8939_v12  ;;  %v9100_v6 = vmul.f32 1.442695, %v8942_v9  ;;  %v9103_v62 = vmul.f32 1.442695, %v8945_v22  ;;  %v3634_v50 = vpop.eup %3633  ;;  %3653 = vpow2.f32 %v2878_v46 }
 0x34d   :  { %v9106_v20 = vmul.f32 1.442695, %v8948_v25  ;;  %v9109_v56 = vmul.f32 1.442695, %v8951_v43  ;;  %v9112_v30 = vmul.f32 1.442695, %v8954_v2  ;;  %v3636_v35 = vpop.eup %3635  ;;  %3655 = vpow2.f32 %v9007_v59 }
 0x34e   :  { %v9115_v12 = vmul.f32 1.442695, %v8957_v1  ;;  %v12123_v9 = vld [vmem:[#allocation251_spill] sm:$0xff]  ;;  %v12124_v22 = vld [vmem:[#allocation252_spill] sm:$0xff]  ;;  %v12125_v25 = vld [vmem:[#allocation253_spill] sm:$0xff]  ;;  %v3638_v11 = vpop.eup %3637  ;;  %3657 = vpow2.f32 %v9010_v51 }
 0x34f   :  { %v9118_v15 = vmul.f32 1.442695, %v12123_v9  ;;  %v9121_v31 = vmul.f32 1.442695, %v12124_v22  ;;  %v9124_v32 = vmul.f32 1.442695, %v12125_v25  ;;  %3659 = vpow2.f32 %v9013_v57 }
 0x350   :  { %v12126_v43 = vld [vmem:[#allocation254_spill] sm:$0xff]  ;;  %v12127_v2 = vld [vmem:[#allocation255_spill] sm:$0xff]  ;;  %v12128_v1 = vld [vmem:[#allocation256_spill] sm:$0xff]  ;;  %3661 = vpow2.f32 %v9016_v40 }
 0x351   :  { %v9127_v0 = vmul.f32 1.442695, %v12126_v43  ;;  %v9130_v10 = vmul.f32 1.442695, %v12127_v2  ;;  %v9134_v39 = vmul.f32 1.442695, %v12128_v1  ;;  %v3640_v2 = vpop.eup %3639  ;;  %3663 = vpow2.f32 %v9019_v63 }
 0x352   :  { %v12129_v42 = vld [vmem:[#allocation201_spill] sm:$0xff]  ;;  %v12131_v19 = vld [vmem:[#allocation258_spill] sm:$0xff]  ;;  %v12133_v46 = vld [vmem:[#allocation260_spill] sm:$0xff]  ;;  %3665 = vpow2.f32 %v9022_v7 }
 0x353   :  { %v9137_v24 = vmul.f32 1.442695, %v12129_v42  ;;  %v9140_v14 = vmul.f32 1.442695, %v12131_v19  ;;  %v9144_v9 = vmul.f32 1.442695, %v12133_v46  ;;  %v3642_v46 = vpop.eup %3641  ;;  %3667 = vpow2.f32 %v9025_v33 }
 0x354   :  { %v12135_v22 = vld [vmem:[#allocation275_spill] sm:$0xff]  ;;  %v12137_v1 = vld [vmem:[#allocation44_spill] sm:$0xff]  ;;  %3669 = vpow2.f32 %v9028_v13  ;;  %v12150_v33 = vld [vmem:[#allocation197_spill] sm:$0xff] }
 0x355   :  { %12130 = vst [vmem:[#allocation262_spill] sm:$0xff] %v9137_v24  ;;  %12132 = vst [vmem:[#allocation264_spill] sm:$0xff] %v9140_v14  ;;  %v9147_v25 = vmul.f32 %v3620_v23, %v12135_v22  ;;  %v12136_v43 = vld [vmem:[#allocation279_spill] sm:$0xff]  ;;  %v9154_v42 = vmul.f32 %v3624_v28, %v12137_v1  ;;  %v12138_v19 = vld [vmem:[#allocation280_spill] sm:$0xff]  ;;  %v3644_v28 = vpop.eup %3643  ;;  %3671 = vpow2.f32 %v9031_v41 }
 0x356   :  { %12134 = vst [vmem:[#allocation266_spill] sm:$0xff] %v9144_v9  ;;  %v9150_v59 = vmul.f32 %v3622_v47, %v12136_v43  ;;  %v9157_v14 = vmul.f32 %v3626_v58, %v12138_v19  ;;  %v12139_v24 = vld [vmem:[#allocation138_spill] sm:$0xff]  ;;  %v12140_v23 = vld [vmem:[#allocation281_spill] sm:$0xff]  ;;  %v12143_v58 = vld [vmem:[#allocation196_spill] sm:$0xff]  ;;  %3673 = vpow2.f32 %v9034_v18 }
 0x357   :  { %v9160_v51 = vmul.f32 %v3628_v61, %v12139_v24  ;;  %v9164_v22 = vmul.f32 %v3630_v49, %v12140_v23  ;;  %v12141_v47 = vld [vmem:[#allocation282_spill] sm:$0xff]  ;;  %v9174_v1 = vmul.f32 %v3636_v35, %v12143_v58  ;;  %v12144_v61 = vld [vmem:[#allocation248_spill] sm:$0xff]  ;;  %v12145_v19 = vld [vmem:[#allocation41_spill] sm:$0xff]  ;;  %v3646_v49 = vpop.eup %3645  ;;  %v3036_v63 = vsub.f32 1.0, %v9147_v25 }
 0x358   :  { %v9167_v43 = vmul.f32 %v3632_v17, %v12141_v47  ;;  %v12142_v9 = vld [vmem:[#allocation246_spill] sm:$0xff]  ;;  %v9177_v24 = vmul.f32 %v3638_v11, %v12144_v61  ;;  %v9180_v40 = vmul.f32 %v3640_v2, %v12145_v19  ;;  %v3648_v47 = vpop.eup %3647  ;;  %v3037_v2 = vsub.f32 1.0, %v9150_v59  ;;  %v12149_v7 = vld [vmem:[#allocation195_spill] sm:$0xff]  ;;  %v12153_v18 = vld [vmem:[#allocation204_spill] sm:$0xff] }
 0x359   :  { %v9170_v57 = vmul.f32 %v3634_v50, %v12142_v9  ;;  %v12146_v17 = vld [vmem:[#allocation250_spill] sm:$0xff]  ;;  %v12147_v50 = vld [vmem:[#allocation200_spill] sm:$0xff]  ;;  %v3038_v58 = vsub.f32 1.0, %v9154_v42  ;;  %v3650_v61 = vpop.eup %3649  ;;  %v3040_v25 = vsub.f32 1.0, %v9160_v51  ;;  %3675 = vpow2.f32 %v9037_v36  ;;  %v12152_v41 = vld [vmem:[#allocation203_spill] sm:$0xff] }
 0x35a   :  { %v9184_v23 = vmul.f32 %v3642_v46, %v12146_v17  ;;  %v9187_v9 = vmul.f32 %v3644_v28, %v12147_v50  ;;  %v12148_v35 = vld [vmem:[#allocation194_spill] sm:$0xff]  ;;  %v9198_v46 = vmul.f32 %v3648_v47, %v12149_v7  ;;  %v3039_v28 = vsub.f32 1.0, %v9157_v14  ;;  %v3652_v19 = vpop.eup %3651  ;;  %v12154_v36 = vld [vmem:[#allocation205_spill] sm:$0xff] }
 0x35b   :  { %v9192_v11 = vmul.f32 %v3646_v49, %v12148_v35  ;;  %v9204_v49 = vmul.f32 %v3650_v61, %v12150_v33  ;;  %v3654_v17 = vpop.eup %3653  ;;  %v12151_v13 = vld [vmem:[#allocation202_spill] sm:$0xff]  ;;  %3677 = vpow2.f32 %v9040_v44  ;;  %v12161_v47 = vld [vmem:[#allocation45_spill] sm:$0xff] }
 0x35c   :  { %v9210_v50 = vmul.f32 %v3652_v19, %v12151_v13  ;;  %v3656_v35 = vpop.eup %3655  ;;  %v9216_v61 = vmul.f32 %v3654_v17, %v12152_v41  ;;  %3679 = vpow2.f32 %v9043_v3  ;;  %v12155_v44 = vld [vmem:[#allocation206_spill] sm:$0xff]  ;;  %v12156_v3 = vld [vmem:[#allocation207_spill] sm:$0xff] }
 0x35d   :  { %v3658_v42 = vpop.eup %3657  ;;  %v9222_v19 = vmul.f32 %v3656_v35, %v12153_v18  ;;  %3681 = vpow2.f32 %v9046_v60  ;;  %v12157_v60 = vld [vmem:[#allocation208_spill] sm:$0xff] }
 0x35e   :  { %v3660_v14 = vpop.eup %3659  ;;  %v9228_v17 = vmul.f32 %v3658_v42, %v12154_v36  ;;  %3683 = vpow2.f32 %v9049_v27  ;;  %v12158_v27 = vld [vmem:[#allocation209_spill] sm:$0xff]  ;;  %v12159_v36 = vld [vmem:[#allocation40_spill] sm:$0xff] }
 0x35f   :  { %v3662_v7 = vpop.eup %3661  ;;  %v9234_v35 = vmul.f32 %v3660_v14, %v12155_v44  ;;  %3685 = vpow2.f32 %v9052_v38  ;;  %v9256_v33 = vmul.f32 %v3036_v63, %v12159_v36  ;;  %v12160_v38 = vld [vmem:[#allocation210_spill] sm:$0xff]  ;;  %v9264_v44 = vmul.f32 %v3037_v2, %v12161_v47  ;;  %v12163_v36 = vld [vmem:[#allocation47_spill] sm:$0xff]  ;;  %v12165_v47 = vld [vmem:[#allocation48_spill] sm:$0xff] }
 0x360   :  { %v3664_v13 = vpop.eup %3663  ;;  %v9240_v42 = vmul.f32 %v3662_v7, %v12156_v3  ;;  %3687 = vpow2.f32 %v9055_v48  ;;  %v9272_v3 = vmul.f32 %v3038_v58, %v12163_v36  ;;  %v12167_v36 = vld [vmem:[#allocation100_spill] sm:$0xff]  ;;  %v12171_v58 = vld [vmem:[#allocation199_spill] sm:$0xff] }
 0x361   :  { %v3666_v41 = vpop.eup %3665  ;;  %v9246_v14 = vmul.f32 %v3664_v13, %v12157_v60  ;;  %3689 = vpow2.f32 %v9058_v53  ;;  %v9280_v60 = vmul.f32 %v3039_v28, %v12165_v47  ;;  %v12169_v47 = vld [vmem:[#allocation101_spill] sm:$0xff]  ;;  %v12174_v28 = vld [vmem:[#allocation214_spill] sm:$0xff] }
 0x362   :  { %v3668_v18 = vpop.eup %3667  ;;  %v9252_v7 = vmul.f32 %v3666_v41, %v12158_v27  ;;  %3691 = vpow2.f32 %v9061_v29  ;;  %v12162_v41 = vld [vmem:[#allocation211_spill] sm:$0xff] }
 0x363   :  { %v3670_v59 = vpop.eup %3669  ;;  %v9260_v13 = vmul.f32 %v3668_v18, %v12160_v38  ;;  %3693 = vpow2.f32 %v9064_v45  ;;  %v12164_v18 = vld [vmem:[#allocation212_spill] sm:$0xff]  ;;  %v9290_v45 = vmul.f32 %v3040_v25, %v12167_v36  ;;  %v12177_v25 = vld [vmem:[#allocation257_spill] sm:$0xff] }
 0x364   :  { %v3672_v48 = vpop.eup %3671  ;;  %v9268_v27 = vmul.f32 %v3670_v59, %v12162_v41  ;;  %v3059_v63 = vsub.f32 1.0, %v9252_v7  ;;  %3695 = vpow2.f32 %v9067_v55  ;;  %v12166_v59 = vld [vmem:[#allocation213_spill] sm:$0xff]  ;;  %v12170_v55 = vsub.f32 1.0, %v9164_v22  ;;  %v12172_v36 = vld [vmem:[#allocation104_spill] sm:$0xff] }
 0x365   :  { %v3674_v53 = vpop.eup %3673  ;;  %v9276_v38 = vmul.f32 %v3672_v48, %v12164_v18  ;;  %3697 = vpow2.f32 %v9070_v16  ;;  %v12168_v18 = vld [vmem:[#allocation198_spill] sm:$0xff]  ;;  %v12173_v16 = vsub.f32 1.0, %v9167_v43 }
 0x366   :  { %v3676_v29 = vpop.eup %3675  ;;  %v9284_v41 = vmul.f32 %v3674_v53, %v12166_v59  ;;  %v9300_v53 = vmul.f32 %v12170_v55, %v12169_v47  ;;  %3699 = vpow2.f32 %v9073_v34  ;;  %v12175_v55 = vld [vmem:[#allocation63_spill] sm:$0xff]  ;;  %v12176_v34 = vsub.f32 1.0, %v9170_v57 }
 0x367   :  { %v3678_v48 = vpop.eup %3677  ;;  %v9294_v2 = vmul.f32 %v3676_v29, %v12168_v18  ;;  %v9310_v29 = vmul.f32 %v12173_v16, %v12172_v36  ;;  %3701 = vpow2.f32 %v9076_v37  ;;  %v12178_v16 = vld [vmem:[#allocation69_spill] sm:$0xff]  ;;  %v12179_v37 = vsub.f32 1.0, %v9174_v1  ;;  %v12180_v47 = vld [vmem:[#allocation259_spill] sm:$0xff] }
 0x368   :  { %v3680_v59 = vpop.eup %3679  ;;  %v9304_v51 = vmul.f32 %v3678_v48, %v12171_v58  ;;  %v9320_v58 = vmul.f32 %v12176_v34, %v12175_v55  ;;  %3703 = vpow2.f32 %v9079_v54  ;;  %v12181_v34 = vld [vmem:[#allocation70_spill] sm:$0xff]  ;;  %v12182_v54 = vsub.f32 1.0, %v9177_v24  ;;  %v12183_v36 = vld [vmem:[#allocation261_spill] sm:$0xff]  ;;  %v12186_v55 = vld [vmem:[#allocation215_spill] sm:$0xff] }
 0x369   :  { %v3682_v18 = vpop.eup %3681  ;;  %v9314_v22 = vmul.f32 %v3680_v59, %v12174_v28  ;;  %v9330_v28 = vmul.f32 %v12179_v37, %v12178_v16  ;;  %3705 = vpow2.f32 %v9082_v52  ;;  %v12184_v37 = vld [vmem:[#allocation71_spill] sm:$0xff]  ;;  %v12185_v52 = vsub.f32 1.0, %v9180_v40 }
 0x36a   :  { %v3684_v48 = vpop.eup %3683  ;;  %v9324_v43 = vmul.f32 %v3682_v18, %v12177_v25  ;;  %v9340_v25 = vmul.f32 %v12182_v54, %v12181_v34  ;;  %3707 = vpow2.f32 %v9085_v4  ;;  %v12187_v54 = vld [vmem:[#allocation74_spill] sm:$0xff]  ;;  %v12188_v4 = vsub.f32 1.0, %v9184_v23  ;;  %v12189_v16 = vld [vmem:[#allocation263_spill] sm:$0xff]  ;;  %v12192_v34 = vld [vmem:[#allocation265_spill] sm:$0xff] }
 0x36b   :  { %v3686_v59 = vpop.eup %3685  ;;  %v9334_v57 = vmul.f32 %v3684_v48, %v12180_v47  ;;  %v9350_v47 = vmul.f32 %v12185_v52, %v12184_v37  ;;  %3709 = vpow2.f32 %v9088_v8  ;;  %v12190_v52 = vld [vmem:[#allocation102_spill] sm:$0xff]  ;;  %v12191_v8 = vsub.f32 1.0, %v9187_v9  ;;  %v12195_v37 = vld [vmem:[#allocation267_spill] sm:$0xff] }
 0x36c   :  { %v3688_v18 = vpop.eup %3687  ;;  %v9344_v1 = vmul.f32 %v3686_v59, %v12183_v36  ;;  %v9360_v36 = vmul.f32 %v12188_v4, %v12187_v54  ;;  %3711 = vpow2.f32 %v9091_v26  ;;  %v12193_v4 = vld [vmem:[#allocation103_spill] sm:$0xff]  ;;  %v12194_v26 = vsub.f32 1.0, %v9192_v11  ;;  %v12198_v54 = vld [vmem:[#allocation216_spill] sm:$0xff] }
 0x36d   :  { %v3690_v48 = vpop.eup %3689  ;;  %v9354_v24 = vmul.f32 %v3688_v18, %v12186_v55  ;;  %v9370_v55 = vmul.f32 %v12191_v8, %v12190_v52  ;;  %3713 = vpow2.f32 %v9094_v5  ;;  %v12196_v8 = vld [vmem:[#allocation60_spill] sm:$0xff]  ;;  %v12197_v5 = vsub.f32 1.0, %v9198_v46  ;;  %v12201_v52 = vld [vmem:[#allocation269_spill] sm:$0xff] }
 0x36e   :  { %v3692_v59 = vpop.eup %3691  ;;  %v9364_v40 = vmul.f32 %v3690_v48, %v12189_v16  ;;  %v9380_v16 = vmul.f32 %v12194_v26, %v12193_v4  ;;  %3715 = vpow2.f32 %v9097_v21  ;;  %v12199_v26 = vld [vmem:[#allocation105_spill] sm:$0xff]  ;;  %v12200_v21 = vsub.f32 1.0, %v9204_v49  ;;  %v12204_v4 = vld [vmem:[#allocation271_spill] sm:$0xff] }
 0x36f   :  { %v3694_v18 = vpop.eup %3693  ;;  %v9374_v23 = vmul.f32 %v3692_v59, %v12192_v34  ;;  %v9390_v34 = vmul.f32 %v12197_v5, %v12196_v8  ;;  %3717 = vpow2.f32 %v9100_v6  ;;  %v12202_v5 = vld [vmem:[#allocation28_spill] sm:$0xff]  ;;  %v12203_v6 = vsub.f32 1.0, %v9210_v50  ;;  %v12207_v8 = vld [vmem:[#allocation273_spill] sm:$0xff] }
 0x370   :  { %v3696_v48 = vpop.eup %3695  ;;  %v9384_v9 = vmul.f32 %v3694_v18, %v12195_v37  ;;  %v9400_v37 = vmul.f32 %v12200_v21, %v12199_v26  ;;  %3719 = vpow2.f32 %v9103_v62  ;;  %v12205_v21 = vld [vmem:[#allocation64_spill] sm:$0xff]  ;;  %v12206_v62 = vsub.f32 1.0, %v9216_v61  ;;  %v12210_v26 = vld [vmem:[#allocation217_spill] sm:$0xff] }
 0x371   :  { %v3698_v59 = vpop.eup %3697  ;;  %v9394_v11 = vmul.f32 %v3696_v48, %v12198_v54  ;;  %v9410_v54 = vmul.f32 %v12203_v6, %v12202_v5  ;;  %3721 = vpow2.f32 %v9106_v20  ;;  %v12208_v6 = vld [vmem:[#allocation50_spill] sm:$0xff]  ;;  %v12209_v20 = vsub.f32 1.0, %v9222_v19  ;;  %v12213_v5 = vld [vmem:[#allocation283_spill] sm:$0xff] }
 0x372   :  { %v3700_v18 = vpop.eup %3699  ;;  %v9404_v46 = vmul.f32 %v3698_v59, %v12201_v52  ;;  %v9420_v52 = vmul.f32 %v12206_v62, %v12205_v21  ;;  %3723 = vpow2.f32 %v9109_v56  ;;  %v12211_v62 = vld [vmem:[#allocation75_spill] sm:$0xff]  ;;  %v12212_v56 = vsub.f32 1.0, %v9228_v17  ;;  %v12216_v21 = vld [vmem:[#allocation218_spill] sm:$0xff] }
 0x373   :  { %v3702_v48 = vpop.eup %3701  ;;  %v9414_v49 = vmul.f32 %v3700_v18, %v12204_v4  ;;  %v9430_v4 = vmul.f32 %v12209_v20, %v12208_v6  ;;  %3725 = vpow2.f32 %v9112_v30  ;;  %v12214_v20 = vld [vmem:[#allocation55_spill] sm:$0xff]  ;;  %v12215_v30 = vsub.f32 1.0, %v9234_v35 }
 0x374   :  { %v3704_v59 = vpop.eup %3703  ;;  %v9424_v50 = vmul.f32 %v3702_v48, %v12207_v8  ;;  %v9440_v8 = vmul.f32 %v12212_v56, %v12211_v62  ;;  %3727 = vpow2.f32 %v9115_v12  ;;  %v12217_v56 = vld [vmem:[#allocation58_spill] sm:$0xff]  ;;  %v12218_v12 = vsub.f32 1.0, %v9240_v42  ;;  %v12219_v6 = vld [vmem:[#allocation219_spill] sm:$0xff]  ;;  %v12222_v62 = vld [vmem:[#allocation220_spill] sm:$0xff] }
 0x375   :  { %v3706_v18 = vpop.eup %3705  ;;  %v9434_v61 = vmul.f32 %v3704_v59, %v12210_v26  ;;  %v9450_v26 = vmul.f32 %v12215_v30, %v12214_v20  ;;  %3729 = vpow2.f32 %v9118_v15  ;;  %v12220_v30 = vld [vmem:[#allocation22_spill] sm:$0xff]  ;;  %v12221_v15 = vsub.f32 1.0, %v9246_v14  ;;  %v12238_v20 = vld [vmem:[#allocation224_spill] sm:$0xff] }
 0x376   :  { %v3708_v48 = vpop.eup %3707  ;;  %v9444_v19 = vmul.f32 %v3706_v18, %v12213_v5  ;;  %v9460_v5 = vmul.f32 %v12218_v12, %v12217_v56  ;;  %3731 = vpow2.f32 %v9121_v31  ;;  %v12223_v12 = vld [vmem:[#allocation97_spill] sm:$0xff]  ;;  %v12229_v56 = vld [vmem:[#allocation222_spill] sm:$0xff] }
 0x377   :  { %v3710_v59 = vpop.eup %3709  ;;  %v9454_v17 = vmul.f32 %v3708_v48, %v12216_v21  ;;  %v9470_v21 = vmul.f32 %v12221_v15, %v12220_v30  ;;  %3733 = vpow2.f32 %v9124_v32  ;;  %v9480_v31 = vmul.f32 %v3059_v63, %v12223_v12  ;;  %v12226_v15 = vld [vmem:[#allocation13_spill] sm:$0xff]  ;;  %v12230_v12 = vld [vmem:[#allocation98_spill] sm:$0xff]  ;;  %v12233_v30 = vld [vmem:[#allocation223_spill] sm:$0xff] }
 0x378   :  { %v3712_v18 = vpop.eup %3711  ;;  %v9464_v35 = vmul.f32 %v3710_v59, %v12219_v6  ;;  %3735 = vpow2.f32 %v9127_v0  ;;  %v12225_v59 = vld [vmem:[#allocation221_spill] sm:$0xff]  ;;  %v12227_v32 = vsub.f32 1.0, %v9260_v13  ;;  %v12231_v0 = vsub.f32 1.0, %v9268_v27  ;;  %v12237_v63 = vld [vmem:[#allocation262_spill] sm:$0xff] }
 0x379   :  { %v3714_v48 = vpop.eup %3713  ;;  %v9474_v42 = vmul.f32 %v3712_v18, %v12222_v62  ;;  %12224 = vst [vmem:[#allocation268_spill] sm:$0xff] %v9480_v31  ;;  %3737 = vpow2.f32 %v9130_v10  ;;  %v12235_v10 = vsub.f32 1.0, %v9276_v38  ;;  %v12253_v31 = vld [vmem:[#allocation26_spill] sm:$0xff] }
 0x37a   :  { %v3716_v6 = vpop.eup %3715  ;;  %v9484_v14 = vmul.f32 %v3714_v48, %v12225_v59  ;;  %v9490_v62 = vmul.f32 %v12227_v32, %v12226_v15  ;;  %v9500_v48 = vmul.f32 %v12231_v0, %v12230_v12  ;;  %3739 = vpow2.f32 %v9134_v39  ;;  %v12234_v32 = vld [vmem:[#allocation24_spill] sm:$0xff] }
 0x37b   :  { %v3718_v18 = vpop.eup %3717  ;;  %v9494_v7 = vmul.f32 %v3716_v6, %v12229_v56  ;;  %v9510_v56 = vmul.f32 %v12235_v10, %v12234_v32  ;;  %3741 = vpow2.f32 %v12237_v63  ;;  %v12239_v0 = vld [vmem:[#allocation16_spill] sm:$0xff]  ;;  %v12240_v39 = vsub.f32 1.0, %v9284_v41  ;;  %v12244_v10 = vld [vmem:[#allocation99_spill] sm:$0xff] }
 0x37c   :  { %12228 = vst [vmem:[#allocation270_spill] sm:$0xff] %v9490_v62  ;;  %12232 = vst [vmem:[#allocation272_spill] sm:$0xff] %v9500_v48  ;;  %v3720_v59 = vpop.eup %3719  ;;  %v9504_v13 = vmul.f32 %v3718_v18, %v12233_v30  ;;  %v3083_v15 = vsub.f32 1.0, %v9484_v14  ;;  %v12242_v14 = vld [vmem:[#allocation264_spill] sm:$0xff]  ;;  %v12243_v48 = vld [vmem:[#allocation225_spill] sm:$0xff]  ;;  %v12245_v63 = vsub.f32 1.0, %v9294_v2 }
 0x37d   :  { %12236 = vst [vmem:[#allocation274_spill] sm:$0xff] %v9510_v56  ;;  %v3722_v6 = vpop.eup %3721  ;;  %v9514_v27 = vmul.f32 %v3720_v59, %v12238_v20  ;;  %v3084_v12 = vsub.f32 1.0, %v9494_v7  ;;  %v9520_v30 = vmul.f32 %v12240_v39, %v12239_v0  ;;  %3743 = vpow2.f32 %v12242_v14  ;;  %v12247_v59 = vld [vmem:[#allocation266_spill] sm:$0xff]  ;;  %v12249_v0 = vld [vmem:[#allocation25_spill] sm:$0xff] }
 0x37e   :  { %v3724_v18 = vpop.eup %3723  ;;  %v3023_v38 = vmul.f32 %v3722_v6, %v12243_v48  ;;  %v3085_v32 = vsub.f32 1.0, %v9504_v13  ;;  %v9528_v56 = vmul.f32 %v12245_v63, %v12244_v10  ;;  %3745 = vpow2.f32 %v12247_v59  ;;  %v12248_v7 = vld [vmem:[#allocation226_spill] sm:$0xff]  ;;  %v12252_v6 = vld [vmem:[#allocation227_spill] sm:$0xff]  ;;  %v12255_v63 = vld [vmem:[#allocation109_spill] sm:$0xff] }
 0x37f   :  { %12241 = vst [vmem:[#allocation139_spill] sm:$0xff] %v9520_v30  ;;  %v3726_v20 = vpop.eup %3725  ;;  %v3024_v62 = vmul.f32 %v3724_v18, %v12248_v7  ;;  %v3086_v41 = vsub.f32 1.0, %v9514_v27  ;;  %v12250_v39 = vsub.f32 1.0, %v9304_v51  ;;  %v12254_v2 = vsub.f32 1.0, %v9314_v22  ;;  %v12258_v7 = vld [vmem:[#allocation228_spill] sm:$0xff] }
 0x380   :  { %12246 = vst [vmem:[#allocation140_spill] sm:$0xff] %v9528_v56  ;;  %v3728_v48 = vpop.eup %3727  ;;  %v3025_v13 = vmul.f32 %v3726_v20, %v12252_v6  ;;  %v3087_v30 = vsub.f32 1.0, %v3023_v38  ;;  %v12256_v59 = vsub.f32 1.0, %v9324_v43  ;;  %v12261_v38 = vld [vmem:[#allocation111_spill] sm:$0xff]  ;;  %v12262_v20 = vsub.f32 1.0, %v9344_v1  ;;  %v12264_v6 = vld [vmem:[#allocation229_spill] sm:$0xff] }
 0x381   :  { %v9536_v14 = vmul.f32 %v12250_v39, %v12249_v0  ;;  %v9542_v10 = vmul.f32 %v12254_v2, %v12253_v31  ;;  %v3730_v27 = vpop.eup %3729  ;;  %v3026_v56 = vmul.f32 %v3728_v48, %v12258_v7  ;;  %v3088_v51 = vsub.f32 1.0, %v3024_v62  ;;  %v12259_v0 = vld [vmem:[#allocation110_spill] sm:$0xff]  ;;  %v12267_v62 = vld [vmem:[#allocation113_spill] sm:$0xff] }
 0x382   :  { %v9547_v18 = vmul.f32 %v12256_v59, %v12255_v63  ;;  %v12260_v39 = vsub.f32 1.0, %v9334_v57  ;;  %v9558_v22 = vmul.f32 %v12262_v20, %v12261_v38  ;;  %v3732_v31 = vpop.eup %3731  ;;  %v3027_v2 = vmul.f32 %v3730_v27, %v12264_v6  ;;  %v12265_v63 = vld [vmem:[#allocation112_spill] sm:$0xff]  ;;  %v12271_v38 = vld [vmem:[#allocation21_spill] sm:$0xff] }
 0x383   :  { %12251 = vst [vmem:[#allocation141_spill] sm:$0xff] %v9536_v14  ;;  %v3089_v43 = vsub.f32 1.0, %v3025_v13  ;;  %v12266_v59 = vsub.f32 1.0, %v9354_v24  ;;  %v12268_v48 = vsub.f32 1.0, %v9364_v40  ;;  %v3734_v7 = vpop.eup %3733  ;;  %v3090_v1 = vsub.f32 1.0, %v3026_v56  ;;  %v12273_v13 = vld [vmem:[#allocation114_spill] sm:$0xff] }
 0x384   :  { %12257 = vst [vmem:[#allocation142_spill] sm:$0xff] %v9547_v18  ;;  %v9553_v14 = vmul.f32 %v12260_v39, %v12259_v0  ;;  %12263 = vst [vmem:[#allocation143_spill] sm:$0xff] %v9558_v22  ;;  %v12270_v0 = vld [vmem:[#allocation230_spill] sm:$0xff]  ;;  %v12272_v20 = vsub.f32 1.0, %v9374_v23  ;;  %v12274_v27 = vsub.f32 1.0, %v9384_v9  ;;  %v3736_v6 = vpop.eup %3735  ;;  %v3091_v40 = vsub.f32 1.0, %v3027_v2 }
 0x385   :  { %v9564_v18 = vmul.f32 %v12266_v59, %v12265_v63  ;;  %v9569_v57 = vmul.f32 %v12268_v48, %v12267_v62  ;;  %v3028_v39 = vmul.f32 %v3732_v31, %v12270_v0  ;;  %v12276_v63 = vld [vmem:[#allocation231_spill] sm:$0xff]  ;;  %v12277_v62 = vld [vmem:[#allocation30_spill] sm:$0xff]  ;;  %v12278_v48 = vsub.f32 1.0, %v9394_v11  ;;  %v3738_v0 = vpop.eup %3737  ;;  %v12285_v2 = vld [vmem:[#allocation116_spill] sm:$0xff] }
 0x386   :  { %v9575_v22 = vmul.f32 %v12272_v20, %v12271_v38  ;;  %v9580_v24 = vmul.f32 %v12274_v27, %v12273_v13  ;;  %v3029_v59 = vmul.f32 %v3734_v7, %v12276_v63  ;;  %v12279_v56 = vld [vmem:[#allocation23_spill] sm:$0xff]  ;;  %v12280_v31 = vsub.f32 1.0, %v9404_v46  ;;  %v12282_v38 = vld [vmem:[#allocation232_spill] sm:$0xff]  ;;  %v3740_v63 = vpop.eup %3739 }
 0x387   :  { %12269 = vst [vmem:[#allocation144_spill] sm:$0xff] %v9569_v57  ;;  %v9586_v57 = vmul.f32 %v12278_v48, %v12277_v62  ;;  %v3030_v20 = vmul.f32 %v3736_v6, %v12282_v38  ;;  %v3092_v9 = vsub.f32 1.0, %v3028_v39  ;;  %v12283_v13 = vld [vmem:[#allocation115_spill] sm:$0xff]  ;;  %v12284_v27 = vsub.f32 1.0, %v9414_v49  ;;  %v12288_v62 = vld [vmem:[#allocation233_spill] sm:$0xff]  ;;  %v12291_v39 = vld [vmem:[#allocation118_spill] sm:$0xff]  ;;  %v3742_v38 = vpop.eup %3741 }
 0x388   :  { %12275 = vst [vmem:[#allocation145_spill] sm:$0xff] %v9580_v24  ;;  %v9591_v23 = vmul.f32 %v12280_v31, %v12279_v56  ;;  %v12286_v7 = vsub.f32 1.0, %v9424_v50  ;;  %v3031_v48 = vmul.f32 %v3738_v0, %v12288_v62  ;;  %v3093_v46 = vsub.f32 1.0, %v3029_v59  ;;  %v12289_v56 = vld [vmem:[#allocation117_spill] sm:$0xff]  ;;  %v12298_v59 = vld [vmem:[#allocation119_spill] sm:$0xff]  ;;  %v3744_v62 = vpop.eup %3743 }
 0x389   :  { %v9597_v24 = vmul.f32 %v12284_v27, %v12283_v13  ;;  %v12290_v31 = vsub.f32 1.0, %v9434_v61  ;;  %v12292_v6 = vsub.f32 1.0, %v9444_v19  ;;  %v12294_v13 = vld [vmem:[#allocation234_spill] sm:$0xff]  ;;  %v3094_v50 = vsub.f32 1.0, %v3030_v20  ;;  %v12304_v20 = vld [vmem:[#allocation121_spill] sm:$0xff] }
 0x38a   :  { %12281 = vst [vmem:[#allocation146_spill] sm:$0xff] %v9591_v23  ;;  %v9602_v11 = vmul.f32 %v12286_v7, %v12285_v2  ;;  %v3032_v27 = vmul.f32 %v3740_v63, %v12294_v13  ;;  %v12295_v2 = vld [vmem:[#allocation54_spill] sm:$0xff]  ;;  %v12296_v7 = vsub.f32 1.0, %v9454_v17  ;;  %v12299_v0 = vsub.f32 1.0, %v9464_v35  ;;  %v3746_v17 = vpop.eup %3745  ;;  %v12306_v13 = vld [vmem:[#allocation236_spill] sm:$0xff] }
 0x38b   :  { %v9608_v23 = vmul.f32 %v12290_v31, %v12289_v56  ;;  %v9613_v49 = vmul.f32 %v12292_v6, %v12291_v39  ;;  %v12301_v56 = vld [vmem:[#allocation235_spill] sm:$0xff]  ;;  %v3095_v19 = vsub.f32 1.0, %v3031_v48  ;;  %v12302_v39 = vld [vmem:[#allocation120_spill] sm:$0xff]  ;;  %v12303_v6 = vsub.f32 1.0, %v9474_v42 }
 0x38c   :  { %12287 = vst [vmem:[#allocation147_spill] sm:$0xff] %v9602_v11  ;;  %v9619_v11 = vmul.f32 %v12296_v7, %v12295_v2  ;;  %v9624_v61 = vmul.f32 %v12299_v0, %v12298_v59  ;;  %v3033_v31 = vmul.f32 %v3742_v38, %v12301_v56  ;;  %v9633_v63 = vmul.f32 %v3083_v15, %v12304_v20  ;;  %v12308_v59 = vld [vmem:[#allocation123_spill] sm:$0xff]  ;;  %v12309_v38 = vld [vmem:[#allocation237_spill] sm:$0xff]  ;;  %v12312_v20 = vld [vmem:[#allocation126_spill] sm:$0xff] }
 0x38d   :  { %12293 = vst [vmem:[#allocation148_spill] sm:$0xff] %v9613_v49  ;;  %v9630_v49 = vmul.f32 %v12303_v6, %v12302_v39  ;;  %v3034_v2 = vmul.f32 %v3744_v62, %v12306_v13  ;;  %v3096_v7 = vsub.f32 1.0, %v3032_v27  ;;  %v9640_v0 = vmul.f32 %v3085_v32, %v12308_v59  ;;  %v12311_v39 = vld [vmem:[#allocation125_spill] sm:$0xff]  ;;  %v12313_v27 = vld [vmem:[#allocation127_spill] sm:$0xff] }
 0x38e   :  { %12297 = vst [vmem:[#allocation149_spill] sm:$0xff] %v9619_v11  ;;  %12300 = vst [vmem:[#allocation150_spill] sm:$0xff] %v9624_v61  ;;  %v12307_v11 = vld [vmem:[#allocation122_spill] sm:$0xff]  ;;  %v3035_v48 = vmul.f32 %v3746_v17, %v12309_v38  ;;  %v3097_v56 = vsub.f32 1.0, %v3033_v31  ;;  %v12310_v61 = vld [vmem:[#allocation124_spill] sm:$0xff]  ;;  %v9647_v6 = vmul.f32 %v3087_v30, %v12311_v39  ;;  %v9653_v62 = vmul.f32 %v3089_v43, %v12313_v27 }
 0x38f   :  { %12305 = vst [vmem:[#allocation151_spill] sm:$0xff] %v9633_v63  ;;  %v9637_v35 = vmul.f32 %v3084_v12, %v12307_v11  ;;  %v9644_v42 = vmul.f32 %v3086_v41, %v12310_v61  ;;  %v3098_v15 = vsub.f32 1.0, %v3034_v2  ;;  %v9650_v63 = vmul.f32 %v3088_v51, %v12312_v20  ;;  %v12314_v12 = vld [vmem:[#allocation128_spill] sm:$0xff]  ;;  %v12315_v13 = vld [vmem:[#allocation129_spill] sm:$0xff]  ;;  %v12316_v31 = vld [vmem:[#allocation130_spill] sm:$0xff] }
 0x390   :  { %v9656_v11 = vmul.f32 %v3090_v1, %v12314_v12  ;;  %v3099_v32 = vsub.f32 1.0, %v3035_v48  ;;  %v9659_v17 = vmul.f32 %v3091_v40, %v12315_v13  ;;  %v9662_v41 = vmul.f32 %v3092_v9, %v12316_v31  ;;  %v12317_v61 = vld [vmem:[#allocation131_spill] sm:$0xff]  ;;  %v12318_v2 = vld [vmem:[#allocation132_spill] sm:$0xff]  ;;  %v12319_v51 = vld [vmem:[#allocation133_spill] sm:$0xff] }
 0x391   :  { %v9665_v30 = vmul.f32 %v3093_v46, %v12317_v61  ;;  %v9668_v59 = vmul.f32 %v3094_v50, %v12318_v2  ;;  %v9671_v38 = vmul.f32 %v3095_v19, %v12319_v51  ;;  %v12320_v43 = vld [vmem:[#allocation134_spill] sm:$0xff]  ;;  %v12321_v1 = vld [vmem:[#allocation135_spill] sm:$0xff]  ;;  %v12322_v40 = vld [vmem:[#allocation136_spill] sm:$0xff]  ;;  %v9686_v46 = vadd.f32 1.0, %v9256_v33 }
 0x392   :  { %v9674_v39 = vmul.f32 %v3096_v7, %v12320_v43  ;;  %v9677_v48 = vmul.f32 %v3097_v56, %v12321_v1  ;;  %v9680_v20 = vmul.f32 %v3098_v15, %v12322_v40  ;;  %v12323_v9 = vld [vmem:[#allocation137_spill] sm:$0xff]  ;;  %v9689_v50 = vadd.f32 1.0, %v9264_v44  ;;  %v12332_v40 = vld [vmem:[#allocation142_spill] sm:$0xff] }
 0x393   :  { %v9683_v27 = vmul.f32 %v3099_v32, %v12323_v9  ;;  %v9692_v19 = vadd.f32 1.0, %v9272_v3  ;;  %v9695_v7 = vadd.f32 1.0, %v9280_v60  ;;  %v9698_v56 = vadd.f32 1.0, %v9290_v45 }
 0x394   :  { %v9701_v15 = vadd.f32 1.0, %v9300_v53  ;;  %v9704_v12 = vadd.f32 1.0, %v9310_v29  ;;  %v9707_v33 = vadd.f32 1.0, %v9320_v58  ;;  %v9710_v44 = vadd.f32 1.0, %v9330_v28 }
 0x395   :  { %v9713_v3 = vadd.f32 1.0, %v9340_v25  ;;  %v9716_v60 = vadd.f32 1.0, %v9350_v47  ;;  %v9719_v45 = vadd.f32 1.0, %v9360_v36  ;;  %v9722_v53 = vadd.f32 1.0, %v9370_v55 }
 0x396   :  { %v9725_v29 = vadd.f32 1.0, %v9380_v16  ;;  %v9728_v58 = vadd.f32 1.0, %v9390_v34  ;;  %v9731_v28 = vadd.f32 1.0, %v9400_v37  ;;  %v9734_v25 = vadd.f32 1.0, %v9410_v54  ;;  %v12324_v54 = vld [vmem:[#allocation268_spill] sm:$0xff] }
 0x397   :  { %v9737_v47 = vadd.f32 1.0, %v9420_v52  ;;  %v9740_v36 = vadd.f32 1.0, %v9430_v4  ;;  %v9743_v55 = vadd.f32 1.0, %v9440_v8  ;;  %v9746_v16 = vadd.f32 1.0, %v9450_v26  ;;  %v12325_v52 = vld [vmem:[#allocation270_spill] sm:$0xff]  ;;  %v12326_v4 = vld [vmem:[#allocation272_spill] sm:$0xff] }
 0x398   :  { %v9749_v34 = vadd.f32 1.0, %v9460_v5  ;;  %v9752_v37 = vadd.f32 1.0, %v9470_v21  ;;  %v9755_v32 = vadd.f32 1.0, %v12324_v54  ;;  %v9758_v13 = vadd.f32 1.0, %v12325_v52  ;;  %v12327_v8 = vld [vmem:[#allocation274_spill] sm:$0xff]  ;;  %v12328_v26 = vld [vmem:[#allocation139_spill] sm:$0xff] }
 0x399   :  { %v9761_v31 = vadd.f32 1.0, %v12326_v4  ;;  %v9764_v61 = vadd.f32 1.0, %v12327_v8  ;;  %v9767_v2 = vadd.f32 1.0, %v12328_v26  ;;  %v12329_v5 = vld [vmem:[#allocation140_spill] sm:$0xff]  ;;  %v12330_v21 = vld [vmem:[#allocation141_spill] sm:$0xff]  ;;  %v9776_v1 = vadd.f32 1.0, %v9542_v10 }
 0x39a   :  { %v9770_v51 = vadd.f32 1.0, %v12329_v5  ;;  %v9773_v43 = vadd.f32 1.0, %v12330_v21  ;;  %v9779_v9 = vadd.f32 1.0, %v12332_v40  ;;  %v9782_v54 = vadd.f32 1.0, %v9553_v14  ;;  %v12334_v52 = vld [vmem:[#allocation143_spill] sm:$0xff]  ;;  %v12336_v26 = vld [vmem:[#allocation144_spill] sm:$0xff] }
 0x39b   :  { %12331 = vst [vmem:[#allocation152_spill] sm:$0xff] %v9776_v1  ;;  %v9785_v4 = vadd.f32 1.0, %v12334_v52  ;;  %v9788_v8 = vadd.f32 1.0, %v9564_v18  ;;  %v9791_v5 = vadd.f32 1.0, %v12336_v26  ;;  %v9794_v21 = vadd.f32 1.0, %v9575_v22  ;;  %v12338_v10 = vld [vmem:[#allocation145_spill] sm:$0xff] }
 0x39c   :  { %12333 = vst [vmem:[#allocation153_spill] sm:$0xff] %v9782_v54  ;;  %v9797_v1 = vadd.f32 1.0, %v12338_v10  ;;  %v9800_v40 = vadd.f32 1.0, %v9586_v57  ;;  %v12341_v14 = vld [vmem:[#allocation146_spill] sm:$0xff]  ;;  %v9806_v52 = vadd.f32 1.0, %v9597_v24  ;;  %v12343_v18 = vld [vmem:[#allocation147_spill] sm:$0xff] }
 0x39d   :  { %12335 = vst [vmem:[#allocation154_spill] sm:$0xff] %v9788_v8  ;;  %12337 = vst [vmem:[#allocation155_spill] sm:$0xff] %v9794_v21  ;;  %v9803_v54 = vadd.f32 1.0, %v12341_v14  ;;  %v9809_v8 = vadd.f32 1.0, %v12343_v18  ;;  %v9812_v26 = vadd.f32 1.0, %v9608_v23  ;;  %v12344_v22 = vld [vmem:[#allocation148_spill] sm:$0xff] }
 0x39e   :  { %12339 = vst [vmem:[#allocation156_spill] sm:$0xff] %v9797_v1  ;;  %12340 = vst [vmem:[#allocation157_spill] sm:$0xff] %v9800_v40  ;;  %v9815_v21 = vadd.f32 1.0, %v12344_v22  ;;  %v12345_v10 = vld [vmem:[#allocation149_spill] sm:$0xff]  ;;  %v12346_v57 = vld [vmem:[#allocation150_spill] sm:$0xff]  ;;  %v9824_v14 = vadd.f32 1.0, %v9630_v49 }
 0x39f   :  { %12342 = vst [vmem:[#allocation158_spill] sm:$0xff] %v9806_v52  ;;  %v9818_v1 = vadd.f32 1.0, %v12345_v10  ;;  %v9821_v40 = vadd.f32 1.0, %v12346_v57  ;;  %v12347_v24 = vld [vmem:[#allocation151_spill] sm:$0xff]  ;;  %v9830_v18 = vadd.f32 1.0, %v9637_v35  ;;  %v9833_v23 = vadd.f32 1.0, %v9640_v0 }
 0x3a0   :  { %v9827_v52 = vadd.f32 1.0, %v12347_v24  ;;  %v9836_v22 = vadd.f32 1.0, %v9644_v42  ;;  %v9839_v10 = vadd.f32 1.0, %v9647_v6  ;;  %v9842_v57 = vadd.f32 1.0, %v9650_v63 }
 0x3a1   :  { %v9845_v49 = vadd.f32 1.0, %v9653_v62  ;;  %v9848_v24 = vadd.f32 1.0, %v9656_v11  ;;  %v9851_v35 = vadd.f32 1.0, %v9659_v17  ;;  %v9854_v0 = vadd.f32 1.0, %v9662_v41 }
 0x3a2   :  { %v9857_v42 = vadd.f32 1.0, %v9665_v30  ;;  %v9860_v6 = vadd.f32 1.0, %v9668_v59  ;;  %v9863_v63 = vadd.f32 1.0, %v9671_v38  ;;  %v9866_v62 = vadd.f32 1.0, %v9674_v39  ;;  %v12356_v30 = vld [vmem:[#allocation78_spill] sm:$0xff]  ;;  %v12357_v59 = vld [vmem:[#allocation79_spill] sm:$0xff] }
 0x3a3   :  { %12348 = vst [vmem:[#allocation159_spill] sm:$0xff] %v9854_v0  ;;  %v9869_v11 = vadd.f32 1.0, %v9677_v48  ;;  %v9872_v17 = vadd.f32 1.0, %v9680_v20  ;;  %v9875_v41 = vadd.f32 1.0, %v9683_v27  ;;  %v12358_v38 = vld [vmem:[#allocation80_spill] sm:$0xff]  ;;  %v12359_v39 = vld [vmem:[#allocation106_spill] sm:$0xff] }
 0x3a4   :  { %12349 = vst [vmem:[#allocation160_spill] sm:$0xff] %v9857_v42  ;;  %12350 = vst [vmem:[#allocation161_spill] sm:$0xff] %v9860_v6  ;;  %v3228_v42 = vmul.f32 %v9686_v46, %v12356_v30  ;;  %v3229_v6 = vmul.f32 %v9689_v50, %v12357_v59  ;;  %v12360_v48 = vld [vmem:[#allocation107_spill] sm:$0xff]  ;;  %v12361_v20 = vld [vmem:[#allocation81_spill] sm:$0xff] }
 0x3a5   :  { %12351 = vst [vmem:[#allocation162_spill] sm:$0xff] %v9863_v63  ;;  %12352 = vst [vmem:[#allocation163_spill] sm:$0xff] %v9866_v62  ;;  %v3230_v63 = vmul.f32 %v9692_v19, %v12358_v38  ;;  %v3231_v62 = vmul.f32 %v9695_v7, %v12359_v39  ;;  %v12362_v27 = vld [vmem:[#allocation108_spill] sm:$0xff]  ;;  %v12363_v0 = vld [vmem:[#allocation82_spill] sm:$0xff] }
 0x3a6   :  { %12353 = vst [vmem:[#allocation164_spill] sm:$0xff] %v9869_v11  ;;  %12354 = vst [vmem:[#allocation165_spill] sm:$0xff] %v9872_v17  ;;  %v3232_v11 = vmul.f32 %v9698_v56, %v12360_v48  ;;  %v3233_v17 = vmul.f32 %v9701_v15, %v12361_v20  ;;  %v3235_v46 = vmul.f32 %v9707_v33, %v12363_v0  ;;  %v12364_v30 = vld [vmem:[#allocation84_spill] sm:$0xff]  ;;  %v12365_v59 = vld [vmem:[#allocation85_spill] sm:$0xff] }
 0x3a7   :  { %12355 = vst [vmem:[#allocation166_spill] sm:$0xff] %v9875_v41  ;;  %v3234_v41 = vmul.f32 %v9704_v12, %v12362_v27  ;;  %v3236_v50 = vmul.f32 %v9710_v44, %v12364_v30  ;;  %v3237_v19 = vmul.f32 %v9713_v3, %v12365_v59  ;;  %3292 = vst.msk [vmem:[%s10264_s3] sm:$0xff] %vm12366_vm14, %v3228_v42  ;;  %v12368_v7 = vld [vmem:[#allocation86_spill] sm:$0xff]  ;;  %v12369_v15 = vld [vmem:[#allocation87_spill] sm:$0xff] }
 0x3a8   :  { %3293 = vst.msk [vmem:[%s10264_s3 + $0x8] sm:$0xff] %vm12367_vm9, %v3229_v6  ;;  %v3238_v56 = vmul.f32 %v9716_v60, %v12368_v7  ;;  %v3239_v12 = vmul.f32 %v9719_v45, %v12369_v15  ;;  %v12370_v33 = vld [vmem:[#allocation88_spill] sm:$0xff]  ;;  %v12371_v3 = vld [vmem:[#allocation89_spill] sm:$0xff]  ;;  %v12376_v60 = vld [vmem:[#allocation90_spill] sm:$0xff] }
 0x3a9   :  { %v3240_v44 = vmul.f32 %v9722_v53, %v12370_v33  ;;  %v3241_v0 = vmul.f32 %v9725_v29, %v12371_v3  ;;  %3294 = vst.msk [vmem:[%s10264_s3 + $0x10] sm:$0xff] %vm12372_vm10, %v3230_v63  ;;  %v3242_v45 = vmul.f32 %v9728_v58, %v12376_v60  ;;  %v12377_v53 = vld [vmem:[#allocation91_spill] sm:$0xff]  ;;  %v12378_v42 = vld [vmem:[#allocation92_spill] sm:$0xff]  ;;  %v12379_v63 = vld [vmem:[#allocation93_spill] sm:$0xff] }
 0x3aa   :  { %3295 = vst.msk [vmem:[%s10264_s3 + $0x18] sm:$0xff] %vm12373_vm11, %v3231_v62  ;;  %v3243_v29 = vmul.f32 %v9731_v28, %v12377_v53  ;;  %v3244_v6 = vmul.f32 %v9734_v25, %v12378_v42  ;;  %v3245_v62 = vmul.f32 %v9737_v47, %v12379_v63  ;;  %v12384_v58 = vld [vmem:[#allocation31_spill] sm:$0xff]  ;;  %v12385_v25 = vld [vmem:[#allocation32_spill] sm:$0xff]  ;;  %v12394_v39 = vld [vmem:[#allocation42_spill] sm:$0xff] }
 0x3ab   :  { %3296 = vst.msk [vmem:[%s10264_s3 + $0x20] sm:$0xff] %vm12374_vm12, %v3232_v11  ;;  %v3246_v28 = vmul.f32 %v9740_v36, %v12384_v58  ;;  %v3247_v47 = vmul.f32 %v9743_v55, %v12385_v25  ;;  %v12386_v11 = vld [vmem:[#allocation35_spill] sm:$0xff]  ;;  %v12392_v36 = vld [vmem:[#allocation37_spill] sm:$0xff]  ;;  %v3252_v48 = vmul.f32 %v9758_v13, %v12394_v39  ;;  %vm12398_vm14 = vmmov %vm12390_vm0 }
 0x3ac   :  { %3297 = vst.msk [vmem:[%s10264_s3 + $0x28] sm:$0xff] %vm12375_vm13, %v3233_v17  ;;  %v3248_v17 = vmul.f32 %v9746_v16, %v12386_v11  ;;  %v3250_v55 = vmul.f32 %v9752_v37, %v12392_v36  ;;  %v12393_v16 = vld [vmem:[#allocation38_spill] sm:$0xff]  ;;  %v12395_v20 = vld [vmem:[#allocation43_spill] sm:$0xff]  ;;  %vm12399_vm9 = vmmov %vm12390_vm0 }
 0x3ad   :  { %3298 = vst.msk [vmem:[%s10264_s3 + $0x30] sm:$0xff] %vm12380_vm4, %v3234_v41  ;;  %v12387_v41 = vld [vmem:[#allocation36_spill] sm:$0xff]  ;;  %v3253_v27 = vmul.f32 %v9761_v31, %v12395_v20  ;;  %v12400_v37 = vld [vmem:[#allocation46_spill] sm:$0xff]  ;;  %v12401_v13 = vld [vmem:[#allocation49_spill] sm:$0xff] }
 0x3ae   :  { %3299 = vst.msk [vmem:[%s10264_s3 + $0x38] sm:$0xff] %vm12381_vm3, %v3235_v46  ;;  %v3249_v38 = vmul.f32 %v9749_v34, %v12387_v41  ;;  %v3251_v34 = vmul.f32 %v9755_v32, %v12393_v16  ;;  %v3254_v32 = vmul.f32 %v9764_v61, %v12400_v37  ;;  %v3255_v31 = vmul.f32 %v9767_v2, %v12401_v13  ;;  %v12402_v46 = vld [vmem:[#allocation51_spill] sm:$0xff]  ;;  %vm12404_vm10 = vmmov %vm12390_vm0  ;;  %v12408_v61 = vld [vmem:[#allocation56_spill] sm:$0xff] }
 0x3af   :  { %3300 = vst.msk [vmem:[%s10264_s3 + $0x40] sm:$0xff] %vm12382_vm1, %v3236_v50  ;;  %v3256_v30 = vmul.f32 %v9770_v51, %v12402_v46  ;;  %v12403_v50 = vld [vmem:[#allocation53_spill] sm:$0xff]  ;;  %vm12405_vm11 = vmmov %vm12390_vm0  ;;  %v12409_v2 = vld [vmem:[#allocation152_spill] sm:$0xff] }
 0x3b0   :  { %3301 = vst.msk [vmem:[%s10264_s3 + $0x48] sm:$0xff] %vm12383_vm5, %v3237_v19  ;;  %v3257_v59 = vmul.f32 %v9773_v43, %v12403_v50  ;;  %vm12406_vm12 = vmmov %vm12390_vm0  ;;  %v3258_v51 = vmul.f32 %v12409_v2, %v12408_v61  ;;  %v12410_v43 = vld [vmem:[#allocation57_spill] sm:$0xff]  ;;  %v12411_v7 = vld [vmem:[#allocation59_spill] sm:$0xff] }
 0x3b1   :  { %3302 = vst.msk [vmem:[%s10264_s3 + $0x50] sm:$0xff] %vm12388_vm15, %v3238_v56  ;;  %vm12407_vm13 = vmmov %vm12390_vm0  ;;  %v3259_v19 = vmul.f32 %v9779_v9, %v12410_v43  ;;  %v12412_v56 = vld [vmem:[#allocation153_spill] sm:$0xff]  ;;  %v12418_v9 = vld [vmem:[#allocation62_spill] sm:$0xff] }
 0x3b2   :  { %3303 = vst.msk [vmem:[%s10264_s3 + $0x58] sm:$0xff] %vm12389_vm6, %v3239_v12  ;;  %v3260_v15 = vmul.f32 %v12412_v56, %v12411_v7  ;;  %v12413_v12 = vld [vmem:[#allocation61_spill] sm:$0xff]  ;;  %vm12414_vm4 = vmmov %vm12390_vm0  ;;  %v12421_v60 = vld [vmem:[#allocation66_spill] sm:$0xff] }
 0x3b3   :  { %3304 = vst.msk [vmem:[%s10264_s3 + $0x60] sm:$0xff] %vm12390_vm0, %v3240_v44  ;;  %v3261_v33 = vmul.f32 %v9785_v4, %v12413_v12  ;;  %vm12415_vm3 = vmmov %vm12390_vm0  ;;  %v12419_v4 = vld [vmem:[#allocation154_spill] sm:$0xff]  ;;  %v12420_v3 = vld [vmem:[#allocation65_spill] sm:$0xff] }
 0x3b4   :  { %3305 = vst.msk [vmem:[%s10264_s3 + $0x68] sm:$0xff] %vm12391_vm7, %v3241_v0  ;;  %vm12416_vm1 = vmmov %vm12390_vm0  ;;  %v3262_v44 = vmul.f32 %v12419_v4, %v12418_v9  ;;  %v3263_v0 = vmul.f32 %v9791_v5, %v12420_v3  ;;  %v12424_v42 = vld [vmem:[#allocation156_spill] sm:$0xff]  ;;  %v12429_v63 = vld [vmem:[#allocation157_spill] sm:$0xff] }
 0x3b5   :  { %3306 = vst.msk [vmem:[%s10264_s3 + $0x70] sm:$0xff] %vm12396_vm2, %v3242_v45  ;;  %vm12417_vm5 = vmmov %vm12390_vm0  ;;  %v12422_v45 = vld [vmem:[#allocation155_spill] sm:$0xff]  ;;  %v12428_v5 = vld [vmem:[#allocation68_spill] sm:$0xff] }
 0x3b6   :  { %3307 = vst.msk [vmem:[%s10264_s3 + $0x78] sm:$0xff] %vm12397_vm8, %v3243_v29  ;;  %v3264_v53 = vmul.f32 %v12422_v45, %v12421_v60  ;;  %v12423_v29 = vld [vmem:[#allocation67_spill] sm:$0xff]  ;;  %vm12425_vm15 = vmmov %vm12390_vm0  ;;  %v12430_v58 = vld [vmem:[#allocation72_spill] sm:$0xff] }
 0x3b7   :  { %3308 = vst.msk [vmem:[%s10264_s3 + $0x80] sm:$0xff] %vm12398_vm14, %v3244_v6  ;;  %v3265_v6 = vmul.f32 %v12424_v42, %v12423_v29  ;;  %vm12426_vm6 = vmmov %vm12390_vm0  ;;  %v12431_v25 = vld [vmem:[#allocation73_spill] sm:$0xff]  ;;  %v12464_v50 = vld [vmem:[#allocation159_spill] sm:$0xff] }
 0x3b8   :  { %3309 = vst.msk [vmem:[%s10264_s3 + $0x88] sm:$0xff] %vm12399_vm9, %v3245_v62  ;;  %vm12427_vm7 = vmmov %vm12390_vm0  ;;  %v3266_v62 = vmul.f32 %v12429_v63, %v12428_v5  ;;  %v12465_v61 = vld [vmem:[#allocation17_spill] sm:$0xff]  ;;  %v12466_v2 = vld [vmem:[#allocation160_spill] sm:$0xff] }
 0x3b9   :  { %3310 = vst.msk [vmem:[%s10264_s3 + $0x90] sm:$0xff] %vm12404_vm10, %v3246_v28  ;;  %v3267_v28 = vmul.f32 %v9803_v54, %v12430_v58  ;;  %vm12434_vm2 = vmmov %vm12390_vm0  ;;  %v12438_v54 = vld [vmem:[#allocation77_spill] sm:$0xff]  ;;  %v12474_v7 = vld [vmem:[#allocation162_spill] sm:$0xff] }
 0x3ba   :  { %3311 = vst.msk [vmem:[%s10264_s3 + $0x98] sm:$0xff] %vm12405_vm11, %v3247_v47  ;;  %v12432_v47 = vld [vmem:[#allocation158_spill] sm:$0xff]  ;;  %vm12435_vm8 = vmmov %vm12390_vm0  ;;  %v12476_v12 = vld [vmem:[#allocation163_spill] sm:$0xff] }
 0x3bb   :  { %3312 = vst.msk [vmem:[%s10264_s3 + $0xa0] sm:$0xff] %vm12406_vm12, %v3248_v17  ;;  %v3268_v11 = vmul.f32 %v12432_v47, %v12431_v25  ;;  %v12433_v17 = vld [vmem:[#allocation76_spill] sm:$0xff]  ;;  %vm12436_vm14 = vmmov %vm12390_vm0  ;;  %v12485_v45 = vld [vmem:[#allocation27_spill] sm:$0xff] }
 0x3bc   :  { %3313 = vst.msk [vmem:[%s10264_s3 + $0xa8] sm:$0xff] %vm12407_vm13, %v3249_v38  ;;  %v3269_v41 = vmul.f32 %v9809_v8, %v12433_v17  ;;  %vm12437_vm9 = vmmov %vm12390_vm0  ;;  %v3270_v8 = vmul.f32 %v9812_v26, %v12438_v54  ;;  %v12439_v38 = vld [vmem:[#allocation83_spill] sm:$0xff]  ;;  %v12477_v9 = vld [vmem:[#allocation20_spill] sm:$0xff] }
 0x3bd   :  { %3314 = vst.msk [vmem:[%s10264_s3 + $0xb0] sm:$0xff] %vm12414_vm4, %v3250_v55  ;;  %v3271_v36 = vmul.f32 %v9815_v21, %v12439_v38  ;;  %v12440_v55 = vld [vmem:[#allocation2_spill] sm:$0xff]  ;;  %vm12442_vm10 = vmmov %vm12390_vm0  ;;  %v12478_v4 = vld [vmem:[#allocation164_spill] sm:$0xff] }
 0x3be   :  { %3315 = vst.msk [vmem:[%s10264_s3 + $0xb8] sm:$0xff] %vm12415_vm3, %v3251_v34  ;;  %v3272_v16 = vmul.f32 %v9818_v1, %v12440_v55  ;;  %v12441_v34 = vld [vmem:[#allocation3_spill] sm:$0xff]  ;;  %vm12443_vm11 = vmmov %vm12390_vm0  ;;  %v12446_v1 = vld [vmem:[#allocation4_spill] sm:$0xff] }
 0x3bf   :  { %3316 = vst.msk [vmem:[%s10264_s3 + $0xc0] sm:$0xff] %vm12416_vm1, %v3252_v48  ;;  %v3273_v39 = vmul.f32 %v9821_v40, %v12441_v34  ;;  %vm12444_vm12 = vmmov %vm12390_vm0  ;;  %v3274_v21 = vmul.f32 %v9824_v14, %v12446_v1  ;;  %v12447_v40 = vld [vmem:[#allocation5_spill] sm:$0xff]  ;;  %v12448_v48 = vld [vmem:[#allocation6_spill] sm:$0xff] }
 0x3c0   :  { %3317 = vst.msk [vmem:[%s10264_s3 + $0xc8] sm:$0xff] %vm12417_vm5, %v3253_v27  ;;  %vm12445_vm13 = vmmov %vm12390_vm0  ;;  %v3275_v26 = vmul.f32 %v9827_v52, %v12447_v40  ;;  %v3276_v20 = vmul.f32 %v9830_v18, %v12448_v48  ;;  %v12449_v27 = vld [vmem:[#allocation7_spill] sm:$0xff]  ;;  %v12454_v52 = vld [vmem:[#allocation8_spill] sm:$0xff] }
 0x3c1   :  { %3318 = vst.msk [vmem:[%s10264_s3 + $0xd0] sm:$0xff] %vm12425_vm15, %v3254_v32  ;;  %v3277_v37 = vmul.f32 %v9833_v23, %v12449_v27  ;;  %vm12450_vm4 = vmmov %vm12390_vm0  ;;  %v3278_v14 = vmul.f32 %v9836_v22, %v12454_v52  ;;  %v12455_v18 = vld [vmem:[#allocation9_spill] sm:$0xff]  ;;  %v12456_v32 = vld [vmem:[#allocation10_spill] sm:$0xff] }
 0x3c2   :  { %3319 = vst.msk [vmem:[%s10264_s3 + $0xd8] sm:$0xff] %vm12426_vm6, %v3255_v31  ;;  %vm12451_vm3 = vmmov %vm12390_vm0  ;;  %v3279_v23 = vmul.f32 %v9839_v10, %v12455_v18  ;;  %v3280_v13 = vmul.f32 %v9842_v57, %v12456_v32  ;;  %v12457_v31 = vld [vmem:[#allocation11_spill] sm:$0xff]  ;;  %v12461_v22 = vld [vmem:[#allocation12_spill] sm:$0xff] }
 0x3c3   :  { %3320 = vst.msk [vmem:[%s10264_s3 + $0xe0] sm:$0xff] %vm12390_vm0, %v3256_v30  ;;  %vm12452_vm1 = vmmov %vm12390_vm0  ;;  %v3281_v46 = vmul.f32 %v9845_v49, %v12457_v31  ;;  %v3282_v10 = vmul.f32 %v9848_v24, %v12461_v22  ;;  %v12462_v57 = vld [vmem:[#allocation14_spill] sm:$0xff]  ;;  %v12463_v30 = vld [vmem:[#allocation15_spill] sm:$0xff] }
 0x3c4   :  { %3321 = vst.msk [vmem:[%s10264_s3 + $0xe8] sm:$0xff] %vm12427_vm7, %v3257_v59  ;;  %vm12453_vm5 = vmmov %vm12390_vm0  ;;  %v3283_v49 = vmul.f32 %v9851_v35, %v12462_v57  ;;  %v3284_v59 = vmul.f32 %v12464_v50, %v12463_v30  ;;  %v12471_v24 = vld [vmem:[#allocation18_spill] sm:$0xff]  ;;  %v12472_v35 = vld [vmem:[#allocation161_spill] sm:$0xff] }
 0x3c5   :  { %3322 = vst.msk [vmem:[%s10264_s3 + $0xf0] sm:$0xff] %vm12434_vm2, %v3258_v51  ;;  %vm12458_vm15 = vmmov %vm12390_vm0  ;;  %v3285_v51 = vmul.f32 %v12466_v2, %v12465_v61  ;;  %v3286_v43 = vmul.f32 %v12472_v35, %v12471_v24  ;;  %v12483_v3 = vld [vmem:[#allocation96_spill] sm:$0xff] }
 0x3c6   :  { %3323 = vst.msk [vmem:[%s10264_s3 + $0xf8] sm:$0xff] %vm12435_vm8, %v3259_v19  ;;  %vm12459_vm6 = vmmov %vm12390_vm0  ;;  %v12473_v19 = vld [vmem:[#allocation94_spill] sm:$0xff] }
 0x3c7   :  { %3324 = vst.msk [vmem:[%s10264_s3 + $0x100] sm:$0xff] %vm12436_vm14, %v3260_v15  ;;  %vm12460_vm7 = vmmov %vm12390_vm0  ;;  %v3287_v56 = vmul.f32 %v12474_v7, %v12473_v19  ;;  %v12475_v15 = vld [vmem:[#allocation95_spill] sm:$0xff] }
 0x3c8   :  { %3325 = vst.msk [vmem:[%s10264_s3 + $0x108] sm:$0xff] %vm12437_vm9, %v3261_v33  ;;  %vm12467_vm2 = vmmov %vm12390_vm0  ;;  %v3288_v33 = vmul.f32 %v12476_v12, %v12475_v15 }
 0x3c9   :  { %3326 = vst.msk [vmem:[%s10264_s3 + $0x110] sm:$0xff] %vm12442_vm10, %v3262_v44  ;;  %vm12468_vm8 = vmmov %vm12390_vm0  ;;  %v3289_v44 = vmul.f32 %v12478_v4, %v12477_v9 }
 0x3ca   :  { %3327 = vst.msk [vmem:[%s10264_s3 + $0x118] sm:$0xff] %vm12443_vm11, %v3263_v0  ;;  %vm12469_vm14 = vmmov %vm12390_vm0  ;;  %v12484_v0 = vld [vmem:[#allocation165_spill] sm:$0xff] }
 0x3cb   :  { %3328 = vst.msk [vmem:[%s10264_s3 + $0x120] sm:$0xff] %vm12444_vm12, %v3264_v53  ;;  %vm12470_vm9 = vmmov %vm12390_vm0  ;;  %v3290_v60 = vmul.f32 %v12484_v0, %v12483_v3  ;;  %v12486_v53 = vld [vmem:[#allocation166_spill] sm:$0xff] }
 0x3cc   :  { %3329 = vst.msk [vmem:[%s10264_s3 + $0x128] sm:$0xff] %vm12445_vm13, %v3265_v6  ;;  %vm12479_vm10 = vmmov %vm12390_vm0  ;;  %v3291_v29 = vmul.f32 %v12486_v53, %v12485_v45 }
 0x3cd   :  { %3330 = vst.msk [vmem:[%s10264_s3 + $0x130] sm:$0xff] %vm12450_vm4, %v3266_v62  ;;  %vm12480_vm11 = vmmov %vm12390_vm0 }
 0x3ce   :  { %3331 = vst.msk [vmem:[%s10264_s3 + $0x138] sm:$0xff] %vm12451_vm3, %v3267_v28  ;;  %vm12481_vm12 = vmmov %vm12390_vm0 }
 0x3cf   :  { %3332 = vst.msk [vmem:[%s10264_s3 + $0x140] sm:$0xff] %vm12452_vm1, %v3268_v11  ;;  %vm12482_vm13 = vmmov %vm12390_vm0 }
 0x3d0   :  { %3333 = vst.msk [vmem:[%s10264_s3 + $0x148] sm:$0xff] %vm12453_vm5, %v3269_v41  ;;  %vm12487_vm4 = vmmov %vm12390_vm0 }
 0x3d1   :  { %3334 = vst.msk [vmem:[%s10264_s3 + $0x150] sm:$0xff] %vm12458_vm15, %v3270_v8  ;;  %vm12488_vm3 = vmmov %vm12390_vm0 }
 0x3d2   :  { %3335 = vst.msk [vmem:[%s10264_s3 + $0x158] sm:$0xff] %vm12459_vm6, %v3271_v36  ;;  %vm12489_vm1 = vmmov %vm12390_vm0 }
 0x3d3   :  { %3336 = vst.msk [vmem:[%s10264_s3 + $0x160] sm:$0xff] %vm12390_vm0, %v3272_v16  ;;  %vm12490_vm5 = vmmov %vm12390_vm0 }
 0x3d4   :  { %3337 = vst.msk [vmem:[%s10264_s3 + $0x168] sm:$0xff] %vm12460_vm7, %v3273_v39  ;;  %vm12491_vm15 = vmmov %vm12390_vm0 }
 0x3d5   :  { %3338 = vst.msk [vmem:[%s10264_s3 + $0x170] sm:$0xff] %vm12467_vm2, %v3274_v21  ;;  %vm12492_vm6 = vmmov %vm12390_vm0 }
 0x3d6   :  { %3339 = vst.msk [vmem:[%s10264_s3 + $0x178] sm:$0xff] %vm12468_vm8, %v3275_v26  ;;  %vm12493_vm7 = vmmov %vm12390_vm0 }
 0x3d7   :  { %3340 = vst.msk [vmem:[%s10264_s3 + $0x180] sm:$0xff] %vm12469_vm14, %v3276_v20  ;;  %vm12494_vm2 = vmmov %vm12390_vm0 }
 0x3d8   :  { %3341 = vst.msk [vmem:[%s10264_s3 + $0x188] sm:$0xff] %vm12470_vm9, %v3277_v37  ;;  %vm12495_vm8 = vmmov %vm12390_vm0 }
 0x3d9   :  { %3342 = vst.msk [vmem:[%s10264_s3 + $0x190] sm:$0xff] %vm12479_vm10, %v3278_v14 }
 0x3da   :  { %3343 = vst.msk [vmem:[%s10264_s3 + $0x198] sm:$0xff] %vm12480_vm11, %v3279_v23 }
 0x3db   :  { %3344 = vst.msk [vmem:[%s10264_s3 + $0x1a0] sm:$0xff] %vm12481_vm12, %v3280_v13 }
 0x3dc   :  { %3345 = vst.msk [vmem:[%s10264_s3 + $0x1a8] sm:$0xff] %vm12482_vm13, %v3281_v46 }
 0x3dd   :  { %3346 = vst.msk [vmem:[%s10264_s3 + $0x1b0] sm:$0xff] %vm12487_vm4, %v3282_v10 }
 0x3de   :  { %3347 = vst.msk [vmem:[%s10264_s3 + $0x1b8] sm:$0xff] %vm12488_vm3, %v3283_v49 }
 0x3df   :  { %3348 = vst.msk [vmem:[%s10264_s3 + $0x1c0] sm:$0xff] %vm12489_vm1, %v3284_v59 }
 0x3e0   :  { %3349 = vst.msk [vmem:[%s10264_s3 + $0x1c8] sm:$0xff] %vm12490_vm5, %v3285_v51 }
 0x3e1   :  { %3350 = vst.msk [vmem:[%s10264_s3 + $0x1d0] sm:$0xff] %vm12491_vm15, %v3286_v43 }
 0x3e2   :  { %3351 = vst.msk [vmem:[%s10264_s3 + $0x1d8] sm:$0xff] %vm12492_vm6, %v3287_v56 }
 0x3e3   :  { %3352 = vst.msk [vmem:[%s10264_s3 + $0x1e0] sm:$0xff] %vm12390_vm0, %v3288_v33 }
 0x3e4   :  { %3353 = vst.msk [vmem:[%s10264_s3 + $0x1e8] sm:$0xff] %vm12493_vm7, %v3289_v44 }
 0x3e5   :  { %3354 = vst.msk [vmem:[%s10264_s3 + $0x1f0] sm:$0xff] %vm12494_vm2, %v3290_v60 }
 0x3e6   :  { %3355 = vst.msk [vmem:[%s10264_s3 + $0x1f8] sm:$0xff] %vm12495_vm8, %v3291_v29 }

// kernel: speech_recognition_model.19
= control target key start
LH: loop header
LB: loop body
LE: loop exit
PB: predicated region body
PF: predicated region fallthrough
CT: control target
= control target key end

     0   :  { %s1140_s1 = inlined_call_operand.vmem [shape: f32[384,128], index: 1, kind: input, shape index: {}]   ;;  %s1141_s0 = inlined_call_operand.vmem [shape: f32[128,384], index: 0, kind: input, shape index: {}]   ;;  %s1142_s2 = inlined_call_operand.vmem [shape: f32[1,128], index: 2, kind: input, shape index: {}]   ;;  %s1143_s3 = inlined_call_operand.vmem [shape: f32[128,128], index: 3, kind: output, shape index: {}]  }
   0x1   :  { %v114_v0 = vld [vmem:[%s1140_s1 + $0x80] sm:$0xff]  ;;  %v115_v1 = vld [vmem:[%s1140_s1 + $0x88] sm:$0xff]  ;;  %v116_v9 = vld [vmem:[%s1140_s1 + $0x90] sm:$0xff] }
   0x2   :  { %v98_v2 = vld [vmem:[%s1140_s1] sm:$0xff]  ;;  %v699_v3 = vpack.c.bf16 %v115_v1, %v114_v0  ;;  %v99_v4 = vld [vmem:[%s1140_s1 + $0x8] sm:$0xff]  ;;  %v117_v10 = vld [vmem:[%s1140_s1 + $0x98] sm:$0xff] }
   0x3   :  { %v130_v5 = vld [vmem:[%s1140_s1 + $0x100] sm:$0xff]  ;;  %v131_v6 = vld [vmem:[%s1140_s1 + $0x108] sm:$0xff]  ;;  %v701_v7 = vpack.c.bf16 %v99_v4, %v98_v2  ;;  %v100_v11 = vld [vmem:[%s1140_s1 + $0x10] sm:$0xff]  ;;  %v703_v12 = vpack.c.bf16 %v117_v10, %v116_v9 }
   0x4   :  { %v731_v8 = vpack.c.bf16 %v131_v6, %v130_v5  ;;  %700 = vmatprep.subr.bf16.mxu0 %v699_v3  ;;  %v101_v13 = vld [vmem:[%s1140_s1 + $0x18] sm:$0xff]  ;;  %v132_v14 = vld [vmem:[%s1140_s1 + $0x110] sm:$0xff]  ;;  %v118_v18 = vld [vmem:[%s1140_s1 + $0xa0] sm:$0xff] }
   0x5   :  { %v133_v15 = vld [vmem:[%s1140_s1 + $0x118] sm:$0xff]  ;;  %702 = vmatpush3.bf16.msra.mxu0 %v701_v7  ;;  %v705_v16 = vpack.c.bf16 %v101_v13, %v100_v11  ;;  %v119_v19 = vld [vmem:[%s1140_s1 + $0xa8] sm:$0xff]  ;;  %v102_v20 = vld [vmem:[%s1140_s1 + $0x20] sm:$0xff] }
   0x6   :  { %732 = vmatprep.subr.bf16.mxu1 %v731_v8  ;;  %v735_v17 = vpack.c.bf16 %v133_v15, %v132_v14  ;;  %704 = vmatprep.subr.bf16.mxu0 %v703_v12  ;;  %v707_v21 = vpack.c.bf16 %v119_v19, %v118_v18  ;;  %v103_v22 = vld [vmem:[%s1140_s1 + $0x28] sm:$0xff]  ;;  %v134_v23 = vld [vmem:[%s1140_s1 + $0x120] sm:$0xff]  ;;  %v120_v26 = vld [vmem:[%s1140_s1 + $0xb0] sm:$0xff] }
   0x7   :  { %734 = vmatpush3.bf16.msra.mxu1 %v731_v8  ;;  %v135_v24 = vld [vmem:[%s1140_s1 + $0x128] sm:$0xff]  ;;  %v121_v27 = vld [vmem:[%s1140_s1 + $0xb8] sm:$0xff]  ;;  %v136_v28 = vld [vmem:[%s1140_s1 + $0x130] sm:$0xff]  ;;  %v709_v30 = vpack.c.bf16 %v103_v22, %v102_v20 }
   0x8   :  { %736 = vmatprep.subr.bf16.mxu1 %v735_v17  ;;  %v739_v25 = vpack.c.bf16 %v135_v24, %v134_v23  ;;  %v137_v29 = vld [vmem:[%s1140_s1 + $0x138] sm:$0xff]  ;;  %v711_v31 = vpack.c.bf16 %v121_v27, %v120_v26  ;;  %v104_v32 = vld [vmem:[%s1140_s1 + $0x30] sm:$0xff]  ;;  %v122_v35 = vld [vmem:[%s1140_s1 + $0xc0] sm:$0xff] }
   0x9   :  { %706 = vmatpush3.bf16.msra.mxu0 %v705_v16  ;;  %v105_v33 = vld [vmem:[%s1140_s1 + $0x38] sm:$0xff]  ;;  %v743_v34 = vpack.c.bf16 %v137_v29, %v136_v28  ;;  %v123_v36 = vld [vmem:[%s1140_s1 + $0xc8] sm:$0xff]  ;;  %v138_v37 = vld [vmem:[%s1140_s1 + $0x140] sm:$0xff] }
   0xa   :  { %708 = vmatprep.subr.bf16.mxu0 %v707_v21  ;;  %v139_v38 = vld [vmem:[%s1140_s1 + $0x148] sm:$0xff]  ;;  %v713_v39 = vpack.c.bf16 %v105_v33, %v104_v32  ;;  %v715_v40 = vpack.c.bf16 %v123_v36, %v122_v35  ;;  %v106_v41 = vld [vmem:[%s1140_s1 + $0x40] sm:$0xff]  ;;  %v124_v44 = vld [vmem:[%s1140_s1 + $0xd0] sm:$0xff] }
   0xb   :  { %738 = vmatpush3.bf16.msra.mxu1 %v735_v17  ;;  %v107_v42 = vld [vmem:[%s1140_s1 + $0x48] sm:$0xff]  ;;  %v747_v43 = vpack.c.bf16 %v139_v38, %v138_v37  ;;  %v125_v45 = vld [vmem:[%s1140_s1 + $0xd8] sm:$0xff]  ;;  %v140_v46 = vld [vmem:[%s1140_s1 + $0x150] sm:$0xff] }
   0xc   :  { %740 = vmatprep.subr.bf16.mxu1 %v739_v25  ;;  %v141_v47 = vld [vmem:[%s1140_s1 + $0x158] sm:$0xff]  ;;  %v717_v48 = vpack.c.bf16 %v107_v42, %v106_v41  ;;  %v51_v49 = vld [vmem:[%s1141_s0 + $0x8] sm:$0xff]  ;;  %v52_v50 = vld [vmem:[%s1141_s0 + $0x10] sm:$0xff]  ;;  %v719_v51 = vpack.c.bf16 %v125_v45, %v124_v44 }
   0xd   :  { %710 = vmatpush3.bf16.msra.mxu0 %v709_v30  ;;  %v108_v52 = vld [vmem:[%s1140_s1 + $0x50] sm:$0xff]  ;;  %v109_v53 = vld [vmem:[%s1140_s1 + $0x58] sm:$0xff]  ;;  %v751_v54 = vpack.c.bf16 %v141_v47, %v140_v46  ;;  %v126_v55 = vld [vmem:[%s1140_s1 + $0xe0] sm:$0xff]  ;;  %210 = vmatprep.mubr.f32.mxu0 %v51_v49 }
   0xe   :  { %712 = vmatprep.subr.bf16.mxu0 %v711_v31  ;;  %v127_v56 = vld [vmem:[%s1140_s1 + $0xe8] sm:$0xff]  ;;  %v142_v57 = vld [vmem:[%s1140_s1 + $0x160] sm:$0xff]  ;;  %675 = vmatprep.mubr.f32.mxu1 %v52_v50  ;;  %v721_v59 = vpack.c.bf16 %v109_v53, %v108_v52  ;;  %v128_v0 = vld [vmem:[%s1140_s1 + $0xf0] sm:$0xff] }
   0xf   :  { %742 = vmatpush3.bf16.msra.mxu1 %v739_v25  ;;  %v143_v58 = vld [vmem:[%s1140_s1 + $0x168] sm:$0xff]  ;;  %v723_v60 = vpack.c.bf16 %v127_v56, %v126_v55  ;;  %v110_v61 = vld [vmem:[%s1140_s1 + $0x60] sm:$0xff]  ;;  %v129_v1 = vld [vmem:[%s1140_s1 + $0xf8] sm:$0xff] }
  0x10   :  { %744 = vmatprep.subr.bf16.mxu1 %v743_v34  ;;  %v111_v62 = vld [vmem:[%s1140_s1 + $0x68] sm:$0xff]  ;;  %v755_v63 = vpack.c.bf16 %v143_v58, %v142_v57  ;;  %v144_v2 = vld [vmem:[%s1140_s1 + $0x170] sm:$0xff]  ;;  %v145_v3 = vld [vmem:[%s1140_s1 + $0x178] sm:$0xff]  ;;  %v727_v5 = vpack.c.bf16 %v129_v1, %v128_v0 }
  0x11   :  { %714 = vmatpush3.bf16.msra.mxu0 %v713_v39  ;;  %v725_v4 = vpack.c.bf16 %v111_v62, %v110_v61  ;;  %v112_v6 = vld [vmem:[%s1140_s1 + $0x70] sm:$0xff]  ;;  %v113_v7 = vld [vmem:[%s1140_s1 + $0x78] sm:$0xff]  ;;  %v759_v8 = vpack.c.bf16 %v145_v3, %v144_v2  ;;  %v50_v10 = vld [vmem:[%s1141_s0] sm:$0xff] }
  0x12   :  { %716 = vmatprep.subr.bf16.mxu0 %v715_v40  ;;  %v729_v9 = vpack.c.bf16 %v113_v7, %v112_v6  ;;  %v55_v11 = vld [vmem:[%s1141_s0 + $0x28] sm:$0xff]  ;;  %v54_v12 = vld [vmem:[%s1141_s0 + $0x20] sm:$0xff]  ;;  %v53_v14 = vld [vmem:[%s1141_s0 + $0x18] sm:$0xff] }
  0x13   :  { %746 = vmatpush3.bf16.msra.mxu1 %v743_v34  ;;  %v58_v13 = vld [vmem:[%s1141_s0 + $0x40] sm:$0xff]  ;;  %v57_v15 = vld [vmem:[%s1141_s0 + $0x38] sm:$0xff]  ;;  %v64_v17 = vld [vmem:[%s1141_s0 + $0x70] sm:$0xff] }
  0x14   :  { %748 = vmatprep.subr.bf16.mxu1 %v747_v43  ;;  %v61_v16 = vld [vmem:[%s1141_s0 + $0x58] sm:$0xff]  ;;  %v56_v18 = vld [vmem:[%s1141_s0 + $0x30] sm:$0xff]  ;;  %v67_v20 = vld [vmem:[%s1141_s0 + $0x88] sm:$0xff] }
  0x15   :  { %718 = vmatpush3.bf16.msra.mxu0 %v717_v48  ;;  %v60_v19 = vld [vmem:[%s1141_s0 + $0x50] sm:$0xff]  ;;  %v70_v21 = vld [vmem:[%s1141_s0 + $0xa0] sm:$0xff]  ;;  %v59_v22 = vld [vmem:[%s1141_s0 + $0x48] sm:$0xff] }
  0x16   :  { %720 = vmatprep.subr.bf16.mxu0 %v719_v51  ;;  %v63_v23 = vld [vmem:[%s1141_s0 + $0x68] sm:$0xff]  ;;  %v73_v24 = vld [vmem:[%s1141_s0 + $0xb8] sm:$0xff]  ;;  %v76_v25 = vld [vmem:[%s1141_s0 + $0xd0] sm:$0xff] }
  0x17   :  { %750 = vmatpush3.bf16.msra.mxu1 %v747_v43  ;;  %v62_v26 = vld [vmem:[%s1141_s0 + $0x60] sm:$0xff]  ;;  %v79_v28 = vld [vmem:[%s1141_s0 + $0xe8] sm:$0xff]  ;;  %v65_v30 = vld [vmem:[%s1141_s0 + $0x78] sm:$0xff] }
  0x18   :  { %752 = vmatprep.subr.bf16.mxu1 %v751_v54  ;;  %v66_v27 = vld [vmem:[%s1141_s0 + $0x80] sm:$0xff]  ;;  %v69_v31 = vld [vmem:[%s1141_s0 + $0x98] sm:$0xff]  ;;  %v88_v33 = vld [vmem:[%s1141_s0 + $0x130] sm:$0xff] }
  0x19   :  { %722 = vmatpush3.bf16.msra.mxu0 %v721_v59  ;;  %v82_v29 = vld [vmem:[%s1141_s0 + $0x100] sm:$0xff]  ;;  %v85_v32 = vld [vmem:[%s1141_s0 + $0x118] sm:$0xff]  ;;  %v68_v34 = vld [vmem:[%s1141_s0 + $0x90] sm:$0xff] }
  0x1a   :  { %724 = vmatprep.subr.bf16.mxu0 %v723_v60  ;;  %v72_v35 = vld [vmem:[%s1141_s0 + $0xb0] sm:$0xff]  ;;  %v91_v36 = vld [vmem:[%s1141_s0 + $0x148] sm:$0xff]  ;;  %v94_v37 = vld [vmem:[%s1141_s0 + $0x160] sm:$0xff] }
  0x1b   :  { %754 = vmatpush3.bf16.msra.mxu1 %v751_v54  ;;  %v71_v38 = vld [vmem:[%s1141_s0 + $0xa8] sm:$0xff]  ;;  %v97_v40 = vld [vmem:[%s1141_s0 + $0x178] sm:$0xff]  ;;  %v74_v41 = vld [vmem:[%s1141_s0 + $0xc0] sm:$0xff] }
  0x1c   :  { %756 = vmatprep.subr.bf16.mxu1 %v755_v63  ;;  %v75_v39 = vld [vmem:[%s1141_s0 + $0xc8] sm:$0xff]  ;;  %v78_v42 = vld [vmem:[%s1141_s0 + $0xe0] sm:$0xff]  ;;  %v77_v43 = vld [vmem:[%s1141_s0 + $0xd8] sm:$0xff] }
  0x1d   :  { %726 = vmatpush3.bf16.msra.mxu0 %v725_v4  ;;  %v81_v44 = vld [vmem:[%s1141_s0 + $0xf8] sm:$0xff]  ;;  %v80_v45 = vld [vmem:[%s1141_s0 + $0xf0] sm:$0xff]  ;;  %v83_v47 = vld [vmem:[%s1141_s0 + $0x108] sm:$0xff] }
  0x1e   :  { %728 = vmatprep.subr.bf16.mxu0 %v727_v5  ;;  %v84_v46 = vld [vmem:[%s1141_s0 + $0x110] sm:$0xff]  ;;  %v87_v48 = vld [vmem:[%s1141_s0 + $0x128] sm:$0xff]  ;;  %v86_v49 = vld [vmem:[%s1141_s0 + $0x120] sm:$0xff] }
  0x1f   :  { %758 = vmatpush3.bf16.msra.mxu1 %v755_v63  ;;  %v90_v50 = vld [vmem:[%s1141_s0 + $0x140] sm:$0xff]  ;;  %v89_v51 = vld [vmem:[%s1141_s0 + $0x138] sm:$0xff]  ;;  %v92_v53 = vld [vmem:[%s1141_s0 + $0x150] sm:$0xff] }
  0x20   :  { %760 = vmatprep.subr.bf16.mxu1 %v759_v8  ;;  %v93_v52 = vld [vmem:[%s1141_s0 + $0x158] sm:$0xff]  ;;  %v96_v54 = vld [vmem:[%s1141_s0 + $0x170] sm:$0xff]  ;;  %v95_v55 = vld [vmem:[%s1141_s0 + $0x168] sm:$0xff] }
  0x21   :  { %730 = vmatpush3.bf16.msra.mxu0 %v729_v9  ;;  %v1074_v61 = vld [vmem:[%s1142_s2] ss:$0 sm:$0xff] }
  0x23   :  { %762 = vmatpush3.bf16.msra.mxu1 %v759_v8 }
  0x24   :  { %211 = vmatmul.mubr.f32.vlgmr.msra.gmra.mrb[0].mxu0 %v50_v10 }
  0x25   :  { %215 = vmatprep.mubr.f32.mxu0 %v54_v12 }
  0x26   :  { %676 = vmatmul.mubr.f32.vlgmr.msra.gmra.mrb[0].mxu1 %v55_v11 }
  0x27   :  { %678 = vmatprep.mubr.f32.mxu1 %v58_v13 }
  0x28   :  { %216 = vmatmul.mubr.f32.gmra.mrb[2].mxu0 %v53_v14 }
  0x29   :  { %220 = vmatprep.mubr.f32.mxu0 %v57_v15 }
  0x2a   :  { %679 = vmatmul.mubr.f32.gmra.mrb[2].mxu1 %v61_v16 }
  0x2b   :  { %681 = vmatprep.mubr.f32.mxu1 %v64_v17 }
  0x2c   :  { %221 = vmatmul.mubr.f32.gmra.mrb[4].mxu0 %v56_v18 }
  0x2d   :  { %225 = vmatprep.mubr.f32.mxu0 %v60_v19 }
  0x2e   :  { %682 = vmatmul.mubr.f32.gmra.mrb[4].mxu1 %v67_v20 }
  0x2f   :  { %684 = vmatprep.mubr.f32.mxu1 %v70_v21 }
  0x30   :  { %226 = vmatmul.mubr.f32.gmra.mrb[6].mxu0 %v59_v22 }
  0x31   :  { %230 = vmatprep.mubr.f32.mxu0 %v63_v23 }
  0x32   :  { %685 = vmatmul.mubr.f32.gmra.mrb[6].mxu1 %v73_v24 }
  0x33   :  { %687 = vmatprep.mubr.f32.mxu1 %v76_v25 }
  0x34   :  { %231 = vmatmul.mubr.f32.gmra.mrb[8].mxu0 %v62_v26 }
  0x35   :  { %235 = vmatprep.mubr.f32.mxu0 %v66_v27 }
  0x36   :  { %688 = vmatmul.mubr.f32.gmra.mrb[8].mxu1 %v79_v28 }
  0x37   :  { %690 = vmatprep.mubr.f32.mxu1 %v82_v29 }
  0x38   :  { %236 = vmatmul.mubr.f32.gmra.mrb[10].mxu0 %v65_v30 }
  0x39   :  { %240 = vmatprep.mubr.f32.mxu0 %v69_v31 }
  0x3a   :  { %691 = vmatmul.mubr.f32.gmra.mrb[10].mxu1 %v85_v32 }
  0x3b   :  { %693 = vmatprep.mubr.f32.mxu1 %v88_v33 }
  0x3c   :  { %241 = vmatmul.mubr.f32.gmra.mrb[12].mxu0 %v68_v34 }
  0x3d   :  { %245 = vmatprep.mubr.f32.mxu0 %v72_v35 }
  0x3e   :  { %694 = vmatmul.mubr.f32.gmra.mrb[12].mxu1 %v91_v36 }
  0x3f   :  { %696 = vmatprep.mubr.f32.mxu1 %v94_v37 }
  0x40   :  { %246 = vmatmul.mubr.f32.gmra.mrb[14].mxu0 %v71_v38 }
  0x41   :  { %250 = vmatprep.mubr.f32.mxu0 %v75_v39 }
  0x42   :  { %697 = vmatmul.mubr.f32.gmra.mrb[14].mxu1 %v97_v40 }
  0x44   :  { %251 = vmatmul.mubr.f32.gmra.mrb[16].mxu0 %v74_v41 }
  0x45   :  { %255 = vmatprep.mubr.f32.mxu0 %v78_v42 }
  0x48   :  { %256 = vmatmul.mubr.f32.gmra.mrb[18].mxu0 %v77_v43 }
  0x49   :  { %260 = vmatprep.mubr.f32.mxu0 %v81_v44 }
  0x4c   :  { %261 = vmatmul.mubr.f32.gmra.mrb[20].mxu0 %v80_v45 }
  0x4d   :  { %265 = vmatprep.mubr.f32.mxu0 %v84_v46 }
  0x50   :  { %266 = vmatmul.mubr.f32.gmra.mrb[22].mxu0 %v83_v47 }
  0x51   :  { %270 = vmatprep.mubr.f32.mxu0 %v87_v48 }
  0x54   :  { %271 = vmatmul.mubr.f32.gmra.mrb[24].mxu0 %v86_v49 }
  0x55   :  { %275 = vmatprep.mubr.f32.mxu0 %v90_v50 }
  0x58   :  { %276 = vmatmul.mubr.f32.gmra.mrb[26].mxu0 %v89_v51 }
  0x59   :  { %280 = vmatprep.mubr.f32.mxu0 %v93_v52 }
  0x5c   :  { %281 = vmatmul.mubr.f32.gmra.mrb[28].mxu0 %v92_v53 }
  0x5d   :  { %285 = vmatprep.mubr.f32.mxu0 %v96_v54 }
  0x60   :  { %286 = vmatmul.mubr.f32.gmra.mrb[30].mxu0 %v95_v55 }
  0xf7   :  { %v563_v56 = vpop.f32.mrb[0].mxu0 }
  0xf8   :  { %v564_v57 = vpop.f32.mrb[1].mxu0 }
  0xf9   :  { %v677_v58 = vpop.f32.mrb[0].mxu1  ;;  %v565_v59 = vadd.f32 %v564_v57, %v563_v56 }
  0xfa   :  { %v357_v60 = vpop.f32.mrb[1].mxu1 }
  0xfb   :  { %v358_v62 = vadd.f32 %v565_v59, %v357_v60  ;;  %v566_v63 = vpop.f32.mrb[2].mxu0 }
  0xfc   :  { %v567_v0 = vpop.f32.mrb[3].mxu0 }
  0xfd   :  { %v680_v1 = vpop.f32.mrb[2].mxu1  ;;  %v494_v2 = vadd.f32 %v1074_v61, %v358_v62  ;;  %v568_v3 = vadd.f32 %v567_v0, %v566_v63 }
  0xfe   :  { %v367_v4 = vpop.f32.mrb[3].mxu1 }
  0xff   :  { %510 = vst [vmem:[%s1143_s3] sm:$0xff] %v494_v2  ;;  %v363_v5 = vadd.f32 %v677_v58, %v568_v3  ;;  %v569_v6 = vpop.f32.mrb[4].mxu0 }
 0x100   :  { %v570_v7 = vpop.f32.mrb[5].mxu0 }
 0x101   :  { %v683_v8 = vpop.f32.mrb[4].mxu1  ;;  %v495_v9 = vadd.f32 %v1074_v61, %v363_v5  ;;  %v571_v10 = vadd.f32 %v570_v7, %v569_v6 }
 0x102   :  { %v377_v11 = vpop.f32.mrb[5].mxu1 }
 0x103   :  { %511 = vst [vmem:[%s1143_s3 + $0x8] sm:$0xff] %v495_v9  ;;  %v368_v12 = vadd.f32 %v571_v10, %v367_v4  ;;  %v572_v13 = vpop.f32.mrb[6].mxu0 }
 0x104   :  { %v573_v14 = vpop.f32.mrb[7].mxu0 }
 0x105   :  { %v686_v15 = vpop.f32.mrb[6].mxu1  ;;  %v496_v16 = vadd.f32 %v1074_v61, %v368_v12  ;;  %v574_v17 = vadd.f32 %v573_v14, %v572_v13 }
 0x106   :  { %v387_v18 = vpop.f32.mrb[7].mxu1 }
 0x107   :  { %512 = vst [vmem:[%s1143_s3 + $0x10] sm:$0xff] %v496_v16  ;;  %v373_v19 = vadd.f32 %v680_v1, %v574_v17  ;;  %v575_v20 = vpop.f32.mrb[8].mxu0 }
 0x108   :  { %v576_v21 = vpop.f32.mrb[9].mxu0 }
 0x109   :  { %v689_v22 = vpop.f32.mrb[8].mxu1  ;;  %v497_v23 = vadd.f32 %v1074_v61, %v373_v19  ;;  %v577_v24 = vadd.f32 %v576_v21, %v575_v20 }
 0x10a   :  { %v397_v25 = vpop.f32.mrb[9].mxu1 }
 0x10b   :  { %513 = vst [vmem:[%s1143_s3 + $0x18] sm:$0xff] %v497_v23  ;;  %v378_v26 = vadd.f32 %v577_v24, %v377_v11  ;;  %v578_v27 = vpop.f32.mrb[10].mxu0 }
 0x10c   :  { %v579_v28 = vpop.f32.mrb[11].mxu0 }
 0x10d   :  { %v692_v29 = vpop.f32.mrb[10].mxu1  ;;  %v498_v30 = vadd.f32 %v1074_v61, %v378_v26  ;;  %v580_v31 = vadd.f32 %v579_v28, %v578_v27 }
 0x10e   :  { %v407_v32 = vpop.f32.mrb[11].mxu1 }
 0x10f   :  { %514 = vst [vmem:[%s1143_s3 + $0x20] sm:$0xff] %v498_v30  ;;  %v383_v33 = vadd.f32 %v683_v8, %v580_v31  ;;  %v581_v34 = vpop.f32.mrb[12].mxu0 }
 0x110   :  { %v582_v35 = vpop.f32.mrb[13].mxu0 }
 0x111   :  { %v695_v36 = vpop.f32.mrb[12].mxu1  ;;  %v499_v37 = vadd.f32 %v1074_v61, %v383_v33  ;;  %v583_v38 = vadd.f32 %v582_v35, %v581_v34 }
 0x112   :  { %v417_v39 = vpop.f32.mrb[13].mxu1 }
 0x113   :  { %515 = vst [vmem:[%s1143_s3 + $0x28] sm:$0xff] %v499_v37  ;;  %v388_v40 = vadd.f32 %v583_v38, %v387_v18  ;;  %v584_v41 = vpop.f32.mrb[14].mxu0 }
 0x114   :  { %v585_v42 = vpop.f32.mrb[15].mxu0 }
 0x115   :  { %v698_v43 = vpop.f32.mrb[14].mxu1  ;;  %v500_v44 = vadd.f32 %v1074_v61, %v388_v40  ;;  %v586_v45 = vadd.f32 %v585_v42, %v584_v41 }
 0x116   :  { %v427_v46 = vpop.f32.mrb[15].mxu1 }
 0x117   :  { %516 = vst [vmem:[%s1143_s3 + $0x30] sm:$0xff] %v500_v44  ;;  %v393_v47 = vadd.f32 %v686_v15, %v586_v45  ;;  %v587_v48 = vpop.f32.mrb[16].mxu0 }
 0x118   :  { %v588_v49 = vpop.f32.mrb[17].mxu0 }
 0x119   :  { %v501_v50 = vadd.f32 %v1074_v61, %v393_v47  ;;  %v589_v51 = vadd.f32 %v588_v49, %v587_v48 }
 0x11b   :  { %517 = vst [vmem:[%s1143_s3 + $0x38] sm:$0xff] %v501_v50  ;;  %v398_v52 = vadd.f32 %v589_v51, %v397_v25  ;;  %v590_v53 = vpop.f32.mrb[18].mxu0 }
 0x11c   :  { %v591_v54 = vpop.f32.mrb[19].mxu0 }
 0x11d   :  { %v502_v55 = vadd.f32 %v1074_v61, %v398_v52  ;;  %v592_v56 = vadd.f32 %v591_v54, %v590_v53 }
 0x11f   :  { %518 = vst [vmem:[%s1143_s3 + $0x40] sm:$0xff] %v502_v55  ;;  %v403_v57 = vadd.f32 %v689_v22, %v592_v56  ;;  %v593_v58 = vpop.f32.mrb[20].mxu0 }
 0x120   :  { %v594_v59 = vpop.f32.mrb[21].mxu0 }
 0x121   :  { %v503_v60 = vadd.f32 %v1074_v61, %v403_v57  ;;  %v595_v62 = vadd.f32 %v594_v59, %v593_v58 }
 0x123   :  { %519 = vst [vmem:[%s1143_s3 + $0x48] sm:$0xff] %v503_v60  ;;  %v408_v63 = vadd.f32 %v595_v62, %v407_v32  ;;  %v596_v0 = vpop.f32.mrb[22].mxu0 }
 0x124   :  { %v597_v1 = vpop.f32.mrb[23].mxu0 }
 0x125   :  { %v504_v2 = vadd.f32 %v1074_v61, %v408_v63  ;;  %v598_v3 = vadd.f32 %v597_v1, %v596_v0 }
 0x127   :  { %520 = vst [vmem:[%s1143_s3 + $0x50] sm:$0xff] %v504_v2  ;;  %v413_v4 = vadd.f32 %v692_v29, %v598_v3  ;;  %v599_v5 = vpop.f32.mrb[24].mxu0 }
 0x128   :  { %v600_v6 = vpop.f32.mrb[25].mxu0 }
 0x129   :  { %v505_v7 = vadd.f32 %v1074_v61, %v413_v4  ;;  %v601_v8 = vadd.f32 %v600_v6, %v599_v5 }
 0x12b   :  { %521 = vst [vmem:[%s1143_s3 + $0x58] sm:$0xff] %v505_v7  ;;  %v418_v9 = vadd.f32 %v601_v8, %v417_v39  ;;  %v602_v10 = vpop.f32.mrb[26].mxu0 }
 0x12c   :  { %v603_v11 = vpop.f32.mrb[27].mxu0 }
 0x12d   :  { %v506_v12 = vadd.f32 %v1074_v61, %v418_v9  ;;  %v604_v13 = vadd.f32 %v603_v11, %v602_v10 }
 0x12f   :  { %522 = vst [vmem:[%s1143_s3 + $0x60] sm:$0xff] %v506_v12  ;;  %v423_v14 = vadd.f32 %v695_v36, %v604_v13  ;;  %v605_v15 = vpop.f32.mrb[28].mxu0 }
 0x130   :  { %v606_v16 = vpop.f32.mrb[29].mxu0 }
 0x131   :  { %v507_v17 = vadd.f32 %v1074_v61, %v423_v14  ;;  %v607_v18 = vadd.f32 %v606_v16, %v605_v15 }
 0x133   :  { %523 = vst [vmem:[%s1143_s3 + $0x68] sm:$0xff] %v507_v17  ;;  %v428_v19 = vadd.f32 %v607_v18, %v427_v46  ;;  %v608_v20 = vpop.f32.mrb[30].mxu0 }
 0x134   :  { %v609_v21 = vpop.f32.mrb[31].mxu0 }
 0x135   :  { %v508_v22 = vadd.f32 %v1074_v61, %v428_v19  ;;  %v610_v23 = vadd.f32 %v609_v21, %v608_v20 }
 0x137   :  { %524 = vst [vmem:[%s1143_s3 + $0x70] sm:$0xff] %v508_v22  ;;  %v433_v24 = vadd.f32 %v698_v43, %v610_v23 }
 0x139   :  { %v509_v25 = vadd.f32 %v1074_v61, %v433_v24 }
 0x13b   :  { %525 = vst [vmem:[%s1143_s3 + $0x78] sm:$0xff] %v509_v25 }

// kernel: speech_recognition_model.26
= control target key start
LH: loop header
LB: loop body
LE: loop exit
PB: predicated region body
PF: predicated region fallthrough
CT: control target
= control target key end

     0   :  { %s381_s1 = inlined_call_operand.vmem [shape: f32[256,128], index: 1, kind: input, shape index: {}]   ;;  %s382_s0 = inlined_call_operand.vmem [shape: f32[16,256], index: 0, kind: input, shape index: {}]   ;;  %s383_s2 = inlined_call_operand.vmem [shape: f32[1,128], index: 2, kind: input, shape index: {}]   ;;  %s384_s3 = inlined_call_operand.vmem [shape: f32[16,128], index: 3, kind: output, shape index: {}]  }
   0x1   :  { %v42_v0 = vld [vmem:[%s381_s1 + $0x80] sm:$0xff]  ;;  %v43_v1 = vld [vmem:[%s381_s1 + $0x88] sm:$0xff]  ;;  %v44_v5 = vld [vmem:[%s381_s1 + $0x90] sm:$0xff] }
   0x2   :  { %v26_v2 = vld [vmem:[%s381_s1] sm:$0xff]  ;;  %v196_v3 = vpack.c.bf16 %v43_v1, %v42_v0  ;;  %v27_v4 = vld [vmem:[%s381_s1 + $0x8] sm:$0xff]  ;;  %v45_v6 = vld [vmem:[%s381_s1 + $0x98] sm:$0xff] }
   0x3   :  { %v198_v7 = vpack.c.bf16 %v27_v4, %v26_v2  ;;  %v200_v8 = vpack.c.bf16 %v45_v6, %v44_v5  ;;  %v28_v9 = vld [vmem:[%s381_s1 + $0x10] sm:$0xff]  ;;  %v29_v10 = vld [vmem:[%s381_s1 + $0x18] sm:$0xff]  ;;  %v46_v11 = vld [vmem:[%s381_s1 + $0xa0] sm:$0xff] }
   0x4   :  { %197 = vmatprep.subr.bf16.mxu0 %v196_v3  ;;  %228 = vmatprep.subr.bf16.mxu1 %v196_v3  ;;  %v47_v12 = vld [vmem:[%s381_s1 + $0xa8] sm:$0xff]  ;;  %v202_v13 = vpack.c.bf16 %v29_v10, %v28_v9  ;;  %v30_v15 = vld [vmem:[%s381_s1 + $0x20] sm:$0xff]  ;;  %v48_v17 = vld [vmem:[%s381_s1 + $0xb0] sm:$0xff] }
   0x5   :  { %199 = vmatpush3.bf16.msra.mxu0 %v198_v7  ;;  %236 = vmatpush3.bf16.msra.mxu1 %v198_v7  ;;  %v204_v14 = vpack.c.bf16 %v47_v12, %v46_v11  ;;  %v31_v16 = vld [vmem:[%s381_s1 + $0x28] sm:$0xff]  ;;  %v49_v18 = vld [vmem:[%s381_s1 + $0xb8] sm:$0xff]  ;;  %v32_v21 = vld [vmem:[%s381_s1 + $0x30] sm:$0xff] }
   0x6   :  { %201 = vmatprep.subr.bf16.mxu0 %v200_v8  ;;  %229 = vmatprep.subr.bf16.mxu1 %v200_v8  ;;  %v206_v19 = vpack.c.bf16 %v31_v16, %v30_v15  ;;  %v208_v20 = vpack.c.bf16 %v49_v18, %v48_v17  ;;  %v33_v22 = vld [vmem:[%s381_s1 + $0x38] sm:$0xff]  ;;  %v50_v23 = vld [vmem:[%s381_s1 + $0xc0] sm:$0xff]  ;;  %v51_v24 = vld [vmem:[%s381_s1 + $0xc8] sm:$0xff] }
   0x7   :  { %v23_v25 = vld [vmem:[%s382_s0 + $0x8] sm:$0xff]  ;;  %v25_v26 = vld [vmem:[%s382_s0 + $0x18] sm:$0xff]  ;;  %v210_v27 = vpack.c.bf16 %v33_v22, %v32_v21  ;;  %v212_v28 = vpack.c.bf16 %v51_v24, %v50_v23  ;;  %v34_v29 = vld [vmem:[%s381_s1 + $0x40] sm:$0xff] }
   0x8   :  { %122 = vmatprep.mubr.f32.mxu0 %v23_v25  ;;  %v35_v30 = vld [vmem:[%s381_s1 + $0x48] sm:$0xff]  ;;  %v52_v31 = vld [vmem:[%s381_s1 + $0xd0] sm:$0xff]  ;;  %v53_v32 = vld [vmem:[%s381_s1 + $0xd8] sm:$0xff]  ;;  %127 = vmatprep.mubr.f32.mxu1 %v25_v26 }
   0x9   :  { %203 = vmatpush3.bf16.msra.mxu0 %v202_v13  ;;  %237 = vmatpush3.bf16.msra.mxu1 %v202_v13  ;;  %v214_v33 = vpack.c.bf16 %v35_v30, %v34_v29  ;;  %v216_v34 = vpack.c.bf16 %v53_v32, %v52_v31  ;;  %v36_v35 = vld [vmem:[%s381_s1 + $0x50] sm:$0xff]  ;;  %v37_v36 = vld [vmem:[%s381_s1 + $0x58] sm:$0xff]  ;;  %v54_v37 = vld [vmem:[%s381_s1 + $0xe0] sm:$0xff] }
   0xa   :  { %205 = vmatprep.subr.bf16.mxu0 %v204_v14  ;;  %230 = vmatprep.subr.bf16.mxu1 %v204_v14  ;;  %v55_v38 = vld [vmem:[%s381_s1 + $0xe8] sm:$0xff]  ;;  %v218_v39 = vpack.c.bf16 %v37_v36, %v36_v35  ;;  %v38_v41 = vld [vmem:[%s381_s1 + $0x60] sm:$0xff]  ;;  %v56_v43 = vld [vmem:[%s381_s1 + $0xf0] sm:$0xff] }
   0xb   :  { %v220_v40 = vpack.c.bf16 %v55_v38, %v54_v37  ;;  %v39_v42 = vld [vmem:[%s381_s1 + $0x68] sm:$0xff]  ;;  %v57_v44 = vld [vmem:[%s381_s1 + $0xf8] sm:$0xff]  ;;  %v40_v47 = vld [vmem:[%s381_s1 + $0x70] sm:$0xff] }
   0xc   :  { %v222_v45 = vpack.c.bf16 %v39_v42, %v38_v41  ;;  %v224_v46 = vpack.c.bf16 %v57_v44, %v56_v43  ;;  %v41_v48 = vld [vmem:[%s381_s1 + $0x78] sm:$0xff]  ;;  %v22_v50 = vld [vmem:[%s382_s0] sm:$0xff]  ;;  %v24_v51 = vld [vmem:[%s382_s0 + $0x10] sm:$0xff] }
   0xd   :  { %207 = vmatpush3.bf16.msra.mxu0 %v206_v19  ;;  %238 = vmatpush3.bf16.msra.mxu1 %v206_v19  ;;  %v226_v49 = vpack.c.bf16 %v41_v48, %v40_v47  ;;  %v157_v55 = vld [vmem:[%s383_s2] ss:$0 sm:$0xff] }
   0xe   :  { %209 = vmatprep.subr.bf16.mxu0 %v208_v20  ;;  %231 = vmatprep.subr.bf16.mxu1 %v208_v20 }
  0x11   :  { %211 = vmatpush3.bf16.msra.mxu0 %v210_v27  ;;  %239 = vmatpush3.bf16.msra.mxu1 %v210_v27 }
  0x12   :  { %213 = vmatprep.subr.bf16.mxu0 %v212_v28  ;;  %232 = vmatprep.subr.bf16.mxu1 %v212_v28 }
  0x15   :  { %215 = vmatpush3.bf16.msra.mxu0 %v214_v33  ;;  %240 = vmatpush3.bf16.msra.mxu1 %v214_v33 }
  0x16   :  { %217 = vmatprep.subr.bf16.mxu0 %v216_v34  ;;  %233 = vmatprep.subr.bf16.mxu1 %v216_v34 }
  0x19   :  { %219 = vmatpush3.bf16.msra.mxu0 %v218_v39  ;;  %241 = vmatpush3.bf16.msra.mxu1 %v218_v39 }
  0x1a   :  { %221 = vmatprep.subr.bf16.mxu0 %v220_v40  ;;  %234 = vmatprep.subr.bf16.mxu1 %v220_v40 }
  0x1d   :  { %223 = vmatpush3.bf16.msra.mxu0 %v222_v45  ;;  %242 = vmatpush3.bf16.msra.mxu1 %v222_v45 }
  0x1e   :  { %225 = vmatprep.subr.bf16.mxu0 %v224_v46  ;;  %235 = vmatprep.subr.bf16.mxu1 %v224_v46 }
  0x21   :  { %227 = vmatpush3.bf16.msra.mxu0 %v226_v49  ;;  %243 = vmatpush3.bf16.msra.mxu1 %v226_v49 }
  0x24   :  { %123 = vmatmul.mubr.f32.vlgmr.msra.gmra.mrb[0].mxu0 %v22_v50  ;;  %128 = vmatmul.mubr.f32.vlgmr.msra.gmra.mrb[0].mxu1 %v24_v51 }
  0xf7   :  { %v190_v52 = vpop.f32.mrb[0].mxu0  ;;  %v193_v53 = vpop.f32.mrb[0].mxu1 }
  0xf8   :  { %v191_v54 = vpop.f32.mrb[1].mxu0  ;;  %v194_v56 = vpop.f32.mrb[1].mxu1 }
  0xf9   :  { %v192_v57 = vadd.f32 %v191_v54, %v190_v52  ;;  %v195_v58 = vadd.f32 %v194_v56, %v193_v53 }
  0xfb   :  { %v149_v59 = vadd.f32 %v192_v57, %v157_v55  ;;  %v150_v60 = vadd.f32 %v195_v58, %v157_v55 }
  0xfd   :  { %151 = vst [vmem:[%s384_s3] sm:$0xff] %v149_v59  ;;  %152 = vst [vmem:[%s384_s3 + $0x8] sm:$0xff] %v150_v60 }

// kernel: speech_recognition_model.27
= control target key start
LH: loop header
LB: loop body
LE: loop exit
PB: predicated region body
PF: predicated region fallthrough
CT: control target
= control target key end

     0   :  { %vm16_vm0 = vcmask 261120   ;;  %s182_s0 = inlined_call_operand.vmem [shape: f32[16,32], index: 0, kind: input, shape index: {}]   ;;  %s183_s1 = inlined_call_operand.vmem [shape: f32[1,32], index: 1, kind: input, shape index: {}]   ;;  %s184_s2 = inlined_call_operand.vmem [shape: f32[1,32], index: 2, kind: input, shape index: {}]   ;;  %s185_s3 = inlined_call_operand.vmem [shape: f32[16,32], index: 3, kind: output, shape index: {}]  }
   0x1   :  { %v14_v0 = vld [vmem:[%s182_s0] sm:$0xff]  ;;  %v15_v1 = vld [vmem:[%s182_s0 + $0x8] sm:$0xff] }
   0x2   :  { %v17_v2 = vsel %vm16_vm0, %v14_v0, 0.0  ;;  %v20_v3 = vsel %vm16_vm0, %v15_v1, 0.0  ;;  %v122_v21 = vld [vmem:[%s183_s1] ss:$0 sm:$0xff] }
   0x3   :  { %18 = vadd.xlane.f32.xlu0 %v17_v2  ;;  %v123_v23 = vld [vmem:[%s184_s2] ss:$0 sm:$0xff] }
   0x7   :  { %21 = vadd.xlane.f32.xlu0 %v20_v3 }
  0x90   :  { %v19_v4 = vpop.xlane.xlu0 %18 }
  0x91   :  { %v24_v5 = vmul.f32 0.03125, %v19_v4  ;;  %v137_v4 = vmov -1.0  }
  0x93   :  { %v26_v6 = vsub.f32 %v14_v0, %v24_v5 }
  0x94   :  { %v22_v7 = vpop.xlane.xlu0 %21 }
  0x95   :  { %v25_v8 = vmul.f32 0.03125, %v22_v7  ;;  %v28_v9 = vmul.f32 %v26_v6, %v26_v6 }
  0x97   :  { %v27_v10 = vsub.f32 %v15_v1, %v25_v8  ;;  %v30_v11 = vsel %vm16_vm0, %v28_v9, 0.0 }
  0x98   :  { %31 = vadd.xlane.f32.xlu1 %v30_v11 }
  0x99   :  { %v29_v12 = vmul.f32 %v27_v10, %v27_v10 }
  0x9b   :  { %v33_v13 = vsel %vm16_vm0, %v29_v12, 0.0 }
  0x9c   :  { %34 = vadd.xlane.f32.xlu1 %v33_v13 }
 0x125   :  { %v32_v14 = vpop.xlane.xlu1 %31 }
 0x126   :  { %v36_v15 = vmul.f32 0.03125, %v32_v14 }
 0x128   :  { %v38_v16 = vadd.f32 1e-05, %v36_v15 }
 0x129   :  { %v35_v17 = vpop.xlane.xlu1 %34 }
 0x12a   :  { %125 = vrsqrt.f32 %v38_v16  ;;  %v37_v18 = vmul.f32 0.03125, %v35_v17 }
 0x12c   :  { %v39_v19 = vadd.f32 1e-05, %v37_v18 }
 0x12e   :  { %127 = vrsqrt.f32 %v39_v19 }
 0x134   :  { %v126_v20 = vpop.eup %125 }
 0x135   :  { %v42_v22 = vmul.f32 %v126_v20, %v26_v6 }
 0x137   :  { %v51_v24 = vmul.f32 %v122_v21, %v42_v22 }
 0x138   :  { %v128_v25 = vpop.eup %127 }
 0x139   :  { %v60_v26 = vadd.f32 %v123_v23, %v51_v24  ;;  %v43_v27 = vmul.f32 %v128_v25, %v27_v10 }
 0x13b   :  { %v64_v28 = vmul.f32 0.70710677, %v60_v26  ;;  %v52_v29 = vmul.f32 %v122_v21, %v43_v27  ;;  %v62_v8 = vmul.f32 0.5, %v60_v26 }
 0x13d   :  { %v70_v30 = vand.u32 2147483647, %v64_v28  ;;  %v61_v31 = vadd.f32 %v123_v23, %v52_v29  ;;  %vm66_vm1 = vcmp.ge.f32.partialorder %v64_v28, 0.0 }
 0x13e   :  { %v68_v5 = vsel %vm66_vm1, 1.0, %v137_v4 }
 0x13f   :  { %v72_v32 = vmul.f32 0.3275911, %v70_v30  ;;  %v65_v33 = vmul.f32 0.70710677, %v61_v31  ;;  %v98_v38 = vsub.f32 0.0, %v70_v30  ;;  %v63_v14 = vmul.f32 0.5, %v61_v31 }
 0x141   :  { %v74_v34 = vadd.f32 1.0, %v72_v32  ;;  %v71_v35 = vand.u32 2147483647, %v65_v33  ;;  %v100_v40 = vmul.f32 %v98_v38, %v70_v30  ;;  %vm67_vm2 = vcmp.ge.f32.partialorder %v65_v33, 0.0 }
 0x142   :  { %v69_v11 = vsel %vm67_vm2, 1.0, %v137_v4 }
 0x143   :  { %129 = vrcp.f32 %v74_v34  ;;  %v73_v36 = vmul.f32 0.3275911, %v71_v35  ;;  %v99_v41 = vsub.f32 0.0, %v71_v35  ;;  %v102_v45 = vmul.f32 1.442695, %v100_v40 }
 0x145   :  { %v75_v37 = vadd.f32 1.0, %v73_v36  ;;  %v101_v46 = vmul.f32 %v99_v41, %v71_v35 }
 0x147   :  { %131 = vrcp.f32 %v75_v37  ;;  %v104_v51 = vmul.f32 1.442695, %v101_v46 }
 0x148   :  { %133 = vpow2.f32 %v102_v45 }
 0x149   :  { %135 = vpow2.f32 %v104_v51 }
 0x14d   :  { %v130_v39 = vpop.eup %129 }
 0x14e   :  { %v80_v42 = vmul.f32 1.0614054, %v130_v39 }
 0x150   :  { %v82_v43 = vadd.f32 -1.4531521, %v80_v42 }
 0x151   :  { %v132_v44 = vpop.eup %131 }
 0x152   :  { %v84_v47 = vmul.f32 %v130_v39, %v82_v43  ;;  %v81_v48 = vmul.f32 1.0614054, %v132_v44  ;;  %v134_v62 = vpop.eup %133 }
 0x153   :  { %v136_v3 = vpop.eup %135 }
 0x154   :  { %v86_v49 = vadd.f32 1.4214138, %v84_v47  ;;  %v83_v50 = vadd.f32 -1.4531521, %v81_v48 }
 0x156   :  { %v88_v52 = vmul.f32 %v130_v39, %v86_v49  ;;  %v85_v53 = vmul.f32 %v132_v44, %v83_v50 }
 0x158   :  { %v90_v54 = vadd.f32 -0.28449672, %v88_v52  ;;  %v87_v55 = vadd.f32 1.4214138, %v85_v53 }
 0x15a   :  { %v92_v56 = vmul.f32 %v130_v39, %v90_v54  ;;  %v89_v57 = vmul.f32 %v132_v44, %v87_v55 }
 0x15c   :  { %v94_v58 = vadd.f32 0.2548296, %v92_v56  ;;  %v91_v59 = vadd.f32 -0.28449672, %v89_v57 }
 0x15e   :  { %v96_v60 = vmul.f32 %v130_v39, %v94_v58  ;;  %v93_v61 = vmul.f32 %v132_v44, %v91_v59 }
 0x160   :  { %v106_v63 = vmul.f32 %v134_v62, %v96_v60  ;;  %v95_v0 = vadd.f32 0.2548296, %v93_v61 }
 0x162   :  { %v108_v1 = vsub.f32 1.0, %v106_v63  ;;  %v97_v2 = vmul.f32 %v132_v44, %v95_v0 }
 0x164   :  { %v110_v6 = vmul.f32 %v108_v1, %v68_v5  ;;  %v107_v7 = vmul.f32 %v136_v3, %v97_v2 }
 0x166   :  { %v112_v9 = vadd.f32 1.0, %v110_v6  ;;  %v109_v10 = vsub.f32 1.0, %v107_v7 }
 0x168   :  { %v114_v12 = vmul.f32 %v112_v9, %v62_v8  ;;  %v111_v13 = vmul.f32 %v109_v10, %v69_v11 }
 0x16a   :  { %116 = vst.msk [vmem:[%s185_s3] sm:$0xff] %vm16_vm0, %v114_v12  ;;  %v113_v15 = vadd.f32 1.0, %v111_v13 }
 0x16c   :  { %v115_v16 = vmul.f32 %v113_v15, %v63_v14 }
 0x16e   :  { %117 = vst.msk [vmem:[%s185_s3 + $0x8] sm:$0xff] %vm16_vm0, %v115_v16 }

// kernel: speech_recognition_model.28
= control target key start
LH: loop header
LB: loop body
LE: loop exit
PB: predicated region body
PF: predicated region fallthrough
CT: control target
= control target key end

     0   :  { %v225_v3 = vmov 0.0   ;;  %v154_v51 = vlaneseq  ;;  %s363_s1 = inlined_call_operand.vmem [shape: f32[128,256], index: 1, kind: input, shape index: {}]   ;;  %s364_s0 = inlined_call_operand.vmem [shape: f32[16,128], index: 0, kind: input, shape index: {}]   ;;  %s365_s2 = inlined_call_operand.vmem [shape: f32[1,256], index: 2, kind: input, shape index: {}]   ;;  %s366_s3 = inlined_call_operand.vmem [shape: f32[16,256], index: 3, kind: output, shape index: {}]  }
   0x1   :  { %v29_v0 = vld [vmem:[%s363_s1 + $0x8] sm:$0xff]  ;;  %v31_v1 = vld [vmem:[%s363_s1 + $0x18] sm:$0xff]  ;;  %v28_v2 = vld [vmem:[%s363_s1] sm:$0xff]  ;;  %124 = vmatprep.mubr.f32.mxu0 %v225_v3  ;;  %130 = vmatprep.mubr.f32.mxu1 %v225_v3 }
   0x2   :  { %v176_v4 = vpack.c.bf16 %v31_v1, %v29_v0  ;;  %v30_v5 = vld [vmem:[%s363_s1 + $0x10] sm:$0xff]  ;;  %v33_v6 = vld [vmem:[%s363_s1 + $0x28] sm:$0xff]  ;;  %v35_v7 = vld [vmem:[%s363_s1 + $0x38] sm:$0xff]  ;;  %v155_v52 = vshrl.u32 %v154_v51, 7 }
   0x3   :  { %v178_v8 = vpack.c.bf16 %v30_v5, %v28_v2  ;;  %v180_v9 = vpack.c.bf16 %v35_v7, %v33_v6  ;;  %v32_v10 = vld [vmem:[%s363_s1 + $0x20] sm:$0xff]  ;;  %v34_v11 = vld [vmem:[%s363_s1 + $0x30] sm:$0xff]  ;;  %v37_v12 = vld [vmem:[%s363_s1 + $0x48] sm:$0xff] }
   0x4   :  { %177 = vmatprep.subr.bf16.mxu0 %v176_v4  ;;  %208 = vmatprep.subr.bf16.mxu1 %v176_v4  ;;  %v39_v13 = vld [vmem:[%s363_s1 + $0x58] sm:$0xff]  ;;  %v182_v14 = vpack.c.bf16 %v34_v11, %v32_v10  ;;  %v36_v16 = vld [vmem:[%s363_s1 + $0x40] sm:$0xff]  ;;  %v38_v17 = vld [vmem:[%s363_s1 + $0x50] sm:$0xff]  ;;  %v156_v53 = vsub.s32 0, %v155_v52  ;;  %v160_v55 = vsub.s32 1, %v155_v52 }
   0x5   :  { %179 = vmatpush1.bf16.msra.mxu0 %v178_v8  ;;  %216 = vmatpush1.bf16.msra.mxu1 %v178_v8  ;;  %v184_v15 = vpack.c.bf16 %v39_v13, %v37_v12  ;;  %v41_v18 = vld [vmem:[%s363_s1 + $0x68] sm:$0xff]  ;;  %v43_v19 = vld [vmem:[%s363_s1 + $0x78] sm:$0xff]  ;;  %v186_v20 = vpack.c.bf16 %v38_v17, %v36_v16  ;;  %v40_v22 = vld [vmem:[%s363_s1 + $0x60] sm:$0xff] }
   0x6   :  { %181 = vmatprep.subr.bf16.mxu0 %v180_v9  ;;  %209 = vmatprep.subr.bf16.mxu1 %v180_v9  ;;  %v188_v21 = vpack.c.bf16 %v43_v19, %v41_v18  ;;  %v42_v23 = vld [vmem:[%s363_s1 + $0x70] sm:$0xff]  ;;  %v45_v24 = vld [vmem:[%s363_s1 + $0x88] sm:$0xff]  ;;  %v47_v25 = vld [vmem:[%s363_s1 + $0x98] sm:$0xff] }
   0x7   :  { %v190_v26 = vpack.c.bf16 %v42_v23, %v40_v22  ;;  %v192_v27 = vpack.c.bf16 %v47_v25, %v45_v24  ;;  %v44_v28 = vld [vmem:[%s363_s1 + $0x80] sm:$0xff]  ;;  %v46_v29 = vld [vmem:[%s363_s1 + $0x90] sm:$0xff]  ;;  %v49_v30 = vld [vmem:[%s363_s1 + $0xa8] sm:$0xff] }
   0x8   :  { %v51_v31 = vld [vmem:[%s363_s1 + $0xb8] sm:$0xff]  ;;  %v194_v32 = vpack.c.bf16 %v46_v29, %v44_v28  ;;  %v48_v34 = vld [vmem:[%s363_s1 + $0xa0] sm:$0xff]  ;;  %v50_v35 = vld [vmem:[%s363_s1 + $0xb0] sm:$0xff] }
   0x9   :  { %183 = vmatpush1.bf16.msra.mxu0 %v182_v14  ;;  %217 = vmatpush1.bf16.msra.mxu1 %v182_v14  ;;  %v196_v33 = vpack.c.bf16 %v51_v31, %v49_v30  ;;  %v53_v36 = vld [vmem:[%s363_s1 + $0xc8] sm:$0xff]  ;;  %v55_v37 = vld [vmem:[%s363_s1 + $0xd8] sm:$0xff]  ;;  %v198_v38 = vpack.c.bf16 %v50_v35, %v48_v34  ;;  %v52_v40 = vld [vmem:[%s363_s1 + $0xc0] sm:$0xff] }
   0xa   :  { %185 = vmatprep.subr.bf16.mxu0 %v184_v15  ;;  %210 = vmatprep.subr.bf16.mxu1 %v184_v15  ;;  %v200_v39 = vpack.c.bf16 %v55_v37, %v53_v36  ;;  %v54_v41 = vld [vmem:[%s363_s1 + $0xd0] sm:$0xff]  ;;  %v57_v42 = vld [vmem:[%s363_s1 + $0xe8] sm:$0xff]  ;;  %v59_v43 = vld [vmem:[%s363_s1 + $0xf8] sm:$0xff] }
   0xb   :  { %v202_v44 = vpack.c.bf16 %v54_v41, %v52_v40  ;;  %v204_v45 = vpack.c.bf16 %v59_v43, %v57_v42  ;;  %v56_v46 = vld [vmem:[%s363_s1 + $0xe0] sm:$0xff]  ;;  %v58_v47 = vld [vmem:[%s363_s1 + $0xf0] sm:$0xff]  ;;  %v27_v50 = vld [vmem:[%s364_s0 + $0x8] sm:$0xff] }
   0xc   :  { %v206_v48 = vpack.c.bf16 %v58_v47, %v56_v46  ;;  %v26_v49 = vld [vmem:[%s364_s0] sm:$0xff] }
   0xd   :  { %187 = vmatpush1.bf16.msra.mxu0 %v186_v20  ;;  %218 = vmatpush1.bf16.msra.mxu1 %v186_v20  ;;  %v152_v54 = vld [vmem:[%s365_s2] sm:$0x3] }
   0xe   :  { %189 = vmatprep.subr.bf16.mxu0 %v188_v21  ;;  %211 = vmatprep.subr.bf16.mxu1 %v188_v21  ;;  %v157_v56 = vrot.slane %v152_v54, %v156_v53  ;;  %v161_v57 = vrot.slane %v152_v54, %v160_v55 }
  0x11   :  { %191 = vmatpush1.bf16.msra.mxu0 %v190_v26  ;;  %219 = vmatpush1.bf16.msra.mxu1 %v190_v26 }
  0x12   :  { %193 = vmatprep.subr.bf16.mxu0 %v192_v27  ;;  %212 = vmatprep.subr.bf16.mxu1 %v192_v27 }
  0x15   :  { %195 = vmatpush1.bf16.msra.mxu0 %v194_v32  ;;  %220 = vmatpush1.bf16.msra.mxu1 %v194_v32 }
  0x16   :  { %197 = vmatprep.subr.bf16.mxu0 %v196_v33  ;;  %213 = vmatprep.subr.bf16.mxu1 %v196_v33 }
  0x19   :  { %199 = vmatpush1.bf16.msra.mxu0 %v198_v38  ;;  %221 = vmatpush1.bf16.msra.mxu1 %v198_v38 }
  0x1a   :  { %201 = vmatprep.subr.bf16.mxu0 %v200_v39  ;;  %214 = vmatprep.subr.bf16.mxu1 %v200_v39 }
  0x1d   :  { %203 = vmatpush1.bf16.msra.mxu0 %v202_v44  ;;  %222 = vmatpush1.bf16.msra.mxu1 %v202_v44 }
  0x1e   :  { %205 = vmatprep.subr.bf16.mxu0 %v204_v45  ;;  %215 = vmatprep.subr.bf16.mxu1 %v204_v45 }
  0x21   :  { %207 = vmatpush1.bf16.msra.mxu0 %v206_v48  ;;  %223 = vmatpush1.bf16.msra.mxu1 %v206_v48 }
  0x24   :  { %125 = vmatmul.mubr.f32.vlgmr.msra.gmra.mrb[0].mxu0 %v26_v49  ;;  %131 = vmatmul.mubr.f32.vlgmr.msra.gmra.mrb[0].mxu1 %v27_v50 }
  0xf7   :  { %v126_v58 = vpop.f32.mrb[0].mxu0  ;;  %v132_v59 = vpop.f32.mrb[0].mxu1 }
  0xf8   :  { %v164_v60 = vadd.f32 %v157_v56, %v126_v58  ;;  %v166_v61 = vadd.f32 %v157_v56, %v132_v59  ;;  %v128_v62 = vpop.f32.mrb[1].mxu0  ;;  %v134_v63 = vpop.f32.mrb[1].mxu1 }
  0xf9   :  { %v165_v0 = vadd.f32 %v161_v57, %v128_v62  ;;  %v167_v1 = vadd.f32 %v161_v57, %v134_v63 }
  0xfa   :  { %168 = vst [vmem:[%s366_s3] sm:$0xff] %v164_v60  ;;  %170 = vst [vmem:[%s366_s3 + $0x10] sm:$0xff] %v166_v61 }
  0xfb   :  { %169 = vst [vmem:[%s366_s3 + $0x8] sm:$0xff] %v165_v0  ;;  %171 = vst [vmem:[%s366_s3 + $0x18] sm:$0xff] %v167_v1 }

// kernel: speech_recognition_model.29
= control target key start
LH: loop header
LB: loop body
LE: loop exit
PB: predicated region body
PF: predicated region fallthrough
CT: control target
= control target key end

     0   :  { %vm21_vm0 = vcmask 257024   ;;  %v232_v0 = vmov 0.0   ;;  %s264_s15 = smov 0   ;;  %s311_s0 = inlined_call_operand.vmem [shape: f32[8,4,96], index: 0, kind: input, shape index: {}]   ;;  %s312_s1 = inlined_call_operand.vmem [shape: f32[32,192], index: 1, kind: input, shape index: {}]   ;;  %s313_s2 = inlined_call_operand.vmem [shape: f32[4,96], index: 2, kind: input, shape index: {}]   ;;  %s314_s3 = inlined_call_operand.vmem [shape: f32[4,1], index: 3, kind: input, shape index: {}]   ;;  %s315_s4 = inlined_call_operand.vmem [shape: f32[8,4,32], index: 4, kind: output, shape index: {}]  }
   0x1   :  { %22 = vst.msk [vmem:[#allocation2] sm:$0xf] %vm21_vm0, %v232_v0 }
   0x2 LB: > { %v31_v1 = vld [vmem:[%s312_s1 + $0x8] sm:$0xff]  ;;  %v33_v2 = vld [vmem:[%s312_s1 + $0x18] sm:$0xff]  ;;  %v30_v3 = vld [vmem:[%s312_s1] sm:$0xff]  ;;  %v233_v8 = vmov 0.0   ;;  %v234_v9 = vmov 0   ;;  %vm38_vm1 = vcmask 261120   ;;  %s230_s15 = sphi %s264_s15, %s28_s15  }
   0x3   : > { %v195_v4 = vpack.c.bf16 %v33_v2, %v31_v1  ;;  %v32_v5 = vld [vmem:[%s312_s1 + $0x10] sm:$0xff]  ;;  %v35_v6 = vld [vmem:[%s312_s1 + $0x28] sm:$0xff]  ;;  %v37_v7 = vld [vmem:[%s312_s1 + $0x38] sm:$0xff]  ;;  %106 = vmatprep.mubr.f32.mxu0 %v233_v8  ;;  %217 = vset.pattern.permute.xlu0 %v234_v9  ;;  %s235_s8 = smov 32   ;;  %s236_s11 = smov 64  }
   0x4   : > { %v197_v10 = vpack.c.bf16 %v32_v5, %v30_v3  ;;  %v199_v11 = vpack.c.bf16 %v37_v7, %v35_v6  ;;  %v34_v12 = vld [vmem:[%s312_s1 + $0x20] sm:$0xff]  ;;  %v36_v13 = vld [vmem:[%s312_s1 + $0x30] sm:$0xff]  ;;  %s193_s12 = sshll.u32 %s230_s15, 2  ;;  %s237_s17 = smov 96  }
   0x5   : > { %196 = vmatprep.subr.bf16.mxu0 %v195_v4  ;;  %v113_v14 = vld [vmem:[%s314_s3] sm:$0xf]  ;;  %v201_v15 = vpack.c.bf16 %v36_v13, %v34_v12  ;;  %s140_s16 = scalar_lea.vmem %s311_s0, %s193_s12  ;;  %s177_s20 = scalar_lea.vmem %s315_s4, %s193_s12 }
   0x6   : > { %198 = vmatpush1.bf16.msra.mxu0 %v197_v10  ;;  %v120_v16 = vsub.f32 1.0, %v113_v14  ;;  %v137_v28 = vld [vmem:[%s313_s2] sm:$0xf]  ;;  %s28_s15 = sadd.s32 1, %s230_s15  }
   0x7   : > { %200 = vmatprep.subr.bf16.mxu0 %v199_v11  ;;  %v141_v31 = vld [vmem:[%s140_s16] sm:$0xf]  ;;  %p25_p0 = scmp.ge.s32.totalorder %s28_s15, 8  }
   0x8   : > { %123 = vperm.xlu0 %217, %v120_v16   ;;  %v29_v17 = vld [vmem:[#allocation2] sm:$0xf] }
   0xa   : > { %202 = vmatpush1.bf16.msra.mxu0 %v201_v15 }
   0xc   : > { %116 = vperm.xlu0 %217, %v113_v14  }
   0xd   : > { %192 = vmatmul.mubr.msk.f32.vlgmr.msra.gmra.mrb[0].mxu0 %vm38_vm1, %v29_v17 }
  0x87   : > { %v124_v18 = vpop.permute.xlu0 %123 }
  0x8b   : > { %v117_v24 = vpop.permute.xlu0 %116 }
  0xe0   : > { %v108_v19 = vpop.f32.mrb[0].mxu0 }
  0xe1   : > { %v110_v20 = vpop.f32.mrb[1].mxu0  ;;  %v126_v21 = vmul.f32 %v124_v18, %v108_v19  ;;  %v119_v25 = vmul.f32 %v117_v24, %v108_v19 }
  0xe2   : > { %v127_v22 = vmul.f32 %v124_v18, %v110_v20 }
  0xe3   : > { %130 = vrot.lane.b32.xlu1 %v126_v21, %s235_s8 }
  0xe7   : > { %132 = vrot.lane.b32.xlu1 %v127_v22, %s235_s8 }
 0x155   : > { %v131_v23 = vpop.permute.xlu1 %130 }
 0x159   : > { %v133_v26 = vpop.permute.xlu1 %132 }
 0x15a   : > { %v134_v27 = vsel %vm38_vm1, %v131_v23, %v133_v26 }
 0x15b   : > { %v136_v29 = vadd.f32 %v134_v27, %v119_v25 }
 0x15d   : > { %v138_v30 = vadd.f32 %v137_v28, %v136_v29 }
 0x15f   : > { %150 = vrot.lane.b32.xlu0 %v138_v30, %s236_s11  ;;  %v142_v32 = vadd.f32 %v141_v31, %v138_v30 }
 0x161   : > { %v194_v33 = vmul.f32 -1.442695, %v142_v32 }
 0x163   : > { %218 = vpow2.f32 %v194_v33 }
 0x16d   : > { %v219_v34 = vpop.eup %218 }
 0x16e   : > { %v146_v35 = vadd.f32 1.0, %v219_v34 }
 0x170   : > { %220 = vrcp.f32 %v146_v35 }
 0x17a   : > { %v221_v36 = vpop.eup %220 }
 0x17b   : > { %v160_v43 = vsub.f32 1.0, %v221_v36 }
 0x1d1   : > { %v151_v37 = vpop.permute.xlu0 %150 }
 0x1d2   : > { %v153_v38 = vmul.f32 %v221_v36, %v151_v37 }
 0x1d4   : > { %155 = vrot.lane.b32.xlu1 %v153_v38, %s236_s11 }
 0x1d8   : > { %166 = vrot.lane.b32.xlu1 %v29_v17, %s235_s8 }
 0x246   : > { %v156_v39 = vpop.permute.xlu1 %155 }
 0x247   : > { %v158_v40 = vadd.f32 %v156_v39, %v141_v31 }
 0x249   : > { %222 = vtanh.f32 %v158_v40 }
 0x24a   : > { %v167_v42 = vpop.permute.xlu1 %166 }
 0x24b   : > { %v169_v45 = vmul.f32 %v221_v36, %v167_v42 }
 0x253   : > { %v223_v41 = vpop.eup %222 }
 0x254   : > { %162 = vrot.lane.b32.xlu0 %v223_v41, %s237_s17 }
 0x2c6   : > { %v163_v44 = vpop.permute.xlu0 %162 }
 0x2c7   : > { %v165_v46 = vmul.f32 %v163_v44, %v160_v43 }
 0x2c9   : > { %v170_v47 = vadd.f32 %v169_v45, %v165_v46 }
 0x2cb   : > { %172 = vrot.lane.b32.xlu0 %v170_v47, %s237_s17 }
 0x338   :  { %27 = sbr.rel (!%p25_p0) target bundleno = 2 (0x2), region = 49 }
 0x33d   : > { %v173_v48 = vpop.permute.xlu0 %172 }
 0x33e   : > { %176 = vst.msk [vmem:[#allocation2] sm:$0xf] %vm21_vm0, %v173_v48  ;;  %178 = vst.msk [vmem:[%s177_s20] sm:$0xf] %vm21_vm0, %v173_v48 }

// kernel: speech_recognition_model.30
= control target key start
LH: loop header
LB: loop body
LE: loop exit
PB: predicated region body
PF: predicated region fallthrough
CT: control target
= control target key end

     0   :  { %vm16_vm0 = vcmask 523264   ;;  %s182_s0 = inlined_call_operand.vmem [shape: f32[16,64], index: 0, kind: input, shape index: {}]   ;;  %s183_s1 = inlined_call_operand.vmem [shape: f32[1,64], index: 1, kind: input, shape index: {}]   ;;  %s184_s2 = inlined_call_operand.vmem [shape: f32[1,64], index: 2, kind: input, shape index: {}]   ;;  %s185_s3 = inlined_call_operand.vmem [shape: f32[16,64], index: 3, kind: output, shape index: {}]  }
   0x1   :  { %v14_v0 = vld [vmem:[%s182_s0] sm:$0xff]  ;;  %v15_v1 = vld [vmem:[%s182_s0 + $0x8] sm:$0xff] }
   0x2   :  { %v17_v2 = vsel %vm16_vm0, %v14_v0, 0.0  ;;  %v20_v3 = vsel %vm16_vm0, %v15_v1, 0.0  ;;  %v122_v21 = vld [vmem:[%s183_s1] ss:$0 sm:$0xff] }
   0x3   :  { %18 = vadd.xlane.f32.xlu0 %v17_v2  ;;  %v123_v23 = vld [vmem:[%s184_s2] ss:$0 sm:$0xff] }
   0x7   :  { %21 = vadd.xlane.f32.xlu0 %v20_v3 }
  0x90   :  { %v19_v4 = vpop.xlane.xlu0 %18 }
  0x91   :  { %v24_v5 = vmul.f32 0.015625, %v19_v4  ;;  %v137_v4 = vmov -1.0  }
  0x93   :  { %v26_v6 = vsub.f32 %v14_v0, %v24_v5 }
  0x94   :  { %v22_v7 = vpop.xlane.xlu0 %21 }
  0x95   :  { %v25_v8 = vmul.f32 0.015625, %v22_v7  ;;  %v28_v9 = vmul.f32 %v26_v6, %v26_v6 }
  0x97   :  { %v27_v10 = vsub.f32 %v15_v1, %v25_v8  ;;  %v30_v11 = vsel %vm16_vm0, %v28_v9, 0.0 }
  0x98   :  { %31 = vadd.xlane.f32.xlu1 %v30_v11 }
  0x99   :  { %v29_v12 = vmul.f32 %v27_v10, %v27_v10 }
  0x9b   :  { %v33_v13 = vsel %vm16_vm0, %v29_v12, 0.0 }
  0x9c   :  { %34 = vadd.xlane.f32.xlu1 %v33_v13 }
 0x125   :  { %v32_v14 = vpop.xlane.xlu1 %31 }
 0x126   :  { %v36_v15 = vmul.f32 0.015625, %v32_v14 }
 0x128   :  { %v38_v16 = vadd.f32 1e-05, %v36_v15 }
 0x129   :  { %v35_v17 = vpop.xlane.xlu1 %34 }
 0x12a   :  { %125 = vrsqrt.f32 %v38_v16  ;;  %v37_v18 = vmul.f32 0.015625, %v35_v17 }
 0x12c   :  { %v39_v19 = vadd.f32 1e-05, %v37_v18 }
 0x12e   :  { %127 = vrsqrt.f32 %v39_v19 }
 0x134   :  { %v126_v20 = vpop.eup %125 }
 0x135   :  { %v42_v22 = vmul.f32 %v126_v20, %v26_v6 }
 0x137   :  { %v51_v24 = vmul.f32 %v122_v21, %v42_v22 }
 0x138   :  { %v128_v25 = vpop.eup %127 }
 0x139   :  { %v60_v26 = vadd.f32 %v123_v23, %v51_v24  ;;  %v43_v27 = vmul.f32 %v128_v25, %v27_v10 }
 0x13b   :  { %v64_v28 = vmul.f32 0.70710677, %v60_v26  ;;  %v52_v29 = vmul.f32 %v122_v21, %v43_v27  ;;  %v62_v8 = vmul.f32 0.5, %v60_v26 }
 0x13d   :  { %v70_v30 = vand.u32 2147483647, %v64_v28  ;;  %v61_v31 = vadd.f32 %v123_v23, %v52_v29  ;;  %vm66_vm1 = vcmp.ge.f32.partialorder %v64_v28, 0.0 }
 0x13e   :  { %v68_v5 = vsel %vm66_vm1, 1.0, %v137_v4 }
 0x13f   :  { %v72_v32 = vmul.f32 0.3275911, %v70_v30  ;;  %v65_v33 = vmul.f32 0.70710677, %v61_v31  ;;  %v98_v38 = vsub.f32 0.0, %v70_v30  ;;  %v63_v14 = vmul.f32 0.5, %v61_v31 }
 0x141   :  { %v74_v34 = vadd.f32 1.0, %v72_v32  ;;  %v71_v35 = vand.u32 2147483647, %v65_v33  ;;  %v100_v40 = vmul.f32 %v98_v38, %v70_v30  ;;  %vm67_vm2 = vcmp.ge.f32.partialorder %v65_v33, 0.0 }
 0x142   :  { %v69_v11 = vsel %vm67_vm2, 1.0, %v137_v4 }
 0x143   :  { %129 = vrcp.f32 %v74_v34  ;;  %v73_v36 = vmul.f32 0.3275911, %v71_v35  ;;  %v99_v41 = vsub.f32 0.0, %v71_v35  ;;  %v102_v45 = vmul.f32 1.442695, %v100_v40 }
 0x145   :  { %v75_v37 = vadd.f32 1.0, %v73_v36  ;;  %v101_v46 = vmul.f32 %v99_v41, %v71_v35 }
 0x147   :  { %131 = vrcp.f32 %v75_v37  ;;  %v104_v51 = vmul.f32 1.442695, %v101_v46 }
 0x148   :  { %133 = vpow2.f32 %v102_v45 }
 0x149   :  { %135 = vpow2.f32 %v104_v51 }
 0x14d   :  { %v130_v39 = vpop.eup %129 }
 0x14e   :  { %v80_v42 = vmul.f32 1.0614054, %v130_v39 }
 0x150   :  { %v82_v43 = vadd.f32 -1.4531521, %v80_v42 }
 0x151   :  { %v132_v44 = vpop.eup %131 }
 0x152   :  { %v84_v47 = vmul.f32 %v130_v39, %v82_v43  ;;  %v81_v48 = vmul.f32 1.0614054, %v132_v44  ;;  %v134_v62 = vpop.eup %133 }
 0x153   :  { %v136_v3 = vpop.eup %135 }
 0x154   :  { %v86_v49 = vadd.f32 1.4214138, %v84_v47  ;;  %v83_v50 = vadd.f32 -1.4531521, %v81_v48 }
 0x156   :  { %v88_v52 = vmul.f32 %v130_v39, %v86_v49  ;;  %v85_v53 = vmul.f32 %v132_v44, %v83_v50 }
 0x158   :  { %v90_v54 = vadd.f32 -0.28449672, %v88_v52  ;;  %v87_v55 = vadd.f32 1.4214138, %v85_v53 }
 0x15a   :  { %v92_v56 = vmul.f32 %v130_v39, %v90_v54  ;;  %v89_v57 = vmul.f32 %v132_v44, %v87_v55 }
 0x15c   :  { %v94_v58 = vadd.f32 0.2548296, %v92_v56  ;;  %v91_v59 = vadd.f32 -0.28449672, %v89_v57 }
 0x15e   :  { %v96_v60 = vmul.f32 %v130_v39, %v94_v58  ;;  %v93_v61 = vmul.f32 %v132_v44, %v91_v59 }
 0x160   :  { %v106_v63 = vmul.f32 %v134_v62, %v96_v60  ;;  %v95_v0 = vadd.f32 0.2548296, %v93_v61 }
 0x162   :  { %v108_v1 = vsub.f32 1.0, %v106_v63  ;;  %v97_v2 = vmul.f32 %v132_v44, %v95_v0 }
 0x164   :  { %v110_v6 = vmul.f32 %v108_v1, %v68_v5  ;;  %v107_v7 = vmul.f32 %v136_v3, %v97_v2 }
 0x166   :  { %v112_v9 = vadd.f32 1.0, %v110_v6  ;;  %v109_v10 = vsub.f32 1.0, %v107_v7 }
 0x168   :  { %v114_v12 = vmul.f32 %v112_v9, %v62_v8  ;;  %v111_v13 = vmul.f32 %v109_v10, %v69_v11 }
 0x16a   :  { %116 = vst.msk [vmem:[%s185_s3] sm:$0xff] %vm16_vm0, %v114_v12  ;;  %v113_v15 = vadd.f32 1.0, %v111_v13 }
 0x16c   :  { %v115_v16 = vmul.f32 %v113_v15, %v63_v14 }
 0x16e   :  { %117 = vst.msk [vmem:[%s185_s3 + $0x8] sm:$0xff] %vm16_vm0, %v115_v16 }

// kernel: speech_recognition_model.33
= control target key start
LH: loop header
LB: loop body
LE: loop exit
PB: predicated region body
PF: predicated region fallthrough
CT: control target
= control target key end

     0   :  { %vm37_vm0 = vcmask 523264   ;;  %vm184_vm3 = vcmask 261120   ;;  %s444_s1 = inlined_call_operand.vmem [shape: f32[64,32], index: 1, kind: input, shape index: {}]   ;;  %s445_s0 = inlined_call_operand.vmem [shape: f32[16,64], index: 0, kind: input, shape index: {}]   ;;  %s446_s3 = inlined_call_operand.vmem [shape: f32[32,128], index: 3, kind: input, shape index: {}]   ;;  %s447_s2 = inlined_call_operand.vmem [shape: f32[1,32], index: 2, kind: input, shape index: {}]   ;;  %s448_s4 = inlined_call_operand.vmem [shape: f32[1,128], index: 4, kind: input, shape index: {}]   ;;  %s449_s5 = inlined_call_operand.vmem [shape: f32[16,128], index: 5, kind: output, shape index: {}]  }
   0x1   :  { %v22_v0 = vld [vmem:[%s444_s1] sm:$0xff]  ;;  %v23_v1 = vld [vmem:[%s444_s1 + $0x8] sm:$0xff]  ;;  %v24_v2 = vld [vmem:[%s444_s1 + $0x10] sm:$0xff] }
   0x2   :  { %v324_v3 = vpack.c.bf16 %v23_v1, %v22_v0  ;;  %v25_v4 = vld [vmem:[%s444_s1 + $0x18] sm:$0xff]  ;;  %v26_v6 = vld [vmem:[%s444_s1 + $0x20] sm:$0xff]  ;;  %v27_v7 = vld [vmem:[%s444_s1 + $0x28] sm:$0xff]  ;;  %v357_v0 = vmov -1.0  }
   0x3   :  { %v328_v5 = vpack.c.bf16 %v25_v4, %v24_v2  ;;  %v20_v8 = vld [vmem:[%s445_s0] sm:$0xff]  ;;  %v332_v9 = vpack.c.bf16 %v27_v7, %v26_v6  ;;  %v28_v10 = vld [vmem:[%s444_s1 + $0x30] sm:$0xff]  ;;  %v29_v11 = vld [vmem:[%s444_s1 + $0x38] sm:$0xff] }
   0x4   :  { %325 = vmatprep.subr.bf16.mxu0 %v324_v3  ;;  %310 = vmatprep.mubr.msk.f32.mxu0 %vm37_vm0, %v20_v8  ;;  %v336_v12 = vpack.c.bf16 %v29_v11, %v28_v10  ;;  %v21_v13 = vld [vmem:[%s445_s0 + $0x8] sm:$0xff]  ;;  %v173_v14 = vld [vmem:[%s446_s3] sm:$0xff]  ;;  %v175_v17 = vld [vmem:[%s446_s3 + $0x10] sm:$0xff] }
   0x5   :  { %327 = vmatpush3.bf16.msra.mxu0 %v324_v3  ;;  %v174_v15 = vld [vmem:[%s446_s3 + $0x8] sm:$0xff]  ;;  %v176_v18 = vld [vmem:[%s446_s3 + $0x18] sm:$0xff]  ;;  %v272_v20 = vld [vmem:[%s447_s2] ss:$0 sm:$0xff] }
   0x6   :  { %329 = vmatprep.subr.bf16.mxu0 %v328_v5  ;;  %v340_v16 = vpack.c.bf16 %v174_v15, %v173_v14  ;;  %v344_v19 = vpack.c.bf16 %v176_v18, %v175_v17 }
   0x8   :  { %341 = vmatprep.subr.bf16.mxu1 %v340_v16 }
   0x9   :  { %331 = vmatpush3.bf16.msra.mxu0 %v328_v5  ;;  %343 = vmatpush3.bf16.msra.mxu1 %v340_v16 }
   0xa   :  { %333 = vmatprep.subr.bf16.mxu0 %v332_v9  ;;  %345 = vmatprep.subr.bf16.mxu1 %v344_v19 }
   0xd   :  { %335 = vmatpush3.bf16.msra.mxu0 %v332_v9  ;;  %347 = vmatpush3.bf16.msra.mxu1 %v344_v19 }
   0xe   :  { %337 = vmatprep.subr.bf16.mxu0 %v336_v12 }
  0x11   :  { %339 = vmatpush3.bf16.msra.mxu0 %v336_v12  ;;  %v275_v12 = vld [vmem:[%s448_s4] ss:$0 sm:$0xff] }
  0x14   :  { %311 = vmatmul.mubr.msk.f32.vlgmr.msra.gmra.mrb[0].mxu0 %vm37_vm0, %v21_v13 }
  0xe7   :  { %v312_v21 = vpop.f32.mrb[0].mxu0 }
  0xe8   :  { %v116_v22 = vadd.f32 %v312_v21, %v272_v20  ;;  %v110_v23 = vpop.f32.mrb[1].mxu0 }
  0xe9   :  { %v111_v24 = vadd.f32 %v272_v20, %v110_v23 }
  0xea   :  { %v122_v25 = vmul.f32 0.70710677, %v116_v22  ;;  %v120_v9 = vmul.f32 0.5, %v116_v22 }
  0xeb   :  { %v121_v26 = vmul.f32 0.70710677, %v111_v24  ;;  %v119_v7 = vmul.f32 0.5, %v111_v24 }
  0xec   :  { %v128_v27 = vand.u32 2147483647, %v122_v25  ;;  %vm124_vm1 = vcmp.ge.f32.partialorder %v122_v25, 0.0 }
  0xed   :  { %v127_v28 = vand.u32 2147483647, %v121_v26  ;;  %vm123_vm2 = vcmp.ge.f32.partialorder %v121_v26, 0.0  ;;  %v126_v1 = vsel %vm124_vm1, 1.0, %v357_v0 }
  0xee   :  { %v130_v29 = vmul.f32 0.3275911, %v128_v27  ;;  %v156_v33 = vsub.f32 0.0, %v128_v27  ;;  %v125_v4 = vsel %vm123_vm2, 1.0, %v357_v0 }
  0xef   :  { %v129_v30 = vmul.f32 0.3275911, %v127_v28  ;;  %v155_v34 = vsub.f32 0.0, %v127_v28 }
  0xf0   :  { %v132_v31 = vadd.f32 1.0, %v130_v29  ;;  %v158_v36 = vmul.f32 %v156_v33, %v128_v27 }
  0xf1   :  { %v131_v32 = vadd.f32 1.0, %v129_v30  ;;  %v157_v39 = vmul.f32 %v155_v34, %v127_v28 }
  0xf2   :  { %349 = vrcp.f32 %v132_v31  ;;  %v161_v42 = vmul.f32 1.442695, %v158_v36 }
  0xf3   :  { %351 = vrcp.f32 %v131_v32  ;;  %v159_v45 = vmul.f32 1.442695, %v157_v39 }
  0xf4   :  { %353 = vpow2.f32 %v161_v42 }
  0xf5   :  { %355 = vpow2.f32 %v159_v45 }
  0xfc   :  { %v350_v35 = vpop.eup %349 }
  0xfd   :  { %v352_v37 = vpop.eup %351  ;;  %v138_v38 = vmul.f32 1.0614054, %v350_v35 }
  0xfe   :  { %v137_v40 = vmul.f32 1.0614054, %v352_v37  ;;  %v354_v58 = vpop.eup %353 }
  0xff   :  { %v140_v41 = vadd.f32 -1.4531521, %v138_v38  ;;  %v356_v60 = vpop.eup %355 }
 0x100   :  { %v139_v43 = vadd.f32 -1.4531521, %v137_v40 }
 0x101   :  { %v142_v44 = vmul.f32 %v350_v35, %v140_v41 }
 0x102   :  { %v141_v46 = vmul.f32 %v352_v37, %v139_v43 }
 0x103   :  { %v144_v47 = vadd.f32 1.4214138, %v142_v44 }
 0x104   :  { %v143_v48 = vadd.f32 1.4214138, %v141_v46 }
 0x105   :  { %v146_v49 = vmul.f32 %v350_v35, %v144_v47 }
 0x106   :  { %v145_v50 = vmul.f32 %v352_v37, %v143_v48 }
 0x107   :  { %v148_v51 = vadd.f32 -0.28449672, %v146_v49 }
 0x108   :  { %v147_v52 = vadd.f32 -0.28449672, %v145_v50 }
 0x109   :  { %v150_v53 = vmul.f32 %v350_v35, %v148_v51 }
 0x10a   :  { %v149_v54 = vmul.f32 %v352_v37, %v147_v52 }
 0x10b   :  { %v152_v55 = vadd.f32 0.2548296, %v150_v53 }
 0x10c   :  { %v151_v56 = vadd.f32 0.2548296, %v149_v54 }
 0x10d   :  { %v154_v57 = vmul.f32 %v350_v35, %v152_v55 }
 0x10e   :  { %v153_v59 = vmul.f32 %v352_v37, %v151_v56 }
 0x10f   :  { %v164_v61 = vmul.f32 %v354_v58, %v154_v57 }
 0x110   :  { %v163_v62 = vmul.f32 %v356_v60, %v153_v59 }
 0x111   :  { %v166_v63 = vsub.f32 1.0, %v164_v61 }
 0x112   :  { %v165_v2 = vsub.f32 1.0, %v163_v62 }
 0x113   :  { %v168_v3 = vmul.f32 %v166_v63, %v126_v1 }
 0x114   :  { %v167_v5 = vmul.f32 %v165_v2, %v125_v4 }
 0x115   :  { %v170_v6 = vadd.f32 1.0, %v168_v3 }
 0x116   :  { %v169_v8 = vadd.f32 1.0, %v167_v5 }
 0x117   :  { %v172_v11 = vmul.f32 %v170_v6, %v120_v9 }
 0x118   :  { %v171_v10 = vmul.f32 %v169_v8, %v119_v7 }
 0x11a   :  { %321 = vmatprep.mubr.msk.f32.mxu1 %vm184_vm3, %v171_v10 }
 0x11b   :  { %322 = vmatmul.mubr.msk.f32.vlgmr.msra.gmra.mrb[0].mxu1 %vm184_vm3, %v172_v11 }
 0x1ee   :  { %v323_v13 = vpop.f32.mrb[0].mxu1 }
 0x1ef   :  { %v263_v14 = vadd.f32 %v323_v13, %v275_v12  ;;  %v257_v15 = vpop.f32.mrb[1].mxu1 }
 0x1f0   :  { %v258_v16 = vadd.f32 %v275_v12, %v257_v15 }
 0x1f1   :  { %267 = vst [vmem:[%s449_s5 + $0x8] sm:$0xff] %v263_v14 }
 0x1f2   :  { %266 = vst [vmem:[%s449_s5] sm:$0xff] %v258_v16 }

// kernel: speech_recognition_model.32
= control target key start
LH: loop header
LB: loop body
LE: loop exit
PB: predicated region body
PF: predicated region fallthrough
CT: control target
= control target key end

     0   :  { %vm21_vm0 = vcmask 261120   ;;  %v317_v0 = vmov 0.0   ;;  %s350_s15 = smov 0   ;;  %s427_s0 = inlined_call_operand.vmem [shape: f32[2,16,96], index: 0, kind: input, shape index: {}]   ;;  %s428_s1 = inlined_call_operand.vmem [shape: f32[32,192], index: 1, kind: input, shape index: {}]   ;;  %s429_s2 = inlined_call_operand.vmem [shape: f32[16,96], index: 2, kind: input, shape index: {}]   ;;  %s430_s3 = inlined_call_operand.vmem [shape: f32[16,1], index: 3, kind: input, shape index: {}]   ;;  %s431_s4 = inlined_call_operand.vmem [shape: f32[2,16,32], index: 4, kind: output, shape index: {}]  }
   0x1   :  { %22 = vst.msk [vmem:[#allocation2] sm:$0xff] %vm21_vm0, %v317_v0  ;;  %23 = vst.msk [vmem:[#allocation2 + $0x8] sm:$0xff] %vm21_vm0, %v317_v0 }
   0x2 LB: > { %v33_v1 = vld [vmem:[%s428_s1 + $0x8] sm:$0xff]  ;;  %v35_v2 = vld [vmem:[%s428_s1 + $0x18] sm:$0xff]  ;;  %v32_v3 = vld [vmem:[%s428_s1] sm:$0xff]  ;;  %v318_v8 = vmov 0.0   ;;  %v319_v13 = vmov 0   ;;  %s320_s10 = smov 32   ;;  %s315_s15 = sphi %s350_s15, %s29_s15  }
   0x3   : > { %v269_v4 = vpack.c.bf16 %v35_v2, %v33_v1  ;;  %v34_v5 = vld [vmem:[%s428_s1 + $0x10] sm:$0xff]  ;;  %v37_v6 = vld [vmem:[%s428_s1 + $0x28] sm:$0xff]  ;;  %v39_v7 = vld [vmem:[%s428_s1 + $0x38] sm:$0xff]  ;;  %111 = vmatprep.mubr.f32.mxu0 %v318_v8  ;;  %117 = vmatprep.mubr.f32.mxu1 %v318_v8  ;;  %s321_s16 = smov 64   ;;  %s266_s17 = sshll.u32 %s315_s15, 4 }
   0x4   : > { %v271_v9 = vpack.c.bf16 %v34_v5, %v32_v3  ;;  %v273_v10 = vpack.c.bf16 %v39_v7, %v37_v6  ;;  %v36_v11 = vld [vmem:[%s428_s1 + $0x20] sm:$0xff]  ;;  %v38_v12 = vld [vmem:[%s428_s1 + $0x30] sm:$0xff]  ;;  %295 = vset.pattern.permute.xlu0 %v319_v13  ;;  %296 = vset.pattern.permute.xlu1 %v319_v13  ;;  %v125_v15 = vld [vmem:[%s430_s3 + $0x8] sm:$0xff]  ;;  %s177_s20 = scalar_lea.vmem %s427_s0, %s266_s17  ;;  %s322_s21 = smov 96  }
   0x5   : > { %270 = vmatprep.subr.bf16.mxu0 %v269_v4  ;;  %277 = vmatprep.subr.bf16.mxu1 %v269_v4  ;;  %v124_v14 = vld [vmem:[%s430_s3] sm:$0xff]  ;;  %v275_v16 = vpack.c.bf16 %v38_v12, %v36_v11  ;;  %v139_v18 = vsub.f32 1.0, %v125_v15  ;;  %v173_v43 = vld [vmem:[%s429_s2 + $0x8] sm:$0xff]  ;;  %s248_s24 = scalar_lea.vmem %s431_s4, %s266_s17  ;;  %s29_s15 = sadd.s32 1, %s315_s15  }
   0x6   : > { %272 = vmatpush1.bf16.msra.mxu0 %v271_v9  ;;  %279 = vmatpush1.bf16.msra.mxu1 %v271_v9  ;;  %v138_v17 = vsub.f32 1.0, %v124_v14  ;;  %v172_v36 = vld [vmem:[%s429_s2] sm:$0xff]  ;;  %v179_v49 = vld [vmem:[%s177_s20 + $0x8] sm:$0xff]  ;;  %p26_p0 = scmp.ge.s32.totalorder %s29_s15, 2  }
   0x7   : > { %274 = vmatprep.subr.bf16.mxu0 %v273_v10  ;;  %278 = vmatprep.subr.bf16.mxu1 %v273_v10  ;;  %v178_v47 = vld [vmem:[%s177_s20] sm:$0xff] }
   0x8   : > { %142 = vperm.xlu0 %295, %v138_v17   ;;  %128 = vperm.xlu1 %296, %v124_v14   ;;  %v385_v19 = vld [vmem:[#allocation2] sm:$0xff]  ;;  %v387_v20 = vld [vmem:[#allocation2 + $0x8] sm:$0xff] }
   0xa   : > { %276 = vmatpush1.bf16.msra.mxu0 %v275_v16  ;;  %280 = vmatpush1.bf16.msra.mxu1 %v275_v16 }
   0xc   : > { %147 = vperm.xlu0 %295, %v139_v18   ;;  %133 = vperm.xlu1 %296, %v125_v15  }
   0xd   : > { %264 = vmatmul.mubr.msk.f32.vlgmr.msra.gmra.mrb[0].mxu0 %vm21_vm0, %v385_v19  ;;  %265 = vmatmul.mubr.msk.f32.vlgmr.msra.gmra.mrb[0].mxu1 %vm21_vm0, %v387_v20 }
  0x87   : > { %v143_v21 = vpop.permute.xlu0 %142  ;;  %v129_v31 = vpop.permute.xlu1 %128 }
  0x8b   : > { %v148_v27 = vpop.permute.xlu0 %147  ;;  %v134_v32 = vpop.permute.xlu1 %133 }
  0xe0   : > { %v113_v22 = vpop.f32.mrb[0].mxu0  ;;  %v119_v23 = vpop.f32.mrb[0].mxu1 }
  0xe1   : > { %v150_v24 = vmul.f32 %v143_v21, %v113_v22  ;;  %v115_v25 = vpop.f32.mrb[1].mxu0  ;;  %v121_v26 = vpop.f32.mrb[1].mxu1  ;;  %v152_v29 = vmul.f32 %v148_v27, %v119_v23  ;;  %v136_v34 = vmul.f32 %v129_v31, %v113_v22  ;;  %v137_v40 = vmul.f32 %v134_v32, %v119_v23 }
  0xe2   : > { %v151_v28 = vmul.f32 %v143_v21, %v115_v25  ;;  %v153_v30 = vmul.f32 %v148_v27, %v121_v26 }
  0xe3   : > { %158 = vrot.lane.b32.xlu0 %v150_v24, %s320_s10 }
  0xe4   : > { %160 = vrot.lane.b32.xlu1 %v151_v28, %s320_s10 }
  0xe7   : > { %162 = vrot.lane.b32.xlu0 %v152_v29, %s320_s10 }
  0xe8   : > { %164 = vrot.lane.b32.xlu1 %v153_v30, %s320_s10 }
 0x155   : > { %v159_v33 = vpop.permute.xlu0 %158 }
 0x156   : > { %v161_v35 = vpop.permute.xlu1 %160 }
 0x157   : > { %v166_v37 = vsel %vm21_vm0, %v159_v33, %v161_v35 }
 0x158   : > { %v170_v38 = vadd.f32 %v166_v37, %v136_v34 }
 0x159   : > { %v163_v39 = vpop.permute.xlu0 %162 }
 0x15a   : > { %v174_v41 = vadd.f32 %v172_v36, %v170_v38  ;;  %v165_v42 = vpop.permute.xlu1 %164 }
 0x15b   : > { %v167_v44 = vsel %vm21_vm0, %v163_v39, %v165_v42 }
 0x15c   : > { %v171_v45 = vadd.f32 %v167_v44, %v137_v40  ;;  %196 = vrot.lane.b32.xlu0 %v174_v41, %s321_s16  ;;  %v180_v48 = vadd.f32 %v178_v47, %v174_v41 }
 0x15e   : > { %v175_v46 = vadd.f32 %v173_v43, %v171_v45  ;;  %v267_v50 = vmul.f32 -1.442695, %v180_v48 }
 0x160   : > { %198 = vrot.lane.b32.xlu1 %v175_v46, %s321_s16  ;;  %v181_v51 = vadd.f32 %v179_v49, %v175_v46  ;;  %297 = vpow2.f32 %v267_v50 }
 0x162   : > { %v268_v52 = vmul.f32 -1.442695, %v181_v51 }
 0x164   : > { %299 = vpow2.f32 %v268_v52 }
 0x16a   : > { %v298_v53 = vpop.eup %297 }
 0x16b   : > { %v188_v54 = vadd.f32 1.0, %v298_v53 }
 0x16d   : > { %301 = vrcp.f32 %v188_v54 }
 0x16e   : > { %v300_v55 = vpop.eup %299 }
 0x16f   : > { %v189_v56 = vadd.f32 1.0, %v300_v55 }
 0x171   : > { %303 = vrcp.f32 %v189_v56 }
 0x177   : > { %v302_v57 = vpop.eup %301 }
 0x178   : > { %v216_v6 = vsub.f32 1.0, %v302_v57 }
 0x17b   : > { %v304_v60 = vpop.eup %303 }
 0x17c   : > { %v217_v11 = vsub.f32 1.0, %v304_v60 }
 0x1ce   : > { %v197_v58 = vpop.permute.xlu0 %196 }
 0x1cf   : > { %v202_v59 = vmul.f32 %v302_v57, %v197_v58 }
 0x1d1   : > { %206 = vrot.lane.b32.xlu0 %v202_v59, %s321_s16 }
 0x1d2   : > { %v199_v61 = vpop.permute.xlu1 %198 }
 0x1d3   : > { %v203_v62 = vmul.f32 %v304_v60, %v199_v61 }
 0x1d5   : > { %208 = vrot.lane.b32.xlu1 %v203_v62, %s321_s16 }
 0x243   : > { %v207_v63 = vpop.permute.xlu0 %206 }
 0x244   : > { %v212_v0 = vadd.f32 %v207_v63, %v178_v47 }
 0x246   : > { %305 = vtanh.f32 %v212_v0 }
 0x247   : > { %v209_v1 = vpop.permute.xlu1 %208 }
 0x248   : > { %v213_v2 = vadd.f32 %v209_v1, %v179_v49 }
 0x24a   : > { %307 = vtanh.f32 %v213_v2 }
 0x250   : > { %v306_v3 = vpop.eup %305 }
 0x251   : > { %220 = vrot.lane.b32.xlu0 %v306_v3, %s322_s21 }
 0x254   : > { %v308_v4 = vpop.eup %307 }
 0x255   : > { %222 = vrot.lane.b32.xlu1 %v308_v4, %s322_s21  ;;  %228 = vrot.lane.b32.xlu0 %v385_v19, %s320_s10 }
 0x259   : > { %230 = vrot.lane.b32.xlu1 %v387_v20, %s320_s10 }
 0x2c3   : > { %v221_v5 = vpop.permute.xlu0 %220 }
 0x2c4   : > { %v226_v9 = vmul.f32 %v221_v5, %v216_v6 }
 0x2c7   : > { %v223_v7 = vpop.permute.xlu1 %222  ;;  %v229_v8 = vpop.permute.xlu0 %228 }
 0x2c8   : > { %v234_v10 = vmul.f32 %v302_v57, %v229_v8  ;;  %v227_v14 = vmul.f32 %v223_v7, %v217_v11 }
 0x2ca   : > { %v236_v12 = vadd.f32 %v234_v10, %v226_v9 }
 0x2cb   : > { %v231_v13 = vpop.permute.xlu1 %230 }
 0x2cc   : > { %v235_v15 = vmul.f32 %v304_v60, %v231_v13  ;;  %240 = vrot.lane.b32.xlu0 %v236_v12, %s322_s21 }
 0x2ce   : > { %v237_v16 = vadd.f32 %v235_v15, %v227_v14 }
 0x2d0   : > { %242 = vrot.lane.b32.xlu1 %v237_v16, %s322_s21 }
 0x33d   :  { %28 = sbr.rel (!%p26_p0) target bundleno = 2 (0x2), region = 49 }
 0x33e   : > { %v241_v17 = vpop.permute.xlu0 %240 }
 0x33f   : > { %246 = vst.msk [vmem:[#allocation2] sm:$0xff] %vm21_vm0, %v241_v17  ;;  %249 = vst.msk [vmem:[%s248_s24] sm:$0xff] %vm21_vm0, %v241_v17 }
 0x342   : > { %v243_v18 = vpop.permute.xlu1 %242 }
 0x343   : > { %247 = vst.msk [vmem:[#allocation2 + $0x8] sm:$0xff] %vm21_vm0, %v243_v18  ;;  %250 = vst.msk [vmem:[%s248_s24 + $0x8] sm:$0xff] %vm21_vm0, %v243_v18 }

</bundles_post_ra>
